<compile_context>
chip_gen: v7x
topology: tpu7x:2x2x1
jax: 0.10.0
libtpu: 0.0.40
codegen_flags: <defaults>
</compile_context>

<pallas_src>
import functools

import jax
import jax.numpy as jnp
from jax import lax
from jax.experimental import pallas as pl
from jax.experimental.pallas import tpu as pltpu


_VMEM_LIMIT = 32 * 1024 * 1024   # raise v5e's 16 MiB scoped default; safe everywhere


def _cparams(dimension_semantics):
    return pltpu.CompilerParams(dimension_semantics=dimension_semantics,
                                vmem_limit_bytes=_VMEM_LIMIT)


# ----------------------------- Pallas kernels -------------------------------

def _layer1_kernel(x_ref, w_ref, b_ref, g_ref, beta_ref, o_ref, *,
                   eps, n_sp, cout, inv_m):
    """layer1: dense (B,Z)@(Z,n_sp*cout) matmul + bias + ReLU + training BN.

    Output columns are ordered (spatial, cout).  BN stats fold the n_sp spatial
    groups along the lane axis with 128-aligned static slices; the normalized
    result is written back with 128-aligned static slice stores (no reshapes
    or concatenations inside the kernel).
    """
    acc = jnp.dot(x_ref[...], w_ref[...], preferred_element_type=jnp.float32)
    acc = jnp.maximum(acc + b_ref[...], 0.0)              # ReLU BEFORE BN (reference order)
    colsum = jnp.sum(acc, axis=0, keepdims=True)          # (1, n_sp*cout)
    colsq = jnp.sum(acc * acc, axis=0, keepdims=True)
    sum_c = colsum[:, 0:cout]
    sq_c = colsq[:, 0:cout]
    for s in range(1, n_sp):                              # fold spatial groups per channel
        sum_c = sum_c + colsum[:, s * cout:(s + 1) * cout]
        sq_c = sq_c + colsq[:, s * cout:(s + 1) * cout]
    mean = sum_c * inv_m
    var = sq_c * inv_m - mean * mean                      # biased variance (training BN)
    scale = g_ref[...] * lax.rsqrt(var + eps)             # (1, cout)
    shift = beta_ref[...] - mean * scale
    for s in range(n_sp):
        sl = slice(s * cout, (s + 1) * cout)
        o_ref[:, sl] = acc[:, sl] * scale + shift


def _deconv_relu_bn_kernel(pat_ref, w_ref, b_ref, g_ref, beta_ref, o_ref, *, eps, inv_m):
    """im2col matmul + bias + ReLU + training BN (one-pass scale/shift epilogue)."""
    acc = jnp.dot(pat_ref[...], w_ref[...], preferred_element_type=jnp.float32)
    acc = jnp.maximum(acc + b_ref[...], 0.0)              # ReLU BEFORE BN (reference order)
    mean = jnp.sum(acc, axis=0, keepdims=True) * inv_m    # per-channel over B*OH*OW rows
    msq = jnp.sum(acc * acc, axis=0, keepdims=True) * inv_m
    var = msq - mean * mean                               # biased variance (training BN)
    scale = g_ref[...] * lax.rsqrt(var + eps)
    shift = beta_ref[...] - mean * scale
    o_ref[...] = acc * scale + shift


def _sattn_kernel(x_ref, wq_ref, wk_ref, wv_ref, bq_ref, bk_ref, bv_ref, g_ref,
                  o_ref, a_ref, *, bt):
    """Batch-tiled self-attention in NHWC: separate Q/K/V matmuls, exact softmax."""
    g = g_ref[0, 0]
    for b in range(bt):                                   # static unroll over the batch tile
        xb = x_ref[b]                                     # (HW, C)
        q = jnp.dot(xb, wq_ref[...], preferred_element_type=jnp.float32) + bq_ref[...]
        k = jnp.dot(xb, wk_ref[...], preferred_element_type=jnp.float32) + bk_ref[...]
        v = jnp.dot(xb, wv_ref[...], preferred_element_type=jnp.float32) + bv_ref[...]
        # s[i, j] = sum_d q[i, d] * k[j, d]
        s = lax.dot_general(q, k, (((1,), (1,)), ((), ())),
                            preferred_element_type=jnp.float32)   # (HW, HW)
        s = s - jnp.max(s, axis=-1, keepdims=True)
        e = jnp.exp(s)
        attn = e / jnp.sum(e, axis=-1, keepdims=True)     # exact softmax: rows sum to 1
        out = jnp.dot(attn, v, preferred_element_type=jnp.float32)
        o_ref[b] = g * out + xb
        a_ref[b] = attn


def _tail_kernel(pat_ref, w4_ref, w5_ref, b5_ref, o_ref):
    """layer4 (Cout=1 deconv) as VPU multiply + lane-reduce, then the
    ConvTranspose1d(144,128,1) as one lane-dense (B,144)@(144,128) matmul."""
    t = jnp.sum(pat_ref[...] * w4_ref[...], axis=-1)      # (B, 144)
    o_ref[...] = jnp.dot(t, w5_ref[...], preferred_element_type=jnp.float32) + b5_ref[...]


# ----------------------------- kernel wrappers -------------------------------

def layer1_dense_relu_bn(x, w1, b1, gamma, beta, eps=1e-5):
    """ConvTranspose2d(Z, C1, 4) on a 1x1 input == dense matmul; ReLU + BN fused."""
    B, Z = x.shape
    Cin, Cout, kh, kw = w1.shape
    assert Cin == Z
    n_sp = kh * kw
    w1m = w1.transpose(0, 2, 3, 1).reshape(Cin, n_sp * Cout)   # columns ordered (oy, ox, cout)
    b1t = jnp.tile(b1, n_sp)                                   # bias tiled to match columns
    out = pl.pallas_call(
        functools.partial(_layer1_kernel, eps=eps, n_sp=n_sp, cout=Cout,
                          inv_m=1.0 / (B * n_sp)),
        out_shape=jax.ShapeDtypeStruct((B, n_sp * Cout), jnp.float32),
        grid=(1,),
        in_specs=[
            pl.BlockSpec((B, Z), lambda i: (0, 0)),
            pl.BlockSpec((Z, n_sp * Cout), lambda i: (0, 0)),
            pl.BlockSpec((1, n_sp * Cout), lambda i: (0, 0)),
            pl.BlockSpec((1, Cout), lambda i: (0, 0)),
            pl.BlockSpec((1, Cout), lambda i: (0, 0)),
        ],
        out_specs=pl.BlockSpec((B, n_sp * Cout), lambda i: (0, 0)),
        compiler_params=_cparams(("arbitrary",)),
    )(x, w1m, b1t.reshape(1, n_sp * Cout), gamma.reshape(1, Cout), beta.reshape(1, Cout))
    return out.reshape(B, kh, kw, Cout)                        # NHWC


def deconv_relu_bn_matmul(pat, wmat, bias, gamma, beta, eps=1e-5):
    """pat: (M,K) NHWC patches, wmat: (K,N).  Output (M,N) = BN(ReLU(pat@w+b))."""
    M, K = pat.shape
    N = wmat.shape[1]
    return pl.pallas_call(
        functools.partial(_deconv_relu_bn_kernel, eps=eps, inv_m=1.0 / M),
        out_shape=jax.ShapeDtypeStruct((M, N), jnp.float32),
        grid=(1,),
        in_specs=[
            pl.BlockSpec((M, K), lambda i: (0, 0)),
            pl.BlockSpec((K, N), lambda i: (0, 0)),
            pl.BlockSpec((1, N), lambda i: (0, 0)),
            pl.BlockSpec((1, N), lambda i: (0, 0)),
            pl.BlockSpec((1, N), lambda i: (0, 0)),
        ],
        out_specs=pl.BlockSpec((M, N), lambda i: (0, 0)),
        compiler_params=_cparams(("arbitrary",)),
    )(pat, wmat, bias.reshape(1, N), gamma.reshape(1, N), beta.reshape(1, N))


def sattn(x3, wq, wk, wv, bq, bk, bv, gamma):
    """x3: (B, HW, C) NHWC.  Returns (out (B,HW,C), attn (B,HW,HW))."""
    B, HW, C = x3.shape
    dq = wq.shape[1]
    bt = B if B <= 8 else 8                                    # batch tile per grid step
    assert B % bt == 0
    return pl.pallas_call(
        functools.partial(_sattn_kernel, bt=bt),
        out_shape=(jax.ShapeDtypeStruct((B, HW, C), jnp.float32),
                   jax.ShapeDtypeStruct((B, HW, HW), jnp.float32)),
        grid=(B // bt,),
        in_specs=[
            pl.BlockSpec((bt, HW, C), lambda i: (i, 0, 0)),
            pl.BlockSpec((C, dq), lambda i: (0, 0)),
            pl.BlockSpec((C, dq), lambda i: (0, 0)),
            pl.BlockSpec((C, C), lambda i: (0, 0)),
            pl.BlockSpec((1, dq), lambda i: (0, 0)),
            pl.BlockSpec((1, dq), lambda i: (0, 0)),
            pl.BlockSpec((1, C), lambda i: (0, 0)),
            pl.BlockSpec(memory_space=pltpu.MemorySpace.SMEM),          # scalar gamma
        ],
        out_specs=(pl.BlockSpec((bt, HW, C), lambda i: (i, 0, 0)),
                   pl.BlockSpec((bt, HW, HW), lambda i: (i, 0, 0))),
        compiler_params=_cparams(("parallel",)),
    )(x3, wq, wk, wv, bq.reshape(1, dq), bk.reshape(1, dq), bv.reshape(1, C),
      gamma.reshape(1, 1))


def tail_deconv_conv1d(pat4, w4row, w5mat, b5_eff):
    """pat4: (B,144,K) layer-4 patches; w4row: (1,1,K); w5mat: (144,128).
    Returns (B,128).  layer4 bias is already folded into b5_eff."""
    B, P, K = pat4.shape
    N = w5mat.shape[1]
    return pl.pallas_call(
        _tail_kernel,
        out_shape=jax.ShapeDtypeStruct((B, N), jnp.float32),
        grid=(1,),
        in_specs=[
            pl.BlockSpec((B, P, K), lambda i: (0, 0, 0)),
            pl.BlockSpec((1, 1, K), lambda i: (0, 0, 0)),
            pl.BlockSpec((P, N), lambda i: (0, 0)),
            pl.BlockSpec((1, N), lambda i: (0, 0)),
        ],
        out_specs=pl.BlockSpec((B, N), lambda i: (0, 0)),
        compiler_params=_cparams(("arbitrary",)),
    )(pat4, w4row, w5mat, b5_eff.reshape(1, N))


# ----------------------------- JAX glue (NHWC im2col) -----------------------

def _deconv_patches(x, kh, kw, stride, pad):
    """ConvTranspose2d as a conv: dilate + pad (one lax.pad) + im2col in NHWC.
    x: (B,H,W,Cin) -> (patches (B,OH,OW,kh*kw*Cin), OH, OW)."""
    B, H, W, Cin = x.shape
    ph, pw = kh - 1 - pad, kw - 1 - pad
    assert ph >= 0 and pw >= 0
    xp = lax.pad(x, jnp.array(0.0, x.dtype),
                 ((0, 0, 0), (ph, ph, stride - 1), (pw, pw, stride - 1), (0, 0, 0)))
    Hp, Wp = xp.shape[1], xp.shape[2]
    OH, OW = Hp - kh + 1, Wp - kw + 1
    pats = [xp[:, ky:ky + OH, kx:kx + OW, :] for ky in range(kh) for kx in range(kw)]
    pat = jnp.stack(pats, axis=3)                        # (B, OH, OW, kh*kw, Cin)
    return pat.reshape(B, OH, OW, kh * kw * Cin), OH, OW


def _deconv_wmat(w):
    """w: (Cin,Cout,kh,kw) PyTorch ConvTranspose2d layout -> (kh*kw*Cin, Cout),
    spatially flipped, with K-order (ky, kx, cin) matching _deconv_patches."""
    Cin, Cout, kh, kw = w.shape
    wf = w[:, :, ::-1, ::-1]
    return wf.transpose(2, 3, 0, 1).reshape(kh * kw * Cin, Cout)


def deconv_relu_bn_layer(x_nhwc, w, b, gamma, beta, stride, pad):
    """ConvTranspose2d -> ReLU -> BatchNorm2d, fused in one Pallas kernel (NHWC)."""
    B = x_nhwc.shape[0]
    Cin, Cout, kh, kw = w.shape
    pat, OH, OW = _deconv_patches(x_nhwc, kh, kw, stride, pad)
    out = deconv_relu_bn_matmul(pat.reshape(B * OH * OW, kh * kw * Cin),
                                _deconv_wmat(w), b, gamma, beta)
    return out.reshape(B, OH, OW, Cout)


# ----------------------------- GenSAGAN model -------------------------------

Z_DIM, CONV_DIM = 32, 64
MULT = 4                                   # 2 ** (log2(32) - 3)
C1, C2, C3 = CONV_DIM * MULT, CONV_DIM * MULT // 2, CONV_DIM * MULT // 4   # 256,128,64


def init_params(key):
    ks = jax.random.split(key, 16)

    def n(k, shape, scale=0.05):
        return scale * jax.random.normal(k, shape, jnp.float32)

    return dict(
        w1=n(ks[0], (Z_DIM, C1, 4, 4)), b1=n(ks[1], (C1,)),
        bn1_g=jnp.ones((C1,), jnp.float32), bn1_b=jnp.zeros((C1,), jnp.float32),
        w2=n(ks[2], (C1, C2, 3, 3)), b2=n(ks[3], (C2,)),
        bn2_g=jnp.ones((C2,), jnp.float32), bn2_b=jnp.zeros((C2,), jnp.float32),
        w3=n(ks[4], (C2, C3, 3, 3)), b3=n(ks[5], (C3,)),
        bn3_g=jnp.ones((C3,), jnp.float32), bn3_b=jnp.zeros((C3,), jnp.float32),
        w4=n(ks[6], (C3, 1, 2, 2)), b4=n(ks[7], (1,)),
        aq_w=n(ks[8], (C3 // 8, C3)), aq_b=n(ks[9], (C3 // 8,)),
        ak_w=n(ks[10], (C3 // 8, C3)), ak_b=n(ks[11], (C3 // 8,)),
        av_w=n(ks[12], (C3, C3)), av_b=n(ks[13], (C3,)),
        a_gamma=jnp.zeros((1,), jnp.float32),                  # PyTorch init: zeros(1)
        w5=n(ks[14], (144, 128, 1)), b5=n(ks[15], (128,)),     # ConvTranspose1d(144,128,1)
    )


def gen_sagan_forward(params, x):
    """x: (B, Z_DIM). Returns (out (B,128), p1 (B,49,49))."""
    p = params
    B = x.shape[0]

    # layer1: dense matmul + ReLU + BN (one fused kernel).
    out = layer1_dense_relu_bn(x, p['w1'], p['b1'], p['bn1_g'], p['bn1_b'])    # (B,4,4,256)
    # layers 2-3: ConvTranspose2d -> ReLU -> BatchNorm2d, each one fused kernel (NHWC).
    out = deconv_relu_bn_layer(out, p['w2'], p['b2'],
                               p['bn2_g'], p['bn2_b'], stride=2, pad=2)        # (B,5,5,128)
    out = deconv_relu_bn_layer(out, p['w3'], p['b3'],
                               p['bn3_g'], p['bn3_b'], stride=2, pad=2)        # (B,7,7,64)

    # attn1: batch-tiled self-attention (NHWC), separate Q/K/V matmuls.
    out3, p1 = sattn(out.reshape(B, 49, C3),
                     p['aq_w'].T, p['ak_w'].T, p['av_w'].T,
                     p['aq_b'], p['ak_b'], p['av_b'], p['a_gamma'])            # (B,49,64),(B,49,49)
    out = out3.reshape(B, 7, 7, C3)

    # layer4 (ConvTranspose2d(64,1,2,2,1)) + ConvTranspose1d(144,128,1), fused tail.
    pat4, OH, OW = _deconv_patches(out, 2, 2, stride=2, pad=1)                 # (B,12,12,256)
    w5m = p['w5'].reshape(144, 128)
    b5_eff = p['b5'] + p['b4'][0] * jnp.sum(w5m, axis=0)                       # fold layer4 bias
    out = tail_deconv_conv1d(pat4.reshape(B, OH * OW, 4 * C3),
                             _deconv_wmat(p['w4']).reshape(1, 1, 4 * C3),
                             w5m, b5_eff)                                      # (B,128)
    return out, p1


if __name__ == "__main__":
    key = jax.random.PRNGKey(0)
    pkey, xkey = jax.random.split(key)
    params = init_params(pkey)
    x = jax.random.normal(xkey, (2, Z_DIM), jnp.float32)

    out, p1 = jax.jit(gen_sagan_forward)(params, x)
    jax.block_until_ready((out, p1))

    assert out.shape == (2, 128), out.shape
    assert p1.shape == (2, 49, 49), p1.shape
    assert bool(jnp.all(jnp.isfinite(out))) and bool(jnp.all(jnp.isfinite(p1)))
    print("KERNEL_OK")
</pallas_src>

<mosaic_0001>
module attributes {stable_mosaic.version = 11 : i64} {
  func.func @_layer1_kernel(%arg0: i32, %arg1: memref<2x32xf32, #tpu.memory_space<vmem>>, %arg2: memref<32x4096xf32, #tpu.memory_space<vmem>>, %arg3: memref<1x4096xf32, #tpu.memory_space<vmem>>, %arg4: memref<1x256xf32, #tpu.memory_space<vmem>>, %arg5: memref<1x256xf32, #tpu.memory_space<vmem>>, %arg6: memref<2x4096xf32, #tpu.memory_space<vmem>>) attributes {dimension_semantics = [#tpu.dimension_semantics<arbitrary>], iteration_bounds = array<i64: 1>, scalar_prefetch = 0 : i64, scratch_operands = 0 : i64, tpu.core_type = #tpu.core_type<tc>, window_params = [{pipeline_mode = #tpu.pipeline_mode<synchronous>, transform_indices = @transform_0, window_bounds = array<i64: 2, 32>}, {pipeline_mode = #tpu.pipeline_mode<synchronous>, transform_indices = @transform_1, window_bounds = array<i64: 32, 4096>}, {pipeline_mode = #tpu.pipeline_mode<synchronous>, transform_indices = @transform_2, window_bounds = array<i64: 1, 4096>}, {pipeline_mode = #tpu.pipeline_mode<synchronous>, transform_indices = @transform_3, window_bounds = array<i64: 1, 256>}, {pipeline_mode = #tpu.pipeline_mode<synchronous>, transform_indices = @transform_4, window_bounds = array<i64: 1, 256>}, {pipeline_mode = #tpu.pipeline_mode<synchronous>, transform_indices = @transform_5, window_bounds = array<i64: 2, 4096>}]} {
    %c0 = arith.constant 0 : index
    %c0_0 = arith.constant 0 : index
    %0 = vector.load %arg1[%c0, %c0_0] : memref<2x32xf32, #tpu.memory_space<vmem>>, vector<2x32xf32>
    %c0_1 = arith.constant 0 : index
    %c0_2 = arith.constant 0 : index
    %1 = vector.load %arg2[%c0_1, %c0_2] : memref<32x4096xf32, #tpu.memory_space<vmem>>, vector<32x4096xf32>
    %cst = arith.constant dense<0.000000e+00> : vector<2x4096xf32>
    %2 = tpu.matmul %0, %1, %cst {dimension_numbers = #tpu.dot_dimension_numbers<[1], [0], [0], [1], [0, 0, 1, 1], [], []>} : vector<2x32xf32>, vector<32x4096xf32>, vector<2x4096xf32> -> vector<2x4096xf32>
    %c0_3 = arith.constant 0 : index
    %c0_4 = arith.constant 0 : index
    %3 = vector.load %arg3[%c0_3, %c0_4] : memref<1x4096xf32, #tpu.memory_space<vmem>>, vector<1x4096xf32>
    %4 = vector.broadcast %3 : vector<1x4096xf32> to vector<2x4096xf32>
    %5 = arith.addf %2, %4 : vector<2x4096xf32>
    %cst_5 = arith.constant 0.000000e+00 : f32
    %6 = vector.broadcast %cst_5 : f32 to vector<2x4096xf32>
    %7 = arith.maximumf %5, %6 : vector<2x4096xf32>
    %cst_6 = arith.constant dense<0.000000e+00> : vector<4096xf32>
    %8 = vector.multi_reduction <add>, %7, %cst_6 [0] : vector<2x4096xf32> to vector<4096xf32>
    %9 = vector.shape_cast %8 : vector<4096xf32> to vector<1x4096xf32>
    %10 = arith.mulf %7, %7 : vector<2x4096xf32>
    %cst_7 = arith.constant dense<0.000000e+00> : vector<4096xf32>
    %11 = vector.multi_reduction <add>, %10, %cst_7 [0] : vector<2x4096xf32> to vector<4096xf32>
    %12 = vector.shape_cast %11 : vector<4096xf32> to vector<1x4096xf32>
    %13 = vector.extract_strided_slice %9 {offsets = [0, 0], sizes = [1, 256], strides = [1, 1]} : vector<1x4096xf32> to vector<1x256xf32>
    %14 = vector.extract_strided_slice %12 {offsets = [0, 0], sizes = [1, 256], strides = [1, 1]} : vector<1x4096xf32> to vector<1x256xf32>
    %15 = vector.extract_strided_slice %9 {offsets = [0, 256], sizes = [1, 256], strides = [1, 1]} : vector<1x4096xf32> to vector<1x256xf32>
    %16 = arith.addf %13, %15 : vector<1x256xf32>
    %17 = vector.extract_strided_slice %12 {offsets = [0, 256], sizes = [1, 256], strides = [1, 1]} : vector<1x4096xf32> to vector<1x256xf32>
    %18 = arith.addf %14, %17 : vector<1x256xf32>
    %19 = vector.extract_strided_slice %9 {offsets = [0, 512], sizes = [1, 256], strides = [1, 1]} : vector<1x4096xf32> to vector<1x256xf32>
    %20 = arith.addf %16, %19 : vector<1x256xf32>
    %21 = vector.extract_strided_slice %12 {offsets = [0, 512], sizes = [1, 256], strides = [1, 1]} : vector<1x4096xf32> to vector<1x256xf32>
    %22 = arith.addf %18, %21 : vector<1x256xf32>
    %23 = vector.extract_strided_slice %9 {offsets = [0, 768], sizes = [1, 256], strides = [1, 1]} : vector<1x4096xf32> to vector<1x256xf32>
    %24 = arith.addf %20, %23 : vector<1x256xf32>
    %25 = vector.extract_strided_slice %12 {offsets = [0, 768], sizes = [1, 256], strides = [1, 1]} : vector<1x4096xf32> to vector<1x256xf32>
    %26 = arith.addf %22, %25 : vector<1x256xf32>
    %27 = vector.extract_strided_slice %9 {offsets = [0, 1024], sizes = [1, 256], strides = [1, 1]} : vector<1x4096xf32> to vector<1x256xf32>
    %28 = arith.addf %24, %27 : vector<1x256xf32>
    %29 = vector.extract_strided_slice %12 {offsets = [0, 1024], sizes = [1, 256], strides = [1, 1]} : vector<1x4096xf32> to vector<1x256xf32>
    %30 = arith.addf %26, %29 : vector<1x256xf32>
    %31 = vector.extract_strided_slice %9 {offsets = [0, 1280], sizes = [1, 256], strides = [1, 1]} : vector<1x4096xf32> to vector<1x256xf32>
    %32 = arith.addf %28, %31 : vector<1x256xf32>
    %33 = vector.extract_strided_slice %12 {offsets = [0, 1280], sizes = [1, 256], strides = [1, 1]} : vector<1x4096xf32> to vector<1x256xf32>
    %34 = arith.addf %30, %33 : vector<1x256xf32>
    %35 = vector.extract_strided_slice %9 {offsets = [0, 1536], sizes = [1, 256], strides = [1, 1]} : vector<1x4096xf32> to vector<1x256xf32>
    %36 = arith.addf %32, %35 : vector<1x256xf32>
    %37 = vector.extract_strided_slice %12 {offsets = [0, 1536], sizes = [1, 256], strides = [1, 1]} : vector<1x4096xf32> to vector<1x256xf32>
    %38 = arith.addf %34, %37 : vector<1x256xf32>
    %39 = vector.extract_strided_slice %9 {offsets = [0, 1792], sizes = [1, 256], strides = [1, 1]} : vector<1x4096xf32> to vector<1x256xf32>
    %40 = arith.addf %36, %39 : vector<1x256xf32>
    %41 = vector.extract_strided_slice %12 {offsets = [0, 1792], sizes = [1, 256], strides = [1, 1]} : vector<1x4096xf32> to vector<1x256xf32>
    %42 = arith.addf %38, %41 : vector<1x256xf32>
    %43 = vector.extract_strided_slice %9 {offsets = [0, 2048], sizes = [1, 256], strides = [1, 1]} : vector<1x4096xf32> to vector<1x256xf32>
    %44 = arith.addf %40, %43 : vector<1x256xf32>
    %45 = vector.extract_strided_slice %12 {offsets = [0, 2048], sizes = [1, 256], strides = [1, 1]} : vector<1x4096xf32> to vector<1x256xf32>
    %46 = arith.addf %42, %45 : vector<1x256xf32>
    %47 = vector.extract_strided_slice %9 {offsets = [0, 2304], sizes = [1, 256], strides = [1, 1]} : vector<1x4096xf32> to vector<1x256xf32>
    %48 = arith.addf %44, %47 : vector<1x256xf32>
    %49 = vector.extract_strided_slice %12 {offsets = [0, 2304], sizes = [1, 256], strides = [1, 1]} : vector<1x4096xf32> to vector<1x256xf32>
    %50 = arith.addf %46, %49 : vector<1x256xf32>
    %51 = vector.extract_strided_slice %9 {offsets = [0, 2560], sizes = [1, 256], strides = [1, 1]} : vector<1x4096xf32> to vector<1x256xf32>
    %52 = arith.addf %48, %51 : vector<1x256xf32>
    %53 = vector.extract_strided_slice %12 {offsets = [0, 2560], sizes = [1, 256], strides = [1, 1]} : vector<1x4096xf32> to vector<1x256xf32>
    %54 = arith.addf %50, %53 : vector<1x256xf32>
    %55 = vector.extract_strided_slice %9 {offsets = [0, 2816], sizes = [1, 256], strides = [1, 1]} : vector<1x4096xf32> to vector<1x256xf32>
    %56 = arith.addf %52, %55 : vector<1x256xf32>
    %57 = vector.extract_strided_slice %12 {offsets = [0, 2816], sizes = [1, 256], strides = [1, 1]} : vector<1x4096xf32> to vector<1x256xf32>
    %58 = arith.addf %54, %57 : vector<1x256xf32>
    %59 = vector.extract_strided_slice %9 {offsets = [0, 3072], sizes = [1, 256], strides = [1, 1]} : vector<1x4096xf32> to vector<1x256xf32>
    %60 = arith.addf %56, %59 : vector<1x256xf32>
    %61 = vector.extract_strided_slice %12 {offsets = [0, 3072], sizes = [1, 256], strides = [1, 1]} : vector<1x4096xf32> to vector<1x256xf32>
    %62 = arith.addf %58, %61 : vector<1x256xf32>
    %63 = vector.extract_strided_slice %9 {offsets = [0, 3328], sizes = [1, 256], strides = [1, 1]} : vector<1x4096xf32> to vector<1x256xf32>
    %64 = arith.addf %60, %63 : vector<1x256xf32>
    %65 = vector.extract_strided_slice %12 {offsets = [0, 3328], sizes = [1, 256], strides = [1, 1]} : vector<1x4096xf32> to vector<1x256xf32>
    %66 = arith.addf %62, %65 : vector<1x256xf32>
    %67 = vector.extract_strided_slice %9 {offsets = [0, 3584], sizes = [1, 256], strides = [1, 1]} : vector<1x4096xf32> to vector<1x256xf32>
    %68 = arith.addf %64, %67 : vector<1x256xf32>
    %69 = vector.extract_strided_slice %12 {offsets = [0, 3584], sizes = [1, 256], strides = [1, 1]} : vector<1x4096xf32> to vector<1x256xf32>
    %70 = arith.addf %66, %69 : vector<1x256xf32>
    %71 = vector.extract_strided_slice %9 {offsets = [0, 3840], sizes = [1, 256], strides = [1, 1]} : vector<1x4096xf32> to vector<1x256xf32>
    %72 = arith.addf %68, %71 : vector<1x256xf32>
    %73 = vector.extract_strided_slice %12 {offsets = [0, 3840], sizes = [1, 256], strides = [1, 1]} : vector<1x4096xf32> to vector<1x256xf32>
    %74 = arith.addf %70, %73 : vector<1x256xf32>
    %cst_8 = arith.constant 3.125000e-02 : f32
    %75 = vector.broadcast %cst_8 : f32 to vector<1x256xf32>
    %76 = arith.mulf %72, %75 : vector<1x256xf32>
    %cst_9 = arith.constant 3.125000e-02 : f32
    %77 = vector.broadcast %cst_9 : f32 to vector<1x256xf32>
    %78 = arith.mulf %74, %77 : vector<1x256xf32>
    %79 = arith.mulf %76, %76 : vector<1x256xf32>
    %80 = arith.subf %78, %79 : vector<1x256xf32>
    %c0_10 = arith.constant 0 : index
    %c0_11 = arith.constant 0 : index
    %81 = vector.load %arg4[%c0_10, %c0_11] : memref<1x256xf32, #tpu.memory_space<vmem>>, vector<1x256xf32>
    %cst_12 = arith.constant 9.99999974E-6 : f32
    %82 = vector.broadcast %cst_12 : f32 to vector<1x256xf32>
    %83 = arith.addf %80, %82 : vector<1x256xf32>
    %84 = math.rsqrt %83 : vector<1x256xf32>
    %85 = arith.mulf %81, %84 : vector<1x256xf32>
    %c0_13 = arith.constant 0 : index
    %c0_14 = arith.constant 0 : index
    %86 = vector.load %arg5[%c0_13, %c0_14] : memref<1x256xf32, #tpu.memory_space<vmem>>, vector<1x256xf32>
    %87 = arith.mulf %76, %85 : vector<1x256xf32>
    %88 = arith.subf %86, %87 : vector<1x256xf32>
    %89 = vector.extract_strided_slice %7 {offsets = [0, 0], sizes = [2, 256], strides = [1, 1]} : vector<2x4096xf32> to vector<2x256xf32>
    %90 = vector.broadcast %85 : vector<1x256xf32> to vector<2x256xf32>
    %91 = arith.mulf %89, %90 : vector<2x256xf32>
    %92 = vector.broadcast %88 : vector<1x256xf32> to vector<2x256xf32>
    %93 = arith.addf %91, %92 : vector<2x256xf32>
    %c0_15 = arith.constant 0 : index
    %c0_16 = arith.constant 0 : index
    %94 = vector.load %arg6[%c0_15, %c0_16] : memref<2x4096xf32, #tpu.memory_space<vmem>>, vector<2x256xf32>
    tpu.vector_store %arg6[%c0_15, %c0_16], %93 {strides = array<i32>} : memref<2x4096xf32, #tpu.memory_space<vmem>>, vector<2x256xf32>,
    %95 = vector.extract_strided_slice %7 {offsets = [0, 256], sizes = [2, 256], strides = [1, 1]} : vector<2x4096xf32> to vector<2x256xf32>
    %96 = vector.broadcast %85 : vector<1x256xf32> to vector<2x256xf32>
    %97 = arith.mulf %95, %96 : vector<2x256xf32>
    %98 = vector.broadcast %88 : vector<1x256xf32> to vector<2x256xf32>
    %99 = arith.addf %97, %98 : vector<2x256xf32>
    %c0_17 = arith.constant 0 : index
    %c256 = arith.constant 256 : index
    %100 = vector.load %arg6[%c0_17, %c256] : memref<2x4096xf32, #tpu.memory_space<vmem>>, vector<2x256xf32>
    tpu.vector_store %arg6[%c0_17, %c256], %99 {strides = array<i32>} : memref<2x4096xf32, #tpu.memory_space<vmem>>, vector<2x256xf32>,
    %101 = vector.extract_strided_slice %7 {offsets = [0, 512], sizes = [2, 256], strides = [1, 1]} : vector<2x4096xf32> to vector<2x256xf32>
    %102 = vector.broadcast %85 : vector<1x256xf32> to vector<2x256xf32>
    %103 = arith.mulf %101, %102 : vector<2x256xf32>
    %104 = vector.broadcast %88 : vector<1x256xf32> to vector<2x256xf32>
    %105 = arith.addf %103, %104 : vector<2x256xf32>
    %c0_18 = arith.constant 0 : index
    %c512 = arith.constant 512 : index
    %106 = vector.load %arg6[%c0_18, %c512] : memref<2x4096xf32, #tpu.memory_space<vmem>>, vector<2x256xf32>
    tpu.vector_store %arg6[%c0_18, %c512], %105 {strides = array<i32>} : memref<2x4096xf32, #tpu.memory_space<vmem>>, vector<2x256xf32>,
    %107 = vector.extract_strided_slice %7 {offsets = [0, 768], sizes = [2, 256], strides = [1, 1]} : vector<2x4096xf32> to vector<2x256xf32>
    %108 = vector.broadcast %85 : vector<1x256xf32> to vector<2x256xf32>
    %109 = arith.mulf %107, %108 : vector<2x256xf32>
    %110 = vector.broadcast %88 : vector<1x256xf32> to vector<2x256xf32>
    %111 = arith.addf %109, %110 : vector<2x256xf32>
    %c0_19 = arith.constant 0 : index
    %c768 = arith.constant 768 : index
    %112 = vector.load %arg6[%c0_19, %c768] : memref<2x4096xf32, #tpu.memory_space<vmem>>, vector<2x256xf32>
    tpu.vector_store %arg6[%c0_19, %c768], %111 {strides = array<i32>} : memref<2x4096xf32, #tpu.memory_space<vmem>>, vector<2x256xf32>,
    %113 = vector.extract_strided_slice %7 {offsets = [0, 1024], sizes = [2, 256], strides = [1, 1]} : vector<2x4096xf32> to vector<2x256xf32>
    %114 = vector.broadcast %85 : vector<1x256xf32> to vector<2x256xf32>
    %115 = arith.mulf %113, %114 : vector<2x256xf32>
    %116 = vector.broadcast %88 : vector<1x256xf32> to vector<2x256xf32>
    %117 = arith.addf %115, %116 : vector<2x256xf32>
    %c0_20 = arith.constant 0 : index
    %c1024 = arith.constant 1024 : index
    %118 = vector.load %arg6[%c0_20, %c1024] : memref<2x4096xf32, #tpu.memory_space<vmem>>, vector<2x256xf32>
    tpu.vector_store %arg6[%c0_20, %c1024], %117 {strides = array<i32>} : memref<2x4096xf32, #tpu.memory_space<vmem>>, vector<2x256xf32>,
    %119 = vector.extract_strided_slice %7 {offsets = [0, 1280], sizes = [2, 256], strides = [1, 1]} : vector<2x4096xf32> to vector<2x256xf32>
    %120 = vector.broadcast %85 : vector<1x256xf32> to vector<2x256xf32>
    %121 = arith.mulf %119, %120 : vector<2x256xf32>
    %122 = vector.broadcast %88 : vector<1x256xf32> to vector<2x256xf32>
    %123 = arith.addf %121, %122 : vector<2x256xf32>
    %c0_21 = arith.constant 0 : index
    %c1280 = arith.constant 1280 : index
    %124 = vector.load %arg6[%c0_21, %c1280] : memref<2x4096xf32, #tpu.memory_space<vmem>>, vector<2x256xf32>
    tpu.vector_store %arg6[%c0_21, %c1280], %123 {strides = array<i32>} : memref<2x4096xf32, #tpu.memory_space<vmem>>, vector<2x256xf32>,
    %125 = vector.extract_strided_slice %7 {offsets = [0, 1536], sizes = [2, 256], strides = [1, 1]} : vector<2x4096xf32> to vector<2x256xf32>
    %126 = vector.broadcast %85 : vector<1x256xf32> to vector<2x256xf32>
    %127 = arith.mulf %125, %126 : vector<2x256xf32>
    %128 = vector.broadcast %88 : vector<1x256xf32> to vector<2x256xf32>
    %129 = arith.addf %127, %128 : vector<2x256xf32>
    %c0_22 = arith.constant 0 : index
    %c1536 = arith.constant 1536 : index
    %130 = vector.load %arg6[%c0_22, %c1536] : memref<2x4096xf32, #tpu.memory_space<vmem>>, vector<2x256xf32>
    tpu.vector_store %arg6[%c0_22, %c1536], %129 {strides = array<i32>} : memref<2x4096xf32, #tpu.memory_space<vmem>>, vector<2x256xf32>,
    %131 = vector.extract_strided_slice %7 {offsets = [0, 1792], sizes = [2, 256], strides = [1, 1]} : vector<2x4096xf32> to vector<2x256xf32>
    %132 = vector.broadcast %85 : vector<1x256xf32> to vector<2x256xf32>
    %133 = arith.mulf %131, %132 : vector<2x256xf32>
    %134 = vector.broadcast %88 : vector<1x256xf32> to vector<2x256xf32>
    %135 = arith.addf %133, %134 : vector<2x256xf32>
    %c0_23 = arith.constant 0 : index
    %c1792 = arith.constant 1792 : index
    %136 = vector.load %arg6[%c0_23, %c1792] : memref<2x4096xf32, #tpu.memory_space<vmem>>, vector<2x256xf32>
    tpu.vector_store %arg6[%c0_23, %c1792], %135 {strides = array<i32>} : memref<2x4096xf32, #tpu.memory_space<vmem>>, vector<2x256xf32>,
    %137 = vector.extract_strided_slice %7 {offsets = [0, 2048], sizes = [2, 256], strides = [1, 1]} : vector<2x4096xf32> to vector<2x256xf32>
    %138 = vector.broadcast %85 : vector<1x256xf32> to vector<2x256xf32>
    %139 = arith.mulf %137, %138 : vector<2x256xf32>
    %140 = vector.broadcast %88 : vector<1x256xf32> to vector<2x256xf32>
    %141 = arith.addf %139, %140 : vector<2x256xf32>
    %c0_24 = arith.constant 0 : index
    %c2048 = arith.constant 2048 : index
    %142 = vector.load %arg6[%c0_24, %c2048] : memref<2x4096xf32, #tpu.memory_space<vmem>>, vector<2x256xf32>
    tpu.vector_store %arg6[%c0_24, %c2048], %141 {strides = array<i32>} : memref<2x4096xf32, #tpu.memory_space<vmem>>, vector<2x256xf32>,
    %143 = vector.extract_strided_slice %7 {offsets = [0, 2304], sizes = [2, 256], strides = [1, 1]} : vector<2x4096xf32> to vector<2x256xf32>
    %144 = vector.broadcast %85 : vector<1x256xf32> to vector<2x256xf32>
    %145 = arith.mulf %143, %144 : vector<2x256xf32>
    %146 = vector.broadcast %88 : vector<1x256xf32> to vector<2x256xf32>
    %147 = arith.addf %145, %146 : vector<2x256xf32>
    %c0_25 = arith.constant 0 : index
    %c2304 = arith.constant 2304 : index
    %148 = vector.load %arg6[%c0_25, %c2304] : memref<2x4096xf32, #tpu.memory_space<vmem>>, vector<2x256xf32>
    tpu.vector_store %arg6[%c0_25, %c2304], %147 {strides = array<i32>} : memref<2x4096xf32, #tpu.memory_space<vmem>>, vector<2x256xf32>,
    %149 = vector.extract_strided_slice %7 {offsets = [0, 2560], sizes = [2, 256], strides = [1, 1]} : vector<2x4096xf32> to vector<2x256xf32>
    %150 = vector.broadcast %85 : vector<1x256xf32> to vector<2x256xf32>
    %151 = arith.mulf %149, %150 : vector<2x256xf32>
    %152 = vector.broadcast %88 : vector<1x256xf32> to vector<2x256xf32>
    %153 = arith.addf %151, %152 : vector<2x256xf32>
    %c0_26 = arith.constant 0 : index
    %c2560 = arith.constant 2560 : index
    %154 = vector.load %arg6[%c0_26, %c2560] : memref<2x4096xf32, #tpu.memory_space<vmem>>, vector<2x256xf32>
    tpu.vector_store %arg6[%c0_26, %c2560], %153 {strides = array<i32>} : memref<2x4096xf32, #tpu.memory_space<vmem>>, vector<2x256xf32>,
    %155 = vector.extract_strided_slice %7 {offsets = [0, 2816], sizes = [2, 256], strides = [1, 1]} : vector<2x4096xf32> to vector<2x256xf32>
    %156 = vector.broadcast %85 : vector<1x256xf32> to vector<2x256xf32>
    %157 = arith.mulf %155, %156 : vector<2x256xf32>
    %158 = vector.broadcast %88 : vector<1x256xf32> to vector<2x256xf32>
    %159 = arith.addf %157, %158 : vector<2x256xf32>
    %c0_27 = arith.constant 0 : index
    %c2816 = arith.constant 2816 : index
    %160 = vector.load %arg6[%c0_27, %c2816] : memref<2x4096xf32, #tpu.memory_space<vmem>>, vector<2x256xf32>
    tpu.vector_store %arg6[%c0_27, %c2816], %159 {strides = array<i32>} : memref<2x4096xf32, #tpu.memory_space<vmem>>, vector<2x256xf32>,
    %161 = vector.extract_strided_slice %7 {offsets = [0, 3072], sizes = [2, 256], strides = [1, 1]} : vector<2x4096xf32> to vector<2x256xf32>
    %162 = vector.broadcast %85 : vector<1x256xf32> to vector<2x256xf32>
    %163 = arith.mulf %161, %162 : vector<2x256xf32>
    %164 = vector.broadcast %88 : vector<1x256xf32> to vector<2x256xf32>
    %165 = arith.addf %163, %164 : vector<2x256xf32>
    %c0_28 = arith.constant 0 : index
    %c3072 = arith.constant 3072 : index
    %166 = vector.load %arg6[%c0_28, %c3072] : memref<2x4096xf32, #tpu.memory_space<vmem>>, vector<2x256xf32>
    tpu.vector_store %arg6[%c0_28, %c3072], %165 {strides = array<i32>} : memref<2x4096xf32, #tpu.memory_space<vmem>>, vector<2x256xf32>,
    %167 = vector.extract_strided_slice %7 {offsets = [0, 3328], sizes = [2, 256], strides = [1, 1]} : vector<2x4096xf32> to vector<2x256xf32>
    %168 = vector.broadcast %85 : vector<1x256xf32> to vector<2x256xf32>
    %169 = arith.mulf %167, %168 : vector<2x256xf32>
    %170 = vector.broadcast %88 : vector<1x256xf32> to vector<2x256xf32>
    %171 = arith.addf %169, %170 : vector<2x256xf32>
    %c0_29 = arith.constant 0 : index
    %c3328 = arith.constant 3328 : index
    %172 = vector.load %arg6[%c0_29, %c3328] : memref<2x4096xf32, #tpu.memory_space<vmem>>, vector<2x256xf32>
    tpu.vector_store %arg6[%c0_29, %c3328], %171 {strides = array<i32>} : memref<2x4096xf32, #tpu.memory_space<vmem>>, vector<2x256xf32>,
    %173 = vector.extract_strided_slice %7 {offsets = [0, 3584], sizes = [2, 256], strides = [1, 1]} : vector<2x4096xf32> to vector<2x256xf32>
    %174 = vector.broadcast %85 : vector<1x256xf32> to vector<2x256xf32>
    %175 = arith.mulf %173, %174 : vector<2x256xf32>
    %176 = vector.broadcast %88 : vector<1x256xf32> to vector<2x256xf32>
    %177 = arith.addf %175, %176 : vector<2x256xf32>
    %c0_30 = arith.constant 0 : index
    %c3584 = arith.constant 3584 : index
    %178 = vector.load %arg6[%c0_30, %c3584] : memref<2x4096xf32, #tpu.memory_space<vmem>>, vector<2x256xf32>
    tpu.vector_store %arg6[%c0_30, %c3584], %177 {strides = array<i32>} : memref<2x4096xf32, #tpu.memory_space<vmem>>, vector<2x256xf32>,
    %179 = vector.extract_strided_slice %7 {offsets = [0, 3840], sizes = [2, 256], strides = [1, 1]} : vector<2x4096xf32> to vector<2x256xf32>
    %180 = vector.broadcast %85 : vector<1x256xf32> to vector<2x256xf32>
    %181 = arith.mulf %179, %180 : vector<2x256xf32>
    %182 = vector.broadcast %88 : vector<1x256xf32> to vector<2x256xf32>
    %183 = arith.addf %181, %182 : vector<2x256xf32>
    %c0_31 = arith.constant 0 : index
    %c3840 = arith.constant 3840 : index
    %184 = vector.load %arg6[%c0_31, %c3840] : memref<2x4096xf32, #tpu.memory_space<vmem>>, vector<2x256xf32>
    tpu.vector_store %arg6[%c0_31, %c3840], %183 {strides = array<i32>} : memref<2x4096xf32, #tpu.memory_space<vmem>>, vector<2x256xf32>,
    return
  }
  func.func @transform_0(%arg0: i32) -> (i32, i32) {
    %c0_i32 = arith.constant 0 : i32
    %c0_i32_0 = arith.constant 0 : i32
    %c0_i32_1 = arith.constant 0 : i32
    return %c0_i32, %c0_i32_0 : i32, i32
  }
  func.func @transform_1(%arg0: i32) -> (i32, i32) {
    %c0_i32 = arith.constant 0 : i32
    %c0_i32_0 = arith.constant 0 : i32
    %c0_i32_1 = arith.constant 0 : i32
    return %c0_i32, %c0_i32_0 : i32, i32
  }
  func.func @transform_2(%arg0: i32) -> (i32, i32) {
    %c0_i32 = arith.constant 0 : i32
    %c0_i32_0 = arith.constant 0 : i32
    %c0_i32_1 = arith.constant 0 : i32
    return %c0_i32, %c0_i32_0 : i32, i32
  }
  func.func @transform_3(%arg0: i32) -> (i32, i32) {
    %c0_i32 = arith.constant 0 : i32
    %c0_i32_0 = arith.constant 0 : i32
    %c0_i32_1 = arith.constant 0 : i32
    return %c0_i32, %c0_i32_0 : i32, i32
  }
  func.func @transform_4(%arg0: i32) -> (i32, i32) {
    %c0_i32 = arith.constant 0 : i32
    %c0_i32_0 = arith.constant 0 : i32
    %c0_i32_1 = arith.constant 0 : i32
    return %c0_i32, %c0_i32_0 : i32, i32
  }
  func.func @transform_5(%arg0: i32) -> (i32, i32) {
    %c0_i32 = arith.constant 0 : i32
    %c0_i32_0 = arith.constant 0 : i32
    %c0_i32_1 = arith.constant 0 : i32
    return %c0_i32, %c0_i32_0 : i32, i32
  }
}

module attributes {stable_mosaic.version = 11 : i64} {
  func.func @_deconv_relu_bn_kernel(%arg0: i32, %arg1: memref<50x2304xf32, #tpu.memory_space<vmem>>, %arg2: memref<2304x128xf32, #tpu.memory_space<vmem>>, %arg3: memref<1x128xf32, #tpu.memory_space<vmem>>, %arg4: memref<1x128xf32, #tpu.memory_space<vmem>>, %arg5: memref<1x128xf32, #tpu.memory_space<vmem>>, %arg6: memref<50x128xf32, #tpu.memory_space<vmem>>) attributes {dimension_semantics = [#tpu.dimension_semantics<arbitrary>], iteration_bounds = array<i64: 1>, scalar_prefetch = 0 : i64, scratch_operands = 0 : i64, tpu.core_type = #tpu.core_type<tc>, window_params = [{pipeline_mode = #tpu.pipeline_mode<synchronous>, transform_indices = @transform_0, window_bounds = array<i64: 50, 2304>}, {pipeline_mode = #tpu.pipeline_mode<synchronous>, transform_indices = @transform_1, window_bounds = array<i64: 2304, 128>}, {pipeline_mode = #tpu.pipeline_mode<synchronous>, transform_indices = @transform_2, window_bounds = array<i64: 1, 128>}, {pipeline_mode = #tpu.pipeline_mode<synchronous>, transform_indices = @transform_3, window_bounds = array<i64: 1, 128>}, {pipeline_mode = #tpu.pipeline_mode<synchronous>, transform_indices = @transform_4, window_bounds = array<i64: 1, 128>}, {pipeline_mode = #tpu.pipeline_mode<synchronous>, transform_indices = @transform_5, window_bounds = array<i64: 50, 128>}]} {
    %c0 = arith.constant 0 : index
    %c0_0 = arith.constant 0 : index
    %0 = vector.load %arg1[%c0, %c0_0] : memref<50x2304xf32, #tpu.memory_space<vmem>>, vector<50x2304xf32>
    %c0_1 = arith.constant 0 : index
    %c0_2 = arith.constant 0 : index
    %1 = vector.load %arg2[%c0_1, %c0_2] : memref<2304x128xf32, #tpu.memory_space<vmem>>, vector<2304x128xf32>
    %cst = arith.constant dense<0.000000e+00> : vector<50x128xf32>
    %2 = tpu.matmul %0, %1, %cst {dimension_numbers = #tpu.dot_dimension_numbers<[1], [0], [0], [1], [0, 0, 1, 1], [], []>} : vector<50x2304xf32>, vector<2304x128xf32>, vector<50x128xf32> -> vector<50x128xf32>
    %c0_3 = arith.constant 0 : index
    %c0_4 = arith.constant 0 : index
    %3 = vector.load %arg3[%c0_3, %c0_4] : memref<1x128xf32, #tpu.memory_space<vmem>>, vector<1x128xf32>
    %4 = vector.broadcast %3 : vector<1x128xf32> to vector<50x128xf32>
    %5 = arith.addf %2, %4 : vector<50x128xf32>
    %cst_5 = arith.constant 0.000000e+00 : f32
    %6 = vector.broadcast %cst_5 : f32 to vector<50x128xf32>
    %7 = arith.maximumf %5, %6 : vector<50x128xf32>
    %cst_6 = arith.constant dense<0.000000e+00> : vector<128xf32>
    %8 = vector.multi_reduction <add>, %7, %cst_6 [0] : vector<50x128xf32> to vector<128xf32>
    %9 = vector.shape_cast %8 : vector<128xf32> to vector<1x128xf32>
    %cst_7 = arith.constant 2.000000e-02 : f32
    %10 = vector.broadcast %cst_7 : f32 to vector<1x128xf32>
    %11 = arith.mulf %9, %10 : vector<1x128xf32>
    %12 = arith.mulf %7, %7 : vector<50x128xf32>
    %cst_8 = arith.constant dense<0.000000e+00> : vector<128xf32>
    %13 = vector.multi_reduction <add>, %12, %cst_8 [0] : vector<50x128xf32> to vector<128xf32>
    %14 = vector.shape_cast %13 : vector<128xf32> to vector<1x128xf32>
    %cst_9 = arith.constant 2.000000e-02 : f32
    %15 = vector.broadcast %cst_9 : f32 to vector<1x128xf32>
    %16 = arith.mulf %14, %15 : vector<1x128xf32>
    %17 = arith.mulf %11, %11 : vector<1x128xf32>
    %18 = arith.subf %16, %17 : vector<1x128xf32>
    %c0_10 = arith.constant 0 : index
    %c0_11 = arith.constant 0 : index
    %19 = vector.load %arg4[%c0_10, %c0_11] : memref<1x128xf32, #tpu.memory_space<vmem>>, vector<1x128xf32>
    %cst_12 = arith.constant 9.99999974E-6 : f32
    %20 = vector.broadcast %cst_12 : f32 to vector<1x128xf32>
    %21 = arith.addf %18, %20 : vector<1x128xf32>
    %22 = math.rsqrt %21 : vector<1x128xf32>
    %23 = arith.mulf %19, %22 : vector<1x128xf32>
    %c0_13 = arith.constant 0 : index
    %c0_14 = arith.constant 0 : index
    %24 = vector.load %arg5[%c0_13, %c0_14] : memref<1x128xf32, #tpu.memory_space<vmem>>, vector<1x128xf32>
    %25 = arith.mulf %11, %23 : vector<1x128xf32>
    %26 = arith.subf %24, %25 : vector<1x128xf32>
    %27 = vector.broadcast %23 : vector<1x128xf32> to vector<50x128xf32>
    %28 = arith.mulf %7, %27 : vector<50x128xf32>
    %29 = vector.broadcast %26 : vector<1x128xf32> to vector<50x128xf32>
    %30 = arith.addf %28, %29 : vector<50x128xf32>
    %c0_15 = arith.constant 0 : index
    %c0_16 = arith.constant 0 : index
    %31 = vector.load %arg6[%c0_15, %c0_16] : memref<50x128xf32, #tpu.memory_space<vmem>>, vector<50x128xf32>
    tpu.vector_store %arg6[%c0_15, %c0_16], %30 {strides = array<i32>} : memref<50x128xf32, #tpu.memory_space<vmem>>, vector<50x128xf32>,
    return
  }
  func.func @transform_0(%arg0: i32) -> (i32, i32) {
    %c0_i32 = arith.constant 0 : i32
    %c0_i32_0 = arith.constant 0 : i32
    %c0_i32_1 = arith.constant 0 : i32
    return %c0_i32, %c0_i32_0 : i32, i32
  }
  func.func @transform_1(%arg0: i32) -> (i32, i32) {
    %c0_i32 = arith.constant 0 : i32
    %c0_i32_0 = arith.constant 0 : i32
    %c0_i32_1 = arith.constant 0 : i32
    return %c0_i32, %c0_i32_0 : i32, i32
  }
  func.func @transform_2(%arg0: i32) -> (i32, i32) {
    %c0_i32 = arith.constant 0 : i32
    %c0_i32_0 = arith.constant 0 : i32
    %c0_i32_1 = arith.constant 0 : i32
    return %c0_i32, %c0_i32_0 : i32, i32
  }
  func.func @transform_3(%arg0: i32) -> (i32, i32) {
    %c0_i32 = arith.constant 0 : i32
    %c0_i32_0 = arith.constant 0 : i32
    %c0_i32_1 = arith.constant 0 : i32
    return %c0_i32, %c0_i32_0 : i32, i32
  }
  func.func @transform_4(%arg0: i32) -> (i32, i32) {
    %c0_i32 = arith.constant 0 : i32
    %c0_i32_0 = arith.constant 0 : i32
    %c0_i32_1 = arith.constant 0 : i32
    return %c0_i32, %c0_i32_0 : i32, i32
  }
  func.func @transform_5(%arg0: i32) -> (i32, i32) {
    %c0_i32 = arith.constant 0 : i32
    %c0_i32_0 = arith.constant 0 : i32
    %c0_i32_1 = arith.constant 0 : i32
    return %c0_i32, %c0_i32_0 : i32, i32
  }
}

module attributes {stable_mosaic.version = 11 : i64} {
  func.func @_sattn_kernel(%arg0: i32, %arg1: memref<2x49x64xf32, #tpu.memory_space<vmem>>, %arg2: memref<64x8xf32, #tpu.memory_space<vmem>>, %arg3: memref<64x8xf32, #tpu.memory_space<vmem>>, %arg4: memref<64x64xf32, #tpu.memory_space<vmem>>, %arg5: memref<1x8xf32, #tpu.memory_space<vmem>>, %arg6: memref<1x8xf32, #tpu.memory_space<vmem>>, %arg7: memref<1x64xf32, #tpu.memory_space<vmem>>, %arg8: memref<1x1xf32, #tpu.memory_space<smem>>, %arg9: memref<2x49x64xf32, #tpu.memory_space<vmem>>, %arg10: memref<2x49x49xf32, #tpu.memory_space<vmem>>) attributes {dimension_semantics = [#tpu.dimension_semantics<parallel>], iteration_bounds = array<i64: 1>, scalar_prefetch = 0 : i64, scratch_operands = 0 : i64, tpu.core_type = #tpu.core_type<tc>, window_params = [{transform_indices = @transform_0, window_bounds = array<i64: 2, 49, 64>}, {pipeline_mode = #tpu.pipeline_mode<synchronous>, transform_indices = @transform_1, window_bounds = array<i64: 64, 8>}, {pipeline_mode = #tpu.pipeline_mode<synchronous>, transform_indices = @transform_2, window_bounds = array<i64: 64, 8>}, {pipeline_mode = #tpu.pipeline_mode<synchronous>, transform_indices = @transform_3, window_bounds = array<i64: 64, 64>}, {pipeline_mode = #tpu.pipeline_mode<synchronous>, transform_indices = @transform_4, window_bounds = array<i64: 1, 8>}, {pipeline_mode = #tpu.pipeline_mode<synchronous>, transform_indices = @transform_5, window_bounds = array<i64: 1, 8>}, {pipeline_mode = #tpu.pipeline_mode<synchronous>, transform_indices = @transform_6, window_bounds = array<i64: 1, 64>}, {transform_indices = @transform_7, window_bounds = array<i64: 1, 1>}, {transform_indices = @transform_8, window_bounds = array<i64: 2, 49, 64>}, {transform_indices = @transform_9, window_bounds = array<i64: 2, 49, 49>}]} {
    %c0 = arith.constant 0 : index
    %c0_0 = arith.constant 0 : index
    %0 = memref.load %arg8[%c0, %c0_0] : memref<1x1xf32, #tpu.memory_space<smem>>
    %c0_1 = arith.constant 0 : index
    %c0_2 = arith.constant 0 : index
    %c0_3 = arith.constant 0 : index
    %1 = vector.load %arg1[%c0_1, %c0_2, %c0_3] : memref<2x49x64xf32, #tpu.memory_space<vmem>>, vector<1x49x64xf32>
    %2 = vector.shape_cast %1 : vector<1x49x64xf32> to vector<49x64xf32>
    %c0_4 = arith.constant 0 : index
    %c0_5 = arith.constant 0 : index
    %3 = vector.load %arg2[%c0_4, %c0_5] : memref<64x8xf32, #tpu.memory_space<vmem>>, vector<64x8xf32>
    %cst = arith.constant dense<0.000000e+00> : vector<49x8xf32>
    %4 = tpu.matmul %2, %3, %cst {dimension_numbers = #tpu.dot_dimension_numbers<[1], [0], [0], [1], [0, 0, 1, 1], [], []>} : vector<49x64xf32>, vector<64x8xf32>, vector<49x8xf32> -> vector<49x8xf32>
    %c0_6 = arith.constant 0 : index
    %c0_7 = arith.constant 0 : index
    %5 = vector.load %arg5[%c0_6, %c0_7] : memref<1x8xf32, #tpu.memory_space<vmem>>, vector<1x8xf32>
    %6 = vector.broadcast %5 : vector<1x8xf32> to vector<49x8xf32>
    %7 = arith.addf %4, %6 : vector<49x8xf32>
    %c0_8 = arith.constant 0 : index
    %c0_9 = arith.constant 0 : index
    %8 = vector.load %arg3[%c0_8, %c0_9] : memref<64x8xf32, #tpu.memory_space<vmem>>, vector<64x8xf32>
    %cst_10 = arith.constant dense<0.000000e+00> : vector<49x8xf32>
    %9 = tpu.matmul %2, %8, %cst_10 {dimension_numbers = #tpu.dot_dimension_numbers<[1], [0], [0], [1], [0, 0, 1, 1], [], []>} : vector<49x64xf32>, vector<64x8xf32>, vector<49x8xf32> -> vector<49x8xf32>
    %c0_11 = arith.constant 0 : index
    %c0_12 = arith.constant 0 : index
    %10 = vector.load %arg6[%c0_11, %c0_12] : memref<1x8xf32, #tpu.memory_space<vmem>>, vector<1x8xf32>
    %11 = vector.broadcast %10 : vector<1x8xf32> to vector<49x8xf32>
    %12 = arith.addf %9, %11 : vector<49x8xf32>
    %c0_13 = arith.constant 0 : index
    %c0_14 = arith.constant 0 : index
    %13 = vector.load %arg4[%c0_13, %c0_14] : memref<64x64xf32, #tpu.memory_space<vmem>>, vector<64x64xf32>
    %cst_15 = arith.constant dense<0.000000e+00> : vector<49x64xf32>
    %14 = tpu.matmul %2, %13, %cst_15 {dimension_numbers = #tpu.dot_dimension_numbers<[1], [0], [0], [1], [0, 0, 1, 1], [], []>} : vector<49x64xf32>, vector<64x64xf32>, vector<49x64xf32> -> vector<49x64xf32>
    %c0_16 = arith.constant 0 : index
    %c0_17 = arith.constant 0 : index
    %15 = vector.load %arg7[%c0_16, %c0_17] : memref<1x64xf32, #tpu.memory_space<vmem>>, vector<1x64xf32>
    %16 = vector.broadcast %15 : vector<1x64xf32> to vector<49x64xf32>
    %17 = arith.addf %14, %16 : vector<49x64xf32>
    %cst_18 = arith.constant dense<0.000000e+00> : vector<49x49xf32>
    %18 = tpu.matmul %7, %12, %cst_18 {dimension_numbers = #tpu.dot_dimension_numbers<[1], [1], [0], [0], [0, 0, 1, 0], [], []>} : vector<49x8xf32>, vector<49x8xf32>, vector<49x49xf32> -> vector<49x49xf32>
    %cst_19 = arith.constant dense<0xFF800000> : vector<49xf32>
    %19 = vector.multi_reduction <maximumf>, %18, %cst_19 [1] : vector<49x49xf32> to vector<49xf32>
    %20 = vector.shape_cast %19 : vector<49xf32> to vector<49x1xf32>
    %21 = vector.broadcast %20 : vector<49x1xf32> to vector<49x49xf32>
    %22 = arith.subf %18, %21 : vector<49x49xf32>
    %23 = math.exp %22 : vector<49x49xf32>
    %cst_20 = arith.constant dense<0.000000e+00> : vector<49xf32>
    %24 = vector.multi_reduction <add>, %23, %cst_20 [1] : vector<49x49xf32> to vector<49xf32>
    %25 = vector.shape_cast %24 : vector<49xf32> to vector<49x1xf32>
    %26 = vector.broadcast %25 : vector<49x1xf32> to vector<49x49xf32>
    %27 = arith.divf %23, %26 : vector<49x49xf32>
    %cst_21 = arith.constant dense<0.000000e+00> : vector<49x64xf32>
    %28 = tpu.matmul %27, %17, %cst_21 {dimension_numbers = #tpu.dot_dimension_numbers<[1], [0], [0], [1], [0, 0, 1, 1], [], []>} : vector<49x49xf32>, vector<49x64xf32>, vector<49x64xf32> -> vector<49x64xf32>
    %29 = vector.broadcast %0 : f32 to vector<49x64xf32>
    %30 = arith.mulf %29, %28 : vector<49x64xf32>
    %31 = arith.addf %30, %2 : vector<49x64xf32>
    %c0_22 = arith.constant 0 : index
    %c0_23 = arith.constant 0 : index
    %c0_24 = arith.constant 0 : index
    %32 = vector.load %arg9[%c0_22, %c0_23, %c0_24] : memref<2x49x64xf32, #tpu.memory_space<vmem>>, vector<1x49x64xf32>
    %33 = vector.shape_cast %32 : vector<1x49x64xf32> to vector<49x64xf32>
    %34 = vector.shape_cast %31 : vector<49x64xf32> to vector<1x49x64xf32>
    tpu.vector_store %arg9[%c0_22, %c0_23, %c0_24], %34 {strides = array<i32>} : memref<2x49x64xf32, #tpu.memory_space<vmem>>, vector<1x49x64xf32>,
    %c0_25 = arith.constant 0 : index
    %c0_26 = arith.constant 0 : index
    %c0_27 = arith.constant 0 : index
    %35 = vector.load %arg10[%c0_25, %c0_26, %c0_27] : memref<2x49x49xf32, #tpu.memory_space<vmem>>, vector<1x49x49xf32>
    %36 = vector.shape_cast %35 : vector<1x49x49xf32> to vector<49x49xf32>
    %37 = vector.shape_cast %27 : vector<49x49xf32> to vector<1x49x49xf32>
    tpu.vector_store %arg10[%c0_25, %c0_26, %c0_27], %37 {strides = array<i32>} : memref<2x49x49xf32, #tpu.memory_space<vmem>>, vector<1x49x49xf32>,
    %c1 = arith.constant 1 : index
    %c0_28 = arith.constant 0 : index
    %c0_29 = arith.constant 0 : index
    %38 = vector.load %arg1[%c1, %c0_28, %c0_29] : memref<2x49x64xf32, #tpu.memory_space<vmem>>, vector<1x49x64xf32>
    %39 = vector.shape_cast %38 : vector<1x49x64xf32> to vector<49x64xf32>
    %c0_30 = arith.constant 0 : index
    %c0_31 = arith.constant 0 : index
    %40 = vector.load %arg2[%c0_30, %c0_31] : memref<64x8xf32, #tpu.memory_space<vmem>>, vector<64x8xf32>
    %cst_32 = arith.constant dense<0.000000e+00> : vector<49x8xf32>
    %41 = tpu.matmul %39, %40, %cst_32 {dimension_numbers = #tpu.dot_dimension_numbers<[1], [0], [0], [1], [0, 0, 1, 1], [], []>} : vector<49x64xf32>, vector<64x8xf32>, vector<49x8xf32> -> vector<49x8xf32>
    %c0_33 = arith.constant 0 : index
    %c0_34 = arith.constant 0 : index
    %42 = vector.load %arg5[%c0_33, %c0_34] : memref<1x8xf32, #tpu.memory_space<vmem>>, vector<1x8xf32>
    %43 = vector.broadcast %42 : vector<1x8xf32> to vector<49x8xf32>
    %44 = arith.addf %41, %43 : vector<49x8xf32>
    %c0_35 = arith.constant 0 : index
    %c0_36 = arith.constant 0 : index
    %45 = vector.load %arg3[%c0_35, %c0_36] : memref<64x8xf32, #tpu.memory_space<vmem>>, vector<64x8xf32>
    %cst_37 = arith.constant dense<0.000000e+00> : vector<49x8xf32>
    %46 = tpu.matmul %39, %45, %cst_37 {dimension_numbers = #tpu.dot_dimension_numbers<[1], [0], [0], [1], [0, 0, 1, 1], [], []>} : vector<49x64xf32>, vector<64x8xf32>, vector<49x8xf32> -> vector<49x8xf32>
    %c0_38 = arith.constant 0 : index
    %c0_39 = arith.constant 0 : index
    %47 = vector.load %arg6[%c0_38, %c0_39] : memref<1x8xf32, #tpu.memory_space<vmem>>, vector<1x8xf32>
    %48 = vector.broadcast %47 : vector<1x8xf32> to vector<49x8xf32>
    %49 = arith.addf %46, %48 : vector<49x8xf32>
    %c0_40 = arith.constant 0 : index
    %c0_41 = arith.constant 0 : index
    %50 = vector.load %arg4[%c0_40, %c0_41] : memref<64x64xf32, #tpu.memory_space<vmem>>, vector<64x64xf32>
    %cst_42 = arith.constant dense<0.000000e+00> : vector<49x64xf32>
    %51 = tpu.matmul %39, %50, %cst_42 {dimension_numbers = #tpu.dot_dimension_numbers<[1], [0], [0], [1], [0, 0, 1, 1], [], []>} : vector<49x64xf32>, vector<64x64xf32>, vector<49x64xf32> -> vector<49x64xf32>
    %c0_43 = arith.constant 0 : index
    %c0_44 = arith.constant 0 : index
    %52 = vector.load %arg7[%c0_43, %c0_44] : memref<1x64xf32, #tpu.memory_space<vmem>>, vector<1x64xf32>
    %53 = vector.broadcast %52 : vector<1x64xf32> to vector<49x64xf32>
    %54 = arith.addf %51, %53 : vector<49x64xf32>
    %cst_45 = arith.constant dense<0.000000e+00> : vector<49x49xf32>
    %55 = tpu.matmul %44, %49, %cst_45 {dimension_numbers = #tpu.dot_dimension_numbers<[1], [1], [0], [0], [0, 0, 1, 0], [], []>} : vector<49x8xf32>, vector<49x8xf32>, vector<49x49xf32> -> vector<49x49xf32>
    %cst_46 = arith.constant dense<0xFF800000> : vector<49xf32>
    %56 = vector.multi_reduction <maximumf>, %55, %cst_46 [1] : vector<49x49xf32> to vector<49xf32>
    %57 = vector.shape_cast %56 : vector<49xf32> to vector<49x1xf32>
    %58 = vector.broadcast %57 : vector<49x1xf32> to vector<49x49xf32>
    %59 = arith.subf %55, %58 : vector<49x49xf32>
    %60 = math.exp %59 : vector<49x49xf32>
    %cst_47 = arith.constant dense<0.000000e+00> : vector<49xf32>
    %61 = vector.multi_reduction <add>, %60, %cst_47 [1] : vector<49x49xf32> to vector<49xf32>
    %62 = vector.shape_cast %61 : vector<49xf32> to vector<49x1xf32>
    %63 = vector.broadcast %62 : vector<49x1xf32> to vector<49x49xf32>
    %64 = arith.divf %60, %63 : vector<49x49xf32>
    %cst_48 = arith.constant dense<0.000000e+00> : vector<49x64xf32>
    %65 = tpu.matmul %64, %54, %cst_48 {dimension_numbers = #tpu.dot_dimension_numbers<[1], [0], [0], [1], [0, 0, 1, 1], [], []>} : vector<49x49xf32>, vector<49x64xf32>, vector<49x64xf32> -> vector<49x64xf32>
    %66 = vector.broadcast %0 : f32 to vector<49x64xf32>
    %67 = arith.mulf %66, %65 : vector<49x64xf32>
    %68 = arith.addf %67, %39 : vector<49x64xf32>
    %c1_49 = arith.constant 1 : index
    %c0_50 = arith.constant 0 : index
    %c0_51 = arith.constant 0 : index
    %69 = vector.load %arg9[%c1_49, %c0_50, %c0_51] : memref<2x49x64xf32, #tpu.memory_space<vmem>>, vector<1x49x64xf32>
    %70 = vector.shape_cast %69 : vector<1x49x64xf32> to vector<49x64xf32>
    %71 = vector.shape_cast %68 : vector<49x64xf32> to vector<1x49x64xf32>
    tpu.vector_store %arg9[%c1_49, %c0_50, %c0_51], %71 {strides = array<i32>} : memref<2x49x64xf32, #tpu.memory_space<vmem>>, vector<1x49x64xf32>,
    %c1_52 = arith.constant 1 : index
    %c0_53 = arith.constant 0 : index
    %c0_54 = arith.constant 0 : index
    %72 = vector.load %arg10[%c1_52, %c0_53, %c0_54] : memref<2x49x49xf32, #tpu.memory_space<vmem>>, vector<1x49x49xf32>
    %73 = vector.shape_cast %72 : vector<1x49x49xf32> to vector<49x49xf32>
    %74 = vector.shape_cast %64 : vector<49x49xf32> to vector<1x49x49xf32>
    tpu.vector_store %arg10[%c1_52, %c0_53, %c0_54], %74 {strides = array<i32>} : memref<2x49x49xf32, #tpu.memory_space<vmem>>, vector<1x49x49xf32>,
    return
  }
  func.func @transform_0(%arg0: i32) -> (i32, i32, i32) {
    %c0_i32 = arith.constant 0 : i32
    %c0_i32_0 = arith.constant 0 : i32
    %c0_i32_1 = arith.constant 0 : i32
    return %arg0, %c0_i32, %c0_i32_0 : i32, i32, i32
  }
  func.func @transform_1(%arg0: i32) -> (i32, i32) {
    %c0_i32 = arith.constant 0 : i32
    %c0_i32_0 = arith.constant 0 : i32
    %c0_i32_1 = arith.constant 0 : i32
    return %c0_i32, %c0_i32_0 : i32, i32
  }
  func.func @transform_2(%arg0: i32) -> (i32, i32) {
    %c0_i32 = arith.constant 0 : i32
    %c0_i32_0 = arith.constant 0 : i32
    %c0_i32_1 = arith.constant 0 : i32
    return %c0_i32, %c0_i32_0 : i32, i32
  }
  func.func @transform_3(%arg0: i32) -> (i32, i32) {
    %c0_i32 = arith.constant 0 : i32
    %c0_i32_0 = arith.constant 0 : i32
    %c0_i32_1 = arith.constant 0 : i32
    return %c0_i32, %c0_i32_0 : i32, i32
  }
  func.func @transform_4(%arg0: i32) -> (i32, i32) {
    %c0_i32 = arith.constant 0 : i32
    %c0_i32_0 = arith.constant 0 : i32
    %c0_i32_1 = arith.constant 0 : i32
    return %c0_i32, %c0_i32_0 : i32, i32
  }
  func.func @transform_5(%arg0: i32) -> (i32, i32) {
    %c0_i32 = arith.constant 0 : i32
    %c0_i32_0 = arith.constant 0 : i32
    %c0_i32_1 = arith.constant 0 : i32
    return %c0_i32, %c0_i32_0 : i32, i32
  }
  func.func @transform_6(%arg0: i32) -> (i32, i32) {
    %c0_i32 = arith.constant 0 : i32
    %c0_i32_0 = arith.constant 0 : i32
    %c0_i32_1 = arith.constant 0 : i32
    return %c0_i32, %c0_i32_0 : i32, i32
  }
  func.func @transform_7(%arg0: i32) -> (i32, i32) {
    %c0_i32 = arith.constant 0 : i32
    %c0_i32_0 = arith.constant 0 : i32
    %c0_i32_1 = arith.constant 0 : i32
    return %c0_i32, %c0_i32_0 : i32, i32
  }
  func.func @transform_8(%arg0: i32) -> (i32, i32, i32) {
    %c0_i32 = arith.constant 0 : i32
    %c0_i32_0 = arith.constant 0 : i32
    %c0_i32_1 = arith.constant 0 : i32
    return %arg0, %c0_i32, %c0_i32_0 : i32, i32, i32
  }
  func.func @transform_9(%arg0: i32) -> (i32, i32, i32) {
    %c0_i32 = arith.constant 0 : i32
    %c0_i32_0 = arith.constant 0 : i32
    %c0_i32_1 = arith.constant 0 : i32
    return %arg0, %c0_i32, %c0_i32_0 : i32, i32, i32
  }
}

module attributes {stable_mosaic.version = 11 : i64} {
  func.func @_deconv_relu_bn_kernel(%arg0: i32, %arg1: memref<98x1152xf32, #tpu.memory_space<vmem>>, %arg2: memref<1152x64xf32, #tpu.memory_space<vmem>>, %arg3: memref<1x64xf32, #tpu.memory_space<vmem>>, %arg4: memref<1x64xf32, #tpu.memory_space<vmem>>, %arg5: memref<1x64xf32, #tpu.memory_space<vmem>>, %arg6: memref<98x64xf32, #tpu.memory_space<vmem>>) attributes {dimension_semantics = [#tpu.dimension_semantics<arbitrary>], iteration_bounds = array<i64: 1>, scalar_prefetch = 0 : i64, scratch_operands = 0 : i64, tpu.core_type = #tpu.core_type<tc>, window_params = [{pipeline_mode = #tpu.pipeline_mode<synchronous>, transform_indices = @transform_0, window_bounds = array<i64: 98, 1152>}, {pipeline_mode = #tpu.pipeline_mode<synchronous>, transform_indices = @transform_1, window_bounds = array<i64: 1152, 64>}, {pipeline_mode = #tpu.pipeline_mode<synchronous>, transform_indices = @transform_2, window_bounds = array<i64: 1, 64>}, {pipeline_mode = #tpu.pipeline_mode<synchronous>, transform_indices = @transform_3, window_bounds = array<i64: 1, 64>}, {pipeline_mode = #tpu.pipeline_mode<synchronous>, transform_indices = @transform_4, window_bounds = array<i64: 1, 64>}, {pipeline_mode = #tpu.pipeline_mode<synchronous>, transform_indices = @transform_5, window_bounds = array<i64: 98, 64>}]} {
    %c0 = arith.constant 0 : index
    %c0_0 = arith.constant 0 : index
    %0 = vector.load %arg1[%c0, %c0_0] : memref<98x1152xf32, #tpu.memory_space<vmem>>, vector<98x1152xf32>
    %c0_1 = arith.constant 0 : index
    %c0_2 = arith.constant 0 : index
    %1 = vector.load %arg2[%c0_1, %c0_2] : memref<1152x64xf32, #tpu.memory_space<vmem>>, vector<1152x64xf32>
    %cst = arith.constant dense<0.000000e+00> : vector<98x64xf32>
    %2 = tpu.matmul %0, %1, %cst {dimension_numbers = #tpu.dot_dimension_numbers<[1], [0], [0], [1], [0, 0, 1, 1], [], []>} : vector<98x1152xf32>, vector<1152x64xf32>, vector<98x64xf32> -> vector<98x64xf32>
    %c0_3 = arith.constant 0 : index
    %c0_4 = arith.constant 0 : index
    %3 = vector.load %arg3[%c0_3, %c0_4] : memref<1x64xf32, #tpu.memory_space<vmem>>, vector<1x64xf32>
    %4 = vector.broadcast %3 : vector<1x64xf32> to vector<98x64xf32>
    %5 = arith.addf %2, %4 : vector<98x64xf32>
    %cst_5 = arith.constant 0.000000e+00 : f32
    %6 = vector.broadcast %cst_5 : f32 to vector<98x64xf32>
    %7 = arith.maximumf %5, %6 : vector<98x64xf32>
    %cst_6 = arith.constant dense<0.000000e+00> : vector<64xf32>
    %8 = vector.multi_reduction <add>, %7, %cst_6 [0] : vector<98x64xf32> to vector<64xf32>
    %9 = vector.shape_cast %8 : vector<64xf32> to vector<1x64xf32>
    %cst_7 = arith.constant 0.0102040814 : f32
    %10 = vector.broadcast %cst_7 : f32 to vector<1x64xf32>
    %11 = arith.mulf %9, %10 : vector<1x64xf32>
    %12 = arith.mulf %7, %7 : vector<98x64xf32>
    %cst_8 = arith.constant dense<0.000000e+00> : vector<64xf32>
    %13 = vector.multi_reduction <add>, %12, %cst_8 [0] : vector<98x64xf32> to vector<64xf32>
    %14 = vector.shape_cast %13 : vector<64xf32> to vector<1x64xf32>
    %cst_9 = arith.constant 0.0102040814 : f32
    %15 = vector.broadcast %cst_9 : f32 to vector<1x64xf32>
    %16 = arith.mulf %14, %15 : vector<1x64xf32>
    %17 = arith.mulf %11, %11 : vector<1x64xf32>
    %18 = arith.subf %16, %17 : vector<1x64xf32>
    %c0_10 = arith.constant 0 : index
    %c0_11 = arith.constant 0 : index
    %19 = vector.load %arg4[%c0_10, %c0_11] : memref<1x64xf32, #tpu.memory_space<vmem>>, vector<1x64xf32>
    %cst_12 = arith.constant 9.99999974E-6 : f32
    %20 = vector.broadcast %cst_12 : f32 to vector<1x64xf32>
    %21 = arith.addf %18, %20 : vector<1x64xf32>
    %22 = math.rsqrt %21 : vector<1x64xf32>
    %23 = arith.mulf %19, %22 : vector<1x64xf32>
    %c0_13 = arith.constant 0 : index
    %c0_14 = arith.constant 0 : index
    %24 = vector.load %arg5[%c0_13, %c0_14] : memref<1x64xf32, #tpu.memory_space<vmem>>, vector<1x64xf32>
    %25 = arith.mulf %11, %23 : vector<1x64xf32>
    %26 = arith.subf %24, %25 : vector<1x64xf32>
    %27 = vector.broadcast %23 : vector<1x64xf32> to vector<98x64xf32>
    %28 = arith.mulf %7, %27 : vector<98x64xf32>
    %29 = vector.broadcast %26 : vector<1x64xf32> to vector<98x64xf32>
    %30 = arith.addf %28, %29 : vector<98x64xf32>
    %c0_15 = arith.constant 0 : index
    %c0_16 = arith.constant 0 : index
    %31 = vector.load %arg6[%c0_15, %c0_16] : memref<98x64xf32, #tpu.memory_space<vmem>>, vector<98x64xf32>
    tpu.vector_store %arg6[%c0_15, %c0_16], %30 {strides = array<i32>} : memref<98x64xf32, #tpu.memory_space<vmem>>, vector<98x64xf32>,
    return
  }
  func.func @transform_0(%arg0: i32) -> (i32, i32) {
    %c0_i32 = arith.constant 0 : i32
    %c0_i32_0 = arith.constant 0 : i32
    %c0_i32_1 = arith.constant 0 : i32
    return %c0_i32, %c0_i32_0 : i32, i32
  }
  func.func @transform_1(%arg0: i32) -> (i32, i32) {
    %c0_i32 = arith.constant 0 : i32
    %c0_i32_0 = arith.constant 0 : i32
    %c0_i32_1 = arith.constant 0 : i32
    return %c0_i32, %c0_i32_0 : i32, i32
  }
  func.func @transform_2(%arg0: i32) -> (i32, i32) {
    %c0_i32 = arith.constant 0 : i32
    %c0_i32_0 = arith.constant 0 : i32
    %c0_i32_1 = arith.constant 0 : i32
    return %c0_i32, %c0_i32_0 : i32, i32
  }
  func.func @transform_3(%arg0: i32) -> (i32, i32) {
    %c0_i32 = arith.constant 0 : i32
    %c0_i32_0 = arith.constant 0 : i32
    %c0_i32_1 = arith.constant 0 : i32
    return %c0_i32, %c0_i32_0 : i32, i32
  }
  func.func @transform_4(%arg0: i32) -> (i32, i32) {
    %c0_i32 = arith.constant 0 : i32
    %c0_i32_0 = arith.constant 0 : i32
    %c0_i32_1 = arith.constant 0 : i32
    return %c0_i32, %c0_i32_0 : i32, i32
  }
  func.func @transform_5(%arg0: i32) -> (i32, i32) {
    %c0_i32 = arith.constant 0 : i32
    %c0_i32_0 = arith.constant 0 : i32
    %c0_i32_1 = arith.constant 0 : i32
    return %c0_i32, %c0_i32_0 : i32, i32
  }
}

module attributes {stable_mosaic.version = 11 : i64} {
  func.func @_tail_kernel(%arg0: i32, %arg1: memref<2x144x256xf32, #tpu.memory_space<vmem>>, %arg2: memref<1x1x256xf32, #tpu.memory_space<vmem>>, %arg3: memref<144x128xf32, #tpu.memory_space<vmem>>, %arg4: memref<1x128xf32, #tpu.memory_space<vmem>>, %arg5: memref<2x128xf32, #tpu.memory_space<vmem>>) attributes {dimension_semantics = [#tpu.dimension_semantics<arbitrary>], iteration_bounds = array<i64: 1>, scalar_prefetch = 0 : i64, scratch_operands = 0 : i64, tpu.core_type = #tpu.core_type<tc>, window_params = [{pipeline_mode = #tpu.pipeline_mode<synchronous>, transform_indices = @transform_0, window_bounds = array<i64: 2, 144, 256>}, {pipeline_mode = #tpu.pipeline_mode<synchronous>, transform_indices = @transform_1, window_bounds = array<i64: 1, 1, 256>}, {pipeline_mode = #tpu.pipeline_mode<synchronous>, transform_indices = @transform_2, window_bounds = array<i64: 144, 128>}, {pipeline_mode = #tpu.pipeline_mode<synchronous>, transform_indices = @transform_3, window_bounds = array<i64: 1, 128>}, {pipeline_mode = #tpu.pipeline_mode<synchronous>, transform_indices = @transform_4, window_bounds = array<i64: 2, 128>}]} {
    %c0 = arith.constant 0 : index
    %c0_0 = arith.constant 0 : index
    %c0_1 = arith.constant 0 : index
    %0 = vector.load %arg1[%c0, %c0_0, %c0_1] : memref<2x144x256xf32, #tpu.memory_space<vmem>>, vector<2x144x256xf32>
    %c0_2 = arith.constant 0 : index
    %c0_3 = arith.constant 0 : index
    %c0_4 = arith.constant 0 : index
    %1 = vector.load %arg2[%c0_2, %c0_3, %c0_4] : memref<1x1x256xf32, #tpu.memory_space<vmem>>, vector<1x1x256xf32>
    %2 = vector.broadcast %1 : vector<1x1x256xf32> to vector<2x144x256xf32>
    %3 = arith.mulf %0, %2 : vector<2x144x256xf32>
    %cst = arith.constant dense<0.000000e+00> : vector<2x144xf32>
    %4 = vector.multi_reduction <add>, %3, %cst [2] : vector<2x144x256xf32> to vector<2x144xf32>
    %c0_5 = arith.constant 0 : index
    %c0_6 = arith.constant 0 : index
    %5 = vector.load %arg3[%c0_5, %c0_6] : memref<144x128xf32, #tpu.memory_space<vmem>>, vector<144x128xf32>
    %cst_7 = arith.constant dense<0.000000e+00> : vector<2x128xf32>
    %6 = tpu.matmul %4, %5, %cst_7 {dimension_numbers = #tpu.dot_dimension_numbers<[1], [0], [0], [1], [0, 0, 1, 1], [], []>} : vector<2x144xf32>, vector<144x128xf32>, vector<2x128xf32> -> vector<2x128xf32>
    %c0_8 = arith.constant 0 : index
    %c0_9 = arith.constant 0 : index
    %7 = vector.load %arg4[%c0_8, %c0_9] : memref<1x128xf32, #tpu.memory_space<vmem>>, vector<1x128xf32>
    %8 = vector.broadcast %7 : vector<1x128xf32> to vector<2x128xf32>
    %9 = arith.addf %6, %8 : vector<2x128xf32>
    %c0_10 = arith.constant 0 : index
    %c0_11 = arith.constant 0 : index
    %10 = vector.load %arg5[%c0_10, %c0_11] : memref<2x128xf32, #tpu.memory_space<vmem>>, vector<2x128xf32>
    tpu.vector_store %arg5[%c0_10, %c0_11], %9 {strides = array<i32>} : memref<2x128xf32, #tpu.memory_space<vmem>>, vector<2x128xf32>,
    return
  }
  func.func @transform_0(%arg0: i32) -> (i32, i32, i32) {
    %c0_i32 = arith.constant 0 : i32
    %c0_i32_0 = arith.constant 0 : i32
    %c0_i32_1 = arith.constant 0 : i32
    %c0_i32_2 = arith.constant 0 : i32
    return %c0_i32, %c0_i32_0, %c0_i32_1 : i32, i32, i32
  }
  func.func @transform_1(%arg0: i32) -> (i32, i32, i32) {
    %c0_i32 = arith.constant 0 : i32
    %c0_i32_0 = arith.constant 0 : i32
    %c0_i32_1 = arith.constant 0 : i32
    %c0_i32_2 = arith.constant 0 : i32
    return %c0_i32, %c0_i32_0, %c0_i32_1 : i32, i32, i32
  }
  func.func @transform_2(%arg0: i32) -> (i32, i32) {
    %c0_i32 = arith.constant 0 : i32
    %c0_i32_0 = arith.constant 0 : i32
    %c0_i32_1 = arith.constant 0 : i32
    return %c0_i32, %c0_i32_0 : i32, i32
  }
  func.func @transform_3(%arg0: i32) -> (i32, i32) {
    %c0_i32 = arith.constant 0 : i32
    %c0_i32_0 = arith.constant 0 : i32
    %c0_i32_1 = arith.constant 0 : i32
    return %c0_i32, %c0_i32_0 : i32, i32
  }
  func.func @transform_4(%arg0: i32) -> (i32, i32) {
    %c0_i32 = arith.constant 0 : i32
    %c0_i32_0 = arith.constant 0 : i32
    %c0_i32_1 = arith.constant 0 : i32
    return %c0_i32, %c0_i32_0 : i32, i32
  }
}

</mosaic_0001>

<bundles_post_ra>
// kernel: gen_sagan_forward.5
= control target key start
LH: loop header
LB: loop body
LE: loop exit
PB: predicated region body
PF: predicated region fallthrough
CT: control target
= control target key end

     0   :  { %10 = vsyncpa [#allocation3], 0  ;;  %s3778_s0 = inlined_call_operand.hbm [shape: f32[2,32], index: 0, kind: input, shape index: {}]   ;;  %s3779_s1 = inlined_call_operand.vmem [shape: f32[32,4096], index: 1, kind: input, shape index: {}]   ;;  %s3780_s2 = inlined_call_operand.vmem [shape: f32[1,4096], index: 2, kind: input, shape index: {}]   ;;  %s3781_s3 = inlined_call_operand.hbm [shape: f32[1,256], index: 3, kind: input, shape index: {}]   ;;  %s3782_s4 = inlined_call_operand.hbm [shape: f32[1,256], index: 4, kind: input, shape index: {}]   ;;  %s3783_s5 = inlined_call_operand.vmem [shape: f32[2,4096], index: 5, kind: output, shape index: {}]  }
   0x1   :  { %11 = vsyncpa [#allocation5], 0  ;;  %s2643_s18 = smov [#allocation4]   ;;  %s2644_s20 = smov [#allocation2]  }
   0x2   :  { %s32_s19 = sshll.u32 %s2643_s18, 4  ;;  %s18_s21 = sshll.u32 %s2644_s20, 4  ;;  %s33_s19 = int_to_ptr.vmem [resolvable:$true] %s32_s19  ;;  %s19_s21 = int_to_ptr.vmem [resolvable:$true] %s18_s21 }
   0x3   :  { %s2573_s24 = scalar_lea.hbm %s3781_s3, 32 }
   0x4   :  { %p2574_p0 = scmp.ne.s32.totalorder %s3781_s3, %s2573_s24  ;;  %p2577_p1 = scmp.lt.u32.totalorder %s2573_s24, %s3781_s3 }
   0x6   :  { %p2579_p2 = pnand %p2577_p1, %p2574_p0 }
   0x8   :  { %2582 = shalt.err (!%p2579_p2)
}
   0x9   :  { %s2583_s29 = scalar_lea.vmem %s33_s19, 32  ;;  %p2588_p4 = scmp.lt.s32.totalorder %s33_s19, %s33_s19 }
   0xa   :  { %p2584_p3 = scmp.ne.s32.totalorder %s33_s19, %s2583_s29  ;;  %p2589_p5 = scmp.lt.s32.totalorder %s2583_s29, %s2583_s29 }
   0xc   :  { %p2590_p6 = por %p2589_p5, %p2588_p4 }
   0xe   :  { %p2591_p7 = pnand %p2590_p6, %p2584_p3 }
  0x10   :  { %2594 = shalt.err (!%p2591_p7)
}
  0x11   :  { %35 = dma.hbm_to_vmem [thread:$0]  %s3781_s3, 32, %s33_s19, [#allocation5]  }
  0x12   :  { %s2595_s9 = scalar_lea.hbm %s3778_s0, 32 }
  0x13   :  { %p2596_p8 = scmp.ne.s32.totalorder %s3778_s0, %s2595_s9  ;;  %p2599_p9 = scmp.lt.u32.totalorder %s2595_s9, %s3778_s0 }
  0x15   :  { %p2601_p10 = pnand %p2599_p9, %p2596_p8 }
  0x17   :  { %2604 = shalt.err (!%p2601_p10)
}
  0x18   :  { %s2605_s14 = scalar_lea.vmem %s19_s21, 32  ;;  %p2610_p12 = scmp.lt.s32.totalorder %s19_s21, %s19_s21 }
  0x19   :  { %p2606_p11 = scmp.ne.s32.totalorder %s19_s21, %s2605_s14  ;;  %p2611_p13 = scmp.lt.s32.totalorder %s2605_s14, %s2605_s14 }
  0x1b   :  { %p2612_p0 = por %p2611_p13, %p2610_p12 }
  0x1d   :  { %p2613_p1 = pnand %p2612_p0, %p2606_p11 }
  0x1f   :  { %2616 = shalt.err (!%p2613_p1)
}
  0x20   :  { %21 = dma.hbm_to_vmem [thread:$0]  %s3778_s0, 32, %s19_s21, [#allocation3]  }
  0x21   :  { %s2645_s16 = smov [#allocation6]   ;;  %s2617_s20 = scalar_lea.hbm %s3782_s4, 32 }
  0x22   :  { %s42_s17 = sshll.u32 %s2645_s16, 4  ;;  %p2618_p2 = scmp.ne.s32.totalorder %s3782_s4, %s2617_s20  ;;  %s43_s17 = int_to_ptr.vmem [resolvable:$true] %s42_s17 }
  0x23   :  { %p2621_p3 = scmp.lt.u32.totalorder %s2617_s20, %s3782_s4 }
  0x25   :  { %p2623_p4 = pnand %p2621_p3, %p2618_p2 }
  0x27   :  { %2626 = shalt.err (!%p2623_p4)
}
  0x28   :  { %s2627_s26 = scalar_lea.vmem %s43_s17, 32  ;;  %p2632_p6 = scmp.lt.s32.totalorder %s43_s17, %s43_s17 }
  0x29   :  { %p2628_p5 = scmp.ne.s32.totalorder %s43_s17, %s2627_s26  ;;  %p2633_p7 = scmp.lt.s32.totalorder %s2627_s26, %s2627_s26 }
  0x2b   :  { %p2634_p8 = por %p2633_p7, %p2632_p6 }
  0x2d   :  { %p2635_p9 = pnand %p2634_p8, %p2628_p5 }
  0x2f   :  { %2638 = shalt.err (!%p2635_p9)
}
  0x30   :  { %45 = dma.hbm_to_vmem [thread:$0]  %s3782_s4, 32, %s43_s17, [#allocation5]  }
  0x31   :  { %2639 = dma.done.wait [#allocation3], 32  }
  0x32   :  { %2640 = vsyncadd [#allocation3], 4294967264 }
  0x33   :  { %2641 = dma.done.wait [#allocation5], 64  }
  0x34   :  { %2642 = vsyncadd [#allocation5], 4294967232  ;;  %v2646_v0 = vmov 0.0   ;;  %v57_v1 = vld [vmem:[%s3779_s1 + $0x8] sm:$0xff]  ;;  %v59_v3 = vld [vmem:[%s3779_s1 + $0x18] sm:$0xff]  ;;  %vm352_vm0 = vcmask 261120  }
  0x35   :  { %420 = vmatprep.mubr.f32.mxu0 %v2646_v0  ;;  %491 = vmatprep.mubr.f32.mxu1 %v2646_v0  ;;  %v89_v2 = vld [vmem:[%s3779_s1 + $0x108] sm:$0xff]  ;;  %v91_v5 = vld [vmem:[%s3779_s1 + $0x118] sm:$0xff]  ;;  %v56_v6 = vld [vmem:[%s3779_s1] sm:$0xff]  ;;  %vm1524_vm1 = vcmask 1041408  }
  0x36   :  { %v2435_v4 = vpack.c.bf16 %v89_v2, %v57_v1  ;;  %v88_v7 = vld [vmem:[%s3779_s1 + $0x100] sm:$0xff]  ;;  %v2443_v8 = vpack.c.bf16 %v91_v5, %v59_v3  ;;  %v58_v10 = vld [vmem:[%s3779_s1 + $0x10] sm:$0xff]  ;;  %v121_v12 = vld [vmem:[%s3779_s1 + $0x208] sm:$0xff] }
  0x37   :  { %v2437_v9 = vpack.c.bf16 %v88_v7, %v56_v6  ;;  %v90_v11 = vld [vmem:[%s3779_s1 + $0x110] sm:$0xff]  ;;  %v153_v14 = vld [vmem:[%s3779_s1 + $0x308] sm:$0xff]  ;;  %v123_v15 = vld [vmem:[%s3779_s1 + $0x218] sm:$0xff] }
  0x38   :  { %2436 = vmatprep.subr.bf16.mxu0 %v2435_v4  ;;  %v2445_v13 = vpack.c.bf16 %v90_v11, %v58_v10  ;;  %v155_v16 = vld [vmem:[%s3779_s1 + $0x318] sm:$0xff]  ;;  %2444 = vmatprep.subr.bf16.mxu1 %v2443_v8  ;;  %v2439_v17 = vpack.c.bf16 %v153_v14, %v121_v12  ;;  %v120_v19 = vld [vmem:[%s3779_s1 + $0x200] sm:$0xff]  ;;  %v122_v21 = vld [vmem:[%s3779_s1 + $0x210] sm:$0xff] }
  0x39   :  { %2438 = vmatpush1.bf16.msra.mxu0 %v2437_v9  ;;  %v2447_v18 = vpack.c.bf16 %v155_v16, %v123_v15  ;;  %v152_v20 = vld [vmem:[%s3779_s1 + $0x300] sm:$0xff]  ;;  %v154_v23 = vld [vmem:[%s3779_s1 + $0x310] sm:$0xff]  ;;  %v61_v24 = vld [vmem:[%s3779_s1 + $0x28] sm:$0xff] }
  0x3a   :  { %2446 = vmatpush1.bf16.msra.mxu1 %v2445_v13  ;;  %v2441_v22 = vpack.c.bf16 %v152_v20, %v120_v19  ;;  %2440 = vmatprep.subr.bf16.mxu0 %v2439_v17  ;;  %v2449_v25 = vpack.c.bf16 %v154_v23, %v122_v21  ;;  %v2767_v26 = vld [vmem:[#allocation2] sm:$0x3]  ;;  %v93_v27 = vld [vmem:[%s3779_s1 + $0x128] sm:$0xff]  ;;  %v63_v28 = vld [vmem:[%s3779_s1 + $0x38] sm:$0xff] }
  0x3b   :  { %2448 = vmatprep.subr.bf16.mxu1 %v2447_v18  ;;  %v95_v29 = vld [vmem:[%s3779_s1 + $0x138] sm:$0xff]  ;;  %v2451_v30 = vpack.c.bf16 %v93_v27, %v61_v24  ;;  %v60_v32 = vld [vmem:[%s3779_s1 + $0x20] sm:$0xff]  ;;  %v62_v34 = vld [vmem:[%s3779_s1 + $0x30] sm:$0xff] }
  0x3c   :  { %v2459_v31 = vpack.c.bf16 %v95_v29, %v63_v28  ;;  %v92_v33 = vld [vmem:[%s3779_s1 + $0x120] sm:$0xff]  ;;  %v94_v36 = vld [vmem:[%s3779_s1 + $0x130] sm:$0xff]  ;;  %v125_v37 = vld [vmem:[%s3779_s1 + $0x228] sm:$0xff] }
  0x3d   :  { %2442 = vmatpush1.bf16.msra.mxu0 %v2441_v22  ;;  %v2453_v35 = vpack.c.bf16 %v92_v33, %v60_v32  ;;  %v157_v38 = vld [vmem:[%s3779_s1 + $0x328] sm:$0xff]  ;;  %v2461_v39 = vpack.c.bf16 %v94_v36, %v62_v34  ;;  %v127_v41 = vld [vmem:[%s3779_s1 + $0x238] sm:$0xff]  ;;  %v124_v43 = vld [vmem:[%s3779_s1 + $0x220] sm:$0xff] }
  0x3e   :  { %2450 = vmatpush1.bf16.msra.mxu1 %v2449_v25  ;;  %2452 = vmatprep.subr.bf16.mxu0 %v2451_v30  ;;  %v2455_v40 = vpack.c.bf16 %v157_v38, %v125_v37  ;;  %v159_v42 = vld [vmem:[%s3779_s1 + $0x338] sm:$0xff]  ;;  %v156_v45 = vld [vmem:[%s3779_s1 + $0x320] sm:$0xff]  ;;  %v126_v46 = vld [vmem:[%s3779_s1 + $0x230] sm:$0xff] }
  0x3f   :  { %2460 = vmatprep.subr.bf16.mxu1 %v2459_v31  ;;  %v2463_v44 = vpack.c.bf16 %v159_v42, %v127_v41  ;;  %v158_v47 = vld [vmem:[%s3779_s1 + $0x330] sm:$0xff]  ;;  %v65_v48 = vld [vmem:[%s3779_s1 + $0x48] sm:$0xff]  ;;  %v67_v50 = vld [vmem:[%s3779_s1 + $0x58] sm:$0xff]  ;;  %v2457_v51 = vpack.c.bf16 %v156_v45, %v124_v43 }
  0x40   :  { %2403 = vmatmul.mubr.msk.f32.vlgmr.msra.gmra.mrb[0].mxu0 %vm352_vm0, %v2767_v26  ;;  %v97_v49 = vld [vmem:[%s3779_s1 + $0x148] sm:$0xff]  ;;  %v99_v52 = vld [vmem:[%s3779_s1 + $0x158] sm:$0xff]  ;;  %v2465_v53 = vpack.c.bf16 %v158_v47, %v126_v46  ;;  %v64_v55 = vld [vmem:[%s3779_s1 + $0x40] sm:$0xff] }
  0x41   :  { %2404 = vmatmul.mubr.msk.f32.vlgmr.msra.gmra.mrb[0].mxu1 %vm352_vm0, %v2767_v26  ;;  %2454 = vmatpush1.bf16.msra.mxu0 %v2453_v35  ;;  %v2467_v54 = vpack.c.bf16 %v97_v49, %v65_v48  ;;  %v96_v56 = vld [vmem:[%s3779_s1 + $0x140] sm:$0xff]  ;;  %v66_v57 = vld [vmem:[%s3779_s1 + $0x50] sm:$0xff]  ;;  %v2475_v58 = vpack.c.bf16 %v99_v52, %v67_v50  ;;  %v129_v60 = vld [vmem:[%s3779_s1 + $0x248] sm:$0xff] }
  0x42   :  { %2462 = vmatpush1.bf16.msra.mxu1 %v2461_v39  ;;  %2456 = vmatprep.subr.bf16.mxu0 %v2455_v40  ;;  %v98_v59 = vld [vmem:[%s3779_s1 + $0x150] sm:$0xff]  ;;  %v161_v61 = vld [vmem:[%s3779_s1 + $0x348] sm:$0xff]  ;;  %v131_v62 = vld [vmem:[%s3779_s1 + $0x258] sm:$0xff]  ;;  %v2469_v1 = vpack.c.bf16 %v96_v56, %v64_v55 }
  0x43   :  { %2464 = vmatprep.subr.bf16.mxu1 %v2463_v44  ;;  %562 = vmatprep.mubr.f32.mxu0 %v2646_v0  ;;  %v163_v63 = vld [vmem:[%s3779_s1 + $0x358] sm:$0xff]  ;;  %v2477_v2 = vpack.c.bf16 %v98_v59, %v66_v57  ;;  %v2471_v3 = vpack.c.bf16 %v161_v61, %v129_v60  ;;  %v128_v4 = vld [vmem:[%s3779_s1 + $0x240] sm:$0xff]  ;;  %v130_v6 = vld [vmem:[%s3779_s1 + $0x250] sm:$0xff] }
  0x44   :  { %633 = vmatprep.mubr.f32.mxu1 %v2646_v0  ;;  %v160_v5 = vld [vmem:[%s3779_s1 + $0x340] sm:$0xff]  ;;  %v2479_v7 = vpack.c.bf16 %v163_v63, %v131_v62  ;;  %v162_v8 = vld [vmem:[%s3779_s1 + $0x350] sm:$0xff]  ;;  %v69_v9 = vld [vmem:[%s3779_s1 + $0x68] sm:$0xff] }
  0x45   :  { %2458 = vmatpush1.bf16.msra.mxu0 %v2457_v51  ;;  %v101_v10 = vld [vmem:[%s3779_s1 + $0x168] sm:$0xff]  ;;  %v71_v11 = vld [vmem:[%s3779_s1 + $0x78] sm:$0xff]  ;;  %v2473_v13 = vpack.c.bf16 %v160_v5, %v128_v4  ;;  %v2481_v14 = vpack.c.bf16 %v162_v8, %v130_v6  ;;  %v68_v16 = vld [vmem:[%s3779_s1 + $0x60] sm:$0xff] }
  0x46   :  { %2466 = vmatpush1.bf16.msra.mxu1 %v2465_v53  ;;  %2468 = vmatprep.subr.bf16.mxu0 %v2467_v54  ;;  %v103_v12 = vld [vmem:[%s3779_s1 + $0x178] sm:$0xff]  ;;  %v2483_v15 = vpack.c.bf16 %v101_v10, %v69_v9  ;;  %v100_v17 = vld [vmem:[%s3779_s1 + $0x160] sm:$0xff]  ;;  %v70_v18 = vld [vmem:[%s3779_s1 + $0x70] sm:$0xff] }
  0x47   :  { %2476 = vmatprep.subr.bf16.mxu1 %v2475_v58  ;;  %v2491_v19 = vpack.c.bf16 %v103_v12, %v71_v11  ;;  %v102_v20 = vld [vmem:[%s3779_s1 + $0x170] sm:$0xff]  ;;  %v133_v21 = vld [vmem:[%s3779_s1 + $0x268] sm:$0xff]  ;;  %v135_v23 = vld [vmem:[%s3779_s1 + $0x278] sm:$0xff]  ;;  %v2485_v25 = vpack.c.bf16 %v100_v17, %v68_v16 }
  0x48   :  { %2405 = vmatmul.mubr.msk.f32.vlgmr.msra.gmra.mrb[2].mxu0 %vm352_vm0, %v2767_v26  ;;  %v165_v22 = vld [vmem:[%s3779_s1 + $0x368] sm:$0xff]  ;;  %v167_v24 = vld [vmem:[%s3779_s1 + $0x378] sm:$0xff]  ;;  %v2493_v27 = vpack.c.bf16 %v102_v20, %v70_v18  ;;  %v132_v29 = vld [vmem:[%s3779_s1 + $0x260] sm:$0xff] }
  0x49   :  { %2406 = vmatmul.mubr.msk.f32.vlgmr.msra.gmra.mrb[2].mxu1 %vm352_vm0, %v2767_v26  ;;  %2470 = vmatpush1.bf16.msra.mxu0 %v2469_v1  ;;  %v2487_v28 = vpack.c.bf16 %v165_v22, %v133_v21  ;;  %v164_v30 = vld [vmem:[%s3779_s1 + $0x360] sm:$0xff]  ;;  %v134_v31 = vld [vmem:[%s3779_s1 + $0x270] sm:$0xff]  ;;  %v2495_v32 = vpack.c.bf16 %v167_v24, %v135_v23  ;;  %v73_v34 = vld [vmem:[%s3779_s1 + $0x88] sm:$0xff] }
  0x4a   :  { %2478 = vmatpush1.bf16.msra.mxu1 %v2477_v2  ;;  %2472 = vmatprep.subr.bf16.mxu0 %v2471_v3  ;;  %v166_v33 = vld [vmem:[%s3779_s1 + $0x370] sm:$0xff]  ;;  %v105_v35 = vld [vmem:[%s3779_s1 + $0x188] sm:$0xff]  ;;  %v75_v36 = vld [vmem:[%s3779_s1 + $0x98] sm:$0xff]  ;;  %v2489_v38 = vpack.c.bf16 %v164_v30, %v132_v29 }
  0x4b   :  { %2480 = vmatprep.subr.bf16.mxu1 %v2479_v7  ;;  %704 = vmatprep.mubr.f32.mxu0 %v2646_v0  ;;  %v107_v37 = vld [vmem:[%s3779_s1 + $0x198] sm:$0xff]  ;;  %v2497_v39 = vpack.c.bf16 %v166_v33, %v134_v31  ;;  %v2499_v40 = vpack.c.bf16 %v105_v35, %v73_v34  ;;  %v72_v41 = vld [vmem:[%s3779_s1 + $0x80] sm:$0xff]  ;;  %v74_v43 = vld [vmem:[%s3779_s1 + $0x90] sm:$0xff] }
  0x4c   :  { %775 = vmatprep.mubr.f32.mxu1 %v2646_v0  ;;  %v104_v42 = vld [vmem:[%s3779_s1 + $0x180] sm:$0xff]  ;;  %v2507_v44 = vpack.c.bf16 %v107_v37, %v75_v36  ;;  %v106_v45 = vld [vmem:[%s3779_s1 + $0x190] sm:$0xff]  ;;  %v137_v46 = vld [vmem:[%s3779_s1 + $0x288] sm:$0xff] }
  0x4d   :  { %2474 = vmatpush1.bf16.msra.mxu0 %v2473_v13  ;;  %v169_v47 = vld [vmem:[%s3779_s1 + $0x388] sm:$0xff]  ;;  %v139_v48 = vld [vmem:[%s3779_s1 + $0x298] sm:$0xff]  ;;  %v2501_v50 = vpack.c.bf16 %v104_v42, %v72_v41  ;;  %v2509_v51 = vpack.c.bf16 %v106_v45, %v74_v43  ;;  %v136_v53 = vld [vmem:[%s3779_s1 + $0x280] sm:$0xff] }
  0x4e   :  { %2482 = vmatpush1.bf16.msra.mxu1 %v2481_v14  ;;  %2484 = vmatprep.subr.bf16.mxu0 %v2483_v15  ;;  %v171_v49 = vld [vmem:[%s3779_s1 + $0x398] sm:$0xff]  ;;  %v2503_v52 = vpack.c.bf16 %v169_v47, %v137_v46  ;;  %v168_v54 = vld [vmem:[%s3779_s1 + $0x380] sm:$0xff]  ;;  %v138_v55 = vld [vmem:[%s3779_s1 + $0x290] sm:$0xff] }
  0x4f   :  { %2492 = vmatprep.subr.bf16.mxu1 %v2491_v19  ;;  %v2511_v56 = vpack.c.bf16 %v171_v49, %v139_v48  ;;  %v170_v57 = vld [vmem:[%s3779_s1 + $0x390] sm:$0xff]  ;;  %v77_v58 = vld [vmem:[%s3779_s1 + $0xa8] sm:$0xff]  ;;  %v79_v60 = vld [vmem:[%s3779_s1 + $0xb8] sm:$0xff]  ;;  %v2505_v62 = vpack.c.bf16 %v168_v54, %v136_v53 }
  0x50   :  { %2407 = vmatmul.mubr.msk.f32.vlgmr.msra.gmra.mrb[4].mxu0 %vm352_vm0, %v2767_v26  ;;  %v109_v59 = vld [vmem:[%s3779_s1 + $0x1a8] sm:$0xff]  ;;  %v111_v61 = vld [vmem:[%s3779_s1 + $0x1b8] sm:$0xff]  ;;  %v2513_v63 = vpack.c.bf16 %v170_v57, %v138_v55  ;;  %v76_v2 = vld [vmem:[%s3779_s1 + $0xa0] sm:$0xff] }
  0x51   :  { %2408 = vmatmul.mubr.msk.f32.vlgmr.msra.gmra.mrb[4].mxu1 %vm352_vm0, %v2767_v26  ;;  %2486 = vmatpush1.bf16.msra.mxu0 %v2485_v25  ;;  %v2515_v1 = vpack.c.bf16 %v109_v59, %v77_v58  ;;  %v108_v3 = vld [vmem:[%s3779_s1 + $0x1a0] sm:$0xff]  ;;  %v78_v4 = vld [vmem:[%s3779_s1 + $0xb0] sm:$0xff]  ;;  %v2523_v5 = vpack.c.bf16 %v111_v61, %v79_v60  ;;  %v141_v7 = vld [vmem:[%s3779_s1 + $0x2a8] sm:$0xff] }
  0x52   :  { %2494 = vmatpush1.bf16.msra.mxu1 %v2493_v27  ;;  %2488 = vmatprep.subr.bf16.mxu0 %v2487_v28  ;;  %v110_v6 = vld [vmem:[%s3779_s1 + $0x1b0] sm:$0xff]  ;;  %v173_v8 = vld [vmem:[%s3779_s1 + $0x3a8] sm:$0xff]  ;;  %v143_v9 = vld [vmem:[%s3779_s1 + $0x2b8] sm:$0xff]  ;;  %v2517_v11 = vpack.c.bf16 %v108_v3, %v76_v2 }
  0x53   :  { %2496 = vmatprep.subr.bf16.mxu1 %v2495_v32  ;;  %846 = vmatprep.mubr.f32.mxu0 %v2646_v0  ;;  %v175_v10 = vld [vmem:[%s3779_s1 + $0x3b8] sm:$0xff]  ;;  %v2525_v12 = vpack.c.bf16 %v110_v6, %v78_v4  ;;  %v2519_v13 = vpack.c.bf16 %v173_v8, %v141_v7  ;;  %v140_v14 = vld [vmem:[%s3779_s1 + $0x2a0] sm:$0xff]  ;;  %v142_v16 = vld [vmem:[%s3779_s1 + $0x2b0] sm:$0xff]  ;;  %v192_v7 = vlaneseq }
  0x54   :  { %917 = vmatprep.mubr.f32.mxu1 %v2646_v0  ;;  %v172_v15 = vld [vmem:[%s3779_s1 + $0x3a0] sm:$0xff]  ;;  %v2527_v17 = vpack.c.bf16 %v175_v10, %v143_v9  ;;  %v174_v18 = vld [vmem:[%s3779_s1 + $0x3b0] sm:$0xff]  ;;  %v81_v19 = vld [vmem:[%s3779_s1 + $0xc8] sm:$0xff] }
  0x55   :  { %2490 = vmatpush1.bf16.msra.mxu0 %v2489_v38  ;;  %v113_v20 = vld [vmem:[%s3779_s1 + $0x1c8] sm:$0xff]  ;;  %v83_v21 = vld [vmem:[%s3779_s1 + $0xd8] sm:$0xff]  ;;  %v2521_v23 = vpack.c.bf16 %v172_v15, %v140_v14  ;;  %v2529_v24 = vpack.c.bf16 %v174_v18, %v142_v16  ;;  %v80_v27 = vld [vmem:[%s3779_s1 + $0xc0] sm:$0xff]  ;;  %v3148_v8 = vshrl.u32 %v192_v7, 7 }
  0x56   :  { %2498 = vmatpush1.bf16.msra.mxu1 %v2497_v39  ;;  %2500 = vmatprep.subr.bf16.mxu0 %v2499_v40  ;;  %v115_v22 = vld [vmem:[%s3779_s1 + $0x1d8] sm:$0xff]  ;;  %v2531_v25 = vpack.c.bf16 %v113_v20, %v81_v19  ;;  %v112_v28 = vld [vmem:[%s3779_s1 + $0x1c0] sm:$0xff]  ;;  %v82_v29 = vld [vmem:[%s3779_s1 + $0xd0] sm:$0xff] }
  0x57   :  { %2508 = vmatprep.subr.bf16.mxu1 %v2507_v44  ;;  %v2539_v30 = vpack.c.bf16 %v115_v22, %v83_v21  ;;  %v114_v31 = vld [vmem:[%s3779_s1 + $0x1d0] sm:$0xff]  ;;  %v145_v32 = vld [vmem:[%s3779_s1 + $0x2c8] sm:$0xff]  ;;  %v147_v34 = vld [vmem:[%s3779_s1 + $0x2d8] sm:$0xff]  ;;  %v2533_v36 = vpack.c.bf16 %v112_v28, %v80_v27  ;;  %3802 = vst [vmem:[#allocation9_spill] sm:$0xff] %v3148_v8  ;;  %v3151_v9 = vsub.s32 0, %v3148_v8  ;;  %v3174_v14 = vsub.s32 5, %v3148_v8 }
  0x58   :  { %2409 = vmatmul.mubr.msk.f32.vlgmr.msra.gmra.mrb[6].mxu0 %vm352_vm0, %v2767_v26  ;;  %v177_v33 = vld [vmem:[%s3779_s1 + $0x3c8] sm:$0xff]  ;;  %v179_v35 = vld [vmem:[%s3779_s1 + $0x3d8] sm:$0xff]  ;;  %v2541_v37 = vpack.c.bf16 %v114_v31, %v82_v29  ;;  %v144_v39 = vld [vmem:[%s3779_s1 + $0x2c0] sm:$0xff]  ;;  %v3179_v16 = vsub.s32 7, %v3148_v8 }
  0x59   :  { %2410 = vmatmul.mubr.msk.f32.vlgmr.msra.gmra.mrb[6].mxu1 %vm352_vm0, %v2767_v26  ;;  %2502 = vmatpush1.bf16.msra.mxu0 %v2501_v50  ;;  %v2535_v38 = vpack.c.bf16 %v177_v33, %v145_v32  ;;  %v176_v40 = vld [vmem:[%s3779_s1 + $0x3c0] sm:$0xff]  ;;  %v146_v41 = vld [vmem:[%s3779_s1 + $0x2d0] sm:$0xff]  ;;  %v2543_v42 = vpack.c.bf16 %v179_v35, %v147_v34  ;;  %v85_v44 = vld [vmem:[%s3779_s1 + $0xe8] sm:$0xff] }
  0x5a   :  { %2510 = vmatpush1.bf16.msra.mxu1 %v2509_v51  ;;  %2504 = vmatprep.subr.bf16.mxu0 %v2503_v52  ;;  %v178_v43 = vld [vmem:[%s3779_s1 + $0x3d0] sm:$0xff]  ;;  %v117_v45 = vld [vmem:[%s3779_s1 + $0x1e8] sm:$0xff]  ;;  %v87_v46 = vld [vmem:[%s3779_s1 + $0xf8] sm:$0xff]  ;;  %v2537_v48 = vpack.c.bf16 %v176_v40, %v144_v39 }
  0x5b   :  { %2512 = vmatprep.subr.bf16.mxu1 %v2511_v56  ;;  %988 = vmatprep.mubr.f32.mxu0 %v2646_v0  ;;  %v119_v47 = vld [vmem:[%s3779_s1 + $0x1f8] sm:$0xff]  ;;  %v2545_v49 = vpack.c.bf16 %v178_v43, %v146_v41  ;;  %v2547_v50 = vpack.c.bf16 %v117_v45, %v85_v44  ;;  %v84_v51 = vld [vmem:[%s3779_s1 + $0xe0] sm:$0xff]  ;;  %v86_v53 = vld [vmem:[%s3779_s1 + $0xf0] sm:$0xff] }
  0x5c   :  { %1059 = vmatprep.mubr.f32.mxu1 %v2646_v0  ;;  %v116_v52 = vld [vmem:[%s3779_s1 + $0x1e0] sm:$0xff]  ;;  %v2555_v54 = vpack.c.bf16 %v119_v47, %v87_v46  ;;  %v118_v55 = vld [vmem:[%s3779_s1 + $0x1f0] sm:$0xff]  ;;  %v149_v56 = vld [vmem:[%s3779_s1 + $0x2e8] sm:$0xff] }
  0x5d   :  { %2506 = vmatpush1.bf16.msra.mxu0 %v2505_v62  ;;  %v181_v57 = vld [vmem:[%s3779_s1 + $0x3e8] sm:$0xff]  ;;  %v151_v58 = vld [vmem:[%s3779_s1 + $0x2f8] sm:$0xff]  ;;  %v2549_v60 = vpack.c.bf16 %v116_v52, %v84_v51  ;;  %v2557_v61 = vpack.c.bf16 %v118_v55, %v86_v53  ;;  %v150_v3 = vld [vmem:[%s3779_s1 + $0x2f0] sm:$0xff] }
  0x5e   :  { %2514 = vmatpush1.bf16.msra.mxu1 %v2513_v63  ;;  %2516 = vmatprep.subr.bf16.mxu0 %v2515_v1  ;;  %v183_v59 = vld [vmem:[%s3779_s1 + $0x3f8] sm:$0xff]  ;;  %v2551_v62 = vpack.c.bf16 %v181_v57, %v149_v56  ;;  %v148_v63 = vld [vmem:[%s3779_s1 + $0x2e0] sm:$0xff]  ;;  %v182_v4 = vld [vmem:[%s3779_s1 + $0x3f0] sm:$0xff] }
  0x5f   :  { %2524 = vmatprep.subr.bf16.mxu1 %v2523_v5  ;;  %v180_v1 = vld [vmem:[%s3779_s1 + $0x3e0] sm:$0xff]  ;;  %v2559_v2 = vpack.c.bf16 %v183_v59, %v151_v58  ;;  %v2561_v6 = vpack.c.bf16 %v182_v4, %v150_v3  ;;  %v3188_v19 = vld [vmem:[%s3780_s2 + $0x8] sm:$0xff] }
  0x60   :  { %2411 = vmatmul.mubr.msk.f32.vlgmr.msra.gmra.mrb[8].mxu0 %vm352_vm0, %v2767_v26  ;;  %v2553_v5 = vpack.c.bf16 %v180_v1, %v148_v63  ;;  %v3156_v10 = vld [vmem:[%s3780_s2] sm:$0xff] }
  0x61   :  { %2412 = vmatmul.mubr.msk.f32.vlgmr.msra.gmra.mrb[8].mxu1 %vm352_vm0, %v2767_v26  ;;  %2518 = vmatpush1.bf16.msra.mxu0 %v2517_v11  ;;  %v3162_v11 = vsub.s32 1, %v3148_v8  ;;  %v195_v15 = vrot.slane %v3156_v10, %v3151_v9  ;;  %v223_v29 = vrot.slane %v3156_v10, %v3179_v16 }
  0x62   :  { %2526 = vmatpush1.bf16.msra.mxu1 %v2525_v12  ;;  %2520 = vmatprep.subr.bf16.mxu0 %v2519_v13  ;;  %v3165_v12 = vsub.s32 3, %v3148_v8  ;;  %v3171_v13 = vsub.s32 6, %v3148_v8 }
  0x63   :  { %2528 = vmatprep.subr.bf16.mxu1 %v2527_v17  ;;  %1130 = vmatprep.mubr.f32.mxu0 %v2646_v0  ;;  %v199_v18 = vrot.slane %v3156_v10, %v3162_v11 }
  0x64   :  { %1201 = vmatprep.mubr.f32.mxu1 %v2646_v0  ;;  %v207_v20 = vrot.slane %v3156_v10, %v3165_v12 }
  0x65   :  { %2522 = vmatpush1.bf16.msra.mxu0 %v2521_v23  ;;  %v219_v23 = vrot.slane %v3156_v10, %v3171_v13 }
  0x66   :  { %2530 = vmatpush1.bf16.msra.mxu1 %v2529_v24  ;;  %2532 = vmatprep.subr.bf16.mxu0 %v2531_v25  ;;  %v215_v24 = vrot.slane %v3156_v10, %v3174_v14 }
  0x67   :  { %2540 = vmatprep.subr.bf16.mxu1 %v2539_v30 }
  0x68   :  { %2413 = vmatmul.mubr.msk.f32.vlgmr.msra.gmra.mrb[10].mxu0 %vm352_vm0, %v2767_v26 }
  0x69   :  { %2414 = vmatmul.mubr.msk.f32.vlgmr.msra.gmra.mrb[10].mxu1 %vm352_vm0, %v2767_v26  ;;  %2534 = vmatpush1.bf16.msra.mxu0 %v2533_v36 }
  0x6a   :  { %2542 = vmatpush1.bf16.msra.mxu1 %v2541_v37  ;;  %2536 = vmatprep.subr.bf16.mxu0 %v2535_v38  ;;  %v3211_v37 = vld [vmem:[%s3780_s2 + $0x10] sm:$0xff] }
  0x6b   :  { %2544 = vmatprep.subr.bf16.mxu1 %v2543_v42  ;;  %1272 = vmatprep.mubr.f32.mxu0 %v2646_v0 }
  0x6c   :  { %1343 = vmatprep.mubr.f32.mxu1 %v2646_v0 }
  0x6d   :  { %2538 = vmatpush1.bf16.msra.mxu0 %v2537_v48 }
  0x6e   :  { %2546 = vmatpush1.bf16.msra.mxu1 %v2545_v49  ;;  %2548 = vmatprep.subr.bf16.mxu0 %v2547_v50 }
  0x6f   :  { %2556 = vmatprep.subr.bf16.mxu1 %v2555_v54 }
  0x70   :  { %2415 = vmatmul.mubr.msk.f32.vlgmr.msra.gmra.mrb[12].mxu0 %vm352_vm0, %v2767_v26 }
  0x71   :  { %2416 = vmatmul.mubr.msk.f32.vlgmr.msra.gmra.mrb[12].mxu1 %vm352_vm0, %v2767_v26  ;;  %2550 = vmatpush1.bf16.msra.mxu0 %v2549_v60 }
  0x72   :  { %2558 = vmatpush1.bf16.msra.mxu1 %v2557_v61  ;;  %2552 = vmatprep.subr.bf16.mxu0 %v2551_v62 }
  0x73   :  { %2560 = vmatprep.subr.bf16.mxu1 %v2559_v2  ;;  %1414 = vmatprep.mubr.f32.mxu0 %v2646_v0 }
  0x74   :  { %1485 = vmatprep.mubr.f32.mxu1 %v2646_v0  ;;  %v3159_v0 = vsub.s32 2, %v3148_v8 }
  0x75   :  { %2554 = vmatpush1.bf16.msra.mxu0 %v2553_v5 }
  0x76   :  { %2562 = vmatpush1.bf16.msra.mxu1 %v2561_v6  ;;  %v203_v17 = vrot.slane %v3156_v10, %v3159_v0 }
  0x78   :  { %2417 = vmatmul.mubr.msk.f32.vlgmr.msra.gmra.mrb[14].mxu0 %vm352_vm0, %v2767_v26 }
  0x79   :  { %2418 = vmatmul.mubr.msk.f32.vlgmr.msra.gmra.mrb[14].mxu1 %vm352_vm0, %v2767_v26  ;;  %v3168_v26 = vsub.s32 4, %v3148_v8 }
  0x7b   :  { %v211_v22 = vrot.slane %v3156_v10, %v3168_v26 }
 0x113   :  { %v422_v21 = vpop.f32.mrb[0].mxu0 }
 0x114   :  { %v423_v25 = vadd.f32 %v422_v21, %v195_v15  ;;  %v493_v27 = vpop.f32.mrb[0].mxu1  ;;  %v424_v28 = vpop.f32.mrb[1].mxu0 }
 0x115   :  { %v494_v32 = vadd.f32 %v493_v27, %v203_v17  ;;  %v425_v33 = vadd.f32 %v424_v28, %v199_v18  ;;  %v495_v34 = vpop.f32.mrb[1].mxu1 }
 0x116   :  { %v3213_v38 = vmax.f32 %v423_v25, 0.0  ;;  %v496_v39 = vadd.f32 %v495_v34, %v207_v20 }
 0x117   :  { %v3219_v42 = vmax.f32 %v494_v32, 0.0  ;;  %v3221_v43 = vmax.f32 %v425_v33, 0.0 }
 0x118   :  { %3803 = vst [vmem:[#allocation10_spill] sm:$0xff] %v3213_v38  ;;  %v1525_v46 = vsel %vm1524_vm1, %v3213_v38, 0.0  ;;  %v1749_v47 = vmul.f32 %v3213_v38, %v3213_v38  ;;  %v3231_v48 = vmax.f32 %v496_v39, 0.0 }
 0x119   :  { %3804 = vst [vmem:[#allocation11_spill] sm:$0xff] %v3219_v42  ;;  %3805 = vst [vmem:[#allocation12_spill] sm:$0xff] %v3221_v43  ;;  %v1526_v50 = vrot.slane %v1525_v46, 4  ;;  %v1539_v51 = vsel %vm1524_vm1, %v3219_v42, 0.0  ;;  %v1751_v52 = vmul.f32 %v3219_v42, %v3219_v42  ;;  %v1532_v53 = vsel %vm1524_vm1, %v3221_v43, 0.0 }
 0x11a   :  { %3806 = vst [vmem:[#allocation13_spill] sm:$0xff] %v3231_v48  ;;  %v1781_v54 = vsel %vm1524_vm1, %v1749_v47, 0.0  ;;  %v1540_v55 = vrot.slane %v1539_v51, 4  ;;  %v1533_v56 = vrot.slane %v1532_v53, 4  ;;  %v1750_v57 = vmul.f32 %v3221_v43, %v3221_v43 }
 0x11b   :  { %v1527_v58 = vadd.f32 %v1526_v50, %v1525_v46  ;;  %v1782_v59 = vrot.slane %v1781_v54, 4  ;;  %v1795_v60 = vsel %vm1524_vm1, %v1751_v52, 0.0  ;;  %v1546_v61 = vsel %vm1524_vm1, %v3231_v48, 0.0  ;;  %v564_v62 = vpop.f32.mrb[2].mxu0 }
 0x11c   :  { %v1541_v63 = vadd.f32 %v1540_v55, %v1539_v51  ;;  %v1796_v1 = vrot.slane %v1795_v60, 4  ;;  %v1534_v2 = vadd.f32 %v1533_v56, %v1532_v53  ;;  %v1788_v3 = vsel %vm1524_vm1, %v1750_v57, 0.0  ;;  %v635_v4 = vpop.f32.mrb[2].mxu1  ;;  %v566_v5 = vpop.f32.mrb[3].mxu0  ;;  %v3258_v51 = vld [vmem:[%s3780_s2 + $0x18] sm:$0xff] }
 0x11d   :  { %v1528_v6 = vrot.slane %v1527_v58, 2  ;;  %v1783_v7 = vadd.f32 %v1782_v59, %v1781_v54  ;;  %v1789_v15 = vrot.slane %v1788_v3, 4  ;;  %v1547_v17 = vrot.slane %v1546_v61, 4  ;;  %v637_v18 = vpop.f32.mrb[3].mxu1  ;;  %3807 = vst [vmem:[#allocation14_spill] sm:$0xff] %v3258_v51 }
 0x11e   :  { %v1542_v20 = vrot.slane %v1541_v63, 2  ;;  %v1797_v21 = vadd.f32 %v1796_v1, %v1795_v60  ;;  %v1535_v25 = vrot.slane %v1534_v2, 2  ;;  %v1752_v27 = vmul.f32 %v3231_v48, %v3231_v48 }
 0x11f   :  { %v1529_v28 = vadd.f32 %v1528_v6, %v1527_v58  ;;  %v1784_v32 = vrot.slane %v1783_v7, 2  ;;  %v1790_v33 = vadd.f32 %v1789_v15, %v1788_v3  ;;  %v1548_v46 = vadd.f32 %v1547_v17, %v1546_v61 }
 0x120   :  { %v1543_v39 = vadd.f32 %v1542_v20, %v1541_v63  ;;  %v1802_v47 = vsel %vm1524_vm1, %v1752_v27, 0.0  ;;  %v1798_v52 = vrot.slane %v1797_v21, 2  ;;  %v3266_v57 = vadd.f32 %v1535_v25, %v1534_v2 }
 0x121   :  { %v1530_v56 = vrot.slane %v1529_v28, 1  ;;  %v1803_v58 = vrot.slane %v1802_v47, 4  ;;  %v3270_v60 = vadd.f32 %v1784_v32, %v1783_v7  ;;  %v1791_v61 = vrot.slane %v1790_v33, 2 }
 0x122   :  { %v1544_v6 = vrot.slane %v1543_v39, 1  ;;  %v1549_v15 = vrot.slane %v1548_v46, 2  ;;  %v1799_v25 = vadd.f32 %v1798_v52, %v1797_v21  ;;  %v565_v27 = vadd.f32 %v564_v62, %v211_v22 }
 0x123   :  { %v3272_v63 = vpop.f32.mrb[4].mxu0  ;;  %v1804_v17 = vadd.f32 %v1803_v58, %v1802_v47  ;;  %v3293_v58 = vadd.f32 %v1530_v56, %v1529_v28  ;;  %v1537_v1 = vrot.slane %v3266_v57, 1  ;;  %v636_v21 = vadd.f32 %v635_v4, %v219_v23 }
 0x124   :  { %v3278_v2 = vpop.f32.mrb[4].mxu1  ;;  %v3280_v20 = vpop.f32.mrb[5].mxu0  ;;  %v1786_v22 = vrot.slane %v3270_v60, 1  ;;  %v1792_v62 = vadd.f32 %v1791_v61, %v1790_v33  ;;  %v3302_v7 = vmax.f32 %v565_v27, 0.0  ;;  %v567_v47 = vadd.f32 %v566_v5, %v215_v24 }
 0x125   :  { %v3287_v32 = vpop.f32.mrb[5].mxu1  ;;  %v3307_v28 = vadd.f32 %v1544_v6, %v1543_v39  ;;  %v1550_v56 = vadd.f32 %v1549_v15, %v1548_v46  ;;  %v1805_v3 = vrot.slane %v1804_v17, 2  ;;  %v3309_v59 = vmax.f32 %v636_v21, 0.0 }
 0x126   :  { %3808 = vst [vmem:[#allocation15_spill] sm:$0xff] %v3302_v7  ;;  %v1800_v55 = vrot.slane %v1799_v25, 1  ;;  %v1553_v23 = vsel %vm1524_vm1, %v3302_v7, 0.0  ;;  %v1753_v4 = vmul.f32 %v3302_v7, %v3302_v7  ;;  %v3315_v33 = vmax.f32 %v567_v47, 0.0 }
 0x127   :  { %3809 = vst [vmem:[#allocation16_spill] sm:$0xff] %v3309_v59  ;;  %v1554_v61 = vrot.slane %v1553_v23, 4  ;;  %v1567_v27 = vsel %vm1524_vm1, %v3309_v59, 0.0  ;;  %v1755_v24 = vmul.f32 %v3309_v59, %v3309_v59  ;;  %v638_v5 = vadd.f32 %v637_v18, %v223_v29 }
 0x128   :  { %3810 = vst [vmem:[#allocation17_spill] sm:$0xff] %v3315_v33  ;;  %v1809_v39 = vsel %vm1524_vm1, %v1753_v4, 0.0  ;;  %v1568_v46 = vrot.slane %v1567_v27, 4  ;;  %v1560_v6 = vsel %vm1524_vm1, %v3315_v33, 0.0  ;;  %v1754_v15 = vmul.f32 %v3315_v33, %v3315_v33 }
 0x129   :  { %v1806_v21 = vadd.f32 %v1805_v3, %v1804_v17  ;;  %v1555_v52 = vadd.f32 %v1554_v61, %v1553_v23  ;;  %v1810_v54 = vrot.slane %v1809_v39, 4  ;;  %v1823_v53 = vsel %vm1524_vm1, %v1755_v24, 0.0 }
 0x12a   :  { %v1569_v29 = vadd.f32 %v1568_v46, %v1567_v27  ;;  %v1824_v18 = vrot.slane %v1823_v53, 4  ;;  %v1561_v4 = vrot.slane %v1560_v6, 4  ;;  %v1816_v34 = vsel %vm1524_vm1, %v1754_v15, 0.0 }
 0x12b   :  { %v3329_v47 = vpop.f32.mrb[6].mxu0  ;;  %v1793_v45 = vrot.slane %v1792_v62, 1  ;;  %v1556_v44 = vrot.slane %v1555_v52, 2  ;;  %v1811_v41 = vadd.f32 %v1810_v54, %v1809_v39  ;;  %v1817_v40 = vrot.slane %v1816_v34, 4 }
 0x12c   :  { %v3332_v50 = vpop.f32.mrb[6].mxu1  ;;  %v3334_v10 = vpop.f32.mrb[7].mxu0  ;;  %v1570_v3 = vrot.slane %v1569_v29, 2  ;;  %v1825_v17 = vadd.f32 %v1824_v18, %v1823_v53  ;;  %v1562_v23 = vadd.f32 %v1561_v4, %v1560_v6  ;;  %v3339_v61 = vmax.f32 %v638_v5, 0.0 }
 0x12d   :  { %v3337_v49 = vpop.f32.mrb[7].mxu1  ;;  %v1551_v24 = vrot.slane %v1550_v56, 1  ;;  %v1807_v36 = vrot.slane %v1806_v21, 1  ;;  %v1557_v35 = vadd.f32 %v1556_v44, %v1555_v52  ;;  %v1812_v31 = vrot.slane %v1811_v41, 2 }
 0x12e   :  { %3811 = vst [vmem:[#allocation18_spill] sm:$0xff] %v3339_v61  ;;  %v1538_v27 = vadd.f32 %v1537_v1, %v3266_v57  ;;  %v1571_v46 = vadd.f32 %v1570_v3, %v1569_v29  ;;  %v1818_v30 = vadd.f32 %v1817_v40, %v1816_v34  ;;  %v1574_v15 = vsel %vm1524_vm1, %v3339_v61, 0.0 }
 0x12f   :  { %v1787_v59 = vadd.f32 %v1786_v22, %v3270_v60  ;;  %v1801_v54 = vadd.f32 %v1800_v55, %v1799_v25  ;;  %v1826_v39 = vrot.slane %v1825_v17, 2  ;;  %v1563_v33 = vrot.slane %v1562_v23, 2 }
 0x130   :  { %v1794_v53 = vadd.f32 %v1793_v45, %v1792_v62  ;;  %v1575_v6 = vrot.slane %v1574_v15, 4  ;;  %v1756_v5 = vmul.f32 %v3339_v61, %v3339_v61  ;;  %v3812_v44 = vrot.slane %v3188_v19, %v3151_v9 }
 0x131   :  { %v1552_v40 = vadd.f32 %v1551_v24, %v1550_v56  ;;  %v1808_v34 = vadd.f32 %v1807_v36, %v1806_v21  ;;  %v1558_v52 = vrot.slane %v1557_v35, 1  ;;  %v1813_v29 = vadd.f32 %v1812_v31, %v1811_v41 }
 0x132   :  { %v707_v57 = vadd.f32 %v3272_v63, %v3812_v44  ;;  %v1572_v45 = vrot.slane %v1571_v46, 1  ;;  %v1819_v25 = vrot.slane %v1818_v30, 2  ;;  %v1830_v22 = vsel %vm1524_vm1, %v1756_v5, 0.0 }
 0x133   :  { %v3351_v1 = vpop.f32.mrb[8].mxu0  ;;  %v2005_v63 = vadd.f32 %v3307_v28, %v3293_v58  ;;  %v1827_v56 = vadd.f32 %v1826_v39, %v1825_v17  ;;  %v1564_v36 = vadd.f32 %v1563_v33, %v1562_v23  ;;  %v3366_v41 = vadd.f32 %v1801_v54, %v1787_v59 }
 0x134   :  { %v3353_v60 = vpop.f32.mrb[8].mxu1  ;;  %v3355_v55 = vpop.f32.mrb[9].mxu0  ;;  %v1576_v21 = vadd.f32 %v1575_v6, %v1574_v15  ;;  %v1831_v4 = vrot.slane %v1830_v22, 4  ;;  %v3368_v3 = vmax.f32 %v707_v57, 0.0  ;;  %v3370_v24 = vadd.f32 %v1552_v40, %v1538_v27 }
 0x135   :  { %v3358_v62 = vpop.f32.mrb[9].mxu1  ;;  %v3372_v5 = vadd.f32 %v1808_v34, %v1794_v53  ;;  %v1559_v44 = vadd.f32 %v1558_v52, %v1557_v35  ;;  %v1814_v18 = vrot.slane %v1813_v29, 1  ;;  %v1573_v61 = vadd.f32 %v1572_v45, %v1571_v46 }
 0x136   :  { %3813 = vst [vmem:[#allocation19_spill] sm:$0xff] %v3368_v3  ;;  %v1820_v7 = vadd.f32 %v1819_v25, %v1818_v30  ;;  %v1581_v58 = vsel %vm1524_vm1, %v3368_v3, 0.0  ;;  %v1757_v28 = vmul.f32 %v3368_v3, %v3368_v3  ;;  %v1828_v59 = vrot.slane %v1827_v56, 1 }
 0x137   :  { %v1565_v33 = vrot.slane %v1564_v36, 1  ;;  %v1832_v17 = vadd.f32 %v1831_v4, %v1830_v22  ;;  %v1582_v23 = vrot.slane %v1581_v58, 4  ;;  %v1577_v15 = vrot.slane %v1576_v21, 2 }
 0x138   :  { %v1837_v27 = vsel %vm1524_vm1, %v1757_v28, 0.0  ;;  %v3814_v54 = vrot.slane %v3188_v19, %v3159_v0  ;;  %v3815_v30 = vrot.slane %v3188_v19, %v3162_v11  ;;  %v1815_v53 = vadd.f32 %v1814_v18, %v1813_v29 }
 0x139   :  { %v1583_v6 = vadd.f32 %v1582_v23, %v1581_v58  ;;  %v1838_v57 = vrot.slane %v1837_v27, 4  ;;  %v3816_v40 = vrot.slane %v3188_v19, %v3165_v12  ;;  %v1821_v25 = vrot.slane %v1820_v7, 1 }
 0x13a   :  { %v778_v35 = vadd.f32 %v3278_v2, %v3814_v54  ;;  %v709_v46 = vadd.f32 %v3280_v20, %v3815_v30  ;;  %v2009_v2 = vadd.f32 %v2005_v63, %v1559_v44  ;;  %v1833_v29 = vrot.slane %v1832_v17, 2 }
 0x13b   :  { %v3387_v39 = vpop.f32.mrb[10].mxu0  ;;  %v780_v34 = vadd.f32 %v3287_v32, %v3816_v40  ;;  %v1584_v18 = vrot.slane %v1583_v6, 2  ;;  %v1839_v58 = vadd.f32 %v1838_v57, %v1837_v27  ;;  %v1578_v23 = vadd.f32 %v1577_v15, %v1576_v21 }
 0x13c   :  { %v3393_v52 = vpop.f32.mrb[10].mxu1  ;;  %v3395_v45 = vpop.f32.mrb[11].mxu0  ;;  %v3397_v22 = vmax.f32 %v778_v35, 0.0  ;;  %v3399_v4 = vmax.f32 %v709_v46, 0.0  ;;  %v1829_v40 = vadd.f32 %v1828_v59, %v1827_v56  ;;  %v1834_v15 = vadd.f32 %v1833_v29, %v1832_v17 }
 0x13d   :  { %v3401_v20 = vpop.f32.mrb[11].mxu1  ;;  %v3403_v28 = vmax.f32 %v780_v34, 0.0  ;;  %v1585_v44 = vadd.f32 %v1584_v18, %v1583_v6  ;;  %v1840_v35 = vrot.slane %v1839_v58, 2  ;;  %v1566_v3 = vadd.f32 %v1565_v33, %v1564_v36 }
 0x13e   :  { %3817 = vst [vmem:[#allocation20_spill] sm:$0xff] %v3397_v22  ;;  %3818 = vst [vmem:[#allocation21_spill] sm:$0xff] %v3399_v4  ;;  %v1595_v32 = vsel %vm1524_vm1, %v3397_v22, 0.0  ;;  %v1759_v54 = vmul.f32 %v3397_v22, %v3397_v22  ;;  %v1588_v63 = vsel %vm1524_vm1, %v3399_v4, 0.0  ;;  %v1758_v27 = vmul.f32 %v3399_v4, %v3399_v4 }
 0x13f   :  { %3819 = vst [vmem:[#allocation22_spill] sm:$0xff] %v3403_v28  ;;  %v1596_v30 = vrot.slane %v1595_v32, 4  ;;  %v1589_v46 = vrot.slane %v1588_v63, 4  ;;  %v1602_v21 = vsel %vm1524_vm1, %v3403_v28, 0.0  ;;  %v1841_v57 = vadd.f32 %v1840_v35, %v1839_v58 }
 0x140   :  { %v1851_v31 = vsel %vm1524_vm1, %v1759_v54, 0.0  ;;  %v1844_v6 = vsel %vm1524_vm1, %v1758_v27, 0.0  ;;  %v1603_v18 = vrot.slane %v1602_v21, 4  ;;  %v1822_v56 = vadd.f32 %v1821_v25, %v1820_v7 }
 0x141   :  { %v1597_v34 = vadd.f32 %v1596_v30, %v1595_v32  ;;  %v1852_v22 = vrot.slane %v1851_v31, 4  ;;  %v1590_v48 = vadd.f32 %v1589_v46, %v1588_v63  ;;  %v1579_v59 = vrot.slane %v1578_v23, 1 }
 0x142   :  { %v1586_v54 = vrot.slane %v1585_v44, 1  ;;  %v3821_v4 = vrot.slane %v3188_v19, %v3168_v26  ;;  %v1842_v29 = vrot.slane %v1841_v57, 1  ;;  %v1845_v33 = vrot.slane %v1844_v6, 4 }
 0x143   :  { %v3417_v42 = vpop.f32.mrb[12].mxu0  ;;  %v1598_v36 = vrot.slane %v1597_v34, 2  ;;  %v1760_v58 = vmul.f32 %v3403_v28, %v3403_v28  ;;  %v2011_v7 = vadd.f32 %v3366_v41, %v1815_v53  ;;  %v2013_v25 = vadd.f32 %v2009_v2, %v1573_v61 }
 0x144   :  { %3820 = vst [vmem:[#allocation23_spill] sm:$0xff] %v3417_v42  ;;  %v849_v43 = vadd.f32 %v3329_v47, %v3821_v4  ;;  %v3423_v38 = vpop.f32.mrb[12].mxu1  ;;  %v3425_v17 = vpop.f32.mrb[13].mxu0  ;;  %v1835_v63 = vrot.slane %v1834_v15, 1  ;;  %v1853_v35 = vadd.f32 %v1852_v22, %v1851_v31  ;;  %v1591_v30 = vrot.slane %v1590_v48, 2 }
 0x145   :  { %3822 = vst [vmem:[#allocation24_spill] sm:$0xff] %v3423_v38  ;;  %3823 = vst [vmem:[#allocation25_spill] sm:$0xff] %v3425_v17  ;;  %v3429_v32 = vpop.f32.mrb[13].mxu1  ;;  %v1846_v46 = vadd.f32 %v1845_v33, %v1844_v6  ;;  %v1604_v47 = vadd.f32 %v1603_v18, %v1602_v21  ;;  %v1858_v4 = vsel %vm1524_vm1, %v1760_v58, 0.0  ;;  %v2010_v27 = vadd.f32 %v3370_v24, %v1566_v3 }
 0x146   :  { %3824 = vst [vmem:[#allocation26_spill] sm:$0xff] %v3429_v32  ;;  %v2012_v8 = vadd.f32 %v3372_v5, %v1822_v56  ;;  %v1580_v17 = vadd.f32 %v1579_v59, %v1578_v23  ;;  %v1859_v38 = vrot.slane %v1858_v4, 4  ;;  %v1587_v42 = vadd.f32 %v1586_v54, %v1585_v44 }
 0x147   :  { %v1843_v28 = vadd.f32 %v1842_v29, %v1841_v57  ;;  %v1599_v51 = vadd.f32 %v1598_v36, %v1597_v34  ;;  %v3435_v32 = vmax.f32 %v849_v43, 0.0  ;;  %v1836_v41 = vadd.f32 %v1835_v63, %v1834_v15 }
 0x148   :  { %v1854_v61 = vrot.slane %v1853_v35, 2  ;;  %v1847_v53 = vrot.slane %v1846_v46, 2  ;;  %v3825_v31 = vrot.slane %v3188_v19, %v3171_v13  ;;  %v2015_v22 = vadd.f32 %v2011_v7, %v1829_v40 }
 0x149   :  { %v1592_v21 = vadd.f32 %v1591_v30, %v1590_v48  ;;  %v1605_v3 = vrot.slane %v1604_v47, 2  ;;  %v1609_v24 = vsel %vm1524_vm1, %v3435_v32, 0.0  ;;  %v2014_v23 = vadd.f32 %v2010_v27, %v1580_v17 }
 0x14a   :  { %v920_v2 = vadd.f32 %v3332_v50, %v3825_v31  ;;  %v2016_v44 = vadd.f32 %v2012_v8, %v1836_v41  ;;  %v1860_v43 = vadd.f32 %v1859_v38, %v1858_v4  ;;  %v1610_v57 = vrot.slane %v1609_v24, 4 }
 0x14b   :  { %v3443_v5 = vpop.f32.mrb[14].mxu0  ;;  %v2017_v6 = vadd.f32 %v2013_v25, %v1587_v42  ;;  %v2019_v18 = vadd.f32 %v2015_v22, %v1843_v28  ;;  %v1600_v56 = vrot.slane %v1599_v51, 1  ;;  %v1761_v48 = vmul.f32 %v3435_v32, %v3435_v32 }
 0x14c   :  { %v3445_v15 = vpop.f32.mrb[14].mxu1  ;;  %v3447_v34 = vpop.f32.mrb[15].mxu0  ;;  %v1855_v40 = vadd.f32 %v1854_v61, %v1853_v35  ;;  %v1848_v59 = vadd.f32 %v1847_v53, %v1846_v46  ;;  %v1611_v54 = vadd.f32 %v1610_v57, %v1609_v24  ;;  %v3453_v29 = vmax.f32 %v920_v2, 0.0 }
 0x14d   :  { %v3451_v50 = vpop.f32.mrb[15].mxu1  ;;  %v1593_v8 = vrot.slane %v1592_v21, 1  ;;  %v1606_v38 = vadd.f32 %v1605_v3, %v1604_v47  ;;  %v1865_v17 = vsel %vm1524_vm1, %v1761_v48, 0.0  ;;  %v3826_v36 = vrot.slane %v3188_v19, %v3174_v14 }
 0x14e   :  { %v1861_v28 = vrot.slane %v1860_v43, 2  ;;  %v1612_v33 = vrot.slane %v1611_v54, 2  ;;  %v1866_v58 = vrot.slane %v1865_v17, 4  ;;  %v1623_v7 = vsel %vm1524_vm1, %v3453_v29, 0.0 }
 0x14f   :  { %v851_v42 = vadd.f32 %v3334_v10, %v3826_v36  ;;  %v1601_v25 = vadd.f32 %v1600_v56, %v1599_v51  ;;  %v1624_v63 = vrot.slane %v1623_v7, 4  ;;  %v1763_v35 = vmul.f32 %v3453_v29, %v3453_v29 }
 0x150   :  { %v1856_v46 = vrot.slane %v1855_v40, 1  ;;  %v1849_v47 = vrot.slane %v1848_v59, 1  ;;  %v1867_v4 = vadd.f32 %v1866_v58, %v1865_v17  ;;  %v3827_v27 = vrot.slane %v3188_v19, %v3179_v16 }
 0x151   :  { %v3464_v30 = vmax.f32 %v851_v42, 0.0  ;;  %v1625_v41 = vadd.f32 %v1624_v63, %v1623_v7  ;;  %v1879_v61 = vsel %vm1524_vm1, %v1763_v35, 0.0  ;;  %v1862_v31 = vadd.f32 %v1861_v28, %v1860_v43 }
 0x152   :  { %v922_v10 = vadd.f32 %v3337_v49, %v3827_v27  ;;  %v1613_v2 = vadd.f32 %v1612_v33, %v1611_v54  ;;  %v1868_v22 = vrot.slane %v1867_v4, 2  ;;  %v1880_v3 = vrot.slane %v1879_v61, 4 }
 0x153   :  { %v1616_v51 = vsel %vm1524_vm1, %v3464_v30, 0.0  ;;  %v1762_v53 = vmul.f32 %v3464_v30, %v3464_v30  ;;  %v1626_v24 = vrot.slane %v1625_v41, 2  ;;  %v1594_v49 = vadd.f32 %v1593_v8, %v1592_v21 }
 0x154   :  { %v1617_v57 = vrot.slane %v1616_v51, 4  ;;  %v3476_v19 = vmax.f32 %v922_v10, 0.0  ;;  %v1607_v48 = vrot.slane %v1606_v38, 1  ;;  %v1869_v17 = vadd.f32 %v1868_v22, %v1867_v4 }
 0x155   :  { %v1872_v56 = vsel %vm1524_vm1, %v1762_v53, 0.0  ;;  %v1850_v42 = vadd.f32 %v1849_v47, %v1848_v59  ;;  %v1857_v54 = vadd.f32 %v1856_v46, %v1855_v40  ;;  %v1614_v28 = vrot.slane %v1613_v2, 1 }
 0x156   :  { %v1873_v36 = vrot.slane %v1872_v56, 4  ;;  %v1618_v58 = vadd.f32 %v1617_v57, %v1616_v51  ;;  %v1630_v7 = vsel %vm1524_vm1, %v3476_v19, 0.0  ;;  %v1764_v43 = vmul.f32 %v3476_v19, %v3476_v19 }
 0x157   :  { %v1881_v33 = vadd.f32 %v1880_v3, %v1879_v61  ;;  %v1863_v35 = vrot.slane %v1862_v31, 1  ;;  %v1870_v27 = vrot.slane %v1869_v17, 1  ;;  %v1627_v10 = vadd.f32 %v1626_v24, %v1625_v41 }
 0x158   :  { %v1874_v63 = vadd.f32 %v1873_v36, %v1872_v56  ;;  %v1886_v21 = vsel %vm1524_vm1, %v1764_v43, 0.0  ;;  %v2021_v8 = vadd.f32 %v2017_v6, %v1601_v25  ;;  %v2018_v4 = vadd.f32 %v2014_v23, %v1594_v49 }
 0x159   :  { %v1619_v53 = vrot.slane %v1618_v58, 2  ;;  %v1631_v59 = vrot.slane %v1630_v7, 4  ;;  %v2020_v47 = vadd.f32 %v2016_v44, %v1850_v42  ;;  %v1608_v51 = vadd.f32 %v1607_v48, %v1606_v38 }
 0x15a   :  { %v1875_v22 = vrot.slane %v1874_v63, 2  ;;  %v3828_v57 = vrot.slane %v3211_v37, %v3151_v9  ;;  %v2023_v46 = vadd.f32 %v2019_v18, %v1857_v54  ;;  %v1615_v61 = vadd.f32 %v1614_v28, %v1613_v2 }
 0x15b   :  { %v1882_v3 = vrot.slane %v1881_v33, 2  ;;  %v1887_v56 = vrot.slane %v1886_v21, 4  ;;  %v1864_v36 = vadd.f32 %v1863_v35, %v1862_v31  ;;  %v1871_v41 = vadd.f32 %v1870_v27, %v1869_v17 }
 0x15c   :  { %v991_v40 = vadd.f32 %v3351_v1, %v3828_v57  ;;  %v1628_v24 = vrot.slane %v1627_v10, 1  ;;  %v2022_v23 = vadd.f32 %v2018_v4, %v1608_v51  ;;  %v1620_v6 = vadd.f32 %v1619_v53, %v1618_v58 }
 0x15d   :  { %v1632_v25 = vadd.f32 %v1631_v59, %v1630_v7  ;;  %v3829_v44 = vrot.slane %v3211_v37, %v3159_v0  ;;  %v2024_v49 = vadd.f32 %v2020_v47, %v1864_v36  ;;  %v1876_v48 = vadd.f32 %v1875_v22, %v1874_v63 }
 0x15e   :  { %v3487_v43 = vmax.f32 %v991_v40, 0.0  ;;  %v2025_v31 = vadd.f32 %v2021_v8, %v1615_v61  ;;  %v1883_v2 = vadd.f32 %v1882_v3, %v1881_v33  ;;  %v1888_v17 = vadd.f32 %v1887_v56, %v1886_v21 }
 0x15f   :  { %v1062_v38 = vadd.f32 %v3353_v60, %v3829_v44  ;;  %v2027_v54 = vadd.f32 %v2023_v46, %v1871_v41  ;;  %v1629_v58 = vadd.f32 %v1628_v24, %v1627_v10  ;;  %v1621_v35 = vrot.slane %v1620_v6, 1 }
 0x160   :  { %v1637_v1 = vsel %vm1524_vm1, %v3487_v43, 0.0  ;;  %v1765_v18 = vmul.f32 %v3487_v43, %v3487_v43  ;;  %v1633_v60 = vrot.slane %v1632_v25, 2  ;;  %v1877_v4 = vrot.slane %v1876_v48, 1 }
 0x161   :  { %v1638_v42 = vrot.slane %v1637_v1, 4  ;;  %v3498_v28 = vmax.f32 %v1062_v38, 0.0  ;;  %v3831_v33 = vrot.slane %v3211_v37, %v3162_v11  ;;  %v1889_v21 = vrot.slane %v1888_v17, 2 }
 0x162   :  { %v1893_v7 = vsel %vm1524_vm1, %v1765_v18, 0.0  ;;  %v1884_v22 = vrot.slane %v1883_v2, 1  ;;  %v3832_v46 = vrot.slane %v3211_v37, %v3165_v12  ;;  %v1634_v3 = vadd.f32 %v1633_v60, %v1632_v25 }
 0x163   :  { %3830 = vst [vmem:[#allocation27_spill] sm:$0xff] %v3498_v28  ;;  %v1639_v27 = vadd.f32 %v1638_v42, %v1637_v1  ;;  %v1894_v63 = vrot.slane %v1893_v7, 4  ;;  %v1651_v53 = vsel %vm1524_vm1, %v3498_v28, 0.0  ;;  %v1767_v8 = vmul.f32 %v3498_v28, %v3498_v28 }
 0x164   :  { %v993_v10 = vadd.f32 %v3355_v55, %v3831_v33  ;;  %v1652_v51 = vrot.slane %v1651_v53, 4  ;;  %v1064_v61 = vadd.f32 %v3358_v62, %v3832_v46  ;;  %v1622_v1 = vadd.f32 %v1621_v35, %v1620_v6 }
 0x165   :  { %v1640_v59 = vrot.slane %v1639_v27, 2  ;;  %v1895_v47 = vadd.f32 %v1894_v63, %v1893_v7  ;;  %v1907_v57 = vsel %vm1524_vm1, %v1767_v8, 0.0  ;;  %v1878_v18 = vadd.f32 %v1877_v4, %v1876_v48 }
 0x166   :  { %v3509_v40 = vmax.f32 %v993_v10, 0.0  ;;  %v1653_v41 = vadd.f32 %v1652_v51, %v1651_v53  ;;  %v1908_v24 = vrot.slane %v1907_v57, 4  ;;  %v3519_v38 = vmax.f32 %v1064_v61, 0.0 }
 0x167   :  { %v1641_v56 = vadd.f32 %v1640_v59, %v1639_v27  ;;  %v1896_v36 = vrot.slane %v1895_v47, 2  ;;  %v1890_v42 = vadd.f32 %v1889_v21, %v1888_v17  ;;  %v1635_v27 = vrot.slane %v1634_v3, 1 }
 0x168   :  { %v1644_v55 = vsel %vm1524_vm1, %v3509_v40, 0.0  ;;  %v1766_v44 = vmul.f32 %v3509_v40, %v3509_v40  ;;  %3833 = vst [vmem:[#allocation28_spill] sm:$0xff] %v3519_v38  ;;  %v1658_v25 = vsel %vm1524_vm1, %v3519_v38, 0.0  ;;  %v1768_v60 = vmul.f32 %v3519_v38, %v3519_v38 }
 0x169   :  { %v1645_v7 = vrot.slane %v1644_v55, 4  ;;  %v1897_v63 = vadd.f32 %v1896_v36, %v1895_v47  ;;  %v1642_v53 = vrot.slane %v1641_v56, 1  ;;  %v1654_v8 = vrot.slane %v1653_v41, 2 }
 0x16a   :  { %v1900_v62 = vsel %vm1524_vm1, %v1766_v44, 0.0  ;;  %v1909_v10 = vadd.f32 %v1908_v24, %v1907_v57  ;;  %v1659_v51 = vrot.slane %v1658_v25, 4  ;;  %v1914_v6 = vsel %vm1524_vm1, %v1768_v60, 0.0 }
 0x16b   :  { %v1646_v33 = vadd.f32 %v1645_v7, %v1644_v55  ;;  %v1901_v59 = vrot.slane %v1900_v62, 4  ;;  %v1885_v48 = vadd.f32 %v1884_v22, %v1883_v2  ;;  %v2029_v17 = vadd.f32 %v2025_v31, %v1629_v58 }
 0x16c   :  { %v2026_v35 = vadd.f32 %v2022_v23, %v1622_v1  ;;  %v1891_v4 = vrot.slane %v1890_v42, 1  ;;  %v1898_v21 = vrot.slane %v1897_v63, 1  ;;  %v1915_v61 = vrot.slane %v1914_v6, 4 }
 0x16d   :  { %v1647_v47 = vrot.slane %v1646_v33, 2  ;;  %v1902_v46 = vadd.f32 %v1901_v59, %v1900_v62  ;;  %v2031_v36 = vadd.f32 %v2027_v54, %v1885_v48  ;;  %v2028_v44 = vadd.f32 %v2024_v49, %v1878_v18 }
 0x16e   :  { %v1636_v38 = vadd.f32 %v1635_v27, %v1634_v3  ;;  %v3834_v28 = vrot.slane %v3211_v37, %v3168_v26  ;;  %v1643_v24 = vadd.f32 %v1642_v53, %v1641_v56  ;;  %v1655_v55 = vadd.f32 %v1654_v8, %v1653_v41 }
 0x16f   :  { %v1910_v7 = vrot.slane %v1909_v10, 2  ;;  %v1660_v60 = vadd.f32 %v1659_v51, %v1658_v25  ;;  %v1892_v2 = vadd.f32 %v1891_v4, %v1890_v42  ;;  %v1903_v31 = vrot.slane %v1902_v46, 2 }
 0x170   :  { %v1133_v57 = vadd.f32 %v3387_v39, %v3834_v28  ;;  %v3835_v58 = vrot.slane %v3211_v37, %v3171_v13  ;;  %v2030_v49 = vadd.f32 %v2026_v35, %v1636_v38  ;;  %v1899_v22 = vadd.f32 %v1898_v21, %v1897_v63 }
 0x171   :  { %v1648_v3 = vadd.f32 %v1647_v47, %v1646_v33  ;;  %v1916_v1 = vadd.f32 %v1915_v61, %v1914_v6  ;;  %v2032_v18 = vadd.f32 %v2028_v44, %v1892_v2  ;;  %v2033_v41 = vadd.f32 %v2029_v17, %v1643_v24 }
 0x172   :  { %v3531_v23 = vmax.f32 %v1133_v57, 0.0  ;;  %v1204_v54 = vadd.f32 %v3393_v52, %v3835_v58  ;;  %v1656_v42 = vrot.slane %v1655_v55, 1  ;;  %v1911_v62 = vadd.f32 %v1910_v7, %v1909_v10 }
 0x173   :  { %v1661_v25 = vrot.slane %v1660_v60, 2  ;;  %v1904_v27 = vadd.f32 %v1903_v31, %v1902_v46  ;;  %v2035_v63 = vadd.f32 %v2031_v36, %v1899_v22  ;;  %v1649_v8 = vrot.slane %v1648_v3, 1 }
 0x174   :  { %v1665_v39 = vsel %vm1524_vm1, %v3531_v23, 0.0  ;;  %v1769_v28 = vmul.f32 %v3531_v23, %v3531_v23  ;;  %v3541_v56 = vmax.f32 %v1204_v54, 0.0  ;;  %v1917_v33 = vrot.slane %v1916_v1, 2 }
 0x175   :  { %v1666_v53 = vrot.slane %v1665_v39, 4  ;;  %v3836_v10 = vrot.slane %v3211_v37, %v3174_v14  ;;  %v1657_v35 = vadd.f32 %v1656_v42, %v1655_v55  ;;  %v1912_v4 = vrot.slane %v1911_v62, 1 }
 0x176   :  { %v1921_v52 = vsel %vm1524_vm1, %v1769_v28, 0.0  ;;  %v1679_v38 = vsel %vm1524_vm1, %v3541_v56, 0.0  ;;  %v1771_v48 = vmul.f32 %v3541_v56, %v3541_v56  ;;  %v1662_v21 = vadd.f32 %v1661_v25, %v1660_v60 }
 0x177   :  { %v1922_v59 = vrot.slane %v1921_v52, 4  ;;  %v1667_v51 = vadd.f32 %v1666_v53, %v1665_v39  ;;  %v1680_v6 = vrot.slane %v1679_v38, 4  ;;  %v1135_v17 = vadd.f32 %v3395_v45, %v3836_v10 }
 0x178   :  { %v1905_v46 = vrot.slane %v1904_v27, 1  ;;  %v1935_v36 = vsel %vm1524_vm1, %v1771_v48, 0.0  ;;  %v1918_v57 = vadd.f32 %v1917_v33, %v1916_v1  ;;  %v3837_v2 = vrot.slane %v3211_v37, %v3179_v16  ;;  %v3839_v33 = vld [vmem:[#allocation14_spill] sm:$0xff] }
 0x179   :  { %v1923_v47 = vadd.f32 %v1922_v59, %v1921_v52  ;;  %v1668_v61 = vrot.slane %v1667_v51, 2  ;;  %v3553_v44 = vmax.f32 %v1135_v17, 0.0  ;;  %v1681_v24 = vadd.f32 %v1680_v6, %v1679_v38 }
 0x17a   :  { %v1936_v7 = vrot.slane %v1935_v36, 4  ;;  %v1206_v31 = vadd.f32 %v3401_v20, %v3837_v2  ;;  %v2037_v58 = vadd.f32 %v2033_v41, %v1657_v35  ;;  %v1650_v45 = vadd.f32 %v1649_v8, %v1648_v3 }
 0x17b   :  { %v1672_v55 = vsel %vm1524_vm1, %v3553_v44, 0.0  ;;  %v1770_v60 = vmul.f32 %v3553_v44, %v3553_v44  ;;  %v1669_v54 = vadd.f32 %v1668_v61, %v1667_v51  ;;  %v1924_v22 = vrot.slane %v1923_v47, 2  ;;  %v3841_v51 = vld [vmem:[#allocation23_spill] sm:$0xff] }
 0x17c   :  { %v1673_v39 = vrot.slane %v1672_v55, 4  ;;  %v3563_v28 = vmax.f32 %v1206_v31, 0.0  ;;  %v1913_v1 = vadd.f32 %v1912_v4, %v1911_v62  ;;  %v1663_v42 = vrot.slane %v1662_v21, 1 }
 0x17d   :  { %v1937_v25 = vadd.f32 %v1936_v7, %v1935_v36  ;;  %v1928_v37 = vsel %vm1524_vm1, %v1770_v60, 0.0  ;;  %v1906_v53 = vadd.f32 %v1905_v46, %v1904_v27  ;;  %v1919_v20 = vrot.slane %v1918_v57, 1 }
 0x17e   :  { %3838 = vst [vmem:[#allocation29_spill] sm:$0xff] %v3563_v28  ;;  %v1682_v41 = vrot.slane %v1681_v24, 2  ;;  %v1929_v3 = vrot.slane %v1928_v37, 4  ;;  %v1674_v52 = vadd.f32 %v1673_v39, %v1672_v55  ;;  %v1686_v38 = vsel %vm1524_vm1, %v3563_v28, 0.0 }
 0x17f   :  { %v1772_v8 = vmul.f32 %v3563_v28, %v3563_v28  ;;  %v3840_v59 = vrot.slane %v3839_v33, %v3151_v9  ;;  %v2034_v6 = vadd.f32 %v2030_v49, %v1650_v45  ;;  %v1670_v48 = vrot.slane %v1669_v54, 1 }
 0x180   :  { %v1925_v10 = vadd.f32 %v1924_v22, %v1923_v47  ;;  %v1930_v17 = vadd.f32 %v1929_v3, %v1928_v37  ;;  %v2039_v27 = vadd.f32 %v2035_v63, %v1913_v1  ;;  %v1938_v35 = vrot.slane %v1937_v25, 2  ;;  %v3843_v47 = vld [vmem:[#allocation24_spill] sm:$0xff] }
 0x181   :  { %v1275_v62 = vadd.f32 %v3841_v51, %v3840_v59  ;;  %v1687_v4 = vrot.slane %v1686_v38, 4  ;;  %v1942_v46 = vsel %vm1524_vm1, %v1772_v8, 0.0  ;;  %v2036_v61 = vadd.f32 %v2032_v18, %v1906_v53 }
 0x182   :  { %v1664_v36 = vadd.f32 %v1663_v42, %v1662_v21  ;;  %v1920_v7 = vadd.f32 %v1919_v20, %v1918_v57  ;;  %v1683_v2 = vadd.f32 %v1682_v41, %v1681_v24  ;;  %v1675_v31 = vrot.slane %v1674_v52, 2 }
 0x183   :  { %v1931_v55 = vrot.slane %v1930_v17, 2  ;;  %v1943_v60 = vrot.slane %v1942_v46, 4  ;;  %v3575_v39 = vmax.f32 %v1275_v62, 0.0  ;;  %v1671_v49 = vadd.f32 %v1670_v48, %v1669_v54 }
 0x184   :  { %v3577_v28 = vadd.f32 %v2034_v6, %v1664_v36  ;;  %v1926_v45 = vrot.slane %v1925_v10, 1  ;;  %v3842_v63 = vrot.slane %v3839_v33, %v3159_v0  ;;  %v1939_v1 = vadd.f32 %v1938_v35, %v1937_v25 }
 0x185   :  { %v1688_v37 = vadd.f32 %v1687_v4, %v1686_v38  ;;  %v1693_v18 = vsel %vm1524_vm1, %v3575_v39, 0.0  ;;  %v1773_v21 = vmul.f32 %v3575_v39, %v3575_v39  ;;  %v2040_v57 = vadd.f32 %v2036_v61, %v1920_v7 }
 0x186   :  { %v1346_v22 = vadd.f32 %v3843_v47, %v3842_v63  ;;  %v1684_v24 = vrot.slane %v1683_v2, 1  ;;  %v1944_v42 = vadd.f32 %v1943_v60, %v1942_v46  ;;  %v1694_v53 = vrot.slane %v1693_v18, 4 }
 0x187   :  { %v1676_v20 = vadd.f32 %v1675_v31, %v1674_v52  ;;  %v1932_v54 = vadd.f32 %v1931_v55, %v1930_v17  ;;  %v1949_v41 = vsel %vm1524_vm1, %v1773_v21, 0.0  ;;  %v1927_v0 = vadd.f32 %v1926_v45, %v1925_v10  ;;  %v3845_v10 = vld [vmem:[#allocation25_spill] sm:$0xff] }
 0x188   :  { %v3588_v3 = vmax.f32 %v1346_v22, 0.0  ;;  %v2041_v8 = vadd.f32 %v2037_v58, %v1671_v49  ;;  %v1695_v25 = vadd.f32 %v1694_v53, %v1693_v18  ;;  %v1950_v38 = vrot.slane %v1949_v41, 4  ;;  %v3847_v22 = vld [vmem:[#allocation26_spill] sm:$0xff] }
 0x189   :  { %v1940_v59 = vrot.slane %v1939_v1, 1  ;;  %v1689_v51 = vrot.slane %v1688_v37, 2  ;;  %v1945_v48 = vrot.slane %v1944_v42, 2  ;;  %v1677_v4 = vrot.slane %v1676_v20, 1 }
 0x18a   :  { %v1707_v62 = vsel %vm1524_vm1, %v3588_v3, 0.0  ;;  %v1775_v6 = vmul.f32 %v3588_v3, %v3588_v3  ;;  %v1696_v35 = vrot.slane %v1695_v25, 2  ;;  %v1951_v52 = vadd.f32 %v1950_v38, %v1949_v41 }
 0x18b   :  { %v1708_v17 = vrot.slane %v1707_v62, 4  ;;  %v1933_v46 = vrot.slane %v1932_v54, 1  ;;  %v3844_v58 = vrot.slane %v3839_v33, %v3162_v11  ;;  %v2043_v49 = vadd.f32 %v2039_v27, %v1927_v0 }
 0x18c   :  { %v1963_v61 = vsel %vm1524_vm1, %v1775_v6, 0.0  ;;  %v1697_v7 = vadd.f32 %v1696_v35, %v1695_v25  ;;  %v1952_v31 = vrot.slane %v1951_v52, 2  ;;  %v1685_v45 = vadd.f32 %v1684_v24, %v1683_v2 }
 0x18d   :  { %v1277_v36 = vadd.f32 %v3845_v10, %v3844_v58  ;;  %v1709_v55 = vadd.f32 %v1708_v17, %v1707_v62  ;;  %v1964_v60 = vrot.slane %v1963_v61, 4  ;;  %v3846_v47 = vrot.slane %v3839_v33, %v3165_v12 }
 0x18e   :  { %v1690_v21 = vadd.f32 %v1689_v51, %v1688_v37  ;;  %v1946_v53 = vadd.f32 %v1945_v48, %v1944_v42  ;;  %v1953_v41 = vadd.f32 %v1952_v31, %v1951_v52  ;;  %v1941_v2 = vadd.f32 %v1940_v59, %v1939_v1 }
 0x18f   :  { %v3599_v63 = vmax.f32 %v1277_v36, 0.0  ;;  %v1348_v18 = vadd.f32 %v3847_v22, %v3846_v47  ;;  %v1965_v38 = vadd.f32 %v1964_v60, %v1963_v61  ;;  %v1710_v6 = vrot.slane %v1709_v55, 2 }
 0x190   :  { %v1678_v24 = vadd.f32 %v1677_v4, %v1676_v20  ;;  %v1934_v0 = vadd.f32 %v1933_v46, %v1932_v54  ;;  %v1698_v35 = vrot.slane %v1697_v7, 1  ;;  %v1691_v51 = vrot.slane %v1690_v21, 1 }
 0x191   :  { %v1700_v25 = vsel %vm1524_vm1, %v3599_v63, 0.0  ;;  %v1774_v62 = vmul.f32 %v3599_v63, %v3599_v63  ;;  %v3609_v27 = vmax.f32 %v1348_v18, 0.0  ;;  %v1966_v12 = vrot.slane %v1965_v38, 2 }
 0x192   :  { %v1701_v17 = vrot.slane %v1700_v25, 4  ;;  %v1947_v48 = vrot.slane %v1946_v53, 1  ;;  %v1954_v52 = vrot.slane %v1953_v41, 1  ;;  %v2045_v58 = vadd.f32 %v2041_v8, %v1685_v45 }
 0x193   :  { %v1956_v37 = vsel %vm1524_vm1, %v1774_v62, 0.0  ;;  %v1776_v42 = vmul.f32 %v3609_v27, %v3609_v27  ;;  %v1714_v61 = vsel %vm1524_vm1, %v3609_v27, 0.0  ;;  %v2047_v10 = vadd.f32 %v2043_v49, %v1941_v2 }
 0x194   :  { %v1711_v36 = vadd.f32 %v1710_v6, %v1709_v55  ;;  %v1957_v1 = vrot.slane %v1956_v37, 4  ;;  %v2042_v20 = vadd.f32 %v3577_v28, %v1678_v24  ;;  %v2044_v54 = vadd.f32 %v2040_v57, %v1934_v0 }
 0x195   :  { %v1699_v59 = vadd.f32 %v1698_v35, %v1697_v7  ;;  %v1970_v4 = vsel %vm1524_vm1, %v1776_v42, 0.0  ;;  %v1967_v46 = vadd.f32 %v1966_v12, %v1965_v38  ;;  %v1702_v31 = vadd.f32 %v1701_v17, %v1700_v25 }
 0x196   :  { %v1715_v60 = vrot.slane %v1714_v61, 4  ;;  %v3848_v47 = vrot.slane %v3839_v33, %v3168_v26  ;;  %v1692_v18 = vadd.f32 %v1691_v51, %v1690_v21  ;;  %v1948_v62 = vadd.f32 %v1947_v48, %v1946_v53 }
 0x197   :  { %v1955_v8 = vadd.f32 %v1954_v52, %v1953_v41  ;;  %v3849_v55 = vrot.slane %v3839_v33, %v3171_v13  ;;  %v1712_v57 = vrot.slane %v1711_v36, 1  ;;  %v1958_v7 = vadd.f32 %v1957_v1, %v1956_v37 }
 0x198   :  { %v1417_v22 = vadd.f32 %v3443_v5, %v3848_v47  ;;  %v1971_v49 = vrot.slane %v1970_v4, 4  ;;  %v3628_v38 = vadd.f32 %v2042_v20, %v1692_v18  ;;  %v3630_v6 = vadd.f32 %v2044_v54, %v1948_v62 }
 0x199   :  { %v1488_v28 = vadd.f32 %v3445_v15, %v3849_v55  ;;  %v2049_v26 = vadd.f32 %v2045_v58, %v1699_v59  ;;  %v1968_v5 = vrot.slane %v1967_v46, 1  ;;  %v1703_v21 = vrot.slane %v1702_v31, 2 }
 0x19a   :  { %v3626_v45 = vmax.f32 %v1417_v22, 0.0  ;;  %v1716_v53 = vadd.f32 %v1715_v60, %v1714_v61  ;;  %v2051_v41 = vadd.f32 %v2047_v10, %v1955_v8  ;;  %v1713_v0 = vadd.f32 %v1712_v57, %v1711_v36 }
 0x19b   :  { %v3632_v25 = vmax.f32 %v1488_v28, 0.0  ;;  %v1959_v35 = vrot.slane %v1958_v7, 2  ;;  %v1972_v12 = vadd.f32 %v1971_v49, %v1970_v4  ;;  %v3850_v48 = vrot.slane %v3839_v33, %v3174_v14  ;;  %v2572_v14 = vld [vmem:[%s3780_s2 + $0x18] sm:$0xff] }
 0x19c   :  { %v1721_v13 = vsel %vm1524_vm1, %v3626_v45, 0.0  ;;  %v1777_v2 = vmul.f32 %v3626_v45, %v3626_v45  ;;  %v1969_v61 = vadd.f32 %v1968_v5, %v1967_v46  ;;  %v1704_v58 = vadd.f32 %v1703_v21, %v1702_v31 }
 0x19d   :  { %v1722_v15 = vrot.slane %v1721_v13, 4  ;;  %v1735_v24 = vsel %vm1524_vm1, %v3632_v25, 0.0  ;;  %v1779_v51 = vmul.f32 %v3632_v25, %v3632_v25  ;;  %v1419_v52 = vadd.f32 %v3447_v34, %v3850_v48 }
 0x19e   :  { %v1736_v17 = vrot.slane %v1735_v24, 4  ;;  %v1977_v42 = vsel %vm1524_vm1, %v1777_v2, 0.0  ;;  %v1717_v10 = vrot.slane %v1716_v53, 2  ;;  %v2053_v20 = vadd.f32 %v2049_v26, %v1713_v0 }
 0x19f   :  { %v1723_v37 = vadd.f32 %v1722_v15, %v1721_v13  ;;  %v1978_v1 = vrot.slane %v1977_v42, 4  ;;  %v1991_v59 = vsel %vm1524_vm1, %v1779_v51, 0.0  ;;  %v1960_v4 = vadd.f32 %v1959_v35, %v1958_v7 }
 0x1a0   :  { %v1737_v54 = vadd.f32 %v1736_v17, %v1735_v24  ;;  %v1973_v60 = vrot.slane %v1972_v12, 2  ;;  %v1992_v22 = vrot.slane %v1991_v59, 4  ;;  %v3648_v8 = vmax.f32 %v1419_v52, 0.0 }
 0x1a1   :  { %v1724_v36 = vrot.slane %v1723_v37, 2  ;;  %v1979_v47 = vadd.f32 %v1978_v1, %v1977_v42  ;;  %v319_v34 = vrot.slane %v2572_v14, %v3179_v16  ;;  %v1705_v33 = vrot.slane %v1704_v58, 1 }
 0x1a2   :  { %v1738_v62 = vrot.slane %v1737_v54, 2  ;;  %v1718_v46 = vadd.f32 %v1717_v10, %v1716_v53  ;;  %v1993_v55 = vadd.f32 %v1992_v22, %v1991_v59  ;;  %v1728_v7 = vsel %vm1524_vm1, %v3648_v8, 0.0 }
 0x1a3   :  { %v1725_v18 = vadd.f32 %v1724_v36, %v1723_v37  ;;  %v1980_v31 = vrot.slane %v1979_v47, 2  ;;  %v1778_v49 = vmul.f32 %v3648_v8, %v3648_v8  ;;  %v1729_v21 = vrot.slane %v1728_v7, 4 }
 0x1a4   :  { %v1739_v57 = vadd.f32 %v1738_v62, %v1737_v54  ;;  %v1994_v5 = vrot.slane %v1993_v55, 2  ;;  %v1490_v13 = vadd.f32 %v3451_v50, %v319_v34  ;;  %v1961_v15 = vrot.slane %v1960_v4, 1 }
 0x1a5   :  { %v1726_v28 = vrot.slane %v1725_v18, 1  ;;  %v1981_v26 = vadd.f32 %v1980_v31, %v1979_v47  ;;  %v1984_v53 = vsel %vm1524_vm1, %v1778_v49, 0.0  ;;  %v1730_v35 = vadd.f32 %v1729_v21, %v1728_v7 }
 0x1a6   :  { %v1740_v16 = vrot.slane %v1739_v57, 1  ;;  %v1995_v0 = vadd.f32 %v1994_v5, %v1993_v55  ;;  %v1985_v17 = vrot.slane %v1984_v53, 4  ;;  %v2055_v37 = vadd.f32 %v2051_v41, %v1969_v61 }
 0x1a7   :  { %v1727_v2 = vadd.f32 %v1726_v28, %v1725_v18  ;;  %v1982_v24 = vrot.slane %v1981_v26, 1  ;;  %v1974_v42 = vadd.f32 %v1973_v60, %v1972_v12  ;;  %v3660_v48 = vmax.f32 %v1490_v13, 0.0 }
 0x1a8   :  { %v1706_v52 = vadd.f32 %v1705_v33, %v1704_v58  ;;  %v1731_v1 = vrot.slane %v1730_v35, 2  ;;  %v1986_v36 = vadd.f32 %v1985_v17, %v1984_v53  ;;  %v1741_v54 = vadd.f32 %v1740_v16, %v1739_v57 }
 0x1a9   :  { %v2057_v51 = vadd.f32 %v2053_v20, %v1727_v2  ;;  %v1983_v10 = vadd.f32 %v1982_v24, %v1981_v26  ;;  %v1996_v50 = vrot.slane %v1995_v0, 1  ;;  %v1742_v59 = vsel %vm1524_vm1, %v3660_v48, 0.0 }
 0x1aa   :  { %v1780_v47 = vmul.f32 %v3660_v48, %v3660_v48  ;;  %v1962_v22 = vadd.f32 %v1961_v15, %v1960_v4  ;;  %v1719_v18 = vrot.slane %v1718_v46, 1  ;;  %v1732_v62 = vadd.f32 %v1731_v1, %v1730_v35 }
 0x1ab   :  { %v1987_v41 = vrot.slane %v1986_v36, 2  ;;  %v2059_v12 = vadd.f32 %v2055_v37, %v1983_v10  ;;  %v2061_v61 = vadd.f32 %v2057_v51, %v1741_v54  ;;  %v1743_v20 = vrot.slane %v1742_v59, 4 }
 0x1ac   :  { %v1998_v58 = vsel %vm1524_vm1, %v1780_v47, 0.0  ;;  %v1975_v60 = vrot.slane %v1974_v42, 1  ;;  %v1733_v14 = vrot.slane %v1732_v62, 1  ;;  %v2050_v31 = vadd.f32 %v3628_v38, %v1706_v52 }
 0x1ad   :  { %v1988_v34 = vadd.f32 %v1987_v41, %v1986_v36  ;;  %v1999_v33 = vrot.slane %v1998_v58, 4  ;;  %v1997_v55 = vadd.f32 %v1996_v50, %v1995_v0  ;;  %v1744_v28 = vadd.f32 %v1743_v20, %v1742_v59  ;;  %v3851_v20 = vld [vmem:[#allocation9_spill] sm:$0xff] }
 0x1ae   :  { %v2052_v57 = vadd.f32 %v3630_v6, %v1962_v22  ;;  %v1720_v7 = vadd.f32 %v1719_v18, %v1718_v46  ;;  %v2065_v5 = vmul.f32 0.03125, %v2061_v61  ;;  %v1734_v21 = vadd.f32 %v1733_v14, %v1732_v62 }
 0x1af   :  { %v1989_v4 = vrot.slane %v1988_v34, 1  ;;  %v2000_v49 = vadd.f32 %v1999_v33, %v1998_v58  ;;  %v2063_v26 = vadd.f32 %v2059_v12, %v1997_v55  ;;  %v1745_v13 = vrot.slane %v1744_v28, 2  ;;  %v2073_v33 = vld [vmem:[#allocation4] sm:$0x3] }
 0x1b0   :  { %v1976_v15 = vadd.f32 %v1975_v60, %v1974_v42  ;;  %v2054_v53 = vadd.f32 %v2050_v31, %v1720_v7  ;;  %v2069_v38 = vmul.f32 %v2065_v5, %v2065_v5  ;;  %v2647_v62 = vmov 1966171168  }
 0x1b1   :  { %v1990_v2 = vadd.f32 %v1989_v4, %v1988_v34  ;;  %v2001_v16 = vrot.slane %v2000_v49, 2  ;;  %v1746_v24 = vadd.f32 %v1745_v13, %v1744_v28  ;;  %v2067_v37 = vmul.f32 0.03125, %v2063_v26  ;;  %v3852_v26 = vld [vmem:[#allocation10_spill] sm:$0xff]  ;;  %v3853_v13 = vld [vmem:[#allocation12_spill] sm:$0xff] }
 0x1b2   :  { %v2056_v35 = vadd.f32 %v2052_v57, %v1976_v15  ;;  %v2058_v0 = vadd.f32 %v2054_v53, %v1734_v21  ;;  %v2082_v41 = vunpack.c.l.s4 %v2647_v62  ;;  %v3855_v53 = vld [vmem:[#allocation13_spill] sm:$0xff] }
 0x1b3   :  { %v2002_v17 = vadd.f32 %v2001_v16, %v2000_v49  ;;  %v1747_v51 = vrot.slane %v1746_v24, 1  ;;  %v2071_v1 = vsub.f32 %v2067_v37, %v2069_v38  ;;  %v3857_v38 = vld [vmem:[#allocation17_spill] sm:$0xff] }
 0x1b4   :  { %v2060_v52 = vadd.f32 %v2056_v35, %v1990_v2  ;;  %v2083_v12 = vunpack.c.0.s8 %v2082_v41  ;;  %v3854_v2 = vld [vmem:[#allocation11_spill] sm:$0xff] }
 0x1b5   :  { %v2003_v6 = vrot.slane %v2002_v17, 1  ;;  %v1748_v46 = vadd.f32 %v1747_v51, %v1746_v24  ;;  %v2074_v42 = vadd.f32 1e-05, %v2071_v1  ;;  %v3856_v35 = vld [vmem:[#allocation15_spill] sm:$0xff]  ;;  %v3858_v51 = vld [vmem:[#allocation16_spill] sm:$0xff] }
 0x1b6   :  { %v2086_v58 = vsub.s32 %v2083_v12, %v3851_v20 }
 0x1b7   :  { %v2004_v10 = vadd.f32 %v2003_v6, %v2002_v17  ;;  %v2062_v36 = vadd.f32 %v2058_v0, %v1748_v46  ;;  %2568 = vrsqrt.f32 %v2074_v42  ;;  %v3859_v6 = vld [vmem:[#allocation18_spill] sm:$0xff] }
 0x1b8   :  { %v3863_v42 = vld [vmem:[#allocation22_spill] sm:$0xff] }
 0x1b9   :  { %v2064_v54 = vadd.f32 %v2060_v52, %v2004_v10  ;;  %v2066_v50 = vmul.f32 0.03125, %v2062_v36  ;;  %v3860_v10 = vld [vmem:[#allocation19_spill] sm:$0xff]  ;;  %v3861_v36 = vld [vmem:[#allocation21_spill] sm:$0xff] }
 0x1bb   :  { %v2068_v59 = vmul.f32 0.03125, %v2064_v54  ;;  %v2070_v47 = vmul.f32 %v2066_v50, %v2066_v50 }
 0x1bd   :  { %v2072_v22 = vsub.f32 %v2068_v59, %v2070_v47 }
 0x1bf   :  { %v2075_v18 = vadd.f32 1e-05, %v2072_v22 }
 0x1c1   :  { %2570 = vrsqrt.f32 %v2075_v18  ;;  %v2569_v61 = vpop.eup %2568 }
 0x1cb   :  { %v2571_v60 = vpop.eup %2570 }
 0x1cc   :  { %v2080_v14 = vcombine.low %v2569_v61, %v2571_v60  ;;  %v3864_v60 = vld [vmem:[#allocation27_spill] sm:$0xff] }
 0x1ce   :  { %v2087_v34 = vrot.slane %v2080_v14, %v2086_v58 }
 0x1d0   :  { %v2094_v31 = vrot.slane %v2087_v34, %v2086_v58 }
 0x1d2   :  { %v2096_v55 = vmul.f32 %v2094_v31, %v2073_v33  ;;  %v3865_v33 = vld [vmem:[#allocation28_spill] sm:$0xff] }
 0x1d4   :  { %v2102_v28 = vrot.slane %v2096_v55, %v3151_v9  ;;  %v2106_v57 = vrot.slane %v2096_v55, %v3162_v11 }
 0x1d6   :  { %v2109_v7 = vmul.f32 %v2102_v28, %v2065_v5  ;;  %v2110_v4 = vmul.f32 %v2106_v57, %v2066_v50  ;;  %v2130_v21 = vmul.f32 %v2102_v28, %v3852_v26  ;;  %v2131_v15 = vmul.f32 %v2106_v57, %v3853_v13  ;;  %v2097_v5 = vld [vmem:[#allocation6] sm:$0x3] }
 0x1d7   :  { %v2157_v16 = vmul.f32 %v2102_v28, %v3854_v2  ;;  %v2158_v24 = vmul.f32 %v2106_v57, %v3855_v53  ;;  %v2173_v17 = vmul.f32 %v2102_v28, %v3856_v35  ;;  %v2174_v0 = vmul.f32 %v2106_v57, %v3857_v38  ;;  %v3862_v50 = vld [vmem:[#allocation20_spill] sm:$0xff] }
 0x1d8   :  { %v2113_v49 = vcombine.low %v2109_v7, %v2110_v4  ;;  %v2189_v52 = vmul.f32 %v2102_v28, %v3858_v51  ;;  %v2190_v46 = vmul.f32 %v2106_v57, %v3859_v6  ;;  %v2205_v1 = vmul.f32 %v2102_v28, %v3860_v10 }
 0x1d9   :  { %v2206_v54 = vmul.f32 %v2106_v57, %v3861_v36  ;;  %v2221_v59 = vmul.f32 %v2102_v28, %v3862_v50  ;;  %v2222_v47 = vmul.f32 %v2106_v57, %v3863_v42  ;;  %v2237_v18 = vmul.f32 %v2102_v28, %v3435_v32 }
 0x1da   :  { %v2120_v37 = vrot.slane %v2113_v49, %v2086_v58  ;;  %v2238_v62 = vmul.f32 %v2106_v57, %v3464_v30  ;;  %v2253_v41 = vmul.f32 %v2102_v28, %v3453_v29  ;;  %v2254_v12 = vmul.f32 %v2106_v57, %v3476_v19  ;;  %v3866_v30 = vld [vmem:[#allocation29_spill] sm:$0xff] }
 0x1db   :  { %v2269_v61 = vmul.f32 %v2102_v28, %v3487_v43  ;;  %v2270_v20 = vmul.f32 %v2106_v57, %v3509_v40  ;;  %v2285_v14 = vmul.f32 %v2102_v28, %v3864_v60  ;;  %v2286_v31 = vmul.f32 %v2106_v57, %v3865_v33 }
 0x1dc   :  { %v2127_v22 = vrot.slane %v2120_v37, %v2086_v58  ;;  %v2301_v55 = vmul.f32 %v2102_v28, %v3531_v23  ;;  %v3694_v58 = vmul.f32 %v2106_v57, %v3648_v8  ;;  %v2302_v32 = vmul.f32 %v2106_v57, %v3553_v44 }
 0x1dd   :  { %v2317_v29 = vmul.f32 %v2102_v28, %v3541_v56  ;;  %v2318_v19 = vmul.f32 %v2106_v57, %v3866_v30  ;;  %v3700_v43 = vmul.f32 %v2106_v57, %v3660_v48  ;;  %v2333_v4 = vmul.f32 %v2102_v28, %v3575_v39 }
 0x1de   :  { %v2129_v34 = vsub.f32 %v2097_v5, %v2127_v22  ;;  %v2334_v23 = vmul.f32 %v2106_v57, %v3599_v63  ;;  %v2349_v8 = vmul.f32 %v2102_v28, %v3588_v3  ;;  %v2350_v44 = vmul.f32 %v2106_v57, %v3609_v27 }
 0x1df   :  { %v2365_v56 = vmul.f32 %v2102_v28, %v3626_v45  ;;  %v2381_v49 = vmul.f32 %v2102_v28, %v3632_v25 }
 0x1e0   :  { %v2136_v40 = vrot.slane %v2129_v34, %v3151_v9  ;;  %v3704_v7 = vrot.slane %v2129_v34, %v3162_v11 }
 0x1e2   :  { %v2143_v26 = vadd.f32 %v2136_v40, %v2130_v21  ;;  %v2144_v48 = vadd.f32 %v3704_v7, %v2131_v15  ;;  %v2159_v13 = vadd.f32 %v2157_v16, %v2136_v40  ;;  %v2160_v9 = vadd.f32 %v2158_v24, %v3704_v7 }
 0x1e3   :  { %v2175_v11 = vadd.f32 %v2173_v17, %v2136_v40  ;;  %v2176_v2 = vadd.f32 %v2174_v0, %v3704_v7  ;;  %v2191_v39 = vadd.f32 %v2189_v52, %v2136_v40  ;;  %v2192_v63 = vadd.f32 %v2190_v46, %v3704_v7 }
 0x1e4   :  { %v2147_v53 = vcombine.low %v2143_v26, %v2144_v48  ;;  %v2163_v3 = vcombine.low %v2159_v13, %v2160_v9  ;;  %v2207_v35 = vadd.f32 %v2205_v1, %v2136_v40  ;;  %v2208_v27 = vadd.f32 %v2206_v54, %v3704_v7 }
 0x1e5   :  { %v2179_v45 = vcombine.low %v2175_v11, %v2176_v2  ;;  %v2195_v57 = vcombine.low %v2191_v39, %v2192_v63  ;;  %v2223_v25 = vadd.f32 %v2221_v59, %v2136_v40  ;;  %v2224_v28 = vadd.f32 %v2222_v47, %v3704_v7 }
 0x1e6   :  { %2419 = vst.sshfl [vmem:[%s3783_s5] sm:$0x33 pattern:$0x76325410] %v2147_v53  ;;  %v2211_v21 = vcombine.low %v2207_v35, %v2208_v27  ;;  %v2239_v15 = vadd.f32 %v2237_v18, %v2136_v40  ;;  %v2240_v16 = vadd.f32 %v2238_v62, %v3704_v7  ;;  %v2255_v24 = vadd.f32 %v2253_v41, %v2136_v40 }
 0x1e7   :  { %2420 = vst.sshfl [vmem:[%s3783_s5 + $0x4] sm:$0x33 pattern:$0x76325410] %v2163_v3  ;;  %v2227_v17 = vcombine.low %v2223_v25, %v2224_v28  ;;  %v2256_v37 = vadd.f32 %v2254_v12, %v3704_v7  ;;  %v2271_v38 = vadd.f32 %v2269_v61, %v2136_v40  ;;  %v2272_v0 = vadd.f32 %v2270_v20, %v3704_v7 }
 0x1e8   :  { %2421 = vst.sshfl [vmem:[%s3783_s5 + $0x8] sm:$0x33 pattern:$0x76325410] %v2179_v45  ;;  %v2243_v51 = vcombine.low %v2239_v15, %v2240_v16  ;;  %v2287_v52 = vadd.f32 %v2285_v14, %v2136_v40  ;;  %v2288_v6 = vadd.f32 %v2286_v31, %v3704_v7  ;;  %v2303_v46 = vadd.f32 %v2301_v55, %v2136_v40 }
 0x1e9   :  { %2422 = vst.sshfl [vmem:[%s3783_s5 + $0xc] sm:$0x33 pattern:$0x76325410] %v2195_v57  ;;  %v2259_v5 = vcombine.low %v2255_v24, %v2256_v37  ;;  %v2275_v10 = vcombine.low %v2271_v38, %v2272_v0  ;;  %v2304_v1 = vadd.f32 %v2302_v32, %v3704_v7  ;;  %v2319_v36 = vadd.f32 %v2317_v29, %v2136_v40 }
 0x1ea   :  { %2423 = vst.sshfl [vmem:[%s3783_s5 + $0x10] sm:$0x33 pattern:$0x76325410] %v2211_v21  ;;  %v2291_v54 = vcombine.low %v2287_v52, %v2288_v6  ;;  %v2320_v50 = vadd.f32 %v2318_v19, %v3704_v7  ;;  %v2335_v59 = vadd.f32 %v2333_v4, %v2136_v40  ;;  %v2336_v42 = vadd.f32 %v2334_v23, %v3704_v7 }
 0x1eb   :  { %2424 = vst.sshfl [vmem:[%s3783_s5 + $0x14] sm:$0x33 pattern:$0x76325410] %v2227_v17  ;;  %v2307_v47 = vcombine.low %v2303_v46, %v2304_v1  ;;  %v2351_v22 = vadd.f32 %v2349_v8, %v2136_v40  ;;  %v2352_v18 = vadd.f32 %v2350_v44, %v3704_v7  ;;  %v2367_v62 = vadd.f32 %v2365_v56, %v2136_v40 }
 0x1ec   :  { %2425 = vst.sshfl [vmem:[%s3783_s5 + $0x18] sm:$0x33 pattern:$0x76325410] %v2243_v51  ;;  %v2323_v41 = vcombine.low %v2319_v36, %v2320_v50  ;;  %v2339_v12 = vcombine.low %v2335_v59, %v2336_v42  ;;  %v2368_v61 = vadd.f32 %v3694_v58, %v3704_v7  ;;  %v2383_v20 = vadd.f32 %v2381_v49, %v2136_v40 }
 0x1ed   :  { %2426 = vst.sshfl [vmem:[%s3783_s5 + $0x1c] sm:$0x33 pattern:$0x76325410] %v2259_v5  ;;  %v2355_v60 = vcombine.low %v2351_v22, %v2352_v18  ;;  %v2384_v14 = vadd.f32 %v3700_v43, %v3704_v7 }
 0x1ee   :  { %2427 = vst.sshfl [vmem:[%s3783_s5 + $0x20] sm:$0x33 pattern:$0x76325410] %v2275_v10  ;;  %v2371_v34 = vcombine.low %v2367_v62, %v2368_v61 }
 0x1ef   :  { %2428 = vst.sshfl [vmem:[%s3783_s5 + $0x24] sm:$0x33 pattern:$0x76325410] %v2291_v54  ;;  %v2387_v33 = vcombine.low %v2383_v20, %v2384_v14 }
 0x1f0   :  { %2429 = vst.sshfl [vmem:[%s3783_s5 + $0x28] sm:$0x33 pattern:$0x76325410] %v2307_v47 }
 0x1f1   :  { %2430 = vst.sshfl [vmem:[%s3783_s5 + $0x2c] sm:$0x33 pattern:$0x76325410] %v2323_v41 }
 0x1f2   :  { %2431 = vst.sshfl [vmem:[%s3783_s5 + $0x30] sm:$0x33 pattern:$0x76325410] %v2339_v12 }
 0x1f3   :  { %2432 = vst.sshfl [vmem:[%s3783_s5 + $0x34] sm:$0x33 pattern:$0x76325410] %v2355_v60 }
 0x1f4   :  { %2433 = vst.sshfl [vmem:[%s3783_s5 + $0x38] sm:$0x33 pattern:$0x76325410] %v2371_v34 }
 0x1f5   :  { %2434 = vst.sshfl [vmem:[%s3783_s5 + $0x3c] sm:$0x33 pattern:$0x76325410] %v2387_v33 }
 0x1f6   :  { %2401 = vsyncpa [#allocation3], 1 }
 0x1f7   :  { %2402 = vsyncpa [#allocation5], 1 }

// kernel: gen_sagan_forward.6
= control target key start
LH: loop header
LB: loop body
LE: loop exit
PB: predicated region body
PF: predicated region fallthrough
CT: control target
= control target key end

     0   :  { %vm1353_vm0 = vcmask 1041408   ;;  %s3528_s1 = inlined_call_operand.vmem [shape: f32[2304,128], index: 1, kind: input, shape index: {}]   ;;  %s3529_s0 = inlined_call_operand.vmem [shape: f32[50,2304], index: 0, kind: input, shape index: {}]   ;;  %s3530_s2 = inlined_call_operand.vmem [shape: f32[1,128], index: 2, kind: input, shape index: {}]   ;;  %s3531_s3 = inlined_call_operand.vmem [shape: f32[1,128], index: 3, kind: input, shape index: {}]   ;;  %s3532_s4 = inlined_call_operand.vmem [shape: f32[1,128], index: 4, kind: input, shape index: {}]   ;;  %s3533_s5 = inlined_call_operand.vmem [shape: f32[50,128], index: 5, kind: output, shape index: {}]  }
   0x1   :  { %v162_v0 = vld [vmem:[%s3528_s1 + $0x80] sm:$0xff]  ;;  %v163_v1 = vld [vmem:[%s3528_s1 + $0x88] sm:$0xff]  ;;  %v164_v11 = vld [vmem:[%s3528_s1 + $0x90] sm:$0xff] }
   0x2   :  { %v194_v2 = vld [vmem:[%s3528_s1 + $0x180] sm:$0xff]  ;;  %v1908_v3 = vpack.c.bf16 %v163_v1, %v162_v0  ;;  %v195_v4 = vld [vmem:[%s3528_s1 + $0x188] sm:$0xff]  ;;  %v165_v13 = vld [vmem:[%s3528_s1 + $0x98] sm:$0xff] }
   0x3   :  { %v146_v5 = vld [vmem:[%s3528_s1] sm:$0xff]  ;;  %v147_v6 = vld [vmem:[%s3528_s1 + $0x8] sm:$0xff]  ;;  %v1940_v7 = vpack.c.bf16 %v195_v4, %v194_v2  ;;  %v196_v14 = vld [vmem:[%s3528_s1 + $0x190] sm:$0xff]  ;;  %v1912_v16 = vpack.c.bf16 %v165_v13, %v164_v11 }
   0x4   :  { %v1910_v8 = vpack.c.bf16 %v147_v6, %v146_v5  ;;  %v178_v9 = vld [vmem:[%s3528_s1 + $0x100] sm:$0xff]  ;;  %v179_v10 = vld [vmem:[%s3528_s1 + $0x108] sm:$0xff]  ;;  %1909 = vmatprep.subr.bf16.mxu0 %v1908_v3  ;;  %v197_v15 = vld [vmem:[%s3528_s1 + $0x198] sm:$0xff] }
   0x5   :  { %v1942_v12 = vpack.c.bf16 %v179_v10, %v178_v9  ;;  %1941 = vmatprep.subr.bf16.mxu1 %v1940_v7  ;;  %v1944_v17 = vpack.c.bf16 %v197_v15, %v196_v14  ;;  %v148_v18 = vld [vmem:[%s3528_s1 + $0x10] sm:$0xff]  ;;  %v149_v19 = vld [vmem:[%s3528_s1 + $0x18] sm:$0xff]  ;;  %v166_v23 = vld [vmem:[%s3528_s1 + $0xa0] sm:$0xff] }
   0x6   :  { %1911 = vmatpush3.bf16.msra.mxu0 %v1910_v8  ;;  %v180_v20 = vld [vmem:[%s3528_s1 + $0x110] sm:$0xff]  ;;  %v1914_v21 = vpack.c.bf16 %v149_v19, %v148_v18  ;;  %v181_v22 = vld [vmem:[%s3528_s1 + $0x118] sm:$0xff]  ;;  %v167_v24 = vld [vmem:[%s3528_s1 + $0xa8] sm:$0xff] }
   0x7   :  { %1943 = vmatpush3.bf16.msra.mxu1 %v1942_v12  ;;  %1913 = vmatprep.subr.bf16.mxu0 %v1912_v16  ;;  %v1946_v25 = vpack.c.bf16 %v181_v22, %v180_v20  ;;  %v1916_v26 = vpack.c.bf16 %v167_v24, %v166_v23  ;;  %v198_v27 = vld [vmem:[%s3528_s1 + $0x1a0] sm:$0xff]  ;;  %v199_v28 = vld [vmem:[%s3528_s1 + $0x1a8] sm:$0xff]  ;;  %v168_v35 = vld [vmem:[%s3528_s1 + $0xb0] sm:$0xff] }
   0x8   :  { %1945 = vmatprep.subr.bf16.mxu1 %v1944_v17  ;;  %v150_v29 = vld [vmem:[%s3528_s1 + $0x20] sm:$0xff]  ;;  %v1948_v30 = vpack.c.bf16 %v199_v28, %v198_v27  ;;  %v151_v31 = vld [vmem:[%s3528_s1 + $0x28] sm:$0xff]  ;;  %v169_v36 = vld [vmem:[%s3528_s1 + $0xb8] sm:$0xff] }
   0x9   :  { %v182_v32 = vld [vmem:[%s3528_s1 + $0x120] sm:$0xff]  ;;  %v183_v33 = vld [vmem:[%s3528_s1 + $0x128] sm:$0xff]  ;;  %v1918_v34 = vpack.c.bf16 %v151_v31, %v150_v29  ;;  %v200_v37 = vld [vmem:[%s3528_s1 + $0x1b0] sm:$0xff]  ;;  %v1920_v39 = vpack.c.bf16 %v169_v36, %v168_v35 }
   0xa   :  { %1915 = vmatpush3.bf16.msra.mxu0 %v1914_v21  ;;  %v1950_v38 = vpack.c.bf16 %v183_v33, %v182_v32  ;;  %v201_v40 = vld [vmem:[%s3528_s1 + $0x1b8] sm:$0xff]  ;;  %v152_v41 = vld [vmem:[%s3528_s1 + $0x30] sm:$0xff]  ;;  %v170_v46 = vld [vmem:[%s3528_s1 + $0xc0] sm:$0xff] }
   0xb   :  { %1947 = vmatpush3.bf16.msra.mxu1 %v1946_v25  ;;  %1917 = vmatprep.subr.bf16.mxu0 %v1916_v26  ;;  %v153_v42 = vld [vmem:[%s3528_s1 + $0x38] sm:$0xff]  ;;  %v1952_v43 = vpack.c.bf16 %v201_v40, %v200_v37  ;;  %v184_v44 = vld [vmem:[%s3528_s1 + $0x130] sm:$0xff]  ;;  %v171_v47 = vld [vmem:[%s3528_s1 + $0xc8] sm:$0xff] }
   0xc   :  { %1949 = vmatprep.subr.bf16.mxu1 %v1948_v30  ;;  %v185_v45 = vld [vmem:[%s3528_s1 + $0x138] sm:$0xff]  ;;  %v202_v48 = vld [vmem:[%s3528_s1 + $0x1c0] sm:$0xff]  ;;  %v203_v49 = vld [vmem:[%s3528_s1 + $0x1c8] sm:$0xff]  ;;  %v1922_v50 = vpack.c.bf16 %v153_v42, %v152_v41  ;;  %v1924_v52 = vpack.c.bf16 %v171_v47, %v170_v46 }
   0xd   :  { %v1954_v51 = vpack.c.bf16 %v185_v45, %v184_v44  ;;  %v154_v53 = vld [vmem:[%s3528_s1 + $0x40] sm:$0xff]  ;;  %v155_v54 = vld [vmem:[%s3528_s1 + $0x48] sm:$0xff]  ;;  %v1956_v56 = vpack.c.bf16 %v203_v49, %v202_v48  ;;  %v172_v58 = vld [vmem:[%s3528_s1 + $0xd0] sm:$0xff] }
   0xe   :  { %1919 = vmatpush3.bf16.msra.mxu0 %v1918_v34  ;;  %v186_v55 = vld [vmem:[%s3528_s1 + $0x140] sm:$0xff]  ;;  %v187_v57 = vld [vmem:[%s3528_s1 + $0x148] sm:$0xff]  ;;  %v173_v59 = vld [vmem:[%s3528_s1 + $0xd8] sm:$0xff]  ;;  %v1926_v62 = vpack.c.bf16 %v155_v54, %v154_v53 }
   0xf   :  { %1951 = vmatpush3.bf16.msra.mxu1 %v1950_v38  ;;  %1921 = vmatprep.subr.bf16.mxu0 %v1920_v39  ;;  %v204_v60 = vld [vmem:[%s3528_s1 + $0x1d0] sm:$0xff]  ;;  %v205_v61 = vld [vmem:[%s3528_s1 + $0x1d8] sm:$0xff]  ;;  %v1958_v63 = vpack.c.bf16 %v187_v57, %v186_v55  ;;  %v1928_v0 = vpack.c.bf16 %v173_v59, %v172_v58  ;;  %v174_v6 = vld [vmem:[%s3528_s1 + $0xe0] sm:$0xff] }
  0x10   :  { %1953 = vmatprep.subr.bf16.mxu1 %v1952_v43  ;;  %v156_v1 = vld [vmem:[%s3528_s1 + $0x50] sm:$0xff]  ;;  %v157_v2 = vld [vmem:[%s3528_s1 + $0x58] sm:$0xff]  ;;  %v1960_v4 = vpack.c.bf16 %v205_v61, %v204_v60  ;;  %v175_v7 = vld [vmem:[%s3528_s1 + $0xe8] sm:$0xff] }
  0x11   :  { %v188_v3 = vld [vmem:[%s3528_s1 + $0x150] sm:$0xff]  ;;  %v189_v5 = vld [vmem:[%s3528_s1 + $0x158] sm:$0xff]  ;;  %v206_v8 = vld [vmem:[%s3528_s1 + $0x1e0] sm:$0xff]  ;;  %v1930_v10 = vpack.c.bf16 %v157_v2, %v156_v1  ;;  %v1932_v14 = vpack.c.bf16 %v175_v7, %v174_v6 }
  0x12   :  { %1923 = vmatpush3.bf16.msra.mxu0 %v1922_v50  ;;  %v207_v9 = vld [vmem:[%s3528_s1 + $0x1e8] sm:$0xff]  ;;  %v158_v11 = vld [vmem:[%s3528_s1 + $0x60] sm:$0xff]  ;;  %v1962_v13 = vpack.c.bf16 %v189_v5, %v188_v3  ;;  %v176_v19 = vld [vmem:[%s3528_s1 + $0xf0] sm:$0xff] }
  0x13   :  { %1955 = vmatpush3.bf16.msra.mxu1 %v1954_v51  ;;  %1925 = vmatprep.subr.bf16.mxu0 %v1924_v52  ;;  %v159_v12 = vld [vmem:[%s3528_s1 + $0x68] sm:$0xff]  ;;  %v190_v15 = vld [vmem:[%s3528_s1 + $0x160] sm:$0xff]  ;;  %v1964_v18 = vpack.c.bf16 %v207_v9, %v206_v8  ;;  %v177_v20 = vld [vmem:[%s3528_s1 + $0xf8] sm:$0xff] }
  0x14   :  { %1957 = vmatprep.subr.bf16.mxu1 %v1956_v56  ;;  %v191_v16 = vld [vmem:[%s3528_s1 + $0x168] sm:$0xff]  ;;  %v23_v21 = vld [vmem:[%s3529_s0 + $0x18] sm:$0xff]  ;;  %v208_v22 = vld [vmem:[%s3528_s1 + $0x1f0] sm:$0xff]  ;;  %v1934_v24 = vpack.c.bf16 %v159_v12, %v158_v11  ;;  %v1936_v26 = vpack.c.bf16 %v177_v20, %v176_v19 }
  0x15   :  { %v21_v17 = vld [vmem:[%s3529_s0 + $0x8] sm:$0xff]  ;;  %v209_v23 = vld [vmem:[%s3528_s1 + $0x1f8] sm:$0xff]  ;;  %605 = vmatprep.mubr.f32.mxu1 %v23_v21  ;;  %v1966_v25 = vpack.c.bf16 %v191_v16, %v190_v15  ;;  %v160_v27 = vld [vmem:[%s3528_s1 + $0x70] sm:$0xff] }
  0x16   :  { %1927 = vmatpush3.bf16.msra.mxu0 %v1926_v62  ;;  %505 = vmatprep.mubr.f32.mxu0 %v21_v17  ;;  %v161_v28 = vld [vmem:[%s3528_s1 + $0x78] sm:$0xff]  ;;  %v192_v29 = vld [vmem:[%s3528_s1 + $0x170] sm:$0xff]  ;;  %v1968_v30 = vpack.c.bf16 %v209_v23, %v208_v22  ;;  %v226_v32 = vld [vmem:[%s3528_s1 + $0x280] sm:$0xff] }
  0x17   :  { %1959 = vmatpush3.bf16.msra.mxu1 %v1958_v63  ;;  %1929 = vmatprep.subr.bf16.mxu0 %v1928_v0  ;;  %v193_v31 = vld [vmem:[%s3528_s1 + $0x178] sm:$0xff]  ;;  %v227_v33 = vld [vmem:[%s3528_s1 + $0x288] sm:$0xff]  ;;  %v258_v34 = vld [vmem:[%s3528_s1 + $0x380] sm:$0xff]  ;;  %v1938_v36 = vpack.c.bf16 %v161_v28, %v160_v27 }
  0x18   :  { %1961 = vmatprep.subr.bf16.mxu1 %v1960_v4  ;;  %v259_v35 = vld [vmem:[%s3528_s1 + $0x388] sm:$0xff]  ;;  %v1970_v37 = vpack.c.bf16 %v193_v31, %v192_v29  ;;  %v1972_v38 = vpack.c.bf16 %v227_v33, %v226_v32  ;;  %v210_v39 = vld [vmem:[%s3528_s1 + $0x200] sm:$0xff]  ;;  %v228_v44 = vld [vmem:[%s3528_s1 + $0x290] sm:$0xff] }
  0x19   :  { %v211_v40 = vld [vmem:[%s3528_s1 + $0x208] sm:$0xff]  ;;  %v242_v41 = vld [vmem:[%s3528_s1 + $0x300] sm:$0xff]  ;;  %v2004_v42 = vpack.c.bf16 %v259_v35, %v258_v34  ;;  %v229_v45 = vld [vmem:[%s3528_s1 + $0x298] sm:$0xff] }
  0x1a   :  { %1931 = vmatpush3.bf16.msra.mxu0 %v1930_v10  ;;  %v243_v43 = vld [vmem:[%s3528_s1 + $0x308] sm:$0xff]  ;;  %v260_v46 = vld [vmem:[%s3528_s1 + $0x390] sm:$0xff]  ;;  %v261_v47 = vld [vmem:[%s3528_s1 + $0x398] sm:$0xff]  ;;  %v1974_v50 = vpack.c.bf16 %v211_v40, %v210_v39  ;;  %v1976_v52 = vpack.c.bf16 %v229_v45, %v228_v44 }
  0x1b   :  { %1963 = vmatpush3.bf16.msra.mxu1 %v1962_v13  ;;  %1933 = vmatprep.subr.bf16.mxu0 %v1932_v14  ;;  %v20_v48 = vld [vmem:[%s3529_s0] sm:$0xff]  ;;  %v22_v49 = vld [vmem:[%s3529_s0 + $0x10] sm:$0xff]  ;;  %v2006_v51 = vpack.c.bf16 %v243_v43, %v242_v41  ;;  %v213_v54 = vld [vmem:[%s3528_s1 + $0x218] sm:$0xff]  ;;  %v2008_v56 = vpack.c.bf16 %v261_v47, %v260_v46 }
  0x1c   :  { %1965 = vmatprep.subr.bf16.mxu1 %v1964_v18  ;;  %v212_v53 = vld [vmem:[%s3528_s1 + $0x210] sm:$0xff]  ;;  %v245_v57 = vld [vmem:[%s3528_s1 + $0x318] sm:$0xff]  ;;  %v230_v58 = vld [vmem:[%s3528_s1 + $0x2a0] sm:$0xff] }
  0x1d   :  { %v244_v55 = vld [vmem:[%s3528_s1 + $0x310] sm:$0xff]  ;;  %v231_v59 = vld [vmem:[%s3528_s1 + $0x2a8] sm:$0xff]  ;;  %v39_v60 = vld [vmem:[%s3529_s0 + $0x98] sm:$0xff]  ;;  %v1978_v63 = vpack.c.bf16 %v213_v54, %v212_v53 }
  0x1e   :  { %1935 = vmatpush3.bf16.msra.mxu0 %v1934_v24  ;;  %v262_v61 = vld [vmem:[%s3528_s1 + $0x3a0] sm:$0xff]  ;;  %v263_v62 = vld [vmem:[%s3528_s1 + $0x3a8] sm:$0xff]  ;;  %v38_v0 = vld [vmem:[%s3529_s0 + $0x90] sm:$0xff]  ;;  %v2010_v3 = vpack.c.bf16 %v245_v57, %v244_v55  ;;  %v1980_v4 = vpack.c.bf16 %v231_v59, %v230_v58 }
  0x1f   :  { %1967 = vmatpush3.bf16.msra.mxu1 %v1966_v25  ;;  %1937 = vmatprep.subr.bf16.mxu0 %v1936_v26  ;;  %v41_v1 = vld [vmem:[%s3529_s0 + $0xa8] sm:$0xff]  ;;  %v40_v2 = vld [vmem:[%s3529_s0 + $0xa0] sm:$0xff]  ;;  %v2012_v8 = vpack.c.bf16 %v263_v62, %v262_v61  ;;  %v232_v10 = vld [vmem:[%s3528_s1 + $0x2b0] sm:$0xff] }
  0x20   :  { %1969 = vmatprep.subr.bf16.mxu1 %v1968_v30  ;;  %v214_v5 = vld [vmem:[%s3528_s1 + $0x220] sm:$0xff]  ;;  %v215_v6 = vld [vmem:[%s3528_s1 + $0x228] sm:$0xff]  ;;  %v233_v11 = vld [vmem:[%s3528_s1 + $0x2b8] sm:$0xff] }
  0x21   :  { %v246_v7 = vld [vmem:[%s3528_s1 + $0x320] sm:$0xff]  ;;  %v247_v9 = vld [vmem:[%s3528_s1 + $0x328] sm:$0xff]  ;;  %v264_v13 = vld [vmem:[%s3528_s1 + $0x3b0] sm:$0xff]  ;;  %v1982_v15 = vpack.c.bf16 %v215_v6, %v214_v5  ;;  %v1984_v20 = vpack.c.bf16 %v233_v11, %v232_v10 }
  0x22   :  { %1939 = vmatpush3.bf16.msra.mxu0 %v1938_v36  ;;  %v57_v12 = vld [vmem:[%s3529_s0 + $0x128] sm:$0xff]  ;;  %v265_v14 = vld [vmem:[%s3528_s1 + $0x3b8] sm:$0xff]  ;;  %v56_v16 = vld [vmem:[%s3529_s0 + $0x120] sm:$0xff]  ;;  %v2014_v19 = vpack.c.bf16 %v247_v9, %v246_v7 }
  0x23   :  { %1971 = vmatpush3.bf16.msra.mxu1 %v1970_v37  ;;  %1973 = vmatprep.subr.bf16.mxu0 %v1972_v38  ;;  %v59_v17 = vld [vmem:[%s3529_s0 + $0x138] sm:$0xff]  ;;  %v58_v18 = vld [vmem:[%s3529_s0 + $0x130] sm:$0xff]  ;;  %v2016_v24 = vpack.c.bf16 %v265_v14, %v264_v13  ;;  %v234_v26 = vld [vmem:[%s3528_s1 + $0x2c0] sm:$0xff] }
  0x24   :  { %2005 = vmatprep.subr.bf16.mxu1 %v2004_v42  ;;  %v216_v21 = vld [vmem:[%s3528_s1 + $0x230] sm:$0xff]  ;;  %v217_v22 = vld [vmem:[%s3528_s1 + $0x238] sm:$0xff]  ;;  %v235_v27 = vld [vmem:[%s3528_s1 + $0x2c8] sm:$0xff] }
  0x25   :  { %506 = vmatmul.mubr.f32.vlgmr.msra.gmra.mrb[0].mxu0 %v20_v48  ;;  %v248_v23 = vld [vmem:[%s3528_s1 + $0x330] sm:$0xff]  ;;  %v249_v25 = vld [vmem:[%s3528_s1 + $0x338] sm:$0xff]  ;;  %v266_v29 = vld [vmem:[%s3528_s1 + $0x3c0] sm:$0xff]  ;;  %v1986_v31 = vpack.c.bf16 %v217_v22, %v216_v21  ;;  %v1988_v36 = vpack.c.bf16 %v235_v27, %v234_v26 }
  0x26   :  { %606 = vmatmul.mubr.f32.vlgmr.msra.gmra.mrb[0].mxu1 %v22_v49  ;;  %1975 = vmatpush3.bf16.msra.mxu0 %v1974_v50  ;;  %v75_v28 = vld [vmem:[%s3529_s0 + $0x1b8] sm:$0xff]  ;;  %v267_v30 = vld [vmem:[%s3528_s1 + $0x3c8] sm:$0xff]  ;;  %v74_v32 = vld [vmem:[%s3529_s0 + $0x1b0] sm:$0xff]  ;;  %v2018_v35 = vpack.c.bf16 %v249_v25, %v248_v23 }
  0x27   :  { %2007 = vmatpush3.bf16.msra.mxu1 %v2006_v51  ;;  %1977 = vmatprep.subr.bf16.mxu0 %v1976_v52  ;;  %v77_v33 = vld [vmem:[%s3529_s0 + $0x1c8] sm:$0xff]  ;;  %v76_v34 = vld [vmem:[%s3529_s0 + $0x1c0] sm:$0xff]  ;;  %v2020_v40 = vpack.c.bf16 %v267_v30, %v266_v29  ;;  %v236_v42 = vld [vmem:[%s3528_s1 + $0x2d0] sm:$0xff] }
  0x28   :  { %2009 = vmatprep.subr.bf16.mxu1 %v2008_v56  ;;  %510 = vmatprep.mubr.f32.mxu0 %v39_v60  ;;  %v218_v37 = vld [vmem:[%s3528_s1 + $0x240] sm:$0xff]  ;;  %v219_v38 = vld [vmem:[%s3528_s1 + $0x248] sm:$0xff]  ;;  %v237_v43 = vld [vmem:[%s3528_s1 + $0x2d8] sm:$0xff] }
  0x29   :  { %511 = vmatmul.mubr.f32.gmra.mrb[2].mxu0 %v38_v0  ;;  %610 = vmatprep.mubr.f32.mxu1 %v41_v1  ;;  %v250_v39 = vld [vmem:[%s3528_s1 + $0x340] sm:$0xff]  ;;  %v251_v41 = vld [vmem:[%s3528_s1 + $0x348] sm:$0xff]  ;;  %v268_v45 = vld [vmem:[%s3528_s1 + $0x3d0] sm:$0xff]  ;;  %v1990_v47 = vpack.c.bf16 %v219_v38, %v218_v37  ;;  %v1992_v52 = vpack.c.bf16 %v237_v43, %v236_v42 }
  0x2a   :  { %1979 = vmatpush3.bf16.msra.mxu0 %v1978_v63  ;;  %611 = vmatmul.mubr.f32.gmra.mrb[2].mxu1 %v40_v2  ;;  %v93_v44 = vld [vmem:[%s3529_s0 + $0x248] sm:$0xff]  ;;  %v269_v46 = vld [vmem:[%s3528_s1 + $0x3d8] sm:$0xff]  ;;  %v92_v48 = vld [vmem:[%s3529_s0 + $0x240] sm:$0xff]  ;;  %v2022_v51 = vpack.c.bf16 %v251_v41, %v250_v39 }
  0x2b   :  { %2011 = vmatpush3.bf16.msra.mxu1 %v2010_v3  ;;  %1981 = vmatprep.subr.bf16.mxu0 %v1980_v4  ;;  %v95_v49 = vld [vmem:[%s3529_s0 + $0x258] sm:$0xff]  ;;  %v94_v50 = vld [vmem:[%s3529_s0 + $0x250] sm:$0xff]  ;;  %v2024_v56 = vpack.c.bf16 %v269_v46, %v268_v45  ;;  %v238_v58 = vld [vmem:[%s3528_s1 + $0x2e0] sm:$0xff] }
  0x2c   :  { %2013 = vmatprep.subr.bf16.mxu1 %v2012_v8  ;;  %515 = vmatprep.mubr.f32.mxu0 %v57_v12  ;;  %v220_v53 = vld [vmem:[%s3528_s1 + $0x250] sm:$0xff]  ;;  %v221_v54 = vld [vmem:[%s3528_s1 + $0x258] sm:$0xff]  ;;  %v239_v59 = vld [vmem:[%s3528_s1 + $0x2e8] sm:$0xff] }
  0x2d   :  { %516 = vmatmul.mubr.f32.gmra.mrb[4].mxu0 %v56_v16  ;;  %615 = vmatprep.mubr.f32.mxu1 %v59_v17  ;;  %v252_v55 = vld [vmem:[%s3528_s1 + $0x350] sm:$0xff]  ;;  %v253_v57 = vld [vmem:[%s3528_s1 + $0x358] sm:$0xff]  ;;  %v270_v61 = vld [vmem:[%s3528_s1 + $0x3e0] sm:$0xff]  ;;  %v1994_v63 = vpack.c.bf16 %v221_v54, %v220_v53  ;;  %v1996_v4 = vpack.c.bf16 %v239_v59, %v238_v58 }
  0x2e   :  { %1983 = vmatpush3.bf16.msra.mxu0 %v1982_v15  ;;  %616 = vmatmul.mubr.f32.gmra.mrb[4].mxu1 %v58_v18  ;;  %v111_v60 = vld [vmem:[%s3529_s0 + $0x2d8] sm:$0xff]  ;;  %v271_v62 = vld [vmem:[%s3528_s1 + $0x3e8] sm:$0xff]  ;;  %v110_v0 = vld [vmem:[%s3529_s0 + $0x2d0] sm:$0xff]  ;;  %v2026_v3 = vpack.c.bf16 %v253_v57, %v252_v55 }
  0x2f   :  { %2015 = vmatpush3.bf16.msra.mxu1 %v2014_v19  ;;  %1985 = vmatprep.subr.bf16.mxu0 %v1984_v20  ;;  %v113_v1 = vld [vmem:[%s3529_s0 + $0x2e8] sm:$0xff]  ;;  %v112_v2 = vld [vmem:[%s3529_s0 + $0x2e0] sm:$0xff]  ;;  %v2028_v8 = vpack.c.bf16 %v271_v62, %v270_v61  ;;  %v240_v10 = vld [vmem:[%s3528_s1 + $0x2f0] sm:$0xff] }
  0x30   :  { %2017 = vmatprep.subr.bf16.mxu1 %v2016_v24  ;;  %520 = vmatprep.mubr.f32.mxu0 %v75_v28  ;;  %v222_v5 = vld [vmem:[%s3528_s1 + $0x260] sm:$0xff]  ;;  %v223_v6 = vld [vmem:[%s3528_s1 + $0x268] sm:$0xff]  ;;  %v241_v11 = vld [vmem:[%s3528_s1 + $0x2f8] sm:$0xff] }
  0x31   :  { %521 = vmatmul.mubr.f32.gmra.mrb[6].mxu0 %v74_v32  ;;  %620 = vmatprep.mubr.f32.mxu1 %v77_v33  ;;  %v254_v7 = vld [vmem:[%s3528_s1 + $0x360] sm:$0xff]  ;;  %v255_v9 = vld [vmem:[%s3528_s1 + $0x368] sm:$0xff]  ;;  %v272_v13 = vld [vmem:[%s3528_s1 + $0x3f0] sm:$0xff]  ;;  %v1998_v15 = vpack.c.bf16 %v223_v6, %v222_v5  ;;  %v2000_v20 = vpack.c.bf16 %v241_v11, %v240_v10 }
  0x32   :  { %1987 = vmatpush3.bf16.msra.mxu0 %v1986_v31  ;;  %621 = vmatmul.mubr.f32.gmra.mrb[6].mxu1 %v76_v34  ;;  %v129_v12 = vld [vmem:[%s3529_s0 + $0x368] sm:$0x3]  ;;  %v273_v14 = vld [vmem:[%s3528_s1 + $0x3f8] sm:$0xff]  ;;  %v128_v16 = vld [vmem:[%s3529_s0 + $0x360] sm:$0x3]  ;;  %v2030_v19 = vpack.c.bf16 %v255_v9, %v254_v7 }
  0x33   :  { %2019 = vmatpush3.bf16.msra.mxu1 %v2018_v35  ;;  %1989 = vmatprep.subr.bf16.mxu0 %v1988_v36  ;;  %v131_v17 = vld [vmem:[%s3529_s0 + $0x378] sm:$0x3]  ;;  %v130_v18 = vld [vmem:[%s3529_s0 + $0x370] sm:$0x3]  ;;  %v2032_v24 = vpack.c.bf16 %v273_v14, %v272_v13  ;;  %v290_v26 = vld [vmem:[%s3528_s1 + $0x480] sm:$0xff] }
  0x34   :  { %2021 = vmatprep.subr.bf16.mxu1 %v2020_v40  ;;  %525 = vmatprep.mubr.f32.mxu0 %v93_v44  ;;  %v224_v21 = vld [vmem:[%s3528_s1 + $0x270] sm:$0xff]  ;;  %v225_v22 = vld [vmem:[%s3528_s1 + $0x278] sm:$0xff]  ;;  %v291_v27 = vld [vmem:[%s3528_s1 + $0x488] sm:$0xff] }
  0x35   :  { %526 = vmatmul.mubr.f32.gmra.mrb[8].mxu0 %v92_v48  ;;  %625 = vmatprep.mubr.f32.mxu1 %v95_v49  ;;  %v256_v23 = vld [vmem:[%s3528_s1 + $0x370] sm:$0xff]  ;;  %v257_v25 = vld [vmem:[%s3528_s1 + $0x378] sm:$0xff]  ;;  %v25_v28 = vld [vmem:[%s3529_s0 + $0x28] sm:$0xff]  ;;  %v2002_v31 = vpack.c.bf16 %v225_v22, %v224_v21  ;;  %v2036_v34 = vpack.c.bf16 %v291_v27, %v290_v26 }
  0x36   :  { %1991 = vmatpush3.bf16.msra.mxu0 %v1990_v47  ;;  %626 = vmatmul.mubr.f32.gmra.mrb[8].mxu1 %v94_v50  ;;  %v322_v29 = vld [vmem:[%s3528_s1 + $0x580] sm:$0xff]  ;;  %v323_v30 = vld [vmem:[%s3528_s1 + $0x588] sm:$0xff]  ;;  %v27_v32 = vld [vmem:[%s3529_s0 + $0x38] sm:$0xff]  ;;  %v2034_v33 = vpack.c.bf16 %v257_v25, %v256_v23 }
  0x37   :  { %2023 = vmatpush3.bf16.msra.mxu1 %v2022_v51  ;;  %1993 = vmatprep.subr.bf16.mxu0 %v1992_v52  ;;  %v274_v35 = vld [vmem:[%s3528_s1 + $0x400] sm:$0xff]  ;;  %v275_v36 = vld [vmem:[%s3528_s1 + $0x408] sm:$0xff]  ;;  %v2068_v37 = vpack.c.bf16 %v323_v30, %v322_v29  ;;  %v292_v40 = vld [vmem:[%s3528_s1 + $0x490] sm:$0xff] }
  0x38   :  { %2025 = vmatprep.subr.bf16.mxu1 %v2024_v56  ;;  %530 = vmatprep.mubr.f32.mxu0 %v111_v60  ;;  %v306_v38 = vld [vmem:[%s3528_s1 + $0x500] sm:$0xff]  ;;  %v307_v39 = vld [vmem:[%s3528_s1 + $0x508] sm:$0xff]  ;;  %v293_v41 = vld [vmem:[%s3528_s1 + $0x498] sm:$0xff]  ;;  %v2038_v46 = vpack.c.bf16 %v275_v36, %v274_v35 }
  0x39   :  { %531 = vmatmul.mubr.f32.gmra.mrb[10].mxu0 %v110_v0  ;;  %630 = vmatprep.mubr.f32.mxu1 %v113_v1  ;;  %v324_v42 = vld [vmem:[%s3528_s1 + $0x590] sm:$0xff]  ;;  %v325_v43 = vld [vmem:[%s3528_s1 + $0x598] sm:$0xff]  ;;  %v24_v44 = vld [vmem:[%s3529_s0 + $0x20] sm:$0xff]  ;;  %v2070_v47 = vpack.c.bf16 %v307_v39, %v306_v38  ;;  %v2040_v51 = vpack.c.bf16 %v293_v41, %v292_v40 }
  0x3a   :  { %1995 = vmatpush3.bf16.msra.mxu0 %v1994_v63  ;;  %631 = vmatmul.mubr.f32.gmra.mrb[10].mxu1 %v112_v2  ;;  %v26_v45 = vld [vmem:[%s3529_s0 + $0x30] sm:$0xff]  ;;  %v43_v48 = vld [vmem:[%s3529_s0 + $0xb8] sm:$0xff]  ;;  %v2072_v52 = vpack.c.bf16 %v325_v43, %v324_v42  ;;  %v294_v55 = vld [vmem:[%s3528_s1 + $0x4a0] sm:$0xff] }
  0x3b   :  { %2027 = vmatpush3.bf16.msra.mxu1 %v2026_v3  ;;  %1997 = vmatprep.subr.bf16.mxu0 %v1996_v4  ;;  %v276_v49 = vld [vmem:[%s3528_s1 + $0x410] sm:$0xff]  ;;  %v277_v50 = vld [vmem:[%s3528_s1 + $0x418] sm:$0xff]  ;;  %v295_v56 = vld [vmem:[%s3528_s1 + $0x4a8] sm:$0xff] }
  0x3c   :  { %2029 = vmatprep.subr.bf16.mxu1 %v2028_v8  ;;  %535 = vmatprep.mubr.f32.mxu0 %v129_v12  ;;  %v308_v53 = vld [vmem:[%s3528_s1 + $0x510] sm:$0xff]  ;;  %v309_v54 = vld [vmem:[%s3528_s1 + $0x518] sm:$0xff]  ;;  %v326_v57 = vld [vmem:[%s3528_s1 + $0x5a0] sm:$0xff]  ;;  %v2042_v61 = vpack.c.bf16 %v277_v50, %v276_v49  ;;  %v2044_v3 = vpack.c.bf16 %v295_v56, %v294_v55 }
  0x3d   :  { %536 = vmatmul.mubr.f32.gmra.mrb[12].mxu0 %v128_v16  ;;  %635 = vmatprep.mubr.f32.mxu1 %v131_v17  ;;  %v327_v58 = vld [vmem:[%s3528_s1 + $0x5a8] sm:$0xff]  ;;  %v42_v59 = vld [vmem:[%s3529_s0 + $0xb0] sm:$0xff]  ;;  %v44_v62 = vld [vmem:[%s3529_s0 + $0xc0] sm:$0xff]  ;;  %v2074_v63 = vpack.c.bf16 %v309_v54, %v308_v53 }
  0x3e   :  { %1999 = vmatpush3.bf16.msra.mxu0 %v1998_v15  ;;  %636 = vmatmul.mubr.f32.gmra.mrb[12].mxu1 %v130_v18  ;;  %v45_v60 = vld [vmem:[%s3529_s0 + $0xc8] sm:$0xff]  ;;  %v278_v1 = vld [vmem:[%s3528_s1 + $0x420] sm:$0xff]  ;;  %v2076_v4 = vpack.c.bf16 %v327_v58, %v326_v57  ;;  %v296_v7 = vld [vmem:[%s3528_s1 + $0x4b0] sm:$0xff] }
  0x3f   :  { %2031 = vmatpush3.bf16.msra.mxu1 %v2030_v19  ;;  %2001 = vmatprep.subr.bf16.mxu0 %v2000_v20  ;;  %v61_v0 = vld [vmem:[%s3529_s0 + $0x148] sm:$0xff]  ;;  %v310_v5 = vld [vmem:[%s3528_s1 + $0x520] sm:$0xff]  ;;  %v297_v8 = vld [vmem:[%s3528_s1 + $0x4b8] sm:$0xff] }
  0x40   :  { %2033 = vmatprep.subr.bf16.mxu1 %v2032_v24  ;;  %705 = vmatprep.mubr.f32.mxu0 %v25_v28  ;;  %v279_v2 = vld [vmem:[%s3528_s1 + $0x428] sm:$0xff]  ;;  %v328_v9 = vld [vmem:[%s3528_s1 + $0x5b0] sm:$0xff]  ;;  %v329_v10 = vld [vmem:[%s3528_s1 + $0x5b8] sm:$0xff]  ;;  %v2048_v19 = vpack.c.bf16 %v297_v8, %v296_v7 }
  0x41   :  { %805 = vmatprep.mubr.f32.mxu1 %v27_v32  ;;  %v311_v6 = vld [vmem:[%s3528_s1 + $0x528] sm:$0xff]  ;;  %v60_v11 = vld [vmem:[%s3529_s0 + $0x140] sm:$0xff]  ;;  %v63_v12 = vld [vmem:[%s3529_s0 + $0x158] sm:$0xff]  ;;  %v2046_v13 = vpack.c.bf16 %v279_v2, %v278_v1  ;;  %v2080_v20 = vpack.c.bf16 %v329_v10, %v328_v9 }
  0x42   :  { %2003 = vmatpush3.bf16.msra.mxu0 %v2002_v31  ;;  %v62_v14 = vld [vmem:[%s3529_s0 + $0x150] sm:$0xff]  ;;  %v2078_v15 = vpack.c.bf16 %v311_v6, %v310_v5  ;;  %v79_v16 = vld [vmem:[%s3529_s0 + $0x1d8] sm:$0xff]  ;;  %v298_v23 = vld [vmem:[%s3528_s1 + $0x4c0] sm:$0xff] }
  0x43   :  { %2035 = vmatpush3.bf16.msra.mxu1 %v2034_v33  ;;  %2037 = vmatprep.subr.bf16.mxu0 %v2036_v34  ;;  %v280_v17 = vld [vmem:[%s3528_s1 + $0x430] sm:$0xff]  ;;  %v281_v18 = vld [vmem:[%s3528_s1 + $0x438] sm:$0xff]  ;;  %v299_v24 = vld [vmem:[%s3528_s1 + $0x4c8] sm:$0xff] }
  0x44   :  { %2069 = vmatprep.subr.bf16.mxu1 %v2068_v37  ;;  %v312_v21 = vld [vmem:[%s3528_s1 + $0x530] sm:$0xff]  ;;  %v313_v22 = vld [vmem:[%s3528_s1 + $0x538] sm:$0xff]  ;;  %v330_v25 = vld [vmem:[%s3528_s1 + $0x5c0] sm:$0xff]  ;;  %v2050_v29 = vpack.c.bf16 %v281_v18, %v280_v17  ;;  %v2052_v35 = vpack.c.bf16 %v299_v24, %v298_v23 }
  0x45   :  { %706 = vmatmul.mubr.f32.vlgmr.msra.gmra.mrb[14].mxu0 %v24_v44  ;;  %v331_v26 = vld [vmem:[%s3528_s1 + $0x5c8] sm:$0xff]  ;;  %v78_v27 = vld [vmem:[%s3529_s0 + $0x1d0] sm:$0xff]  ;;  %v80_v30 = vld [vmem:[%s3529_s0 + $0x1e0] sm:$0xff]  ;;  %v2082_v31 = vpack.c.bf16 %v313_v22, %v312_v21 }
  0x46   :  { %806 = vmatmul.mubr.f32.vlgmr.msra.gmra.mrb[14].mxu1 %v26_v45  ;;  %2039 = vmatpush3.bf16.msra.mxu0 %v2038_v46  ;;  %v81_v28 = vld [vmem:[%s3529_s0 + $0x1e8] sm:$0xff]  ;;  %v282_v33 = vld [vmem:[%s3528_s1 + $0x440] sm:$0xff]  ;;  %v2084_v36 = vpack.c.bf16 %v331_v26, %v330_v25  ;;  %v300_v39 = vld [vmem:[%s3528_s1 + $0x4d0] sm:$0xff] }
  0x47   :  { %2071 = vmatpush3.bf16.msra.mxu1 %v2070_v47  ;;  %710 = vmatprep.mubr.f32.mxu0 %v43_v48  ;;  %v97_v32 = vld [vmem:[%s3529_s0 + $0x268] sm:$0xff]  ;;  %v314_v37 = vld [vmem:[%s3528_s1 + $0x540] sm:$0xff]  ;;  %v301_v40 = vld [vmem:[%s3528_s1 + $0x4d8] sm:$0xff] }
  0x48   :  { %2041 = vmatprep.subr.bf16.mxu0 %v2040_v51  ;;  %2073 = vmatprep.subr.bf16.mxu1 %v2072_v52  ;;  %v283_v34 = vld [vmem:[%s3528_s1 + $0x448] sm:$0xff]  ;;  %v332_v41 = vld [vmem:[%s3528_s1 + $0x5d0] sm:$0xff]  ;;  %v333_v42 = vld [vmem:[%s3528_s1 + $0x5d8] sm:$0xff]  ;;  %v2056_v52 = vpack.c.bf16 %v301_v40, %v300_v39 }
  0x49   :  { %711 = vmatmul.mubr.f32.gmra.mrb[16].mxu0 %v42_v59  ;;  %810 = vmatprep.mubr.f32.mxu1 %v45_v60  ;;  %v315_v38 = vld [vmem:[%s3528_s1 + $0x548] sm:$0xff]  ;;  %v96_v43 = vld [vmem:[%s3529_s0 + $0x260] sm:$0xff]  ;;  %v99_v44 = vld [vmem:[%s3529_s0 + $0x278] sm:$0xff]  ;;  %v2054_v45 = vpack.c.bf16 %v283_v34, %v282_v33  ;;  %v2088_v53 = vpack.c.bf16 %v333_v42, %v332_v41 }
  0x4a   :  { %2043 = vmatpush3.bf16.msra.mxu0 %v2042_v61  ;;  %811 = vmatmul.mubr.f32.gmra.mrb[16].mxu1 %v44_v62  ;;  %v98_v46 = vld [vmem:[%s3529_s0 + $0x270] sm:$0xff]  ;;  %v2086_v47 = vpack.c.bf16 %v315_v38, %v314_v37  ;;  %v115_v48 = vld [vmem:[%s3529_s0 + $0x2f8] sm:$0xff]  ;;  %v302_v56 = vld [vmem:[%s3528_s1 + $0x4e0] sm:$0xff] }
  0x4b   :  { %2075 = vmatpush3.bf16.msra.mxu1 %v2074_v63  ;;  %715 = vmatprep.mubr.f32.mxu0 %v61_v0  ;;  %v284_v49 = vld [vmem:[%s3528_s1 + $0x450] sm:$0xff]  ;;  %v285_v50 = vld [vmem:[%s3528_s1 + $0x458] sm:$0xff]  ;;  %v303_v57 = vld [vmem:[%s3528_s1 + $0x4e8] sm:$0xff] }
  0x4c   :  { %2045 = vmatprep.subr.bf16.mxu0 %v2044_v3  ;;  %2077 = vmatprep.subr.bf16.mxu1 %v2076_v4  ;;  %v114_v51 = vld [vmem:[%s3529_s0 + $0x2f0] sm:$0xff]  ;;  %v317_v55 = vld [vmem:[%s3528_s1 + $0x558] sm:$0xff]  ;;  %v334_v58 = vld [vmem:[%s3528_s1 + $0x5e0] sm:$0xff]  ;;  %v2058_v61 = vpack.c.bf16 %v285_v50, %v284_v49  ;;  %v2060_v4 = vpack.c.bf16 %v303_v57, %v302_v56 }
  0x4d   :  { %716 = vmatmul.mubr.f32.gmra.mrb[18].mxu0 %v60_v11  ;;  %815 = vmatprep.mubr.f32.mxu1 %v63_v12  ;;  %v316_v54 = vld [vmem:[%s3528_s1 + $0x550] sm:$0xff]  ;;  %v335_v59 = vld [vmem:[%s3528_s1 + $0x5e8] sm:$0xff]  ;;  %v116_v62 = vld [vmem:[%s3529_s0 + $0x300] sm:$0xff] }
  0x4e   :  { %2047 = vmatpush3.bf16.msra.mxu0 %v2046_v13  ;;  %816 = vmatmul.mubr.f32.gmra.mrb[18].mxu1 %v62_v14  ;;  %v117_v60 = vld [vmem:[%s3529_s0 + $0x308] sm:$0xff]  ;;  %v2090_v0 = vpack.c.bf16 %v317_v55, %v316_v54  ;;  %v286_v1 = vld [vmem:[%s3528_s1 + $0x460] sm:$0xff]  ;;  %v2092_v5 = vpack.c.bf16 %v335_v59, %v334_v58  ;;  %v304_v7 = vld [vmem:[%s3528_s1 + $0x4f0] sm:$0xff] }
  0x4f   :  { %2079 = vmatpush3.bf16.msra.mxu1 %v2078_v15  ;;  %720 = vmatprep.mubr.f32.mxu0 %v79_v16  ;;  %v133_v63 = vld [vmem:[%s3529_s0 + $0x388] sm:$0x3]  ;;  %v318_v3 = vld [vmem:[%s3528_s1 + $0x560] sm:$0xff]  ;;  %v305_v8 = vld [vmem:[%s3528_s1 + $0x4f8] sm:$0xff] }
  0x50   :  { %2049 = vmatprep.subr.bf16.mxu0 %v2048_v19  ;;  %2081 = vmatprep.subr.bf16.mxu1 %v2080_v20  ;;  %v287_v2 = vld [vmem:[%s3528_s1 + $0x468] sm:$0xff]  ;;  %v336_v9 = vld [vmem:[%s3528_s1 + $0x5f0] sm:$0xff]  ;;  %v337_v10 = vld [vmem:[%s3528_s1 + $0x5f8] sm:$0xff]  ;;  %v2064_v16 = vpack.c.bf16 %v305_v8, %v304_v7 }
  0x51   :  { %721 = vmatmul.mubr.f32.gmra.mrb[20].mxu0 %v78_v27  ;;  %820 = vmatprep.mubr.f32.mxu1 %v81_v28  ;;  %v319_v6 = vld [vmem:[%s3528_s1 + $0x568] sm:$0xff]  ;;  %v132_v11 = vld [vmem:[%s3529_s0 + $0x380] sm:$0x3]  ;;  %v135_v12 = vld [vmem:[%s3529_s0 + $0x398] sm:$0x3]  ;;  %v2062_v13 = vpack.c.bf16 %v287_v2, %v286_v1  ;;  %v2096_v20 = vpack.c.bf16 %v337_v10, %v336_v9 }
  0x52   :  { %2051 = vmatpush3.bf16.msra.mxu0 %v2050_v29  ;;  %821 = vmatmul.mubr.f32.gmra.mrb[20].mxu1 %v80_v30  ;;  %v134_v14 = vld [vmem:[%s3529_s0 + $0x390] sm:$0x3]  ;;  %v2094_v15 = vpack.c.bf16 %v319_v6, %v318_v3  ;;  %v289_v18 = vld [vmem:[%s3528_s1 + $0x478] sm:$0xff]  ;;  %v354_v22 = vld [vmem:[%s3528_s1 + $0x680] sm:$0xff] }
  0x53   :  { %2083 = vmatpush3.bf16.msra.mxu1 %v2082_v31  ;;  %725 = vmatprep.mubr.f32.mxu0 %v97_v32  ;;  %v288_v17 = vld [vmem:[%s3528_s1 + $0x470] sm:$0xff]  ;;  %v321_v21 = vld [vmem:[%s3528_s1 + $0x578] sm:$0xff]  ;;  %v355_v23 = vld [vmem:[%s3528_s1 + $0x688] sm:$0xff] }
  0x54   :  { %2053 = vmatprep.subr.bf16.mxu0 %v2052_v35  ;;  %2085 = vmatprep.subr.bf16.mxu1 %v2084_v36  ;;  %v320_v19 = vld [vmem:[%s3528_s1 + $0x570] sm:$0xff]  ;;  %v29_v24 = vld [vmem:[%s3529_s0 + $0x48] sm:$0xff]  ;;  %v386_v25 = vld [vmem:[%s3528_s1 + $0x780] sm:$0xff]  ;;  %v2066_v27 = vpack.c.bf16 %v289_v18, %v288_v17  ;;  %v2100_v30 = vpack.c.bf16 %v355_v23, %v354_v22 }
  0x55   :  { %726 = vmatmul.mubr.f32.gmra.mrb[22].mxu0 %v96_v43  ;;  %825 = vmatprep.mubr.f32.mxu1 %v99_v44  ;;  %v387_v26 = vld [vmem:[%s3528_s1 + $0x788] sm:$0xff]  ;;  %v31_v28 = vld [vmem:[%s3529_s0 + $0x58] sm:$0xff]  ;;  %v2098_v29 = vpack.c.bf16 %v321_v21, %v320_v19  ;;  %v338_v31 = vld [vmem:[%s3528_s1 + $0x600] sm:$0xff] }
  0x56   :  { %2055 = vmatpush3.bf16.msra.mxu0 %v2054_v45  ;;  %826 = vmatmul.mubr.f32.gmra.mrb[22].mxu1 %v98_v46  ;;  %v339_v32 = vld [vmem:[%s3528_s1 + $0x608] sm:$0xff]  ;;  %v2132_v33 = vpack.c.bf16 %v387_v26, %v386_v25  ;;  %v370_v34 = vld [vmem:[%s3528_s1 + $0x700] sm:$0xff]  ;;  %v356_v36 = vld [vmem:[%s3528_s1 + $0x690] sm:$0xff] }
  0x57   :  { %2087 = vmatpush3.bf16.msra.mxu1 %v2086_v47  ;;  %730 = vmatprep.mubr.f32.mxu0 %v115_v48  ;;  %v371_v35 = vld [vmem:[%s3528_s1 + $0x708] sm:$0xff]  ;;  %v357_v37 = vld [vmem:[%s3528_s1 + $0x698] sm:$0xff]  ;;  %v388_v38 = vld [vmem:[%s3528_s1 + $0x790] sm:$0xff]  ;;  %v2102_v42 = vpack.c.bf16 %v339_v32, %v338_v31 }
  0x58   :  { %2057 = vmatprep.subr.bf16.mxu0 %v2056_v52  ;;  %2089 = vmatprep.subr.bf16.mxu1 %v2088_v53  ;;  %v389_v39 = vld [vmem:[%s3528_s1 + $0x798] sm:$0xff]  ;;  %v28_v40 = vld [vmem:[%s3529_s0 + $0x40] sm:$0xff]  ;;  %v30_v41 = vld [vmem:[%s3529_s0 + $0x50] sm:$0xff]  ;;  %v2134_v43 = vpack.c.bf16 %v371_v35, %v370_v34  ;;  %v2104_v47 = vpack.c.bf16 %v357_v37, %v356_v36 }
  0x59   :  { %731 = vmatmul.mubr.f32.gmra.mrb[24].mxu0 %v114_v51  ;;  %830 = vmatprep.mubr.f32.mxu1 %v117_v60  ;;  %v47_v44 = vld [vmem:[%s3529_s0 + $0xd8] sm:$0xff]  ;;  %v340_v45 = vld [vmem:[%s3528_s1 + $0x610] sm:$0xff]  ;;  %v2136_v48 = vpack.c.bf16 %v389_v39, %v388_v38  ;;  %v358_v51 = vld [vmem:[%s3528_s1 + $0x6a0] sm:$0xff] }
  0x5a   :  { %2059 = vmatpush3.bf16.msra.mxu0 %v2058_v61  ;;  %831 = vmatmul.mubr.f32.gmra.mrb[24].mxu1 %v116_v62  ;;  %v341_v46 = vld [vmem:[%s3528_s1 + $0x618] sm:$0xff]  ;;  %v372_v49 = vld [vmem:[%s3528_s1 + $0x710] sm:$0xff]  ;;  %v359_v52 = vld [vmem:[%s3528_s1 + $0x6a8] sm:$0xff] }
  0x5b   :  { %2091 = vmatpush3.bf16.msra.mxu1 %v2090_v0  ;;  %735 = vmatprep.mubr.f32.mxu0 %v133_v63  ;;  %v373_v50 = vld [vmem:[%s3528_s1 + $0x718] sm:$0xff]  ;;  %v390_v53 = vld [vmem:[%s3528_s1 + $0x7a0] sm:$0xff]  ;;  %v391_v54 = vld [vmem:[%s3528_s1 + $0x7a8] sm:$0xff]  ;;  %v2106_v57 = vpack.c.bf16 %v341_v46, %v340_v45  ;;  %v2108_v63 = vpack.c.bf16 %v359_v52, %v358_v51 }
  0x5c   :  { %2061 = vmatprep.subr.bf16.mxu0 %v2060_v4  ;;  %2093 = vmatprep.subr.bf16.mxu1 %v2092_v5  ;;  %v46_v55 = vld [vmem:[%s3529_s0 + $0xd0] sm:$0xff]  ;;  %v49_v56 = vld [vmem:[%s3529_s0 + $0xe8] sm:$0xff]  ;;  %v48_v58 = vld [vmem:[%s3529_s0 + $0xe0] sm:$0xff]  ;;  %v2138_v59 = vpack.c.bf16 %v373_v50, %v372_v49  ;;  %v2140_v0 = vpack.c.bf16 %v391_v54, %v390_v53 }
  0x5d   :  { %736 = vmatmul.mubr.f32.gmra.mrb[26].mxu0 %v132_v11  ;;  %835 = vmatprep.mubr.f32.mxu1 %v135_v12  ;;  %v65_v60 = vld [vmem:[%s3529_s0 + $0x168] sm:$0xff]  ;;  %v342_v61 = vld [vmem:[%s3528_s1 + $0x620] sm:$0xff]  ;;  %v360_v3 = vld [vmem:[%s3528_s1 + $0x6b0] sm:$0xff] }
  0x5e   :  { %2063 = vmatpush3.bf16.msra.mxu0 %v2062_v13  ;;  %836 = vmatmul.mubr.f32.gmra.mrb[26].mxu1 %v134_v14  ;;  %v343_v62 = vld [vmem:[%s3528_s1 + $0x628] sm:$0xff]  ;;  %v374_v1 = vld [vmem:[%s3528_s1 + $0x720] sm:$0xff]  ;;  %v361_v4 = vld [vmem:[%s3528_s1 + $0x6b8] sm:$0xff] }
  0x5f   :  { %2095 = vmatpush3.bf16.msra.mxu1 %v2094_v15  ;;  %2065 = vmatprep.subr.bf16.mxu0 %v2064_v16  ;;  %v375_v2 = vld [vmem:[%s3528_s1 + $0x728] sm:$0xff]  ;;  %v392_v5 = vld [vmem:[%s3528_s1 + $0x7b0] sm:$0xff]  ;;  %v393_v6 = vld [vmem:[%s3528_s1 + $0x7b8] sm:$0xff]  ;;  %v2110_v9 = vpack.c.bf16 %v343_v62, %v342_v61  ;;  %v2112_v15 = vpack.c.bf16 %v361_v4, %v360_v3 }
  0x60   :  { %2097 = vmatprep.subr.bf16.mxu1 %v2096_v20  ;;  %905 = vmatprep.mubr.f32.mxu0 %v29_v24  ;;  %v64_v7 = vld [vmem:[%s3529_s0 + $0x160] sm:$0xff]  ;;  %v67_v8 = vld [vmem:[%s3529_s0 + $0x178] sm:$0xff]  ;;  %v66_v10 = vld [vmem:[%s3529_s0 + $0x170] sm:$0xff]  ;;  %v2142_v11 = vpack.c.bf16 %v375_v2, %v374_v1  ;;  %v2144_v16 = vpack.c.bf16 %v393_v6, %v392_v5 }
  0x61   :  { %1005 = vmatprep.mubr.f32.mxu1 %v31_v28  ;;  %v83_v12 = vld [vmem:[%s3529_s0 + $0x1f8] sm:$0xff]  ;;  %v344_v13 = vld [vmem:[%s3528_s1 + $0x630] sm:$0xff]  ;;  %v362_v19 = vld [vmem:[%s3528_s1 + $0x6c0] sm:$0xff] }
  0x62   :  { %2067 = vmatpush3.bf16.msra.mxu0 %v2066_v27  ;;  %v345_v14 = vld [vmem:[%s3528_s1 + $0x638] sm:$0xff]  ;;  %v376_v17 = vld [vmem:[%s3528_s1 + $0x730] sm:$0xff]  ;;  %v363_v20 = vld [vmem:[%s3528_s1 + $0x6c8] sm:$0xff] }
  0x63   :  { %2099 = vmatpush3.bf16.msra.mxu1 %v2098_v29  ;;  %2101 = vmatprep.subr.bf16.mxu0 %v2100_v30  ;;  %v377_v18 = vld [vmem:[%s3528_s1 + $0x738] sm:$0xff]  ;;  %v394_v21 = vld [vmem:[%s3528_s1 + $0x7c0] sm:$0xff]  ;;  %v395_v22 = vld [vmem:[%s3528_s1 + $0x7c8] sm:$0xff]  ;;  %v2114_v25 = vpack.c.bf16 %v345_v14, %v344_v13  ;;  %v2116_v31 = vpack.c.bf16 %v363_v20, %v362_v19 }
  0x64   :  { %2133 = vmatprep.subr.bf16.mxu1 %v2132_v33  ;;  %v82_v23 = vld [vmem:[%s3529_s0 + $0x1f0] sm:$0xff]  ;;  %v85_v24 = vld [vmem:[%s3529_s0 + $0x208] sm:$0xff]  ;;  %v84_v26 = vld [vmem:[%s3529_s0 + $0x200] sm:$0xff]  ;;  %v2146_v27 = vpack.c.bf16 %v377_v18, %v376_v17  ;;  %v2148_v32 = vpack.c.bf16 %v395_v22, %v394_v21 }
  0x65   :  { %906 = vmatmul.mubr.f32.vlgmr.msra.gmra.mrb[28].mxu0 %v28_v40  ;;  %v101_v28 = vld [vmem:[%s3529_s0 + $0x288] sm:$0xff]  ;;  %v346_v29 = vld [vmem:[%s3528_s1 + $0x640] sm:$0xff]  ;;  %v364_v35 = vld [vmem:[%s3528_s1 + $0x6d0] sm:$0xff] }
  0x66   :  { %1006 = vmatmul.mubr.f32.vlgmr.msra.gmra.mrb[28].mxu1 %v30_v41  ;;  %2103 = vmatpush3.bf16.msra.mxu0 %v2102_v42  ;;  %v347_v30 = vld [vmem:[%s3528_s1 + $0x648] sm:$0xff]  ;;  %v378_v33 = vld [vmem:[%s3528_s1 + $0x740] sm:$0xff]  ;;  %v365_v36 = vld [vmem:[%s3528_s1 + $0x6d8] sm:$0xff] }
  0x67   :  { %2135 = vmatpush3.bf16.msra.mxu1 %v2134_v43  ;;  %910 = vmatprep.mubr.f32.mxu0 %v47_v44  ;;  %v379_v34 = vld [vmem:[%s3528_s1 + $0x748] sm:$0xff]  ;;  %v396_v37 = vld [vmem:[%s3528_s1 + $0x7d0] sm:$0xff]  ;;  %v397_v38 = vld [vmem:[%s3528_s1 + $0x7d8] sm:$0xff]  ;;  %v2118_v41 = vpack.c.bf16 %v347_v30, %v346_v29 }
  0x68   :  { %2105 = vmatprep.subr.bf16.mxu0 %v2104_v47  ;;  %2137 = vmatprep.subr.bf16.mxu1 %v2136_v48  ;;  %v100_v39 = vld [vmem:[%s3529_s0 + $0x280] sm:$0xff]  ;;  %v103_v40 = vld [vmem:[%s3529_s0 + $0x298] sm:$0xff]  ;;  %v102_v42 = vld [vmem:[%s3529_s0 + $0x290] sm:$0xff]  ;;  %v2150_v43 = vpack.c.bf16 %v379_v34, %v378_v33  ;;  %v2120_v48 = vpack.c.bf16 %v365_v36, %v364_v35  ;;  %v2152_v49 = vpack.c.bf16 %v397_v38, %v396_v37 }
  0x69   :  { %911 = vmatmul.mubr.f32.gmra.mrb[30].mxu0 %v46_v55  ;;  %1010 = vmatprep.mubr.f32.mxu1 %v49_v56  ;;  %v119_v44 = vld [vmem:[%s3529_s0 + $0x318] sm:$0xff]  ;;  %v348_v45 = vld [vmem:[%s3528_s1 + $0x650] sm:$0xff]  ;;  %v366_v52 = vld [vmem:[%s3528_s1 + $0x6e0] sm:$0xff] }
  0x6a   :  { %2107 = vmatpush3.bf16.msra.mxu0 %v2106_v57  ;;  %1011 = vmatmul.mubr.f32.gmra.mrb[30].mxu1 %v48_v58  ;;  %v349_v46 = vld [vmem:[%s3528_s1 + $0x658] sm:$0xff]  ;;  %v118_v47 = vld [vmem:[%s3529_s0 + $0x310] sm:$0xff]  ;;  %v367_v53 = vld [vmem:[%s3528_s1 + $0x6e8] sm:$0xff] }
  0x6b   :  { %2139 = vmatpush3.bf16.msra.mxu1 %v2138_v59  ;;  %915 = vmatprep.mubr.f32.mxu0 %v65_v60  ;;  %v380_v50 = vld [vmem:[%s3528_s1 + $0x750] sm:$0xff]  ;;  %v381_v51 = vld [vmem:[%s3528_s1 + $0x758] sm:$0xff]  ;;  %v398_v54 = vld [vmem:[%s3528_s1 + $0x7e0] sm:$0xff]  ;;  %v2122_v57 = vpack.c.bf16 %v349_v46, %v348_v45 }
  0x6c   :  { %2109 = vmatprep.subr.bf16.mxu0 %v2108_v63  ;;  %2141 = vmatprep.subr.bf16.mxu1 %v2140_v0  ;;  %v399_v55 = vld [vmem:[%s3528_s1 + $0x7e8] sm:$0xff]  ;;  %v120_v58 = vld [vmem:[%s3529_s0 + $0x320] sm:$0xff]  ;;  %v2154_v60 = vpack.c.bf16 %v381_v51, %v380_v50  ;;  %v2124_v0 = vpack.c.bf16 %v367_v53, %v366_v52  ;;  %v368_v3 = vld [vmem:[%s3528_s1 + $0x6f0] sm:$0xff] }
  0x6d   :  { %916 = vmatmul.mubr.f32.gmra.mrb[32].mxu0 %v64_v7  ;;  %1015 = vmatprep.mubr.f32.mxu1 %v67_v8  ;;  %v121_v56 = vld [vmem:[%s3529_s0 + $0x328] sm:$0xff]  ;;  %v350_v61 = vld [vmem:[%s3528_s1 + $0x660] sm:$0xff]  ;;  %v2156_v1 = vpack.c.bf16 %v399_v55, %v398_v54  ;;  %v369_v4 = vld [vmem:[%s3528_s1 + $0x6f8] sm:$0xff] }
  0x6e   :  { %2111 = vmatpush3.bf16.msra.mxu0 %v2110_v9  ;;  %1016 = vmatmul.mubr.f32.gmra.mrb[32].mxu1 %v66_v10  ;;  %v137_v59 = vld [vmem:[%s3529_s0 + $0x3a8] sm:$0x3]  ;;  %v382_v63 = vld [vmem:[%s3528_s1 + $0x760] sm:$0xff]  ;;  %v400_v5 = vld [vmem:[%s3528_s1 + $0x7f0] sm:$0xff] }
  0x6f   :  { %2143 = vmatpush3.bf16.msra.mxu1 %v2142_v11  ;;  %920 = vmatprep.mubr.f32.mxu0 %v83_v12  ;;  %v351_v62 = vld [vmem:[%s3528_s1 + $0x668] sm:$0xff]  ;;  %v401_v6 = vld [vmem:[%s3528_s1 + $0x7f8] sm:$0xff]  ;;  %v136_v7 = vld [vmem:[%s3529_s0 + $0x3a0] sm:$0x3]  ;;  %v2128_v12 = vpack.c.bf16 %v369_v4, %v368_v3 }
  0x70   :  { %2113 = vmatprep.subr.bf16.mxu0 %v2112_v15  ;;  %2145 = vmatprep.subr.bf16.mxu1 %v2144_v16  ;;  %v383_v2 = vld [vmem:[%s3528_s1 + $0x768] sm:$0xff]  ;;  %v139_v8 = vld [vmem:[%s3529_s0 + $0x3b8] sm:$0x3]  ;;  %v2126_v9 = vpack.c.bf16 %v351_v62, %v350_v61  ;;  %v138_v10 = vld [vmem:[%s3529_s0 + $0x3b0] sm:$0x3]  ;;  %v2160_v16 = vpack.c.bf16 %v401_v6, %v400_v5 }
  0x71   :  { %921 = vmatmul.mubr.f32.gmra.mrb[34].mxu0 %v82_v23  ;;  %1020 = vmatprep.mubr.f32.mxu1 %v85_v24  ;;  %v2158_v11 = vpack.c.bf16 %v383_v2, %v382_v63  ;;  %v352_v13 = vld [vmem:[%s3528_s1 + $0x670] sm:$0xff]  ;;  %v353_v14 = vld [vmem:[%s3528_s1 + $0x678] sm:$0xff]  ;;  %v418_v18 = vld [vmem:[%s3528_s1 + $0x880] sm:$0xff] }
  0x72   :  { %2115 = vmatpush3.bf16.msra.mxu0 %v2114_v25  ;;  %1021 = vmatmul.mubr.f32.gmra.mrb[34].mxu1 %v84_v26  ;;  %v384_v15 = vld [vmem:[%s3528_s1 + $0x770] sm:$0xff]  ;;  %v385_v17 = vld [vmem:[%s3528_s1 + $0x778] sm:$0xff]  ;;  %v419_v19 = vld [vmem:[%s3528_s1 + $0x888] sm:$0xff]  ;;  %v2130_v21 = vpack.c.bf16 %v353_v14, %v352_v13 }
  0x73   :  { %2147 = vmatpush3.bf16.msra.mxu1 %v2146_v27  ;;  %925 = vmatprep.mubr.f32.mxu0 %v101_v28  ;;  %v33_v20 = vld [vmem:[%s3529_s0 + $0x68] sm:$0xff]  ;;  %v35_v22 = vld [vmem:[%s3529_s0 + $0x78] sm:$0xff]  ;;  %v2162_v23 = vpack.c.bf16 %v385_v17, %v384_v15  ;;  %v2164_v24 = vpack.c.bf16 %v419_v19, %v418_v18  ;;  %v402_v25 = vld [vmem:[%s3528_s1 + $0x800] sm:$0xff] }
  0x74   :  { %2117 = vmatprep.subr.bf16.mxu0 %v2116_v31  ;;  %2149 = vmatprep.subr.bf16.mxu1 %v2148_v32  ;;  %v403_v26 = vld [vmem:[%s3528_s1 + $0x808] sm:$0xff]  ;;  %v420_v27 = vld [vmem:[%s3528_s1 + $0x890] sm:$0xff]  ;;  %v421_v28 = vld [vmem:[%s3528_s1 + $0x898] sm:$0xff] }
  0x75   :  { %926 = vmatmul.mubr.f32.gmra.mrb[36].mxu0 %v100_v39  ;;  %1025 = vmatprep.mubr.f32.mxu1 %v103_v40  ;;  %v32_v29 = vld [vmem:[%s3529_s0 + $0x60] sm:$0xff]  ;;  %v2166_v30 = vpack.c.bf16 %v403_v26, %v402_v25  ;;  %v34_v31 = vld [vmem:[%s3529_s0 + $0x70] sm:$0xff]  ;;  %v405_v33 = vld [vmem:[%s3528_s1 + $0x818] sm:$0xff]  ;;  %v2168_v35 = vpack.c.bf16 %v421_v28, %v420_v27 }
  0x76   :  { %2119 = vmatpush3.bf16.msra.mxu0 %v2118_v41  ;;  %1026 = vmatmul.mubr.f32.gmra.mrb[36].mxu1 %v102_v42  ;;  %v404_v32 = vld [vmem:[%s3528_s1 + $0x810] sm:$0xff]  ;;  %v51_v34 = vld [vmem:[%s3529_s0 + $0xf8] sm:$0xff]  ;;  %v422_v36 = vld [vmem:[%s3528_s1 + $0x8a0] sm:$0xff] }
  0x77   :  { %2151 = vmatpush3.bf16.msra.mxu1 %v2150_v43  ;;  %930 = vmatprep.mubr.f32.mxu0 %v119_v44  ;;  %v423_v37 = vld [vmem:[%s3528_s1 + $0x8a8] sm:$0xff]  ;;  %v50_v38 = vld [vmem:[%s3529_s0 + $0xf0] sm:$0xff]  ;;  %v2170_v40 = vpack.c.bf16 %v405_v33, %v404_v32  ;;  %v52_v41 = vld [vmem:[%s3529_s0 + $0x100] sm:$0xff] }
  0x78   :  { %2121 = vmatprep.subr.bf16.mxu0 %v2120_v48  ;;  %2153 = vmatprep.subr.bf16.mxu1 %v2152_v49  ;;  %v53_v39 = vld [vmem:[%s3529_s0 + $0x108] sm:$0xff]  ;;  %v406_v42 = vld [vmem:[%s3528_s1 + $0x820] sm:$0xff]  ;;  %v2172_v45 = vpack.c.bf16 %v423_v37, %v422_v36  ;;  %v424_v46 = vld [vmem:[%s3528_s1 + $0x8b0] sm:$0xff] }
  0x79   :  { %931 = vmatmul.mubr.f32.gmra.mrb[38].mxu0 %v118_v47  ;;  %1030 = vmatprep.mubr.f32.mxu1 %v121_v56  ;;  %v407_v43 = vld [vmem:[%s3528_s1 + $0x828] sm:$0xff]  ;;  %v425_v47 = vld [vmem:[%s3528_s1 + $0x8b8] sm:$0xff]  ;;  %v68_v48 = vld [vmem:[%s3529_s0 + $0x180] sm:$0xff] }
  0x7a   :  { %2123 = vmatpush3.bf16.msra.mxu0 %v2122_v57  ;;  %1031 = vmatmul.mubr.f32.gmra.mrb[38].mxu1 %v120_v58  ;;  %v69_v44 = vld [vmem:[%s3529_s0 + $0x188] sm:$0xff]  ;;  %v71_v49 = vld [vmem:[%s3529_s0 + $0x198] sm:$0xff]  ;;  %v2174_v50 = vpack.c.bf16 %v407_v43, %v406_v42  ;;  %v70_v51 = vld [vmem:[%s3529_s0 + $0x190] sm:$0xff]  ;;  %v2176_v55 = vpack.c.bf16 %v425_v47, %v424_v46 }
  0x7b   :  { %2155 = vmatpush3.bf16.msra.mxu1 %v2154_v60  ;;  %935 = vmatprep.mubr.f32.mxu0 %v137_v59  ;;  %v408_v52 = vld [vmem:[%s3528_s1 + $0x830] sm:$0xff]  ;;  %v409_v53 = vld [vmem:[%s3528_s1 + $0x838] sm:$0xff]  ;;  %v426_v56 = vld [vmem:[%s3528_s1 + $0x8c0] sm:$0xff] }
  0x7c   :  { %2125 = vmatprep.subr.bf16.mxu0 %v2124_v0  ;;  %2157 = vmatprep.subr.bf16.mxu1 %v2156_v1  ;;  %v87_v54 = vld [vmem:[%s3529_s0 + $0x218] sm:$0xff]  ;;  %v427_v57 = vld [vmem:[%s3528_s1 + $0x8c8] sm:$0xff]  ;;  %v86_v58 = vld [vmem:[%s3529_s0 + $0x210] sm:$0xff]  ;;  %v2178_v60 = vpack.c.bf16 %v409_v53, %v408_v52 }
  0x7d   :  { %936 = vmatmul.mubr.f32.gmra.mrb[40].mxu0 %v136_v7  ;;  %1035 = vmatprep.mubr.f32.mxu1 %v139_v8  ;;  %v89_v59 = vld [vmem:[%s3529_s0 + $0x228] sm:$0xff]  ;;  %v88_v61 = vld [vmem:[%s3529_s0 + $0x220] sm:$0xff]  ;;  %v2180_v1 = vpack.c.bf16 %v427_v57, %v426_v56  ;;  %v428_v2 = vld [vmem:[%s3528_s1 + $0x8d0] sm:$0xff] }
  0x7e   :  { %2127 = vmatpush3.bf16.msra.mxu0 %v2126_v9  ;;  %1036 = vmatmul.mubr.f32.gmra.mrb[40].mxu1 %v138_v10  ;;  %v410_v62 = vld [vmem:[%s3528_s1 + $0x840] sm:$0xff]  ;;  %v411_v63 = vld [vmem:[%s3528_s1 + $0x848] sm:$0xff]  ;;  %v429_v3 = vld [vmem:[%s3528_s1 + $0x8d8] sm:$0xff] }
  0x7f   :  { %2159 = vmatpush3.bf16.msra.mxu1 %v2158_v11  ;;  %2129 = vmatprep.subr.bf16.mxu0 %v2128_v12  ;;  %v105_v0 = vld [vmem:[%s3529_s0 + $0x2a8] sm:$0xff]  ;;  %v104_v4 = vld [vmem:[%s3529_s0 + $0x2a0] sm:$0xff]  ;;  %v107_v5 = vld [vmem:[%s3529_s0 + $0x2b8] sm:$0xff]  ;;  %v2182_v6 = vpack.c.bf16 %v411_v63, %v410_v62  ;;  %v2184_v11 = vpack.c.bf16 %v429_v3, %v428_v2 }
  0x80   :  { %2161 = vmatprep.subr.bf16.mxu1 %v2160_v16  ;;  %1105 = vmatprep.mubr.f32.mxu0 %v33_v20  ;;  %v106_v7 = vld [vmem:[%s3529_s0 + $0x2b0] sm:$0xff]  ;;  %v413_v9 = vld [vmem:[%s3528_s1 + $0x858] sm:$0xff]  ;;  %v430_v12 = vld [vmem:[%s3528_s1 + $0x8e0] sm:$0xff] }
  0x81   :  { %1205 = vmatprep.mubr.f32.mxu1 %v35_v22  ;;  %v412_v8 = vld [vmem:[%s3528_s1 + $0x850] sm:$0xff]  ;;  %v123_v10 = vld [vmem:[%s3529_s0 + $0x338] sm:$0xff]  ;;  %v431_v13 = vld [vmem:[%s3528_s1 + $0x8e8] sm:$0xff] }
  0x82   :  { %2131 = vmatpush3.bf16.msra.mxu0 %v2130_v21  ;;  %v122_v14 = vld [vmem:[%s3529_s0 + $0x330] sm:$0xff]  ;;  %v125_v15 = vld [vmem:[%s3529_s0 + $0x348] sm:$0xff]  ;;  %v2186_v16 = vpack.c.bf16 %v413_v9, %v412_v8  ;;  %v124_v17 = vld [vmem:[%s3529_s0 + $0x340] sm:$0xff]  ;;  %v2188_v21 = vpack.c.bf16 %v431_v13, %v430_v12 }
  0x83   :  { %2163 = vmatpush3.bf16.msra.mxu1 %v2162_v23  ;;  %2165 = vmatprep.subr.bf16.mxu0 %v2164_v24  ;;  %v414_v18 = vld [vmem:[%s3528_s1 + $0x860] sm:$0xff]  ;;  %v415_v19 = vld [vmem:[%s3528_s1 + $0x868] sm:$0xff]  ;;  %v432_v22 = vld [vmem:[%s3528_s1 + $0x8f0] sm:$0xff] }
  0x84   :  { %2196 = vmatprep.subr.bf16.mxu1 %v2164_v24  ;;  %v141_v20 = vld [vmem:[%s3529_s0 + $0x3c8] sm:$0x3]  ;;  %v433_v23 = vld [vmem:[%s3528_s1 + $0x8f8] sm:$0xff]  ;;  %v140_v24 = vld [vmem:[%s3529_s0 + $0x3c0] sm:$0x3]  ;;  %v2190_v26 = vpack.c.bf16 %v415_v19, %v414_v18 }
  0x85   :  { %1106 = vmatmul.mubr.f32.vlgmr.msra.gmra.mrb[42].mxu0 %v32_v29  ;;  %v143_v25 = vld [vmem:[%s3529_s0 + $0x3d8] sm:$0x3]  ;;  %v142_v27 = vld [vmem:[%s3529_s0 + $0x3d0] sm:$0x3]  ;;  %v2192_v28 = vpack.c.bf16 %v433_v23, %v432_v22  ;;  %v109_v33 = vld [vmem:[%s3529_s0 + $0x2c8] sm:$0xff] }
  0x86   :  { %1206 = vmatmul.mubr.f32.vlgmr.msra.gmra.mrb[42].mxu1 %v34_v31  ;;  %2167 = vmatpush3.bf16.msra.mxu0 %v2166_v30  ;;  %v416_v29 = vld [vmem:[%s3528_s1 + $0x870] sm:$0xff]  ;;  %v37_v31 = vld [vmem:[%s3529_s0 + $0x88] sm:$0xff]  ;;  %v55_v36 = vld [vmem:[%s3529_s0 + $0x118] sm:$0xff] }
  0x87   :  { %2204 = vmatpush3.bf16.msra.mxu1 %v2166_v30  ;;  %1110 = vmatprep.mubr.f32.mxu0 %v51_v34  ;;  %v417_v30 = vld [vmem:[%s3528_s1 + $0x878] sm:$0xff]  ;;  %v36_v34 = vld [vmem:[%s3529_s0 + $0x80] sm:$0xff] }
  0x88   :  { %2169 = vmatprep.subr.bf16.mxu0 %v2168_v35  ;;  %2197 = vmatprep.subr.bf16.mxu1 %v2168_v35  ;;  %v2194_v32 = vpack.c.bf16 %v417_v30, %v416_v29  ;;  %v108_v35 = vld [vmem:[%s3529_s0 + $0x2c0] sm:$0xff]  ;;  %v127_v37 = vld [vmem:[%s3529_s0 + $0x358] sm:$0xff] }
  0x89   :  { %1111 = vmatmul.mubr.f32.gmra.mrb[44].mxu0 %v50_v38  ;;  %1210 = vmatprep.mubr.f32.mxu1 %v53_v39  ;;  %v54_v38 = vld [vmem:[%s3529_s0 + $0x110] sm:$0xff]  ;;  %v72_v42 = vld [vmem:[%s3529_s0 + $0x1a0] sm:$0xff] }
  0x8a   :  { %2171 = vmatpush3.bf16.msra.mxu0 %v2170_v40  ;;  %1211 = vmatmul.mubr.f32.gmra.mrb[44].mxu1 %v52_v41  ;;  %v126_v39 = vld [vmem:[%s3529_s0 + $0x350] sm:$0xff]  ;;  %v145_v41 = vld [vmem:[%s3529_s0 + $0x3e8] sm:$0x3]  ;;  %v144_v43 = vld [vmem:[%s3529_s0 + $0x3e0] sm:$0x3] }
  0x8b   :  { %2205 = vmatpush3.bf16.msra.mxu1 %v2170_v40  ;;  %1115 = vmatprep.mubr.f32.mxu0 %v69_v44  ;;  %v73_v40 = vld [vmem:[%s3529_s0 + $0x1a8] sm:$0xff]  ;;  %v91_v44 = vld [vmem:[%s3529_s0 + $0x238] sm:$0xff]  ;;  %v1430_v47 = vld [vmem:[%s3530_s2] ss:$0 sm:$0xff] }
  0x8c   :  { %2173 = vmatprep.subr.bf16.mxu0 %v2172_v45  ;;  %2198 = vmatprep.subr.bf16.mxu1 %v2172_v45  ;;  %v90_v45 = vld [vmem:[%s3529_s0 + $0x230] sm:$0xff] }
  0x8d   :  { %1116 = vmatmul.mubr.f32.gmra.mrb[46].mxu0 %v68_v48  ;;  %1215 = vmatprep.mubr.f32.mxu1 %v71_v49 }
  0x8e   :  { %2175 = vmatpush3.bf16.msra.mxu0 %v2174_v50  ;;  %1216 = vmatmul.mubr.f32.gmra.mrb[46].mxu1 %v70_v51 }
  0x8f   :  { %2206 = vmatpush3.bf16.msra.mxu1 %v2174_v50  ;;  %1120 = vmatprep.mubr.f32.mxu0 %v87_v54 }
  0x90   :  { %2177 = vmatprep.subr.bf16.mxu0 %v2176_v55  ;;  %2199 = vmatprep.subr.bf16.mxu1 %v2176_v55 }
  0x91   :  { %1121 = vmatmul.mubr.f32.gmra.mrb[48].mxu0 %v86_v58  ;;  %1220 = vmatprep.mubr.f32.mxu1 %v89_v59 }
  0x92   :  { %2179 = vmatpush3.bf16.msra.mxu0 %v2178_v60  ;;  %1221 = vmatmul.mubr.f32.gmra.mrb[48].mxu1 %v88_v61 }
  0x93   :  { %2207 = vmatpush3.bf16.msra.mxu1 %v2178_v60  ;;  %1125 = vmatprep.mubr.f32.mxu0 %v105_v0 }
  0x94   :  { %2181 = vmatprep.subr.bf16.mxu0 %v2180_v1  ;;  %2200 = vmatprep.subr.bf16.mxu1 %v2180_v1 }
  0x95   :  { %1126 = vmatmul.mubr.f32.gmra.mrb[50].mxu0 %v104_v4  ;;  %1225 = vmatprep.mubr.f32.mxu1 %v107_v5 }
  0x96   :  { %2183 = vmatpush3.bf16.msra.mxu0 %v2182_v6  ;;  %1226 = vmatmul.mubr.f32.gmra.mrb[50].mxu1 %v106_v7 }
  0x97   :  { %2208 = vmatpush3.bf16.msra.mxu1 %v2182_v6  ;;  %1130 = vmatprep.mubr.f32.mxu0 %v123_v10 }
  0x98   :  { %2185 = vmatprep.subr.bf16.mxu0 %v2184_v11  ;;  %2201 = vmatprep.subr.bf16.mxu1 %v2184_v11 }
  0x99   :  { %1131 = vmatmul.mubr.f32.gmra.mrb[52].mxu0 %v122_v14  ;;  %1230 = vmatprep.mubr.f32.mxu1 %v125_v15 }
  0x9a   :  { %2187 = vmatpush3.bf16.msra.mxu0 %v2186_v16  ;;  %1231 = vmatmul.mubr.f32.gmra.mrb[52].mxu1 %v124_v17 }
  0x9b   :  { %2209 = vmatpush3.bf16.msra.mxu1 %v2186_v16  ;;  %1135 = vmatprep.mubr.f32.mxu0 %v141_v20 }
  0x9c   :  { %2189 = vmatprep.subr.bf16.mxu0 %v2188_v21  ;;  %2202 = vmatprep.subr.bf16.mxu1 %v2188_v21 }
  0x9d   :  { %1136 = vmatmul.mubr.f32.gmra.mrb[54].mxu0 %v140_v24  ;;  %1235 = vmatprep.mubr.f32.mxu1 %v143_v25 }
  0x9e   :  { %2191 = vmatpush3.bf16.msra.mxu0 %v2190_v26  ;;  %1236 = vmatmul.mubr.f32.gmra.mrb[54].mxu1 %v142_v27 }
  0x9f   :  { %2210 = vmatpush3.bf16.msra.mxu1 %v2190_v26  ;;  %2193 = vmatprep.subr.bf16.mxu0 %v2192_v28 }
  0xa0   :  { %2203 = vmatprep.subr.bf16.mxu1 %v2192_v28  ;;  %1305 = vmatprep.mubr.f32.mxu0 %v37_v31 }
  0xa1   :  { %1325 = vmatprep.mubr.f32.mxu1 %v109_v33 }
  0xa2   :  { %2195 = vmatpush3.bf16.msra.mxu0 %v2194_v32 }
  0xa3   :  { %2211 = vmatpush3.bf16.msra.mxu1 %v2194_v32 }
  0xa5   :  { %1306 = vmatmul.mubr.f32.vlgmr.msra.gmra.mrb[56].mxu0 %v36_v34 }
  0xa6   :  { %1326 = vmatmul.mubr.f32.vlgmr.msra.gmra.mrb[56].mxu1 %v108_v35  ;;  %1310 = vmatprep.mubr.f32.mxu0 %v55_v36 }
  0xa7   :  { %1330 = vmatprep.mubr.f32.mxu1 %v127_v37 }
  0xa9   :  { %1311 = vmatmul.mubr.f32.gmra.mrb[58].mxu0 %v54_v38 }
  0xaa   :  { %1331 = vmatmul.mubr.f32.gmra.mrb[58].mxu1 %v126_v39  ;;  %1315 = vmatprep.mubr.f32.mxu0 %v73_v40 }
  0xab   :  { %1335 = vmatprep.mubr.f32.mxu1 %v145_v41 }
  0xad   :  { %1316 = vmatmul.mubr.f32.gmra.mrb[60].mxu0 %v72_v42 }
  0xae   :  { %1336 = vmatmul.mubr.f32.gmra.mrb[60].mxu1 %v144_v43  ;;  %1320 = vmatprep.mubr.f32.mxu0 %v91_v44 }
  0xb1   :  { %1321 = vmatmul.mubr.f32.gmra.mrb[62].mxu0 %v90_v45 }
  0xf8   :  { %v1463_v46 = vpop.f32.mrb[0].mxu0 }
  0xf9   :  { %v1464_v48 = vpop.f32.mrb[1].mxu0  ;;  %v1516_v49 = vpop.f32.mrb[0].mxu1 }
  0xfa   :  { %v1465_v50 = vadd.f32 %v1464_v48, %v1463_v46  ;;  %v1517_v51 = vpop.f32.mrb[1].mxu1 }
  0xfb   :  { %v1518_v52 = vadd.f32 %v1517_v51, %v1516_v49 }
  0xfc   :  { %v508_v53 = vadd.f32 %v1465_v50, %v1430_v47  ;;  %v1466_v54 = vpop.f32.mrb[2].mxu0 }
  0xfd   :  { %v1467_v55 = vpop.f32.mrb[3].mxu0  ;;  %v1519_v56 = vpop.f32.mrb[2].mxu1 }
  0xfe   :  { %v608_v57 = vadd.f32 %v1518_v52, %v508_v53  ;;  %v1468_v58 = vadd.f32 %v1467_v55, %v1466_v54  ;;  %v1520_v59 = vpop.f32.mrb[3].mxu1 }
  0xff   :  { %v1521_v60 = vadd.f32 %v1520_v59, %v1519_v56 }
 0x100   :  { %v513_v61 = vadd.f32 %v1468_v58, %v1430_v47  ;;  %v1469_v62 = vpop.f32.mrb[4].mxu0 }
 0x101   :  { %v1470_v63 = vpop.f32.mrb[5].mxu0  ;;  %v1522_v0 = vpop.f32.mrb[4].mxu1 }
 0x102   :  { %v613_v1 = vadd.f32 %v1521_v60, %v513_v61  ;;  %v1471_v2 = vadd.f32 %v1470_v63, %v1469_v62  ;;  %v1523_v3 = vpop.f32.mrb[5].mxu1 }
 0x103   :  { %v1524_v4 = vadd.f32 %v1523_v3, %v1522_v0 }
 0x104   :  { %v518_v5 = vadd.f32 %v1471_v2, %v1430_v47  ;;  %v1472_v6 = vpop.f32.mrb[6].mxu0 }
 0x105   :  { %v1473_v7 = vpop.f32.mrb[7].mxu0  ;;  %v1525_v8 = vpop.f32.mrb[6].mxu1 }
 0x106   :  { %v618_v9 = vadd.f32 %v1524_v4, %v518_v5  ;;  %v1474_v10 = vadd.f32 %v1473_v7, %v1472_v6  ;;  %v1526_v11 = vpop.f32.mrb[7].mxu1 }
 0x107   :  { %v1527_v12 = vadd.f32 %v1526_v11, %v1525_v8 }
 0x108   :  { %v523_v13 = vadd.f32 %v1474_v10, %v1430_v47  ;;  %v1475_v14 = vpop.f32.mrb[8].mxu0 }
 0x109   :  { %v1476_v15 = vpop.f32.mrb[9].mxu0  ;;  %v1528_v16 = vpop.f32.mrb[8].mxu1 }
 0x10a   :  { %v623_v17 = vadd.f32 %v1527_v12, %v523_v13  ;;  %v1477_v18 = vadd.f32 %v1476_v15, %v1475_v14  ;;  %v1529_v19 = vpop.f32.mrb[9].mxu1 }
 0x10b   :  { %v1530_v20 = vadd.f32 %v1529_v19, %v1528_v16 }
 0x10c   :  { %v528_v21 = vadd.f32 %v1477_v18, %v1430_v47  ;;  %v1478_v22 = vpop.f32.mrb[10].mxu0 }
 0x10d   :  { %v1479_v23 = vpop.f32.mrb[11].mxu0  ;;  %v1531_v24 = vpop.f32.mrb[10].mxu1 }
 0x10e   :  { %v628_v25 = vadd.f32 %v1530_v20, %v528_v21  ;;  %v1480_v26 = vadd.f32 %v1479_v23, %v1478_v22  ;;  %v1532_v27 = vpop.f32.mrb[11].mxu1 }
 0x10f   :  { %v1533_v28 = vadd.f32 %v1532_v27, %v1531_v24 }
 0x110   :  { %v533_v29 = vadd.f32 %v1480_v26, %v1430_v47  ;;  %v1481_v30 = vpop.f32.mrb[12].mxu0 }
 0x111   :  { %v1482_v31 = vpop.f32.mrb[13].mxu0  ;;  %v1534_v32 = vpop.f32.mrb[12].mxu1 }
 0x112   :  { %v633_v33 = vadd.f32 %v1533_v28, %v533_v29  ;;  %v1483_v34 = vadd.f32 %v1482_v31, %v1481_v30  ;;  %v1535_v35 = vpop.f32.mrb[13].mxu1 }
 0x113   :  { %v1536_v36 = vadd.f32 %v1535_v35, %v1534_v32 }
 0x114   :  { %v538_v37 = vadd.f32 %v1483_v34, %v1430_v47 }
 0x116   :  { %v638_v38 = vadd.f32 %v1536_v36, %v538_v37 }
 0x118   :  { %v1569_v39 = vpop.f32.mrb[14].mxu0 }
 0x119   :  { %v1570_v40 = vpop.f32.mrb[15].mxu0  ;;  %v1622_v41 = vpop.f32.mrb[14].mxu1 }
 0x11a   :  { %v1571_v42 = vadd.f32 %v1570_v40, %v1569_v39  ;;  %v1623_v43 = vpop.f32.mrb[15].mxu1 }
 0x11b   :  { %v1624_v44 = vadd.f32 %v1623_v43, %v1622_v41 }
 0x11c   :  { %v708_v45 = vadd.f32 %v1571_v42, %v608_v57  ;;  %v1572_v46 = vpop.f32.mrb[16].mxu0 }
 0x11d   :  { %v1573_v48 = vpop.f32.mrb[17].mxu0  ;;  %v1625_v49 = vpop.f32.mrb[16].mxu1 }
 0x11e   :  { %v808_v50 = vadd.f32 %v1624_v44, %v708_v45  ;;  %v1574_v51 = vadd.f32 %v1573_v48, %v1572_v46  ;;  %v1626_v52 = vpop.f32.mrb[17].mxu1 }
 0x11f   :  { %v1627_v53 = vadd.f32 %v1626_v52, %v1625_v49 }
 0x120   :  { %v713_v54 = vadd.f32 %v1574_v51, %v613_v1  ;;  %v1575_v55 = vpop.f32.mrb[18].mxu0 }
 0x121   :  { %v1576_v56 = vpop.f32.mrb[19].mxu0  ;;  %v1628_v58 = vpop.f32.mrb[18].mxu1 }
 0x122   :  { %v813_v47 = vadd.f32 %v1627_v53, %v713_v54  ;;  %v1577_v59 = vadd.f32 %v1576_v56, %v1575_v55  ;;  %v1629_v60 = vpop.f32.mrb[19].mxu1 }
 0x123   :  { %v1630_v61 = vadd.f32 %v1629_v60, %v1628_v58 }
 0x124   :  { %v718_v62 = vadd.f32 %v1577_v59, %v618_v9  ;;  %v1578_v63 = vpop.f32.mrb[20].mxu0 }
 0x125   :  { %v1579_v0 = vpop.f32.mrb[21].mxu0  ;;  %v1631_v2 = vpop.f32.mrb[20].mxu1 }
 0x126   :  { %v818_v57 = vadd.f32 %v1630_v61, %v718_v62  ;;  %v1580_v3 = vadd.f32 %v1579_v0, %v1578_v63  ;;  %v1632_v4 = vpop.f32.mrb[21].mxu1 }
 0x127   :  { %v1633_v5 = vadd.f32 %v1632_v4, %v1631_v2 }
 0x128   :  { %v723_v6 = vadd.f32 %v1580_v3, %v623_v17  ;;  %v1581_v7 = vpop.f32.mrb[22].mxu0 }
 0x129   :  { %v1582_v8 = vpop.f32.mrb[23].mxu0  ;;  %v1634_v10 = vpop.f32.mrb[22].mxu1 }
 0x12a   :  { %v823_v1 = vadd.f32 %v1633_v5, %v723_v6  ;;  %v1583_v11 = vadd.f32 %v1582_v8, %v1581_v7  ;;  %v1635_v12 = vpop.f32.mrb[23].mxu1 }
 0x12b   :  { %v1636_v13 = vadd.f32 %v1635_v12, %v1634_v10 }
 0x12c   :  { %v728_v14 = vadd.f32 %v1583_v11, %v628_v25  ;;  %v1584_v15 = vpop.f32.mrb[24].mxu0 }
 0x12d   :  { %v1585_v16 = vpop.f32.mrb[25].mxu0  ;;  %v1637_v18 = vpop.f32.mrb[24].mxu1 }
 0x12e   :  { %v828_v9 = vadd.f32 %v1636_v13, %v728_v14  ;;  %v1586_v19 = vadd.f32 %v1585_v16, %v1584_v15  ;;  %v1638_v20 = vpop.f32.mrb[25].mxu1 }
 0x12f   :  { %v1639_v21 = vadd.f32 %v1638_v20, %v1637_v18 }
 0x130   :  { %v733_v22 = vadd.f32 %v1586_v19, %v633_v33  ;;  %v1587_v23 = vpop.f32.mrb[26].mxu0 }
 0x131   :  { %v1588_v24 = vpop.f32.mrb[27].mxu0  ;;  %v1640_v26 = vpop.f32.mrb[26].mxu1 }
 0x132   :  { %v833_v17 = vadd.f32 %v1639_v21, %v733_v22  ;;  %v1589_v27 = vadd.f32 %v1588_v24, %v1587_v23  ;;  %v1641_v28 = vpop.f32.mrb[27].mxu1 }
 0x133   :  { %v1642_v29 = vadd.f32 %v1641_v28, %v1640_v26 }
 0x134   :  { %v738_v30 = vadd.f32 %v1589_v27, %v638_v38 }
 0x136   :  { %v838_v31 = vadd.f32 %v1642_v29, %v738_v30 }
 0x138   :  { %v1675_v32 = vpop.f32.mrb[28].mxu0 }
 0x139   :  { %v1676_v34 = vpop.f32.mrb[29].mxu0  ;;  %v1728_v25 = vpop.f32.mrb[28].mxu1 }
 0x13a   :  { %v1677_v35 = vadd.f32 %v1676_v34, %v1675_v32  ;;  %v1729_v36 = vpop.f32.mrb[29].mxu1 }
 0x13b   :  { %v1730_v37 = vadd.f32 %v1729_v36, %v1728_v25 }
 0x13c   :  { %v908_v39 = vadd.f32 %v1677_v35, %v808_v50  ;;  %v1678_v40 = vpop.f32.mrb[30].mxu0 }
 0x13d   :  { %v1679_v41 = vpop.f32.mrb[31].mxu0  ;;  %v1731_v42 = vpop.f32.mrb[30].mxu1 }
 0x13e   :  { %v1008_v33 = vadd.f32 %v1730_v37, %v908_v39  ;;  %v1680_v43 = vadd.f32 %v1679_v41, %v1678_v40  ;;  %v1732_v44 = vpop.f32.mrb[31].mxu1 }
 0x13f   :  { %v1733_v45 = vadd.f32 %v1732_v44, %v1731_v42 }
 0x140   :  { %v913_v46 = vadd.f32 %v1680_v43, %v813_v47  ;;  %v1681_v48 = vpop.f32.mrb[32].mxu0 }
 0x141   :  { %v1682_v49 = vpop.f32.mrb[33].mxu0  ;;  %v1734_v51 = vpop.f32.mrb[32].mxu1 }
 0x142   :  { %v1013_v38 = vadd.f32 %v1733_v45, %v913_v46  ;;  %v1683_v52 = vadd.f32 %v1682_v49, %v1681_v48  ;;  %v1735_v53 = vpop.f32.mrb[33].mxu1 }
 0x143   :  { %v1736_v54 = vadd.f32 %v1735_v53, %v1734_v51 }
 0x144   :  { %v918_v55 = vadd.f32 %v1683_v52, %v818_v57  ;;  %v1684_v56 = vpop.f32.mrb[34].mxu0 }
 0x145   :  { %v1685_v58 = vpop.f32.mrb[35].mxu0  ;;  %v1737_v59 = vpop.f32.mrb[34].mxu1 }
 0x146   :  { %v1018_v50 = vadd.f32 %v1736_v54, %v918_v55  ;;  %v1686_v60 = vadd.f32 %v1685_v58, %v1684_v56  ;;  %v1738_v61 = vpop.f32.mrb[35].mxu1 }
 0x147   :  { %v1739_v62 = vadd.f32 %v1738_v61, %v1737_v59 }
 0x148   :  { %v923_v63 = vadd.f32 %v1686_v60, %v823_v1  ;;  %v1687_v0 = vpop.f32.mrb[36].mxu0 }
 0x149   :  { %v1688_v2 = vpop.f32.mrb[37].mxu0  ;;  %v1740_v3 = vpop.f32.mrb[36].mxu1 }
 0x14a   :  { %v1023_v47 = vadd.f32 %v1739_v62, %v923_v63  ;;  %v1689_v4 = vadd.f32 %v1688_v2, %v1687_v0  ;;  %v1741_v5 = vpop.f32.mrb[37].mxu1 }
 0x14b   :  { %v1742_v6 = vadd.f32 %v1741_v5, %v1740_v3 }
 0x14c   :  { %v928_v7 = vadd.f32 %v1689_v4, %v828_v9  ;;  %v1690_v8 = vpop.f32.mrb[38].mxu0 }
 0x14d   :  { %v1691_v10 = vpop.f32.mrb[39].mxu0  ;;  %v1743_v11 = vpop.f32.mrb[38].mxu1 }
 0x14e   :  { %v1028_v57 = vadd.f32 %v1742_v6, %v928_v7  ;;  %v1692_v12 = vadd.f32 %v1691_v10, %v1690_v8  ;;  %v1744_v13 = vpop.f32.mrb[39].mxu1 }
 0x14f   :  { %v1745_v14 = vadd.f32 %v1744_v13, %v1743_v11 }
 0x150   :  { %v933_v15 = vadd.f32 %v1692_v12, %v833_v17  ;;  %v1693_v16 = vpop.f32.mrb[40].mxu0 }
 0x151   :  { %v1694_v18 = vpop.f32.mrb[41].mxu0  ;;  %v1746_v19 = vpop.f32.mrb[40].mxu1 }
 0x152   :  { %v1033_v1 = vadd.f32 %v1745_v14, %v933_v15  ;;  %v1695_v20 = vadd.f32 %v1694_v18, %v1693_v16  ;;  %v1747_v21 = vpop.f32.mrb[41].mxu1 }
 0x153   :  { %v1748_v22 = vadd.f32 %v1747_v21, %v1746_v19 }
 0x154   :  { %v938_v23 = vadd.f32 %v1695_v20, %v838_v31 }
 0x156   :  { %v1038_v24 = vadd.f32 %v1748_v22, %v938_v23 }
 0x158   :  { %v1781_v26 = vpop.f32.mrb[42].mxu0 }
 0x159   :  { %v1782_v27 = vpop.f32.mrb[43].mxu0  ;;  %v1834_v9 = vpop.f32.mrb[42].mxu1 }
 0x15a   :  { %v1783_v28 = vadd.f32 %v1782_v27, %v1781_v26  ;;  %v1835_v29 = vpop.f32.mrb[43].mxu1 }
 0x15b   :  { %v1836_v30 = vadd.f32 %v1835_v29, %v1834_v9 }
 0x15c   :  { %v1108_v32 = vadd.f32 %v1783_v28, %v1008_v33  ;;  %v1784_v34 = vpop.f32.mrb[44].mxu0 }
 0x15d   :  { %v1785_v25 = vpop.f32.mrb[45].mxu0  ;;  %v1837_v35 = vpop.f32.mrb[44].mxu1 }
 0x15e   :  { %v1208_v17 = vadd.f32 %v1836_v30, %v1108_v32  ;;  %v1786_v36 = vadd.f32 %v1785_v25, %v1784_v34  ;;  %v1838_v37 = vpop.f32.mrb[45].mxu1 }
 0x15f   :  { %v1839_v39 = vadd.f32 %v1838_v37, %v1837_v35 }
 0x160   :  { %v1113_v40 = vadd.f32 %v1786_v36, %v1013_v38  ;;  %v1787_v41 = vpop.f32.mrb[46].mxu0 }
 0x161   :  { %v1788_v42 = vpop.f32.mrb[47].mxu0  ;;  %v1840_v43 = vpop.f32.mrb[46].mxu1 }
 0x162   :  { %v1213_v31 = vadd.f32 %v1839_v39, %v1113_v40  ;;  %v1789_v44 = vadd.f32 %v1788_v42, %v1787_v41  ;;  %v1841_v45 = vpop.f32.mrb[47].mxu1 }
 0x163   :  { %v1842_v46 = vadd.f32 %v1841_v45, %v1840_v43 }
 0x164   :  { %v1118_v48 = vadd.f32 %v1789_v44, %v1018_v50  ;;  %v1790_v49 = vpop.f32.mrb[48].mxu0 }
 0x165   :  { %v1791_v51 = vpop.f32.mrb[49].mxu0  ;;  %v1843_v52 = vpop.f32.mrb[48].mxu1 }
 0x166   :  { %v1218_v33 = vadd.f32 %v1842_v46, %v1118_v48  ;;  %v1792_v53 = vadd.f32 %v1791_v51, %v1790_v49  ;;  %v1844_v54 = vpop.f32.mrb[49].mxu1 }
 0x167   :  { %v1845_v55 = vadd.f32 %v1844_v54, %v1843_v52 }
 0x168   :  { %v1123_v56 = vadd.f32 %v1792_v53, %v1023_v47  ;;  %v1793_v58 = vpop.f32.mrb[50].mxu0 }
 0x169   :  { %v1794_v59 = vpop.f32.mrb[51].mxu0  ;;  %v1846_v60 = vpop.f32.mrb[50].mxu1 }
 0x16a   :  { %v1223_v38 = vadd.f32 %v1845_v55, %v1123_v56  ;;  %v1795_v61 = vadd.f32 %v1794_v59, %v1793_v58  ;;  %v1847_v62 = vpop.f32.mrb[51].mxu1 }
 0x16b   :  { %v1848_v63 = vadd.f32 %v1847_v62, %v1846_v60 }
 0x16c   :  { %v1128_v0 = vadd.f32 %v1795_v61, %v1028_v57  ;;  %v1796_v2 = vpop.f32.mrb[52].mxu0 }
 0x16d   :  { %v1797_v3 = vpop.f32.mrb[53].mxu0  ;;  %v1849_v4 = vpop.f32.mrb[52].mxu1 }
 0x16e   :  { %v1228_v50 = vadd.f32 %v1848_v63, %v1128_v0  ;;  %v1798_v5 = vadd.f32 %v1797_v3, %v1796_v2  ;;  %v1850_v6 = vpop.f32.mrb[53].mxu1 }
 0x16f   :  { %v1851_v7 = vadd.f32 %v1850_v6, %v1849_v4 }
 0x170   :  { %v1133_v8 = vadd.f32 %v1798_v5, %v1033_v1  ;;  %v1799_v10 = vpop.f32.mrb[54].mxu0 }
 0x171   :  { %v1800_v11 = vpop.f32.mrb[55].mxu0  ;;  %v1852_v12 = vpop.f32.mrb[54].mxu1 }
 0x172   :  { %v1233_v47 = vadd.f32 %v1851_v7, %v1133_v8  ;;  %v1801_v13 = vadd.f32 %v1800_v11, %v1799_v10  ;;  %v1853_v14 = vpop.f32.mrb[55].mxu1 }
 0x173   :  { %v1854_v15 = vadd.f32 %v1853_v14, %v1852_v12 }
 0x174   :  { %v1138_v16 = vadd.f32 %v1801_v13, %v1038_v24 }
 0x176   :  { %v1238_v18 = vadd.f32 %v1854_v15, %v1138_v16 }
 0x178   :  { %v1887_v19 = vpop.f32.mrb[56].mxu0 }
 0x179   :  { %v1899_v20 = vpop.f32.mrb[56].mxu1  ;;  %v1888_v57 = vpop.f32.mrb[57].mxu0 }
 0x17a   :  { %v1889_v21 = vadd.f32 %v1888_v57, %v1887_v19  ;;  %v1900_v22 = vpop.f32.mrb[57].mxu1 }
 0x17b   :  { %v1901_v23 = vadd.f32 %v1900_v22, %v1899_v20 }
 0x17c   :  { %v1308_v26 = vadd.f32 %v1889_v21, %v1208_v17  ;;  %v1890_v27 = vpop.f32.mrb[58].mxu0 }
 0x17d   :  { %v1328_v9 = vadd.f32 %v1901_v23, %v1228_v50  ;;  %v1902_v28 = vpop.f32.mrb[58].mxu1  ;;  %v1891_v1 = vpop.f32.mrb[59].mxu0 }
 0x17e   :  { %v1892_v29 = vadd.f32 %v1891_v1, %v1890_v27  ;;  %v1903_v30 = vpop.f32.mrb[59].mxu1  ;;  %v3489_v34 = vmax.f32 %v1308_v26, 0.0 }
 0x17f   :  { %v1904_v32 = vadd.f32 %v1903_v30, %v1902_v28  ;;  %v1345_v56 = vmax.f32 %v1328_v9, 0.0  ;;  %v1394_v28 = vlaneseq }
 0x180   :  { %v1313_v25 = vadd.f32 %v1892_v29, %v1213_v31  ;;  %v1893_v35 = vpop.f32.mrb[60].mxu0  ;;  %v1363_v17 = vmul.f32 %v3489_v34, %v3489_v34  ;;  %v1386_v29 = vld [vmem:[%s3531_s3] sm:$0x1] }
 0x181   :  { %v1333_v24 = vadd.f32 %v1904_v32, %v1233_v47  ;;  %v1905_v36 = vpop.f32.mrb[60].mxu1  ;;  %v1894_v37 = vpop.f32.mrb[61].mxu0  ;;  %v1367_v0 = vmul.f32 %v1345_v56, %v1345_v56  ;;  %v1395_v1 = vshrl.u32 %v1394_v28, 7 }
 0x182   :  { %v3491_v39 = vmax.f32 %v1313_v25, 0.0  ;;  %v1895_v40 = vadd.f32 %v1894_v37, %v1893_v35  ;;  %v1906_v41 = vpop.f32.mrb[61].mxu1  ;;  %v1390_v35 = vld [vmem:[%s3532_s4] sm:$0x1] }
 0x183   :  { %v1907_v42 = vadd.f32 %v1906_v41, %v1905_v36  ;;  %v1346_v61 = vmax.f32 %v1333_v24, 0.0  ;;  %v1396_v30 = vsub.s32 0, %v1395_v1 }
 0x184   :  { %v1348_v43 = vadd.f32 %v3491_v39, %v3489_v34  ;;  %v1364_v44 = vmul.f32 %v3491_v39, %v3491_v39  ;;  %v1318_v45 = vadd.f32 %v1895_v40, %v1218_v33  ;;  %v1896_v31 = vpop.f32.mrb[62].mxu0 }
 0x185   :  { %v1338_v46 = vadd.f32 %v1907_v42, %v1238_v18  ;;  %v1897_v48 = vpop.f32.mrb[63].mxu0  ;;  %v1368_v4 = vmul.f32 %v1346_v61, %v1346_v61 }
 0x186   :  { %v1370_v49 = vadd.f32 %v1364_v44, %v1363_v17  ;;  %v1343_v51 = vmax.f32 %v1318_v45, 0.0  ;;  %v1898_v52 = vadd.f32 %v1897_v48, %v1896_v31 }
 0x187   :  { %v1347_v60 = vmax.f32 %v1338_v46, 0.0 }
 0x188   :  { %v1349_v53 = vadd.f32 %v1348_v43, %v1343_v51  ;;  %v1365_v54 = vmul.f32 %v1343_v51, %v1343_v51  ;;  %v1323_v55 = vadd.f32 %v1898_v52, %v1223_v38 }
 0x189   :  { %v1369_v3 = vmul.f32 %v1347_v60, %v1347_v60  ;;  %v1354_v6 = vsel %vm1353_vm0, %v1347_v60, 0.0 }
 0x18a   :  { %v1371_v58 = vadd.f32 %v1370_v49, %v1365_v54  ;;  %v1344_v59 = vmax.f32 %v1323_v55, 0.0 }
 0x18b   :  { %v1375_v10 = vsel %vm1353_vm0, %v1369_v3, 0.0 }
 0x18c   :  { %v1350_v62 = vadd.f32 %v1349_v53, %v1344_v59  ;;  %v1366_v63 = vmul.f32 %v1344_v59, %v1344_v59 }
 0x18e   :  { %v1351_v2 = vadd.f32 %v1350_v62, %v1345_v56  ;;  %v1372_v33 = vadd.f32 %v1371_v58, %v1366_v63 }
 0x190   :  { %v1352_v50 = vadd.f32 %v1351_v2, %v1346_v61  ;;  %v1373_v5 = vadd.f32 %v1372_v33, %v1367_v0 }
 0x192   :  { %v1355_v7 = vadd.f32 %v1354_v6, %v1352_v50  ;;  %v1374_v8 = vadd.f32 %v1373_v5, %v1368_v4 }
 0x194   :  { %v1356_v38 = vrot.slane %v1355_v7, 4  ;;  %v1376_v11 = vadd.f32 %v1375_v10, %v1374_v8 }
 0x196   :  { %v1357_v12 = vadd.f32 %v1356_v38, %v1355_v7  ;;  %v1377_v47 = vrot.slane %v1376_v11, 4 }
 0x198   :  { %v1358_v13 = vrot.slane %v1357_v12, 2  ;;  %v1378_v14 = vadd.f32 %v1377_v47, %v1376_v11 }
 0x19a   :  { %v1359_v15 = vadd.f32 %v1358_v13, %v1357_v12  ;;  %v1379_v16 = vrot.slane %v1378_v14, 2 }
 0x19c   :  { %v1360_v18 = vrot.slane %v1359_v15, 1  ;;  %v1380_v19 = vadd.f32 %v1379_v16, %v1378_v14 }
 0x19e   :  { %v1361_v20 = vadd.f32 %v1360_v18, %v1359_v15  ;;  %v1381_v57 = vrot.slane %v1380_v19, 1 }
 0x1a0   :  { %v1362_v21 = vmul.f32 0.02, %v1361_v20  ;;  %v1382_v22 = vadd.f32 %v1381_v57, %v1380_v19 }
 0x1a2   :  { %v1383_v23 = vmul.f32 0.02, %v1382_v22  ;;  %v1384_v26 = vmul.f32 %v1362_v21, %v1362_v21 }
 0x1a4   :  { %v1385_v27 = vsub.f32 %v1383_v23, %v1384_v26 }
 0x1a6   :  { %v1387_v9 = vadd.f32 1e-05, %v1385_v27 }
 0x1a8   :  { %2212 = vrsqrt.f32 %v1387_v9 }
 0x1b2   :  { %v2213_v32 = vpop.eup %2212 }
 0x1b3   :  { %v1389_v25 = vmul.f32 %v2213_v32, %v1386_v29 }
 0x1b5   :  { %v1391_v24 = vmul.f32 %v1389_v25, %v1362_v21  ;;  %v1397_v36 = vrot.slane %v1389_v25, %v1396_v30 }
 0x1b7   :  { %v1392_v37 = vsub.f32 %v1390_v35, %v1391_v24  ;;  %v1399_v40 = vmul.f32 %v1397_v36, %v3489_v34  ;;  %v1400_v41 = vmul.f32 %v1397_v36, %v3491_v39  ;;  %v1401_v42 = vmul.f32 %v1397_v36, %v1343_v51 }
 0x1b8   :  { %v1402_v17 = vmul.f32 %v1397_v36, %v1344_v59  ;;  %v1403_v43 = vmul.f32 %v1397_v36, %v1345_v56  ;;  %v1404_v44 = vmul.f32 %v1397_v36, %v1346_v61  ;;  %v1405_v45 = vmul.f32 %v1397_v36, %v1347_v60 }
 0x1b9   :  { %v1410_v31 = vrot.slane %v1392_v37, %v1396_v30 }
 0x1bb   :  { %v1412_v46 = vadd.f32 %v1410_v31, %v1399_v40  ;;  %v1413_v48 = vadd.f32 %v1410_v31, %v1400_v41  ;;  %v1414_v49 = vadd.f32 %v1410_v31, %v1401_v42  ;;  %v1415_v52 = vadd.f32 %v1410_v31, %v1402_v17 }
 0x1bc   :  { %v1416_v53 = vadd.f32 %v1410_v31, %v1403_v43  ;;  %v1417_v54 = vadd.f32 %v1410_v31, %v1404_v44  ;;  %v1418_v55 = vadd.f32 %v1410_v31, %v1405_v45 }
 0x1bd   :  { %1419 = vst [vmem:[%s3533_s5] sm:$0xff] %v1412_v46  ;;  %1420 = vst [vmem:[%s3533_s5 + $0x8] sm:$0xff] %v1413_v48 }
 0x1be   :  { %1421 = vst [vmem:[%s3533_s5 + $0x10] sm:$0xff] %v1414_v49  ;;  %1422 = vst [vmem:[%s3533_s5 + $0x18] sm:$0xff] %v1415_v52 }
 0x1bf   :  { %1423 = vst [vmem:[%s3533_s5 + $0x20] sm:$0xff] %v1416_v53  ;;  %1424 = vst [vmem:[%s3533_s5 + $0x28] sm:$0xff] %v1417_v54 }
 0x1c0   :  { %1425 = vst [vmem:[%s3533_s5 + $0x30] sm:$0x3] %v1418_v55 }

// kernel: gen_sagan_forward.8
= control target key start
LH: loop header
LB: loop body
LE: loop exit
PB: predicated region body
PF: predicated region fallthrough
CT: control target
= control target key end

     0   :  { %v2333_v0 = vmov 0.0|0.0   ;;  %vm2334_vm0 = vmmov 0   ;;  %v2335_v4 = vmov 0.0   ;;  %vm55_vm1 = vcmask 523264   ;;  %s3189_s2 = inlined_call_operand.vmem [shape: f32[64,8], index: 2, kind: input, shape index: {}]   ;;  %s3190_s1 = inlined_call_operand.vmem [shape: f32[64,8], index: 1, kind: input, shape index: {}]   ;;  %s3191_s0 = inlined_call_operand.vmem [shape: f32[2,49,64], index: 0, kind: input, shape index: {}]   ;;  %s3192_s5 = inlined_call_operand.vmem [shape: f32[1,8], index: 5, kind: input, shape index: {}]   ;;  %s3193_s4 = inlined_call_operand.vmem [shape: f32[1,8], index: 4, kind: input, shape index: {}]   ;;  %s3194_s3 = inlined_call_operand.vmem [shape: f32[64,64], index: 3, kind: input, shape index: {}]   ;;  %s3195_s6 = inlined_call_operand.vmem [shape: f32[1,64], index: 6, kind: input, shape index: {}]   ;;  %s3196_s9 = inlined_call_operand.vmem [shape: f32[2,49,49], index: 9, kind: output, shape index: {1}]   ;;  %s3197_s7 = inlined_call_operand.<no memory space> [shape: f32[1,1], index: 7, kind: input, shape index: {}]   ;;  %s3198_s8 = inlined_call_operand.vmem [shape: f32[2,49,64], index: 8, kind: output, shape index: {0}]  }
   0x1   :  { %2172 = vmatprep.subr.bf16.mxu1 %v2333_v0  ;;  %v177_v1 = vld [vmem:[%s3189_s2] sm:$0xff]  ;;  %v178_v2 = vld [vmem:[%s3189_s2 + $0x8] sm:$0xff]  ;;  %v179_v3 = vld [vmem:[%s3189_s2 + $0x10] sm:$0xff]  ;;  %1851 = vmatprep.mubr.msk.f32.mxu1 %vm2334_vm0, %v2335_v4  ;;  %vm407_vm2 = vcmask 64512   ;;  %vm550_vm4 = vcmask 400384   ;;  %vm569_vm5 = vcmask 393216  }
   0x2   :  { %v2398_v5 = vpack.c.bf16 %v178_v2, %v177_v1  ;;  %v180_v6 = vld [vmem:[%s3189_s2 + $0x18] sm:$0xff]  ;;  %2160 = vmatprep.subr.bf16.mxu0 %v2333_v0  ;;  %1814 = vmatprep.mubr.msk.f32.mxu0 %vm2334_vm0, %v2335_v4  ;;  %v181_v8 = vld [vmem:[%s3189_s2 + $0x20] sm:$0xff]  ;;  %v182_v9 = vld [vmem:[%s3189_s2 + $0x28] sm:$0xff]  ;;  %vm650_vm6 = vcmask 1040384   ;;  %vm775_vm7 = vcmask 516096  }
   0x3   :  { %v2407_v7 = vpack.c.bf16 %v180_v6, %v179_v3  ;;  %v40_v10 = vld [vmem:[%s3190_s1] sm:$0xff]  ;;  %v41_v11 = vld [vmem:[%s3190_s1 + $0x8] sm:$0xff]  ;;  %v42_v13 = vld [vmem:[%s3190_s1 + $0x10] sm:$0xff]  ;;  %v2431_v15 = vpack.c.bf16 %v182_v9, %v181_v8 }
   0x4   :  { %2174 = vmatpush3.bf16.msra.mxu1 %v2398_v5  ;;  %v2422_v12 = vpack.c.bf16 %v41_v11, %v40_v10  ;;  %v43_v14 = vld [vmem:[%s3190_s1 + $0x18] sm:$0xff]  ;;  %v183_v16 = vld [vmem:[%s3189_s2 + $0x30] sm:$0xff]  ;;  %v44_v19 = vld [vmem:[%s3190_s1 + $0x20] sm:$0xff] }
   0x5   :  { %2175 = vmatprep.subr.bf16.mxu1 %v2333_v0  ;;  %v2437_v17 = vpack.c.bf16 %v43_v14, %v42_v13  ;;  %v184_v18 = vld [vmem:[%s3189_s2 + $0x38] sm:$0xff]  ;;  %v45_v20 = vld [vmem:[%s3190_s1 + $0x28] sm:$0xff]  ;;  %v46_v23 = vld [vmem:[%s3190_s1 + $0x30] sm:$0xff] }
   0x6   :  { %2162 = vmatpush3.bf16.msra.mxu0 %v2422_v12  ;;  %v2451_v21 = vpack.c.bf16 %v184_v18, %v183_v16  ;;  %v2454_v22 = vpack.c.bf16 %v45_v20, %v44_v19  ;;  %v47_v24 = vld [vmem:[%s3190_s1 + $0x38] sm:$0xff]  ;;  %v2468_v25 = vld [vmem:[%s3191_s0] sm:$0xff]  ;;  %v2482_v27 = vld [vmem:[%s3191_s0 + $0x8] sm:$0xff] }
   0x7   :  { %2163 = vmatprep.subr.bf16.mxu0 %v2333_v0  ;;  %v2471_v26 = vpack.c.bf16 %v47_v24, %v46_v23  ;;  %v2495_v28 = vld [vmem:[%s3191_s0 + $0x10] sm:$0xff]  ;;  %v2508_v29 = vld [vmem:[%s3191_s0 + $0x18] sm:$0xff]  ;;  %v2521_v30 = vld [vmem:[%s3191_s0 + $0x20] sm:$0xff] }
   0x8   :  { %2177 = vmatpush3.bf16.msra.mxu1 %v2407_v7  ;;  %v2534_v31 = vld [vmem:[%s3191_s0 + $0x28] sm:$0xff]  ;;  %v2547_v32 = vld [vmem:[%s3191_s0 + $0x30] sm:$0x1]  ;;  %v2566_v35 = vld [vmem:[%s3192_s5] ss:$0 sm:$0xff] }
   0x9   :  { %2178 = vmatprep.subr.bf16.mxu1 %v2333_v0  ;;  %vm2572_vm3 = vmpackc.low %vm407_vm2, %vm407_vm2  ;;  %v2593_v13 = vld [vmem:[%s3193_s4] ss:$0 sm:$0xff]  ;;  %v293_v24 = vld [vmem:[%s3194_s3 + $0x8] sm:$0xff] }
   0xa   :  { %2165 = vmatpush3.bf16.msra.mxu0 %v2437_v17  ;;  %v292_v23 = vld [vmem:[%s3194_s3] sm:$0xff] }
   0xb   :  { %2166 = vmatprep.subr.bf16.mxu0 %v2333_v0 }
   0xc   :  { %2180 = vmatpush3.bf16.msra.mxu1 %v2431_v15 }
   0xd   :  { %2181 = vmatprep.subr.bf16.mxu1 %v2333_v0 }
   0xe   :  { %2168 = vmatpush3.bf16.msra.mxu0 %v2454_v22 }
   0xf   :  { %2169 = vmatprep.subr.bf16.mxu0 %v2333_v0 }
  0x10   :  { %2183 = vmatpush3.bf16.msra.mxu1 %v2451_v21 }
  0x11   :  { %2196 = vmatprep.subr.bf16.mxu1 %v2333_v0 }
  0x12   :  { %2171 = vmatpush3.bf16.msra.mxu0 %v2471_v26 }
  0x13   :  { %1852 = vmatmul.mubr.msk.f32.vlgmr.msra.gmra.mrb[0].mxu1 %vm55_vm1, %v2468_v25  ;;  %2184 = vmatprep.subr.bf16.mxu0 %v2333_v0 }
  0x14   :  { %1854 = vmatprep.mubr.msk.f32.mxu1 %vm2334_vm0, %v2335_v4 }
  0x15   :  { %1815 = vmatmul.mubr.msk.f32.vlgmr.msra.gmra.mrb[0].mxu0 %vm55_vm1, %v2468_v25 }
  0x16   :  { %1817 = vmatprep.mubr.msk.f32.mxu0 %vm2334_vm0, %v2335_v4 }
  0x17   :  { %1855 = vmatmul.mubr.msk.f32.gmra.mrb[2].mxu1 %vm55_vm1, %v2482_v27 }
  0x18   :  { %1857 = vmatprep.mubr.msk.f32.mxu1 %vm2334_vm0, %v2335_v4 }
  0x19   :  { %1818 = vmatmul.mubr.msk.f32.gmra.mrb[2].mxu0 %vm55_vm1, %v2482_v27 }
  0x1a   :  { %1820 = vmatprep.mubr.msk.f32.mxu0 %vm2334_vm0, %v2335_v4 }
  0x1b   :  { %1858 = vmatmul.mubr.msk.f32.gmra.mrb[4].mxu1 %vm55_vm1, %v2495_v28 }
  0x1c   :  { %1860 = vmatprep.mubr.msk.f32.mxu1 %vm2334_vm0, %v2335_v4 }
  0x1d   :  { %1821 = vmatmul.mubr.msk.f32.gmra.mrb[4].mxu0 %vm55_vm1, %v2495_v28 }
  0x1e   :  { %1823 = vmatprep.mubr.msk.f32.mxu0 %vm2334_vm0, %v2335_v4 }
  0x1f   :  { %1861 = vmatmul.mubr.msk.f32.gmra.mrb[6].mxu1 %vm55_vm1, %v2508_v29 }
  0x20   :  { %1863 = vmatprep.mubr.msk.f32.mxu1 %vm2334_vm0, %v2335_v4 }
  0x21   :  { %1824 = vmatmul.mubr.msk.f32.gmra.mrb[6].mxu0 %vm55_vm1, %v2508_v29 }
  0x22   :  { %1826 = vmatprep.mubr.msk.f32.mxu0 %vm2334_vm0, %v2335_v4 }
  0x23   :  { %1864 = vmatmul.mubr.msk.f32.gmra.mrb[8].mxu1 %vm55_vm1, %v2521_v30 }
  0x24   :  { %1866 = vmatprep.mubr.msk.f32.mxu1 %vm2334_vm0, %v2335_v4 }
  0x25   :  { %1827 = vmatmul.mubr.msk.f32.gmra.mrb[8].mxu0 %vm55_vm1, %v2521_v30 }
  0x26   :  { %1829 = vmatprep.mubr.msk.f32.mxu0 %vm2334_vm0, %v2335_v4 }
  0x27   :  { %1867 = vmatmul.mubr.msk.f32.gmra.mrb[10].mxu1 %vm55_vm1, %v2534_v31 }
  0x28   :  { %1869 = vmatprep.mubr.msk.f32.mxu1 %vm2334_vm0, %v2335_v4 }
  0x29   :  { %1830 = vmatmul.mubr.msk.f32.gmra.mrb[10].mxu0 %vm55_vm1, %v2534_v31 }
  0x2a   :  { %1832 = vmatprep.mubr.msk.f32.mxu0 %vm2334_vm0, %v2335_v4 }
  0x2b   :  { %1870 = vmatmul.mubr.msk.f32.gmra.mrb[12].mxu1 %vm55_vm1, %v2547_v32 }
  0x2c   :  { %1923 = vmatprep.mubr.msk.f32.mxu1 %vm2334_vm0, %v2335_v4 }
  0x2d   :  { %1833 = vmatmul.mubr.msk.f32.gmra.mrb[12].mxu0 %vm55_vm1, %v2547_v32 }
  0x2e   :  { %1888 = vmatprep.mubr.msk.f32.mxu0 %vm2334_vm0, %v2335_v4 }
  0xe6   :  { %v258_v33 = vpop.f32.mrb[0].mxu1 }
  0xe7   :  { %v1853_v34 = vpop.f32.mrb[1].mxu1  ;;  %v259_v38 = vadd.f32 %v2566_v35, %v258_v33  ;;  %v2642_v33 = vpack.c.bf16 %v293_v24, %v292_v23 }
  0xe8   :  { %v143_v37 = vpop.f32.mrb[0].mxu0  ;;  %v295_v34 = vld [vmem:[%s3194_s3 + $0x18] sm:$0xff] }
  0xe9   :  { %v1816_v41 = vpop.f32.mrb[1].mxu0  ;;  %v144_v16 = vadd.f32 %v2593_v13, %v143_v37  ;;  %2186 = vmatpush3.bf16.msra.mxu0 %v2642_v33  ;;  %v296_v37 = vld [vmem:[%s3194_s3 + $0x20] sm:$0xff] }
  0xea   :  { %v263_v36 = vpop.f32.mrb[2].mxu1  ;;  %2187 = vmatprep.subr.bf16.mxu0 %v2333_v0  ;;  %v299_v41 = vld [vmem:[%s3194_s3 + $0x38] sm:$0xff] }
  0xeb   :  { %v264_v39 = vadd.f32 %v2566_v35, %v263_v36  ;;  %v1856_v40 = vpop.f32.mrb[3].mxu1 }
  0xec   :  { %v148_v45 = vpop.f32.mrb[2].mxu0  ;;  %v298_v40 = vld [vmem:[%s3194_s3 + $0x30] sm:$0xff] }
  0xed   :  { %v2197_v43 = vpack.c.bf16 %v264_v39, %v259_v38  ;;  %v1819_v47 = vpop.f32.mrb[3].mxu0  ;;  %v149_v18 = vadd.f32 %v2593_v13, %v148_v45  ;;  %v297_v38 = vld [vmem:[%s3194_s3 + $0x28] sm:$0xff] }
  0xee   :  { %v268_v44 = vpop.f32.mrb[4].mxu1  ;;  %v2658_v39 = vpack.c.bf16 %v297_v38, %v296_v37 }
  0xef   :  { %v1859_v46 = vpop.f32.mrb[5].mxu1  ;;  %2199 = vmatpush3.bf16.xpose.msk.msra.mxu1 %vm2572_vm3, %v2197_v43  ;;  %v269_v50 = vadd.f32 %v2566_v35, %v268_v44  ;;  %v2668_v43 = vpack.c.bf16 %v299_v41, %v298_v40 }
  0xf0   :  { %2200 = vmatprep.subr.bf16.mxu1 %v2333_v0  ;;  %v153_v49 = vpop.f32.mrb[4].mxu0 }
  0xf1   :  { %v1822_v53 = vpop.f32.mrb[5].mxu0  ;;  %v154_v19 = vadd.f32 %v2593_v13, %v153_v49 }
  0xf2   :  { %v273_v48 = vpop.f32.mrb[6].mxu1 }
  0xf3   :  { %v274_v51 = vadd.f32 %v2566_v35, %v273_v48  ;;  %v1862_v52 = vpop.f32.mrb[7].mxu1 }
  0xf4   :  { %v158_v56 = vpop.f32.mrb[6].mxu0 }
  0xf5   :  { %v2201_v54 = vpack.c.bf16 %v274_v51, %v269_v50  ;;  %v1825_v58 = vpop.f32.mrb[7].mxu0  ;;  %v159_v20 = vadd.f32 %v2593_v13, %v158_v56 }
  0xf6   :  { %v278_v55 = vpop.f32.mrb[8].mxu1 }
  0xf7   :  { %v1865_v57 = vpop.f32.mrb[9].mxu1  ;;  %2203 = vmatpush3.bf16.xpose.msk.msra.mxu1 %vm2572_vm3, %v2201_v54  ;;  %v279_v61 = vadd.f32 %v2566_v35, %v278_v55 }
  0xf8   :  { %2204 = vmatprep.subr.bf16.mxu1 %v2333_v0  ;;  %v163_v60 = vpop.f32.mrb[8].mxu0 }
  0xf9   :  { %v1828_v1 = vpop.f32.mrb[9].mxu0 }
  0xfa   :  { %v283_v59 = vpop.f32.mrb[10].mxu1 }
  0xfb   :  { %v284_v62 = vadd.f32 %v2566_v35, %v283_v59  ;;  %v1868_v63 = vpop.f32.mrb[11].mxu1 }
  0xfc   :  { %v168_v6 = vpop.f32.mrb[10].mxu0 }
  0xfd   :  { %v2205_v2 = vpack.c.bf16 %v284_v62, %v279_v61  ;;  %v1831_v9 = vpop.f32.mrb[11].mxu0 }
  0xfe   :  { %v288_v3 = vpop.f32.mrb[12].mxu1 }
  0xff   :  { %2207 = vmatpush3.bf16.xpose.msk.msra.mxu1 %vm2572_vm3, %v2205_v2  ;;  %v1871_v8 = vpop.f32.mrb[13].mxu1  ;;  %v289_v11 = vadd.f32 %v2566_v35, %v288_v3  ;;  %v2720_v2 = vld [vmem:[%s3195_s6] ss:$0 sm:$0xff] }
 0x100   :  { %1921 = vmatprep.subr.mxu1 %v2335_v4  ;;  %v173_v10 = vpop.f32.mrb[12].mxu0 }
 0x101   :  { %v1834_v14 = vpop.f32.mrb[13].mxu0 }
 0x107   :  { %1922 = vmatpush3.xpose.msk.msra.mxu1 %vm407_vm2, %v289_v11 }
 0x108   :  { %2217 = vmatprep.subr.bf16.mxu1 %v2333_v0 }
 0x10a   :  { %1924 = vmatmul.mubr.msk.f32.vlgmr.msra.gmra.mrb[14].mxu1 %vm407_vm2, %v144_v16 }
 0x10b   :  { %1926 = vmatprep.mubr.msk.f32.mxu1 %vm2334_vm0, %v2335_v4  ;;  %2219 = vmatpush3.bf16.msra.mxu1 %v2422_v12  ;;  %v164_v12 = vadd.f32 %v2593_v13, %v163_v60 }
 0x10c   :  { %2220 = vmatprep.subr.bf16.mxu1 %v2333_v0 }
 0x10e   :  { %1927 = vmatmul.mubr.msk.f32.gmra.mrb[16].mxu1 %vm407_vm2, %v149_v18 }
 0x10f   :  { %1929 = vmatprep.mubr.msk.f32.mxu1 %vm2334_vm0, %v2335_v4  ;;  %2222 = vmatpush3.bf16.msra.mxu1 %v2437_v17  ;;  %v169_v17 = vadd.f32 %v2593_v13, %v168_v6 }
 0x110   :  { %2223 = vmatprep.subr.bf16.mxu1 %v2333_v0 }
 0x112   :  { %1930 = vmatmul.mubr.msk.f32.gmra.mrb[18].mxu1 %vm407_vm2, %v154_v19 }
 0x113   :  { %1932 = vmatprep.mubr.msk.f32.mxu1 %vm2334_vm0, %v2335_v4  ;;  %2225 = vmatpush3.bf16.msra.mxu1 %v2454_v22  ;;  %v174_v22 = vadd.f32 %v2593_v13, %v173_v10 }
 0x114   :  { %2226 = vmatprep.subr.bf16.mxu1 %v2333_v0 }
 0x116   :  { %1933 = vmatmul.mubr.msk.f32.gmra.mrb[20].mxu1 %vm407_vm2, %v159_v20 }
 0x117   :  { %1935 = vmatprep.mubr.msk.f32.mxu1 %vm2334_vm0, %v2335_v4  ;;  %2228 = vmatpush3.bf16.msra.mxu1 %v2471_v26  ;;  %v294_v26 = vld [vmem:[%s3194_s3 + $0x10] sm:$0xff] }
 0x118   :  { %2241 = vmatprep.subr.bf16.mxu1 %v2333_v0  ;;  %v2648_v36 = vpack.c.bf16 %v295_v34, %v294_v26 }
 0x11a   :  { %1936 = vmatmul.mubr.msk.f32.gmra.mrb[22].mxu1 %vm407_vm2, %v164_v12  ;;  %2189 = vmatpush3.bf16.msra.mxu0 %v2648_v36 }
 0x11b   :  { %1938 = vmatprep.mubr.msk.f32.mxu1 %vm2334_vm0, %v2335_v4  ;;  %2190 = vmatprep.subr.bf16.mxu0 %v2333_v0 }
 0x11e   :  { %1939 = vmatmul.mubr.msk.f32.gmra.mrb[24].mxu1 %vm407_vm2, %v169_v17  ;;  %2192 = vmatpush3.bf16.msra.mxu0 %v2658_v39 }
 0x11f   :  { %1941 = vmatprep.mubr.msk.f32.mxu1 %vm2334_vm0, %v2335_v4  ;;  %2193 = vmatprep.subr.bf16.mxu0 %v2333_v0 }
 0x122   :  { %1942 = vmatmul.mubr.msk.f32.gmra.mrb[26].mxu1 %vm407_vm2, %v174_v22  ;;  %2195 = vmatpush3.bf16.msra.mxu0 %v2668_v43 }
 0x123   :  { %1995 = vmatprep.mubr.msk.f32.mxu1 %vm2334_vm0, %v2335_v4  ;;  %2208 = vmatprep.subr.bf16.mxu0 %v2333_v0 }
 0x125   :  { %1889 = vmatmul.mubr.msk.f32.vlgmr.msra.gmra.mrb[14].mxu0 %vm55_vm1, %v2468_v25 }
 0x126   :  { %1891 = vmatprep.mubr.msk.f32.mxu0 %vm2334_vm0, %v2335_v4 }
 0x129   :  { %1892 = vmatmul.mubr.msk.f32.gmra.mrb[16].mxu0 %vm55_vm1, %v2482_v27 }
 0x12a   :  { %1894 = vmatprep.mubr.msk.f32.mxu0 %vm2334_vm0, %v2335_v4 }
 0x12d   :  { %1895 = vmatmul.mubr.msk.f32.gmra.mrb[18].mxu0 %vm55_vm1, %v2495_v28 }
 0x12e   :  { %1897 = vmatprep.mubr.msk.f32.mxu0 %vm2334_vm0, %v2335_v4 }
 0x131   :  { %1898 = vmatmul.mubr.msk.f32.gmra.mrb[20].mxu0 %vm55_vm1, %v2508_v29 }
 0x132   :  { %1900 = vmatprep.mubr.msk.f32.mxu0 %vm2334_vm0, %v2335_v4 }
 0x135   :  { %1901 = vmatmul.mubr.msk.f32.gmra.mrb[22].mxu0 %vm55_vm1, %v2521_v30 }
 0x136   :  { %1903 = vmatprep.mubr.msk.f32.mxu0 %vm2334_vm0, %v2335_v4 }
 0x139   :  { %1904 = vmatmul.mubr.msk.f32.gmra.mrb[24].mxu0 %vm55_vm1, %v2534_v31 }
 0x13a   :  { %1906 = vmatprep.mubr.msk.f32.mxu0 %vm2334_vm0, %v2335_v4 }
 0x13d   :  { %1907 = vmatmul.mubr.msk.f32.gmra.mrb[26].mxu0 %vm55_vm1, %v2547_v32 }
 0x13e   :  { %1958 = vmatprep.mubr.msk.f32.mxu0 %vm2334_vm0, %v2335_v4 }
 0x1dd   :  { %v516_v44 = vpop.f32.mrb[14].mxu1 }
 0x1de   :  { %v1925_v45 = vpop.f32.mrb[15].mxu1  ;;  %v551_v46 = vsel %vm550_vm4, %v516_v44, -inf }
 0x1df   :  { %552 = vmax.xlane.f32.xlu0 %v551_v46 }
 0x1e1   :  { %v521_v47 = vpop.f32.mrb[16].mxu1 }
 0x1e2   :  { %v1928_v48 = vpop.f32.mrb[17].mxu1  ;;  %v554_v49 = vsel %vm550_vm4, %v521_v47, -inf }
 0x1e3   :  { %555 = vmax.xlane.f32.xlu0 %v554_v49 }
 0x1e5   :  { %v526_v50 = vpop.f32.mrb[18].mxu1 }
 0x1e6   :  { %v1931_v51 = vpop.f32.mrb[19].mxu1  ;;  %v557_v52 = vsel %vm550_vm4, %v526_v50, -inf }
 0x1e7   :  { %558 = vmax.xlane.f32.xlu1 %v557_v52 }
 0x1e9   :  { %v531_v53 = vpop.f32.mrb[20].mxu1 }
 0x1ea   :  { %v1934_v54 = vpop.f32.mrb[21].mxu1  ;;  %v560_v55 = vsel %vm550_vm4, %v531_v53, -inf }
 0x1eb   :  { %561 = vmax.xlane.f32.xlu1 %v560_v55 }
 0x1ed   :  { %v2705_v56 = vpop.f32.mrb[22].mxu1 }
 0x1ee   :  { %v1937_v57 = vpop.f32.mrb[23].mxu1  ;;  %v563_v58 = vsel %vm550_vm4, %v2705_v56, -inf }
 0x1ef   :  { %564 = vmax.xlane.f32.xlu0 %v563_v58 }
 0x1f1   :  { %v2709_v59 = vpop.f32.mrb[24].mxu1 }
 0x1f2   :  { %v1940_v60 = vpop.f32.mrb[25].mxu1  ;;  %v566_v61 = vsel %vm550_vm4, %v2709_v59, -inf }
 0x1f3   :  { %567 = vmax.xlane.f32.xlu1 %v566_v61 }
 0x1f5   :  { %v2713_v62 = vpop.f32.mrb[26].mxu1 }
 0x1f6   :  { %v1943_v63 = vpop.f32.mrb[27].mxu1  ;;  %v570_v1 = vsel %vm569_vm5, %v2713_v62, -inf }
 0x1f7   :  { %571 = vmax.xlane.f32.xlu0 %v570_v1 }
 0x1f8   :  { %v373_v3 = vpop.f32.mrb[14].mxu0 }
 0x1f9   :  { %v1890_v6 = vpop.f32.mrb[15].mxu0  ;;  %v374_v8 = vadd.f32 %v2720_v2, %v373_v3 }
 0x1fc   :  { %v378_v9 = vpop.f32.mrb[16].mxu0 }
 0x1fd   :  { %v379_v10 = vadd.f32 %v2720_v2, %v378_v9  ;;  %v1893_v11 = vpop.f32.mrb[17].mxu0 }
 0x1ff   :  { %v2209_v14 = vpack.c.bf16 %v379_v10, %v374_v8 }
 0x200   :  { %v383_v16 = vpop.f32.mrb[18].mxu0 }
 0x201   :  { %2210 = vmatpush3.bf16.msra.mxu0 %v2209_v14  ;;  %v1896_v18 = vpop.f32.mrb[19].mxu0  ;;  %v384_v19 = vadd.f32 %v2720_v2, %v383_v16 }
 0x202   :  { %2211 = vmatprep.subr.bf16.mxu0 %v2333_v0 }
 0x204   :  { %v388_v20 = vpop.f32.mrb[20].mxu0 }
 0x205   :  { %v389_v12 = vadd.f32 %v2720_v2, %v388_v20  ;;  %v1899_v17 = vpop.f32.mrb[21].mxu0 }
 0x207   :  { %v2212_v23 = vpack.c.bf16 %v389_v12, %v384_v19 }
 0x208   :  { %v393_v26 = vpop.f32.mrb[22].mxu0 }
 0x209   :  { %2213 = vmatpush3.bf16.msra.mxu0 %v2212_v23  ;;  %v1902_v34 = vpop.f32.mrb[23].mxu0  ;;  %v394_v40 = vadd.f32 %v2720_v2, %v393_v26  ;;  %v2768_v26 = vld [vmem:[%s3191_s0 + $0x38] sm:$0xff] }
 0x20a   :  { %2214 = vmatprep.subr.bf16.mxu0 %v2333_v0  ;;  %1996 = vmatmul.mubr.msk.f32.vlgmr.msra.gmra.mrb[28].mxu1 %vm55_vm1, %v2768_v26  ;;  %v2779_v34 = vld [vmem:[%s3191_s0 + $0x40] sm:$0xff] }
 0x20b   :  { %1998 = vmatprep.mubr.msk.f32.mxu1 %vm2334_vm0, %v2335_v4  ;;  %2243 = vmatpush3.bf16.msra.mxu1 %v2642_v33  ;;  %v2790_v33 = vld [vmem:[%s3191_s0 + $0x48] sm:$0xff] }
 0x20c   :  { %v398_v45 = vpop.f32.mrb[24].mxu0  ;;  %2244 = vmatprep.subr.bf16.mxu1 %v2333_v0 }
 0x20d   :  { %v399_v46 = vadd.f32 %v2720_v2, %v398_v45  ;;  %v1905_v48 = vpop.f32.mrb[25].mxu0 }
 0x20e   :  { %1999 = vmatmul.mubr.msk.f32.gmra.mrb[30].mxu1 %vm55_vm1, %v2779_v34 }
 0x20f   :  { %v2215_v52 = vpack.c.bf16 %v399_v46, %v394_v40  ;;  %2001 = vmatprep.mubr.msk.f32.mxu1 %vm2334_vm0, %v2335_v4  ;;  %2246 = vmatpush3.bf16.msra.mxu1 %v2648_v36  ;;  %v2801_v36 = vld [vmem:[%s3191_s0 + $0x50] sm:$0xff] }
 0x210   :  { %v403_v17 = vpop.f32.mrb[26].mxu0  ;;  %2247 = vmatprep.subr.bf16.mxu1 %v2333_v0 }
 0x211   :  { %2216 = vmatpush3.bf16.msra.mxu0 %v2215_v52  ;;  %v1908_v23 = vpop.f32.mrb[27].mxu0 }
 0x212   :  { %1956 = vmatprep.subr.mxu0 %v2335_v4  ;;  %2002 = vmatmul.mubr.msk.f32.gmra.mrb[32].mxu1 %vm55_vm1, %v2790_v33 }
 0x213   :  { %2004 = vmatprep.mubr.msk.f32.mxu1 %vm2334_vm0, %v2335_v4  ;;  %2249 = vmatpush3.bf16.msra.mxu1 %v2658_v39  ;;  %v2812_v39 = vld [vmem:[%s3191_s0 + $0x58] sm:$0xff] }
 0x214   :  { %2250 = vmatprep.subr.bf16.mxu1 %v2333_v0 }
 0x216   :  { %2005 = vmatmul.mubr.msk.f32.gmra.mrb[34].mxu1 %vm55_vm1, %v2801_v36 }
 0x217   :  { %2007 = vmatprep.mubr.msk.f32.mxu1 %vm2334_vm0, %v2335_v4  ;;  %2252 = vmatpush3.bf16.msra.mxu1 %v2668_v43  ;;  %v2830_v43 = vld [vmem:[%s3191_s0 + $0x68] sm:$0x1] }
 0x218   :  { %2265 = vmatprep.subr.bf16.mxu1 %v2333_v0 }
 0x21a   :  { %2008 = vmatmul.mubr.msk.f32.gmra.mrb[36].mxu1 %vm55_vm1, %v2812_v39 }
 0x21b   :  { %2010 = vmatprep.mubr.msk.f32.mxu1 %vm2334_vm0, %v2335_v4 }
 0x26c   :  { %v553_v22 = vpop.xlane.xlu0 %552 }
 0x26d   :  { %v573_v24 = vsub.f32 %v516_v44, %v553_v22 }
 0x26f   :  { %v580_v37 = vmul.f32 1.442695, %v573_v24  ;;  %v404_v24 = vadd.f32 %v2720_v2, %v403_v17 }
 0x270   :  { %v556_v38 = vpop.xlane.xlu0 %555 }
 0x271   :  { %2277 = vpow2.f32 %v580_v37  ;;  %v574_v41 = vsub.f32 %v521_v47, %v556_v38  ;;  %1957 = vmatpush3.msk.msra.mxu0 %vm650_vm6, %v404_v24  ;;  %v2821_v37 = vld [vmem:[%s3191_s0 + $0x60] sm:$0xff] }
 0x272   :  { %2229 = vmatprep.subr.bf16.mxu0 %v2333_v0  ;;  %2011 = vmatmul.mubr.msk.f32.gmra.mrb[38].mxu1 %vm55_vm1, %v2821_v37 }
 0x273   :  { %v582_v49 = vmul.f32 1.442695, %v574_v41  ;;  %2013 = vmatprep.mubr.msk.f32.mxu1 %vm2334_vm0, %v2335_v4 }
 0x274   :  { %v559_v51 = vpop.xlane.xlu1 %558 }
 0x275   :  { %2279 = vpow2.f32 %v582_v49  ;;  %v575_v44 = vsub.f32 %v526_v50, %v559_v51 }
 0x276   :  { %2014 = vmatmul.mubr.msk.f32.gmra.mrb[40].mxu1 %vm55_vm1, %v2830_v43 }
 0x277   :  { %v584_v54 = vmul.f32 1.442695, %v575_v44  ;;  %2069 = vmatprep.mubr.msk.f32.mxu1 %vm2334_vm0, %v2335_v4 }
 0x278   :  { %v562_v55 = vpop.xlane.xlu1 %561 }
 0x279   :  { %2281 = vpow2.f32 %v584_v54  ;;  %v576_v57 = vsub.f32 %v531_v53, %v562_v55 }
 0x27a   :  { %2070 = vmatmul.mubr.msk.f32.vlgmr.msra.gmra.mrb[42].mxu1 %vm55_vm1, %v2768_v26 }
 0x27b   :  { %v2731_v58 = vpop.eup %2277  ;;  %v586_v60 = vmul.f32 1.442695, %v576_v57  ;;  %2072 = vmatprep.mubr.msk.f32.mxu1 %vm2334_vm0, %v2335_v4 }
 0x27c   :  { %v565_v47 = vpop.xlane.xlu0 %564  ;;  %v594_v61 = vsel %vm550_vm4, %v2731_v58, 0.0 }
 0x27d   :  { %2283 = vpow2.f32 %v586_v60  ;;  %v577_v63 = vsub.f32 %v2705_v56, %v565_v47  ;;  %595 = vadd.xlane.f32.xlu1 %v594_v61 }
 0x27e   :  { %2073 = vmatmul.mubr.msk.f32.gmra.mrb[44].mxu1 %vm55_vm1, %v2779_v34 }
 0x27f   :  { %v2736_v1 = vpop.eup %2279  ;;  %v588_v50 = vmul.f32 1.442695, %v577_v63  ;;  %2075 = vmatprep.mubr.msk.f32.mxu1 %vm2334_vm0, %v2335_v4 }
 0x280   :  { %v568_v3 = vpop.xlane.xlu1 %567  ;;  %v597_v6 = vsel %vm550_vm4, %v2736_v1, 0.0 }
 0x281   :  { %2285 = vpow2.f32 %v588_v50  ;;  %v578_v53 = vsub.f32 %v2709_v59, %v568_v3  ;;  %598 = vadd.xlane.f32.xlu0 %v597_v6 }
 0x282   :  { %2076 = vmatmul.mubr.msk.f32.gmra.mrb[46].mxu1 %vm55_vm1, %v2790_v33 }
 0x283   :  { %v2741_v8 = vpop.eup %2281  ;;  %v590_v9 = vmul.f32 1.442695, %v578_v53  ;;  %2078 = vmatprep.mubr.msk.f32.mxu1 %vm2334_vm0, %v2335_v4 }
 0x284   :  { %v572_v10 = vpop.xlane.xlu0 %571  ;;  %v600_v11 = vsel %vm550_vm4, %v2741_v8, 0.0 }
 0x285   :  { %2287 = vpow2.f32 %v590_v9  ;;  %v579_v56 = vsub.f32 %v2713_v62, %v572_v10  ;;  %601 = vadd.xlane.f32.xlu1 %v600_v11 }
 0x286   :  { %2079 = vmatmul.mubr.msk.f32.gmra.mrb[48].mxu1 %vm55_vm1, %v2801_v36 }
 0x287   :  { %v2746_v14 = vpop.eup %2283  ;;  %v592_v16 = vmul.f32 1.442695, %v579_v56  ;;  %2081 = vmatprep.mubr.msk.f32.mxu1 %vm2334_vm0, %v2335_v4 }
 0x288   :  { %v603_v18 = vsel %vm550_vm4, %v2746_v14, 0.0 }
 0x289   :  { %2289 = vpow2.f32 %v592_v16  ;;  %604 = vadd.xlane.f32.xlu0 %v603_v18 }
 0x28a   :  { %2082 = vmatmul.mubr.msk.f32.gmra.mrb[50].mxu1 %vm55_vm1, %v2812_v39 }
 0x28b   :  { %v2750_v59 = vpop.eup %2285  ;;  %2084 = vmatprep.mubr.msk.f32.mxu1 %vm2334_vm0, %v2335_v4 }
 0x28c   :  { %v606_v19 = vsel %vm550_vm4, %v2750_v59, 0.0 }
 0x28d   :  { %607 = vadd.xlane.f32.xlu1 %v606_v19 }
 0x28e   :  { %2085 = vmatmul.mubr.msk.f32.gmra.mrb[52].mxu1 %vm55_vm1, %v2821_v37 }
 0x28f   :  { %v2754_v20 = vpop.eup %2287  ;;  %2087 = vmatprep.mubr.msk.f32.mxu1 %vm2334_vm0, %v2335_v4 }
 0x290   :  { %v609_v62 = vsel %vm550_vm4, %v2754_v20, 0.0 }
 0x291   :  { %610 = vadd.xlane.f32.xlu0 %v609_v62 }
 0x292   :  { %2088 = vmatmul.mubr.msk.f32.gmra.mrb[54].mxu1 %vm55_vm1, %v2830_v43 }
 0x293   :  { %v2758_v12 = vpop.eup %2289  ;;  %2139 = vmatprep.mubr.msk.f32.mxu1 %vm2334_vm0, %v2335_v4 }
 0x294   :  { %v612_v22 = vsel %vm569_vm5, %v2758_v12, 0.0 }
 0x295   :  { %613 = vadd.xlane.f32.xlu1 %v612_v22 }
 0x2dd   :  { %v2956_v63 = vpop.f32.mrb[28].mxu1 }
 0x30a   :  { %v596_v38 = vpop.xlane.xlu1 %595 }
 0x30b   :  { %2291 = vrcp.f32 %v596_v38 }
 0x30e   :  { %v599_v40 = vpop.xlane.xlu0 %598 }
 0x30f   :  { %2293 = vrcp.f32 %v599_v40 }
 0x312   :  { %v602_v41 = vpop.xlane.xlu1 %601 }
 0x313   :  { %2295 = vrcp.f32 %v602_v41 }
 0x315   :  { %v2292_v45 = vpop.eup %2291 }
 0x316   :  { %v616_v46 = vmul.f32 %v2292_v45, %v2731_v58  ;;  %v605_v48 = vpop.xlane.xlu0 %604 }
 0x317   :  { %2297 = vrcp.f32 %v605_v48 }
 0x318   :  { %777 = vst.msk [vmem:[%s3196_s9] sm:$0xff] %vm550_vm4, %v616_v46  ;;  %1959 = vmatmul.mubr.msk.f32.vlgmr.msra.gmra.mrb[28].mxu0 %vm550_vm4, %v616_v46 }
 0x319   :  { %v2294_v49 = vpop.eup %2293  ;;  %1961 = vmatprep.mubr.msk.f32.mxu0 %vm2334_vm0, %v2335_v4  ;;  %2231 = vmatpush3.bf16.msra.mxu0 %v2398_v5 }
 0x31a   :  { %v608_v51 = vpop.xlane.xlu1 %607  ;;  %v618_v52 = vmul.f32 %v2294_v49, %v2736_v1  ;;  %2232 = vmatprep.subr.bf16.mxu0 %v2333_v0  ;;  %v1997_v1 = vpop.f32.mrb[29].mxu1 }
 0x31b   :  { %2299 = vrcp.f32 %v608_v51  ;;  %v2958_v50 = vpop.f32.mrb[30].mxu1 }
 0x31c   :  { %1962 = vmatmul.mubr.msk.f32.gmra.mrb[30].mxu0 %vm550_vm4, %v618_v52  ;;  %778 = vst.msk [vmem:[%s3196_s9 + $0x8] sm:$0xff] %vm550_vm4, %v618_v52  ;;  %v2000_v3 = vpop.f32.mrb[31].mxu1 }
 0x31d   :  { %v2296_v44 = vpop.eup %2295  ;;  %1964 = vmatprep.mubr.msk.f32.mxu0 %vm2334_vm0, %v2335_v4  ;;  %2234 = vmatpush3.bf16.msra.mxu0 %v2407_v7  ;;  %v2960_v6 = vpop.f32.mrb[32].mxu1 }
 0x31e   :  { %v611_v5 = vpop.xlane.xlu0 %610  ;;  %v620_v54 = vmul.f32 %v2296_v44, %v2741_v8  ;;  %2235 = vmatprep.subr.bf16.mxu0 %v2333_v0  ;;  %v2003_v53 = vpop.f32.mrb[33].mxu1  ;;  %v905_v42 = vadd.f32 %v2593_v13, %v2960_v6 }
 0x31f   :  { %2301 = vrcp.f32 %v611_v5  ;;  %v2962_v8 = vpop.f32.mrb[34].mxu1 }
 0x320   :  { %1965 = vmatmul.mubr.msk.f32.gmra.mrb[32].mxu0 %vm550_vm4, %v620_v54  ;;  %779 = vst.msk [vmem:[%s3196_s9 + $0x10] sm:$0xff] %vm550_vm4, %v620_v54  ;;  %v2006_v9 = vpop.f32.mrb[35].mxu1 }
 0x321   :  { %v2298_v55 = vpop.eup %2297  ;;  %1967 = vmatprep.mubr.msk.f32.mxu0 %vm2334_vm0, %v2335_v4  ;;  %2237 = vmatpush3.bf16.msra.mxu0 %v2431_v15  ;;  %v2964_v10 = vpop.f32.mrb[36].mxu1 }
 0x322   :  { %v614_v7 = vpop.xlane.xlu1 %613  ;;  %v622_v57 = vmul.f32 %v2298_v55, %v2746_v14  ;;  %2238 = vmatprep.subr.bf16.mxu0 %v2333_v0  ;;  %v2009_v11 = vpop.f32.mrb[37].mxu1 }
 0x323   :  { %2303 = vrcp.f32 %v614_v7 }
 0x324   :  { %1968 = vmatmul.mubr.msk.f32.gmra.mrb[34].mxu0 %vm550_vm4, %v622_v57  ;;  %780 = vst.msk [vmem:[%s3196_s9 + $0x18] sm:$0xff] %vm550_vm4, %v622_v57 }
 0x325   :  { %v2300_v58 = vpop.eup %2299  ;;  %1970 = vmatprep.mubr.msk.f32.mxu0 %vm2334_vm0, %v2335_v4  ;;  %2240 = vmatpush3.bf16.msra.mxu0 %v2451_v21 }
 0x326   :  { %v624_v15 = vmul.f32 %v2300_v58, %v2750_v59  ;;  %2253 = vmatprep.subr.bf16.mxu0 %v2333_v0  ;;  %v2973_v59 = vstv %s3197_s7 }
 0x328   :  { %1971 = vmatmul.mubr.msk.f32.gmra.mrb[36].mxu0 %vm550_vm4, %v624_v15  ;;  %781 = vst.msk [vmem:[%s3196_s9 + $0x20] sm:$0xff] %vm550_vm4, %v624_v15 }
 0x329   :  { %v2302_v60 = vpop.eup %2301  ;;  %1973 = vmatprep.mubr.msk.f32.mxu0 %vm2334_vm0, %v2335_v4 }
 0x32a   :  { %v626_v47 = vmul.f32 %v2302_v60, %v2754_v20 }
 0x32c   :  { %1974 = vmatmul.mubr.msk.f32.gmra.mrb[38].mxu0 %vm550_vm4, %v626_v47  ;;  %782 = vst.msk [vmem:[%s3196_s9 + $0x28] sm:$0xff] %vm550_vm4, %v626_v47 }
 0x32d   :  { %v2304_v21 = vpop.eup %2303  ;;  %1976 = vmatprep.mubr.msk.f32.mxu0 %vm2334_vm0, %v2335_v4 }
 0x32e   :  { %v628_v61 = vmul.f32 %v2304_v21, %v2758_v12 }
 0x330   :  { %1977 = vmatmul.mubr.msk.f32.gmra.mrb[40].mxu0 %vm550_vm4, %v628_v61  ;;  %783 = vst.msk [vmem:[%s3196_s9 + $0x30] sm:$0x1] %vm569_vm5, %v628_v61 }
 0x331   :  { %2032 = vmatprep.mubr.msk.f32.mxu0 %vm2334_vm0, %v2335_v4 }
 0x334   :  { %2033 = vmatmul.mubr.msk.f32.vlgmr.msra.gmra.mrb[42].mxu0 %vm55_vm1, %v2768_v26 }
 0x335   :  { %2035 = vmatprep.mubr.msk.f32.mxu0 %vm2334_vm0, %v2335_v4 }
 0x338   :  { %2036 = vmatmul.mubr.msk.f32.gmra.mrb[44].mxu0 %vm55_vm1, %v2779_v34 }
 0x339   :  { %2038 = vmatprep.mubr.msk.f32.mxu0 %vm2334_vm0, %v2335_v4 }
 0x33c   :  { %2039 = vmatmul.mubr.msk.f32.gmra.mrb[46].mxu0 %vm55_vm1, %v2790_v33 }
 0x33d   :  { %2041 = vmatprep.mubr.msk.f32.mxu0 %vm2334_vm0, %v2335_v4 }
 0x340   :  { %2042 = vmatmul.mubr.msk.f32.gmra.mrb[48].mxu0 %vm55_vm1, %v2801_v36 }
 0x341   :  { %2044 = vmatprep.mubr.msk.f32.mxu0 %vm2334_vm0, %v2335_v4 }
 0x344   :  { %2045 = vmatmul.mubr.msk.f32.gmra.mrb[50].mxu0 %vm55_vm1, %v2812_v39 }
 0x345   :  { %2047 = vmatprep.mubr.msk.f32.mxu0 %vm2334_vm0, %v2335_v4  ;;  %v2966_v56 = vpop.f32.mrb[38].mxu1 }
 0x346   :  { %v2012_v14 = vpop.f32.mrb[39].mxu1 }
 0x348   :  { %2048 = vmatmul.mubr.msk.f32.gmra.mrb[52].mxu0 %vm55_vm1, %v2821_v37 }
 0x349   :  { %2050 = vmatprep.mubr.msk.f32.mxu0 %vm2334_vm0, %v2335_v4  ;;  %v2968_v16 = vpop.f32.mrb[40].mxu1 }
 0x34a   :  { %v2015_v18 = vpop.f32.mrb[41].mxu1  ;;  %v925_v6 = vadd.f32 %v2593_v13, %v2968_v16 }
 0x34c   :  { %2051 = vmatmul.mubr.msk.f32.gmra.mrb[54].mxu0 %vm55_vm1, %v2830_v43 }
 0x34d   :  { %2104 = vmatprep.mubr.msk.f32.mxu0 %vm2334_vm0, %v2335_v4 }
 0x3eb   :  { %v720_v19 = vpop.f32.mrb[28].mxu0 }
 0x3ec   :  { %v755_v20 = vmul.f32 %v2973_v59, %v720_v19  ;;  %v1960_v62 = vpop.f32.mrb[29].mxu0 }
 0x3ee   :  { %v762_v12 = vadd.f32 %v755_v20, %v2468_v25 }
 0x3ef   :  { %v725_v17 = vpop.f32.mrb[30].mxu0 }
 0x3f0   :  { %769 = vst.msk [vmem:[%s3198_s8] sm:$0xff] %vm55_vm1, %v762_v12  ;;  %v756_v22 = vmul.f32 %v2973_v59, %v725_v17  ;;  %v1963_v23 = vpop.f32.mrb[31].mxu0 }
 0x3f2   :  { %v763_v24 = vadd.f32 %v756_v22, %v2482_v27 }
 0x3f3   :  { %v730_v38 = vpop.f32.mrb[32].mxu0 }
 0x3f4   :  { %770 = vst.msk [vmem:[%s3198_s8 + $0x8] sm:$0xff] %vm55_vm1, %v763_v24  ;;  %v757_v40 = vmul.f32 %v2973_v59, %v730_v38  ;;  %v1966_v25 = vpop.f32.mrb[33].mxu0 }
 0x3f5   :  { %v900_v25 = vadd.f32 %v2593_v13, %v2958_v50  ;;  %v920_v50 = vadd.f32 %v2593_v13, %v2966_v56 }
 0x3f6   :  { %v764_v41 = vadd.f32 %v757_v40, %v2495_v28  ;;  %v895_v40 = vadd.f32 %v2593_v13, %v2956_v63  ;;  %v915_v63 = vadd.f32 %v2593_v13, %v2964_v10 }
 0x3f7   :  { %v735_v45 = vpop.f32.mrb[34].mxu0 }
 0x3f8   :  { %771 = vst.msk [vmem:[%s3198_s8 + $0x10] sm:$0xff] %vm55_vm1, %v764_v41  ;;  %v758_v46 = vmul.f32 %v2973_v59, %v735_v45  ;;  %v1969_v27 = vpop.f32.mrb[35].mxu0 }
 0x3fa   :  { %v765_v48 = vadd.f32 %v758_v46, %v2508_v29 }
 0x3fb   :  { %v740_v49 = vpop.f32.mrb[36].mxu0 }
 0x3fc   :  { %772 = vst.msk [vmem:[%s3198_s8 + $0x18] sm:$0xff] %vm55_vm1, %v765_v48  ;;  %v759_v51 = vmul.f32 %v2973_v59, %v740_v49  ;;  %v1972_v28 = vpop.f32.mrb[37].mxu0 }
 0x3fe   :  { %v766_v52 = vadd.f32 %v759_v51, %v2521_v30 }
 0x3ff   :  { %v745_v44 = vpop.f32.mrb[38].mxu0 }
 0x400   :  { %773 = vst.msk [vmem:[%s3198_s8 + $0x20] sm:$0xff] %vm55_vm1, %v766_v52  ;;  %v760_v5 = vmul.f32 %v2973_v59, %v745_v44  ;;  %v1975_v29 = vpop.f32.mrb[39].mxu0 }
 0x402   :  { %v767_v54 = vadd.f32 %v760_v5, %v2534_v31 }
 0x403   :  { %v750_v55 = vpop.f32.mrb[40].mxu0 }
 0x404   :  { %774 = vst.msk [vmem:[%s3198_s8 + $0x28] sm:$0xff] %vm55_vm1, %v767_v54  ;;  %v761_v7 = vmul.f32 %v2973_v59, %v750_v55  ;;  %v1978_v30 = vpop.f32.mrb[41].mxu0 }
 0x406   :  { %v768_v57 = vadd.f32 %v761_v7, %v2547_v32 }
 0x407   :  { %v1009_v58 = vpop.f32.mrb[42].mxu0 }
 0x408   :  { %776 = vst.msk [vmem:[%s3198_s8 + $0x30] sm:$0x1] %vm775_vm7, %v768_v57  ;;  %v2034_v15 = vpop.f32.mrb[43].mxu0  ;;  %v1010_v60 = vadd.f32 %v2566_v35, %v1009_v58  ;;  %v1124_v57 = vpop.f32.mrb[42].mxu1 }
 0x409   :  { %v1125_v58 = vadd.f32 %v2720_v2, %v1124_v57  ;;  %v2071_v15 = vpop.f32.mrb[43].mxu1 }
 0x40b   :  { %v1014_v31 = vpop.f32.mrb[44].mxu0 }
 0x40c   :  { %v1015_v47 = vadd.f32 %v2566_v35, %v1014_v31  ;;  %v2037_v21 = vpop.f32.mrb[45].mxu0  ;;  %v1129_v31 = vpop.f32.mrb[44].mxu1 }
 0x40e   :  { %v2254_v61 = vpack.c.bf16 %v1015_v47, %v1010_v60  ;;  %v1130_v60 = vadd.f32 %v2720_v2, %v1129_v31  ;;  %v2074_v47 = vpop.f32.mrb[45].mxu1 }
 0x40f   :  { %v1019_v1 = vpop.f32.mrb[46].mxu0  ;;  %v1134_v21 = vpop.f32.mrb[46].mxu1 }
 0x410   :  { %v2040_v3 = vpop.f32.mrb[47].mxu0  ;;  %2256 = vmatpush3.bf16.xpose.msk.msra.mxu0 %vm2572_vm3, %v2254_v61  ;;  %v1020_v53 = vadd.f32 %v2566_v35, %v1019_v1  ;;  %v2266_v61 = vpack.c.bf16 %v1130_v60, %v1125_v58  ;;  %v1135_v1 = vadd.f32 %v2720_v2, %v1134_v21 }
 0x411   :  { %2257 = vmatprep.subr.bf16.mxu0 %v2333_v0  ;;  %v2077_v3 = vpop.f32.mrb[47].mxu1 }
 0x412   :  { %2267 = vmatpush3.bf16.msra.mxu1 %v2266_v61 }
 0x413   :  { %v1024_v32 = vpop.f32.mrb[48].mxu0  ;;  %2268 = vmatprep.subr.bf16.mxu1 %v2333_v0 }
 0x414   :  { %v1025_v9 = vadd.f32 %v2566_v35, %v1024_v32  ;;  %v2043_v11 = vpop.f32.mrb[49].mxu0  ;;  %v1139_v32 = vpop.f32.mrb[48].mxu1 }
 0x416   :  { %v2258_v14 = vpack.c.bf16 %v1025_v9, %v1020_v53  ;;  %v1140_v53 = vadd.f32 %v2720_v2, %v1139_v32  ;;  %v2080_v9 = vpop.f32.mrb[49].mxu1 }
 0x417   :  { %v1029_v18 = vpop.f32.mrb[50].mxu0  ;;  %v1144_v11 = vpop.f32.mrb[50].mxu1 }
 0x418   :  { %v2046_v19 = vpop.f32.mrb[51].mxu0  ;;  %2260 = vmatpush3.bf16.xpose.msk.msra.mxu0 %vm2572_vm3, %v2258_v14  ;;  %v1030_v62 = vadd.f32 %v2566_v35, %v1029_v18  ;;  %v2269_v14 = vpack.c.bf16 %v1140_v53, %v1135_v1  ;;  %v1145_v18 = vadd.f32 %v2720_v2, %v1144_v11 }
 0x419   :  { %2261 = vmatprep.subr.bf16.mxu0 %v2333_v0  ;;  %v2083_v19 = vpop.f32.mrb[51].mxu1 }
 0x41a   :  { %2270 = vmatpush3.bf16.msra.mxu1 %v2269_v14 }
 0x41b   :  { %v1034_v20 = vpop.f32.mrb[52].mxu0  ;;  %2271 = vmatprep.subr.bf16.mxu1 %v2333_v0 }
 0x41c   :  { %v1035_v12 = vadd.f32 %v2566_v35, %v1034_v20  ;;  %v2049_v17 = vpop.f32.mrb[53].mxu0  ;;  %v1149_v20 = vpop.f32.mrb[52].mxu1 }
 0x41e   :  { %v2262_v22 = vpack.c.bf16 %v1035_v12, %v1030_v62  ;;  %v1150_v62 = vadd.f32 %v2720_v2, %v1149_v20  ;;  %v2086_v12 = vpop.f32.mrb[53].mxu1 }
 0x41f   :  { %v1039_v23 = vpop.f32.mrb[54].mxu0  ;;  %v1154_v15 = vpop.f32.mrb[54].mxu1 }
 0x420   :  { %2264 = vmatpush3.bf16.xpose.msk.msra.mxu0 %vm2572_vm3, %v2262_v22  ;;  %v2052_v24 = vpop.f32.mrb[55].mxu0  ;;  %v1040_v38 = vadd.f32 %v2566_v35, %v1039_v23  ;;  %v910_v35 = vadd.f32 %v2593_v13, %v2962_v8  ;;  %v2272_v17 = vpack.c.bf16 %v1150_v62, %v1145_v18  ;;  %v1155_v60 = vadd.f32 %v2720_v2, %v1154_v15 }
 0x421   :  { %2102 = vmatprep.subr.mxu0 %v2335_v4 }
 0x422   :  { %2273 = vmatpush3.bf16.msra.mxu1 %v2272_v17 }
 0x423   :  { %2137 = vmatprep.subr.mxu1 %v2335_v4 }
 0x426   :  { %2138 = vmatpush3.msk.msra.mxu1 %vm650_vm6, %v1155_v60 }
 0x428   :  { %2103 = vmatpush3.xpose.msk.msra.mxu0 %vm407_vm2, %v1040_v38 }
 0x42b   :  { %2105 = vmatmul.mubr.msk.f32.vlgmr.msra.gmra.mrb[56].mxu0 %vm407_vm2, %v895_v40 }
 0x42c   :  { %2107 = vmatprep.mubr.msk.f32.mxu0 %vm2334_vm0, %v2335_v4 }
 0x42f   :  { %2108 = vmatmul.mubr.msk.f32.gmra.mrb[58].mxu0 %vm407_vm2, %v900_v25 }
 0x430   :  { %2110 = vmatprep.mubr.msk.f32.mxu0 %vm2334_vm0, %v2335_v4 }
 0x433   :  { %2111 = vmatmul.mubr.msk.f32.gmra.mrb[60].mxu0 %vm407_vm2, %v905_v42 }
 0x434   :  { %2113 = vmatprep.mubr.msk.f32.mxu0 %vm2334_vm0, %v2335_v4 }
 0x437   :  { %2114 = vmatmul.mubr.msk.f32.gmra.mrb[62].mxu0 %vm407_vm2, %v910_v35 }
 0x438   :  { %2116 = vmatprep.mubr.msk.f32.mxu0 %vm2334_vm0, %v2335_v4 }
 0x43b   :  { %2117 = vmatmul.mubr.msk.f32.gmra.mrb[64].mxu0 %vm407_vm2, %v915_v63 }
 0x43c   :  { %2119 = vmatprep.mubr.msk.f32.mxu0 %vm2334_vm0, %v2335_v4 }
 0x43f   :  { %2120 = vmatmul.mubr.msk.f32.gmra.mrb[66].mxu0 %vm407_vm2, %v920_v50 }
 0x440   :  { %2122 = vmatprep.mubr.msk.f32.mxu0 %vm2334_vm0, %v2335_v4 }
 0x443   :  { %2123 = vmatmul.mubr.msk.f32.gmra.mrb[68].mxu0 %vm407_vm2, %v925_v6 }
 0x4fe   :  { %v1266_v8 = vpop.f32.mrb[56].mxu0 }
 0x4ff   :  { %v1300_v10 = vsel %vm550_vm4, %v1266_v8, -inf  ;;  %v2106_v41 = vpop.f32.mrb[57].mxu0 }
 0x500   :  { %1301 = vmax.xlane.f32.xlu0 %v1300_v10 }
 0x502   :  { %v1271_v45 = vpop.f32.mrb[58].mxu0 }
 0x503   :  { %v1303_v56 = vsel %vm550_vm4, %v1271_v45, -inf  ;;  %v2109_v46 = vpop.f32.mrb[59].mxu0 }
 0x504   :  { %1304 = vmax.xlane.f32.xlu1 %v1303_v56 }
 0x506   :  { %v1276_v27 = vpop.f32.mrb[60].mxu0 }
 0x507   :  { %v1306_v48 = vsel %vm550_vm4, %v1276_v27, -inf  ;;  %v2112_v49 = vpop.f32.mrb[61].mxu0 }
 0x508   :  { %1307 = vmax.xlane.f32.xlu0 %v1306_v48 }
 0x50a   :  { %v1281_v13 = vpop.f32.mrb[62].mxu0 }
 0x50b   :  { %v1309_v16 = vsel %vm550_vm4, %v1281_v13, -inf  ;;  %v2115_v51 = vpop.f32.mrb[63].mxu0 }
 0x50c   :  { %1310 = vmax.xlane.f32.xlu1 %v1309_v16 }
 0x50e   :  { %v1286_v28 = vpop.f32.mrb[64].mxu0 }
 0x50f   :  { %v1312_v52 = vsel %vm550_vm4, %v1286_v28, -inf  ;;  %v2118_v44 = vpop.f32.mrb[65].mxu0 }
 0x510   :  { %1313 = vmax.xlane.f32.xlu0 %v1312_v52 }
 0x512   :  { %v3072_v5 = vpop.f32.mrb[66].mxu0 }
 0x513   :  { %v1315_v29 = vsel %vm550_vm4, %v3072_v5, -inf  ;;  %v2121_v54 = vpop.f32.mrb[67].mxu0 }
 0x514   :  { %1316 = vmax.xlane.f32.xlu1 %v1315_v29 }
 0x516   :  { %v3076_v55 = vpop.f32.mrb[68].mxu0 }
 0x517   :  { %v1318_v7 = vsel %vm569_vm5, %v3076_v55, -inf  ;;  %v2124_v30 = vpop.f32.mrb[69].mxu0 }
 0x518   :  { %1319 = vmax.xlane.f32.xlu0 %v1318_v7 }
 0x58d   :  { %v1302_v22 = vpop.xlane.xlu0 %1301 }
 0x58e   :  { %v1321_v23 = vsub.f32 %v1266_v8, %v1302_v22 }
 0x590   :  { %v1328_v24 = vmul.f32 1.442695, %v1321_v23 }
 0x591   :  { %v1305_v38 = vpop.xlane.xlu1 %1304 }
 0x592   :  { %2305 = vpow2.f32 %v1328_v24  ;;  %v1322_v40 = vsub.f32 %v1271_v45, %v1305_v38 }
 0x594   :  { %v1330_v25 = vmul.f32 1.442695, %v1322_v40 }
 0x595   :  { %v1308_v42 = vpop.xlane.xlu0 %1307 }
 0x596   :  { %2307 = vpow2.f32 %v1330_v25  ;;  %v1323_v35 = vsub.f32 %v1276_v27, %v1308_v42 }
 0x598   :  { %v1332_v63 = vmul.f32 1.442695, %v1323_v35 }
 0x599   :  { %v1311_v50 = vpop.xlane.xlu1 %1310 }
 0x59a   :  { %2309 = vpow2.f32 %v1332_v63  ;;  %v1324_v6 = vsub.f32 %v1281_v13, %v1311_v50 }
 0x59c   :  { %v2306_v10 = vpop.eup %2305  ;;  %v1334_v0 = vmul.f32 1.442695, %v1324_v6 }
 0x59d   :  { %v1314_v41 = vpop.xlane.xlu0 %1313  ;;  %v1342_v56 = vsel %vm550_vm4, %v2306_v10, 0.0 }
 0x59e   :  { %2311 = vpow2.f32 %v1334_v0  ;;  %v1325_v46 = vsub.f32 %v1286_v28, %v1314_v41  ;;  %1343 = vadd.xlane.f32.xlu1 %v1342_v56 }
 0x5a0   :  { %v2308_v8 = vpop.eup %2307  ;;  %v1336_v48 = vmul.f32 1.442695, %v1325_v46 }
 0x5a1   :  { %v1317_v49 = vpop.xlane.xlu1 %1316  ;;  %v1345_v45 = vsel %vm550_vm4, %v2308_v8, 0.0 }
 0x5a2   :  { %2313 = vpow2.f32 %v1336_v48  ;;  %v1326_v27 = vsub.f32 %v3072_v5, %v1317_v49  ;;  %1346 = vadd.xlane.f32.xlu0 %v1345_v45 }
 0x5a4   :  { %v2310_v16 = vpop.eup %2309  ;;  %v1338_v51 = vmul.f32 1.442695, %v1326_v27 }
 0x5a5   :  { %v1320_v13 = vpop.xlane.xlu0 %1319  ;;  %v1348_v52 = vsel %vm550_vm4, %v2310_v16, 0.0 }
 0x5a6   :  { %2315 = vpow2.f32 %v1338_v51  ;;  %v1327_v44 = vsub.f32 %v3076_v55, %v1320_v13  ;;  %1349 = vadd.xlane.f32.xlu1 %v1348_v52  ;;  %v2089_v55 = vpop.f32.mrb[55].mxu1 }
 0x5a8   :  { %v2312_v28 = vpop.eup %2311  ;;  %v1340_v29 = vmul.f32 1.442695, %v1327_v44 }
 0x5a9   :  { %v1351_v54 = vsel %vm550_vm4, %v2312_v28, 0.0 }
 0x5aa   :  { %2317 = vpow2.f32 %v1340_v29  ;;  %1352 = vadd.xlane.f32.xlu0 %v1351_v54 }
 0x5ac   :  { %v2314_v7 = vpop.eup %2313 }
 0x5ad   :  { %v1354_v30 = vsel %vm550_vm4, %v2314_v7, 0.0 }
 0x5ae   :  { %1355 = vadd.xlane.f32.xlu1 %v1354_v30 }
 0x5b0   :  { %v2316_v5 = vpop.eup %2315 }
 0x5b1   :  { %v1357_v57 = vsel %vm550_vm4, %v2316_v5, 0.0 }
 0x5b2   :  { %1358 = vadd.xlane.f32.xlu0 %v1357_v57 }
 0x5b4   :  { %v2318_v58 = vpop.eup %2317 }
 0x5b5   :  { %v1360_v31 = vsel %vm569_vm5, %v2318_v58, 0.0 }
 0x5b6   :  { %1361 = vadd.xlane.f32.xlu1 %v1360_v31 }
 0x62b   :  { %v1344_v47 = vpop.xlane.xlu1 %1343 }
 0x62c   :  { %2319 = vrcp.f32 %v1344_v47 }
 0x62f   :  { %v1347_v21 = vpop.xlane.xlu0 %1346 }
 0x630   :  { %2321 = vrcp.f32 %v1347_v21 }
 0x633   :  { %v1350_v61 = vpop.xlane.xlu1 %1349 }
 0x634   :  { %2323 = vrcp.f32 %v1350_v61 }
 0x636   :  { %v2320_v1 = vpop.eup %2319 }
 0x637   :  { %v1364_v3 = vmul.f32 %v2320_v1, %v2306_v10  ;;  %v1353_v32 = vpop.xlane.xlu0 %1352 }
 0x638   :  { %2325 = vrcp.f32 %v1353_v32 }
 0x639   :  { %1645 = vst.msk [vmem:[%s3196_s9 + $0x38] sm:$0xff] %vm550_vm4, %v1364_v3  ;;  %2140 = vmatmul.mubr.msk.f32.vlgmr.msra.gmra.mrb[56].mxu1 %vm550_vm4, %v1364_v3 }
 0x63a   :  { %v2322_v2 = vpop.eup %2321  ;;  %2142 = vmatprep.mubr.msk.f32.mxu1 %vm2334_vm0, %v2335_v4 }
 0x63b   :  { %v1356_v53 = vpop.xlane.xlu1 %1355  ;;  %v1366_v9 = vmul.f32 %v2322_v2, %v2308_v8 }
 0x63c   :  { %2327 = vrcp.f32 %v1356_v53 }
 0x63d   :  { %2143 = vmatmul.mubr.msk.f32.gmra.mrb[58].mxu1 %vm550_vm4, %v1366_v9  ;;  %1646 = vst.msk [vmem:[%s3196_s9 + $0x40] sm:$0xff] %vm550_vm4, %v1366_v9 }
 0x63e   :  { %v2324_v11 = vpop.eup %2323  ;;  %2145 = vmatprep.mubr.msk.f32.mxu1 %vm2334_vm0, %v2335_v4 }
 0x63f   :  { %v1359_v14 = vpop.xlane.xlu0 %1358  ;;  %v1368_v18 = vmul.f32 %v2324_v11, %v2310_v16 }
 0x640   :  { %2329 = vrcp.f32 %v1359_v14 }
 0x641   :  { %2146 = vmatmul.mubr.msk.f32.gmra.mrb[60].mxu1 %vm550_vm4, %v1368_v18  ;;  %1647 = vst.msk [vmem:[%s3196_s9 + $0x48] sm:$0xff] %vm550_vm4, %v1368_v18 }
 0x642   :  { %v2326_v19 = vpop.eup %2325  ;;  %2148 = vmatprep.mubr.msk.f32.mxu1 %vm2334_vm0, %v2335_v4 }
 0x643   :  { %v1362_v20 = vpop.xlane.xlu1 %1361  ;;  %v1370_v62 = vmul.f32 %v2326_v19, %v2312_v28 }
 0x644   :  { %2331 = vrcp.f32 %v1362_v20 }
 0x645   :  { %2149 = vmatmul.mubr.msk.f32.gmra.mrb[62].mxu1 %vm550_vm4, %v1370_v62  ;;  %1648 = vst.msk [vmem:[%s3196_s9 + $0x50] sm:$0xff] %vm550_vm4, %v1370_v62 }
 0x646   :  { %v2328_v12 = vpop.eup %2327  ;;  %2151 = vmatprep.mubr.msk.f32.mxu1 %vm2334_vm0, %v2335_v4 }
 0x647   :  { %v1372_v17 = vmul.f32 %v2328_v12, %v2314_v7 }
 0x649   :  { %2152 = vmatmul.mubr.msk.f32.gmra.mrb[64].mxu1 %vm550_vm4, %v1372_v17  ;;  %1649 = vst.msk [vmem:[%s3196_s9 + $0x58] sm:$0xff] %vm550_vm4, %v1372_v17 }
 0x64a   :  { %v2330_v22 = vpop.eup %2329  ;;  %2154 = vmatprep.mubr.msk.f32.mxu1 %vm2334_vm0, %v2335_v4 }
 0x64b   :  { %v1374_v23 = vmul.f32 %v2330_v22, %v2316_v5 }
 0x64d   :  { %2155 = vmatmul.mubr.msk.f32.gmra.mrb[66].mxu1 %vm550_vm4, %v1374_v23  ;;  %1650 = vst.msk [vmem:[%s3196_s9 + $0x60] sm:$0xff] %vm550_vm4, %v1374_v23 }
 0x64e   :  { %v2332_v24 = vpop.eup %2331  ;;  %2157 = vmatprep.mubr.msk.f32.mxu1 %vm2334_vm0, %v2335_v4 }
 0x64f   :  { %v1376_v38 = vmul.f32 %v2332_v24, %v2318_v58 }
 0x651   :  { %2158 = vmatmul.mubr.msk.f32.gmra.mrb[68].mxu1 %vm550_vm4, %v1376_v38  ;;  %1651 = vst.msk [vmem:[%s3196_s9 + $0x68] sm:$0x1] %vm569_vm5, %v1376_v38 }
 0x70c   :  { %v1467_v40 = vpop.f32.mrb[56].mxu1 }
 0x70d   :  { %v1501_v25 = vmul.f32 %v1467_v40, %v2973_v59  ;;  %v2141_v42 = vpop.f32.mrb[57].mxu1 }
 0x70f   :  { %v1508_v35 = vadd.f32 %v2768_v26, %v1501_v25 }
 0x710   :  { %v1472_v63 = vpop.f32.mrb[58].mxu1 }
 0x711   :  { %1638 = vst.msk [vmem:[%s3198_s8 + $0x38] sm:$0xff] %vm55_vm1, %v1508_v35  ;;  %v1502_v4 = vmul.f32 %v1472_v63, %v2973_v59  ;;  %v2144_v50 = vpop.f32.mrb[59].mxu1 }
 0x713   :  { %v1509_v6 = vadd.f32 %v2779_v34, %v1502_v4 }
 0x714   :  { %v1477_v10 = vpop.f32.mrb[60].mxu1 }
 0x715   :  { %1639 = vst.msk [vmem:[%s3198_s8 + $0x40] sm:$0xff] %vm55_vm1, %v1509_v6  ;;  %v1503_v0 = vmul.f32 %v1477_v10, %v2973_v59  ;;  %v2147_v26 = vpop.f32.mrb[61].mxu1 }
 0x717   :  { %v1510_v41 = vadd.f32 %v2790_v33, %v1503_v0 }
 0x718   :  { %v1482_v56 = vpop.f32.mrb[62].mxu1 }
 0x719   :  { %1640 = vst.msk [vmem:[%s3198_s8 + $0x48] sm:$0xff] %vm55_vm1, %v1510_v41  ;;  %v1504_v46 = vmul.f32 %v1482_v56, %v2973_v59  ;;  %v2150_v34 = vpop.f32.mrb[63].mxu1 }
 0x71b   :  { %v1511_v8 = vadd.f32 %v2801_v36, %v1504_v46 }
 0x71c   :  { %v1487_v48 = vpop.f32.mrb[64].mxu1 }
 0x71d   :  { %1641 = vst.msk [vmem:[%s3198_s8 + $0x50] sm:$0xff] %vm55_vm1, %v1511_v8  ;;  %v1505_v49 = vmul.f32 %v1487_v48, %v2973_v59  ;;  %v2153_v33 = vpop.f32.mrb[65].mxu1 }
 0x71f   :  { %v1512_v45 = vadd.f32 %v2812_v39, %v1505_v49 }
 0x720   :  { %v1492_v27 = vpop.f32.mrb[66].mxu1 }
 0x721   :  { %1642 = vst.msk [vmem:[%s3198_s8 + $0x58] sm:$0xff] %vm55_vm1, %v1512_v45  ;;  %v1506_v16 = vmul.f32 %v1492_v27, %v2973_v59  ;;  %v2156_v36 = vpop.f32.mrb[67].mxu1 }
 0x723   :  { %v1513_v51 = vadd.f32 %v2821_v37, %v1506_v16 }
 0x724   :  { %v1497_v13 = vpop.f32.mrb[68].mxu1 }
 0x725   :  { %1643 = vst.msk [vmem:[%s3198_s8 + $0x60] sm:$0xff] %vm55_vm1, %v1513_v51  ;;  %v1507_v52 = vmul.f32 %v1497_v13, %v2973_v59  ;;  %v2159_v39 = vpop.f32.mrb[69].mxu1 }
 0x727   :  { %v1514_v44 = vadd.f32 %v2830_v43, %v1507_v52 }
 0x729   :  { %1644 = vst.msk [vmem:[%s3198_s8 + $0x68] sm:$0x1] %vm775_vm7, %v1514_v44 }

// kernel: gen_sagan_forward.7
= control target key start
LH: loop header
LB: loop body
LE: loop exit
PB: predicated region body
PF: predicated region fallthrough
CT: control target
= control target key end

     0   :  { %vm1653_vm0 = vmmov 0   ;;  %vm951_vm1 = vcmask 523264   ;;  %vm975_vm2 = vcmask 517120   ;;  %s2734_s1 = inlined_call_operand.vmem [shape: f32[1152,64], index: 1, kind: input, shape index: {}]   ;;  %s2735_s0 = inlined_call_operand.vmem [shape: f32[98,1152], index: 0, kind: input, shape index: {}]   ;;  %s2736_s2 = inlined_call_operand.vmem [shape: f32[1,64], index: 2, kind: input, shape index: {}]   ;;  %s2737_s3 = inlined_call_operand.vmem [shape: f32[1,64], index: 3, kind: input, shape index: {}]   ;;  %s2738_s4 = inlined_call_operand.vmem [shape: f32[1,64], index: 4, kind: input, shape index: {}]   ;;  %s2739_s5 = inlined_call_operand.vmem [shape: f32[98,64], index: 5, kind: output, shape index: {}]  }
   0x1   :  { %v153_v0 = vld [vmem:[%s2734_s1 + $0x80] sm:$0xff]  ;;  %v154_v1 = vld [vmem:[%s2734_s1 + $0x88] sm:$0xff]  ;;  %v155_v11 = vld [vmem:[%s2734_s1 + $0x90] sm:$0xff] }
   0x2   :  { %v185_v2 = vld [vmem:[%s2734_s1 + $0x180] sm:$0xff]  ;;  %v1479_v3 = vpack.c.bf16 %v154_v1, %v153_v0  ;;  %v186_v4 = vld [vmem:[%s2734_s1 + $0x188] sm:$0xff]  ;;  %v156_v13 = vld [vmem:[%s2734_s1 + $0x98] sm:$0xff] }
   0x3   :  { %v137_v5 = vld [vmem:[%s2734_s1] sm:$0xff]  ;;  %v138_v6 = vld [vmem:[%s2734_s1 + $0x8] sm:$0xff]  ;;  %v1511_v7 = vpack.c.bf16 %v186_v4, %v185_v2  ;;  %v187_v14 = vld [vmem:[%s2734_s1 + $0x190] sm:$0xff]  ;;  %v1483_v16 = vpack.c.bf16 %v156_v13, %v155_v11 }
   0x4   :  { %v1481_v8 = vpack.c.bf16 %v138_v6, %v137_v5  ;;  %v169_v9 = vld [vmem:[%s2734_s1 + $0x100] sm:$0xff]  ;;  %v170_v10 = vld [vmem:[%s2734_s1 + $0x108] sm:$0xff]  ;;  %1480 = vmatprep.subr.bf16.mxu0 %v1479_v3  ;;  %v188_v15 = vld [vmem:[%s2734_s1 + $0x198] sm:$0xff] }
   0x5   :  { %v1513_v12 = vpack.c.bf16 %v170_v10, %v169_v9  ;;  %1512 = vmatprep.subr.bf16.mxu1 %v1511_v7  ;;  %v1515_v17 = vpack.c.bf16 %v188_v15, %v187_v14  ;;  %v139_v18 = vld [vmem:[%s2734_s1 + $0x10] sm:$0xff]  ;;  %v140_v19 = vld [vmem:[%s2734_s1 + $0x18] sm:$0xff]  ;;  %v157_v23 = vld [vmem:[%s2734_s1 + $0xa0] sm:$0xff] }
   0x6   :  { %1482 = vmatpush3.bf16.msra.mxu0 %v1481_v8  ;;  %v171_v20 = vld [vmem:[%s2734_s1 + $0x110] sm:$0xff]  ;;  %v1485_v21 = vpack.c.bf16 %v140_v19, %v139_v18  ;;  %v172_v22 = vld [vmem:[%s2734_s1 + $0x118] sm:$0xff]  ;;  %v158_v24 = vld [vmem:[%s2734_s1 + $0xa8] sm:$0xff] }
   0x7   :  { %1514 = vmatpush3.bf16.msra.mxu1 %v1513_v12  ;;  %1484 = vmatprep.subr.bf16.mxu0 %v1483_v16  ;;  %v1517_v25 = vpack.c.bf16 %v172_v22, %v171_v20  ;;  %v1487_v26 = vpack.c.bf16 %v158_v24, %v157_v23  ;;  %v189_v27 = vld [vmem:[%s2734_s1 + $0x1a0] sm:$0xff]  ;;  %v190_v28 = vld [vmem:[%s2734_s1 + $0x1a8] sm:$0xff]  ;;  %v159_v35 = vld [vmem:[%s2734_s1 + $0xb0] sm:$0xff] }
   0x8   :  { %1516 = vmatprep.subr.bf16.mxu1 %v1515_v17  ;;  %v141_v29 = vld [vmem:[%s2734_s1 + $0x20] sm:$0xff]  ;;  %v1519_v30 = vpack.c.bf16 %v190_v28, %v189_v27  ;;  %v142_v31 = vld [vmem:[%s2734_s1 + $0x28] sm:$0xff]  ;;  %v160_v36 = vld [vmem:[%s2734_s1 + $0xb8] sm:$0xff] }
   0x9   :  { %v173_v32 = vld [vmem:[%s2734_s1 + $0x120] sm:$0xff]  ;;  %v174_v33 = vld [vmem:[%s2734_s1 + $0x128] sm:$0xff]  ;;  %v1489_v34 = vpack.c.bf16 %v142_v31, %v141_v29  ;;  %v191_v37 = vld [vmem:[%s2734_s1 + $0x1b0] sm:$0xff]  ;;  %v1491_v39 = vpack.c.bf16 %v160_v36, %v159_v35 }
   0xa   :  { %1486 = vmatpush3.bf16.msra.mxu0 %v1485_v21  ;;  %v1521_v38 = vpack.c.bf16 %v174_v33, %v173_v32  ;;  %v192_v40 = vld [vmem:[%s2734_s1 + $0x1b8] sm:$0xff]  ;;  %v143_v41 = vld [vmem:[%s2734_s1 + $0x30] sm:$0xff]  ;;  %v161_v46 = vld [vmem:[%s2734_s1 + $0xc0] sm:$0xff] }
   0xb   :  { %1518 = vmatpush3.bf16.msra.mxu1 %v1517_v25  ;;  %1488 = vmatprep.subr.bf16.mxu0 %v1487_v26  ;;  %v144_v42 = vld [vmem:[%s2734_s1 + $0x38] sm:$0xff]  ;;  %v1523_v43 = vpack.c.bf16 %v192_v40, %v191_v37  ;;  %v175_v44 = vld [vmem:[%s2734_s1 + $0x130] sm:$0xff]  ;;  %v162_v47 = vld [vmem:[%s2734_s1 + $0xc8] sm:$0xff] }
   0xc   :  { %1520 = vmatprep.subr.bf16.mxu1 %v1519_v30  ;;  %v176_v45 = vld [vmem:[%s2734_s1 + $0x138] sm:$0xff]  ;;  %v193_v48 = vld [vmem:[%s2734_s1 + $0x1c0] sm:$0xff]  ;;  %v194_v49 = vld [vmem:[%s2734_s1 + $0x1c8] sm:$0xff]  ;;  %v1493_v50 = vpack.c.bf16 %v144_v42, %v143_v41  ;;  %v1495_v52 = vpack.c.bf16 %v162_v47, %v161_v46 }
   0xd   :  { %v1525_v51 = vpack.c.bf16 %v176_v45, %v175_v44  ;;  %v145_v53 = vld [vmem:[%s2734_s1 + $0x40] sm:$0xff]  ;;  %v146_v54 = vld [vmem:[%s2734_s1 + $0x48] sm:$0xff]  ;;  %v1527_v56 = vpack.c.bf16 %v194_v49, %v193_v48  ;;  %v163_v58 = vld [vmem:[%s2734_s1 + $0xd0] sm:$0xff] }
   0xe   :  { %1490 = vmatpush3.bf16.msra.mxu0 %v1489_v34  ;;  %v177_v55 = vld [vmem:[%s2734_s1 + $0x140] sm:$0xff]  ;;  %v178_v57 = vld [vmem:[%s2734_s1 + $0x148] sm:$0xff]  ;;  %v164_v59 = vld [vmem:[%s2734_s1 + $0xd8] sm:$0xff]  ;;  %v1497_v62 = vpack.c.bf16 %v146_v54, %v145_v53 }
   0xf   :  { %1522 = vmatpush3.bf16.msra.mxu1 %v1521_v38  ;;  %1492 = vmatprep.subr.bf16.mxu0 %v1491_v39  ;;  %v195_v60 = vld [vmem:[%s2734_s1 + $0x1d0] sm:$0xff]  ;;  %v196_v61 = vld [vmem:[%s2734_s1 + $0x1d8] sm:$0xff]  ;;  %v1529_v63 = vpack.c.bf16 %v178_v57, %v177_v55  ;;  %v1499_v0 = vpack.c.bf16 %v164_v59, %v163_v58  ;;  %v165_v6 = vld [vmem:[%s2734_s1 + $0xe0] sm:$0xff] }
  0x10   :  { %1524 = vmatprep.subr.bf16.mxu1 %v1523_v43  ;;  %v147_v1 = vld [vmem:[%s2734_s1 + $0x50] sm:$0xff]  ;;  %v148_v2 = vld [vmem:[%s2734_s1 + $0x58] sm:$0xff]  ;;  %v1531_v4 = vpack.c.bf16 %v196_v61, %v195_v60  ;;  %v166_v7 = vld [vmem:[%s2734_s1 + $0xe8] sm:$0xff] }
  0x11   :  { %v179_v3 = vld [vmem:[%s2734_s1 + $0x150] sm:$0xff]  ;;  %v180_v5 = vld [vmem:[%s2734_s1 + $0x158] sm:$0xff]  ;;  %v197_v8 = vld [vmem:[%s2734_s1 + $0x1e0] sm:$0xff]  ;;  %v1501_v10 = vpack.c.bf16 %v148_v2, %v147_v1  ;;  %v1503_v14 = vpack.c.bf16 %v166_v7, %v165_v6 }
  0x12   :  { %1494 = vmatpush3.bf16.msra.mxu0 %v1493_v50  ;;  %v198_v9 = vld [vmem:[%s2734_s1 + $0x1e8] sm:$0xff]  ;;  %v149_v11 = vld [vmem:[%s2734_s1 + $0x60] sm:$0xff]  ;;  %v1533_v13 = vpack.c.bf16 %v180_v5, %v179_v3  ;;  %v23_v17 = vld [vmem:[%s2735_s0 + $0x18] sm:$0xff] }
  0x13   :  { %1526 = vmatpush3.bf16.msra.mxu1 %v1525_v51  ;;  %1496 = vmatprep.subr.bf16.mxu0 %v1495_v52  ;;  %v150_v12 = vld [vmem:[%s2734_s1 + $0x68] sm:$0xff]  ;;  %v181_v15 = vld [vmem:[%s2734_s1 + $0x160] sm:$0xff]  ;;  %v1535_v18 = vpack.c.bf16 %v198_v9, %v197_v8  ;;  %v167_v20 = vld [vmem:[%s2734_s1 + $0xf0] sm:$0xff] }
  0x14   :  { %1528 = vmatprep.subr.bf16.mxu1 %v1527_v56  ;;  %v21_v16 = vld [vmem:[%s2735_s0 + $0x8] sm:$0xff]  ;;  %v168_v21 = vld [vmem:[%s2734_s1 + $0xf8] sm:$0xff]  ;;  %v199_v22 = vld [vmem:[%s2734_s1 + $0x1f0] sm:$0xff]  ;;  %482 = vmatprep.mubr.f32.mxu1 %v23_v17  ;;  %v1505_v24 = vpack.c.bf16 %v150_v12, %v149_v11 }
  0x15   :  { %v182_v19 = vld [vmem:[%s2734_s1 + $0x168] sm:$0xff]  ;;  %352 = vmatprep.mubr.f32.mxu0 %v21_v16  ;;  %v200_v23 = vld [vmem:[%s2734_s1 + $0x1f8] sm:$0xff]  ;;  %v1507_v26 = vpack.c.bf16 %v168_v21, %v167_v20  ;;  %v151_v27 = vld [vmem:[%s2734_s1 + $0x70] sm:$0xff] }
  0x16   :  { %1498 = vmatpush3.bf16.msra.mxu0 %v1497_v62  ;;  %v1537_v25 = vpack.c.bf16 %v182_v19, %v181_v15  ;;  %v152_v28 = vld [vmem:[%s2734_s1 + $0x78] sm:$0xff]  ;;  %v183_v29 = vld [vmem:[%s2734_s1 + $0x170] sm:$0xff]  ;;  %v1539_v30 = vpack.c.bf16 %v200_v23, %v199_v22  ;;  %v217_v32 = vld [vmem:[%s2734_s1 + $0x280] sm:$0xff] }
  0x17   :  { %1530 = vmatpush3.bf16.msra.mxu1 %v1529_v63  ;;  %1500 = vmatprep.subr.bf16.mxu0 %v1499_v0  ;;  %v184_v31 = vld [vmem:[%s2734_s1 + $0x178] sm:$0xff]  ;;  %v218_v33 = vld [vmem:[%s2734_s1 + $0x288] sm:$0xff]  ;;  %v1509_v34 = vpack.c.bf16 %v152_v28, %v151_v27  ;;  %v201_v37 = vld [vmem:[%s2734_s1 + $0x200] sm:$0xff] }
  0x18   :  { %1532 = vmatprep.subr.bf16.mxu1 %v1531_v4  ;;  %v1541_v35 = vpack.c.bf16 %v184_v31, %v183_v29  ;;  %v1543_v36 = vpack.c.bf16 %v218_v33, %v217_v32  ;;  %v202_v38 = vld [vmem:[%s2734_s1 + $0x208] sm:$0xff]  ;;  %v20_v39 = vld [vmem:[%s2735_s0] sm:$0xff]  ;;  %v219_v40 = vld [vmem:[%s2734_s1 + $0x290] sm:$0xff] }
  0x19   :  { %v220_v41 = vld [vmem:[%s2734_s1 + $0x298] sm:$0xff]  ;;  %v1545_v42 = vpack.c.bf16 %v202_v38, %v201_v37  ;;  %v249_v43 = vld [vmem:[%s2734_s1 + $0x380] sm:$0xff]  ;;  %v250_v44 = vld [vmem:[%s2734_s1 + $0x388] sm:$0xff] }
  0x1a   :  { %1502 = vmatpush3.bf16.msra.mxu0 %v1501_v10  ;;  %v233_v45 = vld [vmem:[%s2734_s1 + $0x300] sm:$0xff]  ;;  %v22_v46 = vld [vmem:[%s2735_s0 + $0x10] sm:$0xff]  ;;  %v1575_v48 = vpack.c.bf16 %v250_v44, %v249_v43  ;;  %v234_v49 = vld [vmem:[%s2734_s1 + $0x308] sm:$0xff]  ;;  %v1547_v51 = vpack.c.bf16 %v220_v41, %v219_v40 }
  0x1b   :  { %1534 = vmatpush3.bf16.msra.mxu1 %v1533_v13  ;;  %1504 = vmatprep.subr.bf16.mxu0 %v1503_v14  ;;  %v30_v47 = vld [vmem:[%s2735_s0 + $0x50] sm:$0xff]  ;;  %v32_v50 = vld [vmem:[%s2735_s0 + $0x60] sm:$0xff]  ;;  %v204_v53 = vld [vmem:[%s2734_s1 + $0x218] sm:$0xff]  ;;  %v1577_v54 = vpack.c.bf16 %v234_v49, %v233_v45 }
  0x1c   :  { %1536 = vmatprep.subr.bf16.mxu1 %v1535_v18  ;;  %v203_v52 = vld [vmem:[%s2734_s1 + $0x210] sm:$0xff]  ;;  %v29_v55 = vld [vmem:[%s2735_s0 + $0x48] sm:$0xff]  ;;  %v221_v56 = vld [vmem:[%s2734_s1 + $0x2a0] sm:$0xff] }
  0x1d   :  { %v222_v57 = vld [vmem:[%s2734_s1 + $0x2a8] sm:$0xff]  ;;  %v31_v58 = vld [vmem:[%s2735_s0 + $0x58] sm:$0xff]  ;;  %v251_v60 = vld [vmem:[%s2734_s1 + $0x390] sm:$0xff]  ;;  %v1549_v62 = vpack.c.bf16 %v204_v53, %v203_v52 }
  0x1e   :  { %1506 = vmatpush3.bf16.msra.mxu0 %v1505_v24  ;;  %v39_v59 = vld [vmem:[%s2735_s0 + $0x98] sm:$0xff]  ;;  %v41_v61 = vld [vmem:[%s2735_s0 + $0xa8] sm:$0xff]  ;;  %v205_v63 = vld [vmem:[%s2734_s1 + $0x220] sm:$0xff]  ;;  %v1551_v1 = vpack.c.bf16 %v222_v57, %v221_v56 }
  0x1f   :  { %1538 = vmatpush3.bf16.msra.mxu1 %v1537_v25  ;;  %1508 = vmatprep.subr.bf16.mxu0 %v1507_v26  ;;  %v252_v0 = vld [vmem:[%s2734_s1 + $0x398] sm:$0xff]  ;;  %v206_v2 = vld [vmem:[%s2734_s1 + $0x228] sm:$0xff]  ;;  %v235_v4 = vld [vmem:[%s2734_s1 + $0x310] sm:$0xff] }
  0x20   :  { %1540 = vmatprep.subr.bf16.mxu1 %v1539_v30  ;;  %v1579_v3 = vpack.c.bf16 %v252_v0, %v251_v60  ;;  %v236_v5 = vld [vmem:[%s2734_s1 + $0x318] sm:$0xff]  ;;  %v38_v6 = vld [vmem:[%s2735_s0 + $0x90] sm:$0xff]  ;;  %v40_v10 = vld [vmem:[%s2735_s0 + $0xa0] sm:$0xff]  ;;  %v1553_v13 = vpack.c.bf16 %v206_v2, %v205_v63 }
  0x21   :  { %v223_v7 = vld [vmem:[%s2734_s1 + $0x2b0] sm:$0xff]  ;;  %v224_v8 = vld [vmem:[%s2734_s1 + $0x2b8] sm:$0xff]  ;;  %v1581_v9 = vpack.c.bf16 %v236_v5, %v235_v4  ;;  %v48_v11 = vld [vmem:[%s2735_s0 + $0xe0] sm:$0xff] }
  0x22   :  { %1510 = vmatpush3.bf16.msra.mxu0 %v1509_v34  ;;  %v50_v12 = vld [vmem:[%s2735_s0 + $0xf0] sm:$0xff]  ;;  %v253_v15 = vld [vmem:[%s2734_s1 + $0x3a0] sm:$0xff]  ;;  %v254_v16 = vld [vmem:[%s2734_s1 + $0x3a8] sm:$0xff]  ;;  %v1555_v18 = vpack.c.bf16 %v224_v8, %v223_v7 }
  0x23   :  { %1542 = vmatpush3.bf16.msra.mxu1 %v1541_v35  ;;  %1544 = vmatprep.subr.bf16.mxu0 %v1543_v36  ;;  %v207_v14 = vld [vmem:[%s2734_s1 + $0x230] sm:$0xff]  ;;  %v47_v17 = vld [vmem:[%s2735_s0 + $0xd8] sm:$0xff]  ;;  %v1583_v20 = vpack.c.bf16 %v254_v16, %v253_v15  ;;  %v237_v21 = vld [vmem:[%s2734_s1 + $0x320] sm:$0xff] }
  0x24   :  { %1576 = vmatprep.subr.bf16.mxu1 %v1575_v48  ;;  %v208_v19 = vld [vmem:[%s2734_s1 + $0x238] sm:$0xff]  ;;  %v238_v22 = vld [vmem:[%s2734_s1 + $0x328] sm:$0xff]  ;;  %v225_v24 = vld [vmem:[%s2734_s1 + $0x2c0] sm:$0xff] }
  0x25   :  { %353 = vmatmul.mubr.f32.vlgmr.msra.gmra.mrb[0].mxu0 %v20_v39  ;;  %v49_v23 = vld [vmem:[%s2735_s0 + $0xe8] sm:$0xff]  ;;  %v1585_v26 = vpack.c.bf16 %v238_v22, %v237_v21  ;;  %v255_v28 = vld [vmem:[%s2734_s1 + $0x3b0] sm:$0xff]  ;;  %v256_v29 = vld [vmem:[%s2734_s1 + $0x3b8] sm:$0xff]  ;;  %v1557_v31 = vpack.c.bf16 %v208_v19, %v207_v14 }
  0x26   :  { %483 = vmatmul.mubr.f32.vlgmr.msra.gmra.mrb[0].mxu1 %v22_v46  ;;  %1546 = vmatpush3.bf16.msra.mxu0 %v1545_v42  ;;  %v226_v25 = vld [vmem:[%s2734_s1 + $0x2c8] sm:$0xff]  ;;  %v59_v30 = vld [vmem:[%s2735_s0 + $0x138] sm:$0xff]  ;;  %v239_v32 = vld [vmem:[%s2734_s1 + $0x330] sm:$0xff]  ;;  %v1587_v38 = vpack.c.bf16 %v256_v29, %v255_v28 }
  0x27   :  { %357 = vmatprep.mubr.f32.mxu0 %v30_v47  ;;  %487 = vmatprep.mubr.f32.mxu1 %v32_v50  ;;  %v57_v27 = vld [vmem:[%s2735_s0 + $0x128] sm:$0xff]  ;;  %v240_v33 = vld [vmem:[%s2734_s1 + $0x338] sm:$0xff]  ;;  %v56_v34 = vld [vmem:[%s2735_s0 + $0x120] sm:$0xff]  ;;  %v1559_v35 = vpack.c.bf16 %v226_v25, %v225_v24 }
  0x28   :  { %1548 = vmatprep.subr.bf16.mxu0 %v1547_v51  ;;  %1578 = vmatpush3.bf16.msra.mxu1 %v1577_v54  ;;  %v209_v36 = vld [vmem:[%s2734_s1 + $0x240] sm:$0xff]  ;;  %v210_v37 = vld [vmem:[%s2734_s1 + $0x248] sm:$0xff]  ;;  %v58_v39 = vld [vmem:[%s2735_s0 + $0x130] sm:$0xff]  ;;  %v1589_v42 = vpack.c.bf16 %v240_v33, %v239_v32 }
  0x29   :  { %358 = vmatmul.mubr.f32.gmra.mrb[2].mxu0 %v29_v55  ;;  %1580 = vmatprep.subr.bf16.mxu1 %v1579_v3  ;;  %v227_v40 = vld [vmem:[%s2734_s1 + $0x2d0] sm:$0xff]  ;;  %v228_v41 = vld [vmem:[%s2734_s1 + $0x2d8] sm:$0xff]  ;;  %v257_v43 = vld [vmem:[%s2734_s1 + $0x3c0] sm:$0xff]  ;;  %v1561_v48 = vpack.c.bf16 %v210_v37, %v209_v36 }
  0x2a   :  { %488 = vmatmul.mubr.f32.gmra.mrb[2].mxu1 %v31_v58  ;;  %362 = vmatprep.mubr.f32.mxu0 %v39_v59  ;;  %v258_v44 = vld [vmem:[%s2734_s1 + $0x3c8] sm:$0xff]  ;;  %v241_v45 = vld [vmem:[%s2734_s1 + $0x340] sm:$0xff]  ;;  %v66_v46 = vld [vmem:[%s2735_s0 + $0x170] sm:$0xff]  ;;  %v1563_v51 = vpack.c.bf16 %v228_v41, %v227_v40 }
  0x2b   :  { %492 = vmatprep.mubr.f32.mxu1 %v41_v61  ;;  %1550 = vmatpush3.bf16.msra.mxu0 %v1549_v62  ;;  %v68_v47 = vld [vmem:[%s2735_s0 + $0x180] sm:$0xff]  ;;  %v242_v49 = vld [vmem:[%s2734_s1 + $0x348] sm:$0xff]  ;;  %v211_v52 = vld [vmem:[%s2734_s1 + $0x250] sm:$0xff]  ;;  %v1591_v54 = vpack.c.bf16 %v258_v44, %v257_v43 }
  0x2c   :  { %1552 = vmatprep.subr.bf16.mxu0 %v1551_v1  ;;  %1582 = vmatpush3.bf16.msra.mxu1 %v1581_v9  ;;  %v65_v50 = vld [vmem:[%s2735_s0 + $0x168] sm:$0xff]  ;;  %v212_v53 = vld [vmem:[%s2734_s1 + $0x258] sm:$0xff]  ;;  %v1593_v56 = vpack.c.bf16 %v242_v49, %v241_v45  ;;  %v229_v57 = vld [vmem:[%s2734_s1 + $0x2e0] sm:$0xff] }
  0x2d   :  { %363 = vmatmul.mubr.f32.gmra.mrb[4].mxu0 %v38_v6  ;;  %1584 = vmatprep.subr.bf16.mxu1 %v1583_v20  ;;  %v67_v55 = vld [vmem:[%s2735_s0 + $0x178] sm:$0xff]  ;;  %v230_v58 = vld [vmem:[%s2734_s1 + $0x2e8] sm:$0xff]  ;;  %v259_v59 = vld [vmem:[%s2734_s1 + $0x3d0] sm:$0xff]  ;;  %v1565_v0 = vpack.c.bf16 %v212_v53, %v211_v52 }
  0x2e   :  { %493 = vmatmul.mubr.f32.gmra.mrb[4].mxu1 %v40_v10  ;;  %367 = vmatprep.mubr.f32.mxu0 %v48_v11  ;;  %v260_v60 = vld [vmem:[%s2734_s1 + $0x3d8] sm:$0xff]  ;;  %v243_v61 = vld [vmem:[%s2734_s1 + $0x350] sm:$0xff]  ;;  %v77_v63 = vld [vmem:[%s2735_s0 + $0x1c8] sm:$0xff]  ;;  %v1567_v3 = vpack.c.bf16 %v230_v58, %v229_v57 }
  0x2f   :  { %497 = vmatprep.mubr.f32.mxu1 %v50_v12  ;;  %1554 = vmatpush3.bf16.msra.mxu0 %v1553_v13  ;;  %v75_v62 = vld [vmem:[%s2735_s0 + $0x1b8] sm:$0xff]  ;;  %v74_v2 = vld [vmem:[%s2735_s0 + $0x1b0] sm:$0xff]  ;;  %v213_v4 = vld [vmem:[%s2734_s1 + $0x260] sm:$0xff]  ;;  %v1595_v6 = vpack.c.bf16 %v260_v60, %v259_v59 }
  0x30   :  { %1556 = vmatprep.subr.bf16.mxu0 %v1555_v18  ;;  %1586 = vmatpush3.bf16.msra.mxu1 %v1585_v26  ;;  %v244_v1 = vld [vmem:[%s2734_s1 + $0x358] sm:$0xff]  ;;  %v214_v5 = vld [vmem:[%s2734_s1 + $0x268] sm:$0xff]  ;;  %v261_v8 = vld [vmem:[%s2734_s1 + $0x3e0] sm:$0xff] }
  0x31   :  { %368 = vmatmul.mubr.f32.gmra.mrb[6].mxu0 %v47_v17  ;;  %1588 = vmatprep.subr.bf16.mxu1 %v1587_v38  ;;  %v1597_v7 = vpack.c.bf16 %v244_v1, %v243_v61  ;;  %v262_v9 = vld [vmem:[%s2734_s1 + $0x3e8] sm:$0xff]  ;;  %v245_v10 = vld [vmem:[%s2734_s1 + $0x360] sm:$0xff]  ;;  %v231_v12 = vld [vmem:[%s2734_s1 + $0x2f0] sm:$0xff]  ;;  %v1569_v16 = vpack.c.bf16 %v214_v5, %v213_v4  ;;  %v1652_v38 = vmov 0.0|0.0  }
  0x32   :  { %498 = vmatmul.mubr.f32.gmra.mrb[6].mxu1 %v49_v23  ;;  %372 = vmatprep.mubr.f32.mxu0 %v57_v27  ;;  %v246_v11 = vld [vmem:[%s2734_s1 + $0x368] sm:$0xff]  ;;  %v232_v13 = vld [vmem:[%s2734_s1 + $0x2f8] sm:$0xff]  ;;  %v76_v14 = vld [vmem:[%s2735_s0 + $0x1c0] sm:$0xff]  ;;  %v1599_v18 = vpack.c.bf16 %v262_v9, %v261_v8 }
  0x33   :  { %502 = vmatprep.mubr.f32.mxu1 %v59_v30  ;;  %1558 = vmatpush3.bf16.msra.mxu0 %v1557_v31  ;;  %v84_v15 = vld [vmem:[%s2735_s0 + $0x200] sm:$0xff]  ;;  %v86_v17 = vld [vmem:[%s2735_s0 + $0x210] sm:$0xff]  ;;  %v1571_v19 = vpack.c.bf16 %v232_v13, %v231_v12  ;;  %v216_v21 = vld [vmem:[%s2734_s1 + $0x278] sm:$0xff]  ;;  %v1601_v22 = vpack.c.bf16 %v246_v11, %v245_v10 }
  0x34   :  { %1560 = vmatprep.subr.bf16.mxu0 %v1559_v35  ;;  %1590 = vmatpush3.bf16.msra.mxu1 %v1589_v42  ;;  %v215_v20 = vld [vmem:[%s2734_s1 + $0x270] sm:$0xff]  ;;  %v264_v24 = vld [vmem:[%s2734_s1 + $0x3f8] sm:$0xff]  ;;  %v85_v28 = vld [vmem:[%s2735_s0 + $0x208] sm:$0xff] }
  0x35   :  { %373 = vmatmul.mubr.f32.gmra.mrb[8].mxu0 %v56_v34  ;;  %1592 = vmatprep.subr.bf16.mxu1 %v1591_v54  ;;  %v263_v23 = vld [vmem:[%s2734_s1 + $0x3f0] sm:$0xff]  ;;  %v83_v25 = vld [vmem:[%s2735_s0 + $0x1f8] sm:$0xff]  ;;  %v93_v29 = vld [vmem:[%s2735_s0 + $0x248] sm:$0xff]  ;;  %v1573_v30 = vpack.c.bf16 %v216_v21, %v215_v20 }
  0x36   :  { %503 = vmatmul.mubr.f32.gmra.mrb[8].mxu1 %v58_v39  ;;  %377 = vmatprep.mubr.f32.mxu0 %v66_v46  ;;  %v247_v26 = vld [vmem:[%s2734_s1 + $0x370] sm:$0xff]  ;;  %v248_v27 = vld [vmem:[%s2734_s1 + $0x378] sm:$0xff]  ;;  %v1603_v32 = vpack.c.bf16 %v264_v24, %v263_v23  ;;  %v92_v34 = vld [vmem:[%s2735_s0 + $0x240] sm:$0xff] }
  0x37   :  { %507 = vmatprep.mubr.f32.mxu1 %v68_v47  ;;  %1562 = vmatpush3.bf16.msra.mxu0 %v1561_v48  ;;  %v95_v31 = vld [vmem:[%s2735_s0 + $0x258] sm:$0xff]  ;;  %v1605_v33 = vpack.c.bf16 %v248_v27, %v247_v26  ;;  %v94_v35 = vld [vmem:[%s2735_s0 + $0x250] sm:$0xff]  ;;  %v104_v37 = vld [vmem:[%s2735_s0 + $0x2a0] sm:$0xff] }
  0x38   :  { %1564 = vmatprep.subr.bf16.mxu0 %v1563_v51  ;;  %1594 = vmatpush3.bf16.msra.mxu1 %v1593_v56  ;;  %v102_v36 = vld [vmem:[%s2735_s0 + $0x290] sm:$0xff]  ;;  %v101_v39 = vld [vmem:[%s2735_s0 + $0x288] sm:$0xff]  ;;  %v103_v40 = vld [vmem:[%s2735_s0 + $0x298] sm:$0xff] }
  0x39   :  { %378 = vmatmul.mubr.f32.gmra.mrb[10].mxu0 %v65_v50  ;;  %1596 = vmatprep.subr.bf16.mxu1 %v1595_v6  ;;  %v111_v41 = vld [vmem:[%s2735_s0 + $0x2d8] sm:$0xff]  ;;  %v113_v42 = vld [vmem:[%s2735_s0 + $0x2e8] sm:$0xff]  ;;  %v110_v43 = vld [vmem:[%s2735_s0 + $0x2d0] sm:$0xff] }
  0x3a   :  { %508 = vmatmul.mubr.f32.gmra.mrb[10].mxu1 %v67_v55  ;;  %382 = vmatprep.mubr.f32.mxu0 %v75_v62  ;;  %v112_v44 = vld [vmem:[%s2735_s0 + $0x2e0] sm:$0xff]  ;;  %v122_v46 = vld [vmem:[%s2735_s0 + $0x330] sm:$0xff]  ;;  %v119_v47 = vld [vmem:[%s2735_s0 + $0x318] sm:$0xff] }
  0x3b   :  { %512 = vmatprep.mubr.f32.mxu1 %v77_v63  ;;  %1566 = vmatpush3.bf16.msra.mxu0 %v1565_v0  ;;  %v120_v45 = vld [vmem:[%s2735_s0 + $0x320] sm:$0xff]  ;;  %v121_v48 = vld [vmem:[%s2735_s0 + $0x328] sm:$0xff]  ;;  %v131_v50 = vld [vmem:[%s2735_s0 + $0x378] sm:$0x3] }
  0x3c   :  { %1568 = vmatprep.subr.bf16.mxu0 %v1567_v3  ;;  %1598 = vmatpush3.bf16.msra.mxu1 %v1597_v7  ;;  %v129_v49 = vld [vmem:[%s2735_s0 + $0x368] sm:$0x3]  ;;  %v128_v51 = vld [vmem:[%s2735_s0 + $0x360] sm:$0x3]  ;;  %v130_v52 = vld [vmem:[%s2735_s0 + $0x370] sm:$0x3] }
  0x3d   :  { %383 = vmatmul.mubr.f32.gmra.mrb[12].mxu0 %v74_v2  ;;  %1600 = vmatprep.subr.bf16.mxu1 %v1599_v18  ;;  %v25_v53 = vld [vmem:[%s2735_s0 + $0x28] sm:$0xff]  ;;  %v265_v54 = vld [vmem:[%s2734_s1 + $0x400] sm:$0xff]  ;;  %v27_v56 = vld [vmem:[%s2735_s0 + $0x38] sm:$0xff] }
  0x3e   :  { %513 = vmatmul.mubr.f32.gmra.mrb[12].mxu1 %v76_v14  ;;  %387 = vmatprep.mubr.f32.mxu0 %v84_v15  ;;  %v266_v55 = vld [vmem:[%s2734_s1 + $0x408] sm:$0xff]  ;;  %v24_v57 = vld [vmem:[%s2735_s0 + $0x20] sm:$0xff]  ;;  %v26_v59 = vld [vmem:[%s2735_s0 + $0x30] sm:$0xff] }
  0x3f   :  { %517 = vmatprep.mubr.f32.mxu1 %v86_v17  ;;  %1570 = vmatpush3.bf16.msra.mxu0 %v1569_v16  ;;  %v1608_v58 = vpack.c.bf16 %v266_v55, %v265_v54  ;;  %v34_v60 = vld [vmem:[%s2735_s0 + $0x70] sm:$0xff]  ;;  %v36_v61 = vld [vmem:[%s2735_s0 + $0x80] sm:$0xff]  ;;  %v268_v63 = vld [vmem:[%s2734_s1 + $0x418] sm:$0xff] }
  0x40   :  { %1572 = vmatprep.subr.bf16.mxu0 %v1571_v19  ;;  %1602 = vmatpush3.bf16.msra.mxu1 %v1601_v22  ;;  %v267_v62 = vld [vmem:[%s2734_s1 + $0x410] sm:$0xff]  ;;  %v33_v0 = vld [vmem:[%s2735_s0 + $0x68] sm:$0xff]  ;;  %v35_v1 = vld [vmem:[%s2735_s0 + $0x78] sm:$0xff] }
  0x41   :  { %388 = vmatmul.mubr.f32.gmra.mrb[14].mxu0 %v83_v25  ;;  %1604 = vmatprep.subr.bf16.mxu1 %v1603_v32  ;;  %v43_v2 = vld [vmem:[%s2735_s0 + $0xb8] sm:$0xff]  ;;  %v1611_v3 = vpack.c.bf16 %v268_v63, %v267_v62  ;;  %v45_v4 = vld [vmem:[%s2735_s0 + $0xc8] sm:$0xff]  ;;  %v269_v5 = vld [vmem:[%s2734_s1 + $0x420] sm:$0xff] }
  0x42   :  { %518 = vmatmul.mubr.f32.gmra.mrb[14].mxu1 %v85_v28  ;;  %392 = vmatprep.mubr.f32.mxu0 %v93_v29  ;;  %v270_v6 = vld [vmem:[%s2734_s1 + $0x428] sm:$0xff]  ;;  %v42_v7 = vld [vmem:[%s2735_s0 + $0xb0] sm:$0xff]  ;;  %v44_v8 = vld [vmem:[%s2735_s0 + $0xc0] sm:$0xff] }
  0x43   :  { %522 = vmatprep.mubr.f32.mxu1 %v95_v31  ;;  %1574 = vmatpush3.bf16.msra.mxu0 %v1573_v30  ;;  %v52_v9 = vld [vmem:[%s2735_s0 + $0x100] sm:$0xff]  ;;  %v1614_v10 = vpack.c.bf16 %v270_v6, %v269_v5  ;;  %v54_v11 = vld [vmem:[%s2735_s0 + $0x110] sm:$0xff]  ;;  %v272_v13 = vld [vmem:[%s2734_s1 + $0x438] sm:$0xff] }
  0x44   :  { %1607 = vmatprep.subr.bf16.mxu0 %v1652_v38  ;;  %1606 = vmatpush3.bf16.msra.mxu1 %v1605_v33  ;;  %v271_v12 = vld [vmem:[%s2734_s1 + $0x430] sm:$0xff]  ;;  %v51_v14 = vld [vmem:[%s2735_s0 + $0xf8] sm:$0xff]  ;;  %v53_v15 = vld [vmem:[%s2735_s0 + $0x108] sm:$0xff] }
  0x45   :  { %393 = vmatmul.mubr.f32.gmra.mrb[16].mxu0 %v92_v34  ;;  %1631 = vmatprep.subr.bf16.mxu1 %v1652_v38  ;;  %v61_v16 = vld [vmem:[%s2735_s0 + $0x148] sm:$0xff]  ;;  %v1617_v17 = vpack.c.bf16 %v272_v13, %v271_v12  ;;  %v63_v18 = vld [vmem:[%s2735_s0 + $0x158] sm:$0xff]  ;;  %v273_v19 = vld [vmem:[%s2734_s1 + $0x440] sm:$0xff] }
  0x46   :  { %523 = vmatmul.mubr.f32.gmra.mrb[16].mxu1 %v94_v35  ;;  %397 = vmatprep.mubr.f32.mxu0 %v102_v36  ;;  %v274_v20 = vld [vmem:[%s2734_s1 + $0x448] sm:$0xff]  ;;  %v60_v21 = vld [vmem:[%s2735_s0 + $0x140] sm:$0xff]  ;;  %v62_v22 = vld [vmem:[%s2735_s0 + $0x150] sm:$0xff] }
  0x47   :  { %527 = vmatprep.mubr.f32.mxu1 %v104_v37  ;;  %v70_v23 = vld [vmem:[%s2735_s0 + $0x190] sm:$0xff]  ;;  %v1620_v24 = vpack.c.bf16 %v274_v20, %v273_v19  ;;  %v72_v25 = vld [vmem:[%s2735_s0 + $0x1a0] sm:$0xff]  ;;  %v276_v27 = vld [vmem:[%s2734_s1 + $0x458] sm:$0xff] }
  0x48   :  { %v275_v26 = vld [vmem:[%s2734_s1 + $0x450] sm:$0xff]  ;;  %v69_v28 = vld [vmem:[%s2735_s0 + $0x188] sm:$0xff]  ;;  %v71_v29 = vld [vmem:[%s2735_s0 + $0x198] sm:$0xff] }
  0x49   :  { %398 = vmatmul.mubr.f32.gmra.mrb[18].mxu0 %v101_v39  ;;  %v79_v30 = vld [vmem:[%s2735_s0 + $0x1d8] sm:$0xff]  ;;  %v1623_v31 = vpack.c.bf16 %v276_v27, %v275_v26  ;;  %v81_v32 = vld [vmem:[%s2735_s0 + $0x1e8] sm:$0xff]  ;;  %v277_v33 = vld [vmem:[%s2734_s1 + $0x460] sm:$0xff] }
  0x4a   :  { %528 = vmatmul.mubr.f32.gmra.mrb[18].mxu1 %v103_v40  ;;  %402 = vmatprep.mubr.f32.mxu0 %v111_v41  ;;  %v278_v34 = vld [vmem:[%s2734_s1 + $0x468] sm:$0xff]  ;;  %v78_v35 = vld [vmem:[%s2735_s0 + $0x1d0] sm:$0xff]  ;;  %v80_v36 = vld [vmem:[%s2735_s0 + $0x1e0] sm:$0xff] }
  0x4b   :  { %532 = vmatprep.mubr.f32.mxu1 %v113_v42  ;;  %v88_v37 = vld [vmem:[%s2735_s0 + $0x220] sm:$0xff]  ;;  %v1626_v39 = vpack.c.bf16 %v278_v34, %v277_v33  ;;  %v90_v40 = vld [vmem:[%s2735_s0 + $0x230] sm:$0xff]  ;;  %v280_v42 = vld [vmem:[%s2734_s1 + $0x478] sm:$0xff] }
  0x4c   :  { %v279_v41 = vld [vmem:[%s2734_s1 + $0x470] sm:$0xff]  ;;  %v117_v54 = vld [vmem:[%s2735_s0 + $0x308] sm:$0xff]  ;;  %v135_v62 = vld [vmem:[%s2735_s0 + $0x398] sm:$0x3] }
  0x4d   :  { %403 = vmatmul.mubr.f32.gmra.mrb[20].mxu0 %v110_v43  ;;  %v87_v43 = vld [vmem:[%s2735_s0 + $0x218] sm:$0xff]  ;;  %v114_v55 = vld [vmem:[%s2735_s0 + $0x2f0] sm:$0xff]  ;;  %v132_v63 = vld [vmem:[%s2735_s0 + $0x380] sm:$0x3] }
  0x4e   :  { %533 = vmatmul.mubr.f32.gmra.mrb[20].mxu1 %v112_v44  ;;  %407 = vmatprep.mubr.f32.mxu0 %v120_v45  ;;  %v89_v44 = vld [vmem:[%s2735_s0 + $0x228] sm:$0xff]  ;;  %v100_v5 = vld [vmem:[%s2735_s0 + $0x280] sm:$0xff]  ;;  %v46_v6 = vld [vmem:[%s2735_s0 + $0xd0] sm:$0xff] }
  0x4f   :  { %537 = vmatprep.mubr.f32.mxu1 %v122_v46  ;;  %v97_v45 = vld [vmem:[%s2735_s0 + $0x268] sm:$0xff]  ;;  %v1629_v46 = vpack.c.bf16 %v280_v42, %v279_v41  ;;  %v136_v13 = vld [vmem:[%s2735_s0 + $0x3a0] sm:$0x3] }
  0x50   :  { %v73_v12 = vld [vmem:[%s2735_s0 + $0x1a8] sm:$0xff] }
  0x51   :  { %408 = vmatmul.mubr.f32.gmra.mrb[22].mxu0 %v119_v47  ;;  %v99_v47 = vld [vmem:[%s2735_s0 + $0x278] sm:$0xff] }
  0x52   :  { %538 = vmatmul.mubr.f32.gmra.mrb[22].mxu1 %v121_v48  ;;  %412 = vmatprep.mubr.f32.mxu0 %v129_v49  ;;  %v96_v48 = vld [vmem:[%s2735_s0 + $0x260] sm:$0xff]  ;;  %v98_v49 = vld [vmem:[%s2735_s0 + $0x270] sm:$0xff] }
  0x53   :  { %542 = vmatprep.mubr.f32.mxu1 %v131_v50  ;;  %v106_v50 = vld [vmem:[%s2735_s0 + $0x2b0] sm:$0xff] }
  0x55   :  { %413 = vmatmul.mubr.f32.gmra.mrb[24].mxu0 %v128_v51  ;;  %v105_v51 = vld [vmem:[%s2735_s0 + $0x2a8] sm:$0xff] }
  0x56   :  { %543 = vmatmul.mubr.f32.gmra.mrb[24].mxu1 %v130_v52  ;;  %612 = vmatprep.mubr.f32.mxu0 %v25_v53  ;;  %v107_v52 = vld [vmem:[%s2735_s0 + $0x2b8] sm:$0xff] }
  0x57   :  { %742 = vmatprep.mubr.f32.mxu1 %v27_v56  ;;  %v115_v53 = vld [vmem:[%s2735_s0 + $0x2f8] sm:$0xff]  ;;  %v116_v56 = vld [vmem:[%s2735_s0 + $0x300] sm:$0xff] }
  0x59   :  { %613 = vmatmul.mubr.f32.vlgmr.msra.gmra.mrb[26].mxu0 %v24_v57  ;;  %v124_v57 = vld [vmem:[%s2735_s0 + $0x340] sm:$0xff] }
  0x5a   :  { %743 = vmatmul.mubr.f32.vlgmr.msra.gmra.mrb[26].mxu1 %v26_v59  ;;  %1609 = vmatpush3.bf16.msra.mxu0 %v1608_v58  ;;  %v123_v59 = vld [vmem:[%s2735_s0 + $0x338] sm:$0xff] }
  0x5b   :  { %617 = vmatprep.mubr.f32.mxu0 %v34_v60  ;;  %747 = vmatprep.mubr.f32.mxu1 %v36_v61  ;;  %v125_v60 = vld [vmem:[%s2735_s0 + $0x348] sm:$0xff] }
  0x5c   :  { %1610 = vmatprep.subr.bf16.mxu0 %v1652_v38  ;;  %1639 = vmatpush3.bf16.msra.mxu1 %v1608_v58  ;;  %v126_v58 = vld [vmem:[%s2735_s0 + $0x350] sm:$0xff]  ;;  %v133_v61 = vld [vmem:[%s2735_s0 + $0x388] sm:$0x3] }
  0x5d   :  { %618 = vmatmul.mubr.f32.gmra.mrb[28].mxu0 %v33_v0  ;;  %1632 = vmatprep.subr.bf16.mxu1 %v1652_v38  ;;  %v134_v0 = vld [vmem:[%s2735_s0 + $0x390] sm:$0x3] }
  0x5e   :  { %748 = vmatmul.mubr.f32.gmra.mrb[28].mxu1 %v35_v1  ;;  %622 = vmatprep.mubr.f32.mxu0 %v43_v2  ;;  %v1654_v1 = vmov 0.0   ;;  %v28_v2 = vld [vmem:[%s2735_s0 + $0x40] sm:$0xff] }
  0x5f   :  { %752 = vmatprep.mubr.f32.mxu1 %v45_v4  ;;  %1612 = vmatpush3.bf16.msra.mxu0 %v1611_v3  ;;  %v37_v4 = vld [vmem:[%s2735_s0 + $0x88] sm:$0xff] }
  0x60   :  { %1613 = vmatprep.subr.bf16.mxu0 %v1652_v38  ;;  %1640 = vmatpush3.bf16.msra.mxu1 %v1611_v3  ;;  %v91_v3 = vld [vmem:[%s2735_s0 + $0x238] sm:$0xff] }
  0x61   :  { %623 = vmatmul.mubr.f32.gmra.mrb[30].mxu0 %v42_v7  ;;  %1633 = vmatprep.subr.bf16.mxu1 %v1652_v38  ;;  %v109_v7 = vld [vmem:[%s2735_s0 + $0x2c8] sm:$0xff] }
  0x62   :  { %753 = vmatmul.mubr.f32.gmra.mrb[30].mxu1 %v44_v8  ;;  %627 = vmatprep.mubr.f32.mxu0 %v52_v9  ;;  %v55_v8 = vld [vmem:[%s2735_s0 + $0x118] sm:$0xff]  ;;  %v118_v9 = vld [vmem:[%s2735_s0 + $0x310] sm:$0xff] }
  0x63   :  { %757 = vmatprep.mubr.f32.mxu1 %v54_v11  ;;  %1615 = vmatpush3.bf16.msra.mxu0 %v1614_v10  ;;  %v127_v11 = vld [vmem:[%s2735_s0 + $0x358] sm:$0xff] }
  0x64   :  { %1616 = vmatprep.subr.bf16.mxu0 %v1652_v38  ;;  %1641 = vmatpush3.bf16.msra.mxu1 %v1614_v10  ;;  %v64_v10 = vld [vmem:[%s2735_s0 + $0x160] sm:$0xff] }
  0x65   :  { %628 = vmatmul.mubr.f32.gmra.mrb[32].mxu0 %v51_v14  ;;  %1634 = vmatprep.subr.bf16.mxu1 %v1652_v38  ;;  %v82_v14 = vld [vmem:[%s2735_s0 + $0x1f0] sm:$0xff] }
  0x66   :  { %758 = vmatmul.mubr.f32.gmra.mrb[32].mxu1 %v53_v15  ;;  %632 = vmatprep.mubr.f32.mxu0 %v61_v16  ;;  %v2500_v16 = vld [vmem:[%s2736_s2] ss:$0 sm:$0xff] }
  0x67   :  { %762 = vmatprep.mubr.f32.mxu1 %v63_v18  ;;  %1618 = vmatpush3.bf16.msra.mxu0 %v1617_v17 }
  0x68   :  { %1619 = vmatprep.subr.bf16.mxu0 %v1652_v38  ;;  %1642 = vmatpush3.bf16.msra.mxu1 %v1617_v17 }
  0x69   :  { %633 = vmatmul.mubr.f32.gmra.mrb[34].mxu0 %v60_v21  ;;  %1635 = vmatprep.subr.bf16.mxu1 %v1652_v38 }
  0x6a   :  { %763 = vmatmul.mubr.f32.gmra.mrb[34].mxu1 %v62_v22  ;;  %637 = vmatprep.mubr.f32.mxu0 %v70_v23 }
  0x6b   :  { %767 = vmatprep.mubr.f32.mxu1 %v72_v25  ;;  %1621 = vmatpush3.bf16.msra.mxu0 %v1620_v24 }
  0x6c   :  { %1622 = vmatprep.subr.bf16.mxu0 %v1652_v38  ;;  %1643 = vmatpush3.bf16.msra.mxu1 %v1620_v24 }
  0x6d   :  { %638 = vmatmul.mubr.f32.gmra.mrb[36].mxu0 %v69_v28  ;;  %1636 = vmatprep.subr.bf16.mxu1 %v1652_v38 }
  0x6e   :  { %768 = vmatmul.mubr.f32.gmra.mrb[36].mxu1 %v71_v29  ;;  %642 = vmatprep.mubr.f32.mxu0 %v79_v30 }
  0x6f   :  { %772 = vmatprep.mubr.f32.mxu1 %v81_v32  ;;  %1624 = vmatpush3.bf16.msra.mxu0 %v1623_v31 }
  0x70   :  { %1625 = vmatprep.subr.bf16.mxu0 %v1652_v38  ;;  %1644 = vmatpush3.bf16.msra.mxu1 %v1623_v31 }
  0x71   :  { %643 = vmatmul.mubr.f32.gmra.mrb[38].mxu0 %v78_v35  ;;  %1637 = vmatprep.subr.bf16.mxu1 %v1652_v38 }
  0x72   :  { %773 = vmatmul.mubr.f32.gmra.mrb[38].mxu1 %v80_v36  ;;  %647 = vmatprep.mubr.f32.mxu0 %v88_v37 }
  0x73   :  { %777 = vmatprep.mubr.f32.mxu1 %v90_v40  ;;  %1627 = vmatpush3.bf16.msra.mxu0 %v1626_v39 }
  0x74   :  { %1645 = vmatpush3.bf16.msra.mxu1 %v1626_v39  ;;  %1628 = vmatprep.subr.bf16.mxu0 %v1652_v38 }
  0x75   :  { %648 = vmatmul.mubr.f32.gmra.mrb[40].mxu0 %v87_v43  ;;  %1638 = vmatprep.subr.bf16.mxu1 %v1652_v38  ;;  %v108_v38 = vld [vmem:[%s2735_s0 + $0x2c0] sm:$0xff] }
  0x76   :  { %778 = vmatmul.mubr.f32.gmra.mrb[40].mxu1 %v89_v44  ;;  %652 = vmatprep.mubr.f32.mxu0 %v97_v45 }
  0x77   :  { %782 = vmatprep.mubr.f32.mxu1 %v99_v47  ;;  %1630 = vmatpush3.bf16.msra.mxu0 %v1629_v46 }
  0x78   :  { %1646 = vmatpush3.bf16.msra.mxu1 %v1629_v46 }
  0x79   :  { %653 = vmatmul.mubr.f32.gmra.mrb[42].mxu0 %v96_v48 }
  0x7a   :  { %783 = vmatmul.mubr.f32.gmra.mrb[42].mxu1 %v98_v49  ;;  %657 = vmatprep.mubr.f32.mxu0 %v106_v50 }
  0x7b   :  { %787 = vmatprep.mubr.f32.mxu1 %v108_v38 }
  0x7d   :  { %658 = vmatmul.mubr.f32.gmra.mrb[44].mxu0 %v105_v51 }
  0x7e   :  { %788 = vmatmul.mubr.f32.gmra.mrb[44].mxu1 %v107_v52  ;;  %662 = vmatprep.mubr.f32.mxu0 %v115_v53 }
  0x7f   :  { %792 = vmatprep.mubr.f32.mxu1 %v117_v54 }
  0x81   :  { %663 = vmatmul.mubr.f32.gmra.mrb[46].mxu0 %v114_v55 }
  0x82   :  { %793 = vmatmul.mubr.f32.gmra.mrb[46].mxu1 %v116_v56  ;;  %667 = vmatprep.mubr.f32.mxu0 %v124_v57 }
  0x83   :  { %797 = vmatprep.mubr.f32.mxu1 %v126_v58 }
  0x85   :  { %668 = vmatmul.mubr.f32.gmra.mrb[48].mxu0 %v123_v59 }
  0x86   :  { %798 = vmatmul.mubr.f32.gmra.mrb[48].mxu1 %v125_v60  ;;  %672 = vmatprep.mubr.f32.mxu0 %v133_v61 }
  0x87   :  { %802 = vmatprep.mubr.f32.mxu1 %v135_v62 }
  0x89   :  { %673 = vmatmul.mubr.f32.gmra.mrb[50].mxu0 %v132_v63 }
  0x8a   :  { %803 = vmatmul.mubr.f32.gmra.mrb[50].mxu1 %v134_v0  ;;  %1440 = vmatprep.mubr.msk.f32.mxu0 %vm1653_vm0, %v1654_v1 }
  0x8b   :  { %1461 = vmatprep.mubr.msk.f32.mxu1 %vm1653_vm0, %v1654_v1 }
  0x8d   :  { %1441 = vmatmul.mubr.f32.vlgmr.msra.gmra.mrb[52].mxu0 %v28_v2 }
  0x8e   :  { %1462 = vmatmul.mubr.f32.vlgmr.msra.gmra.mrb[52].mxu1 %v91_v3  ;;  %1443 = vmatprep.mubr.msk.f32.mxu0 %vm1653_vm0, %v1654_v1 }
  0x8f   :  { %1464 = vmatprep.mubr.msk.f32.mxu1 %vm1653_vm0, %v1654_v1 }
  0x91   :  { %1444 = vmatmul.mubr.f32.gmra.mrb[54].mxu0 %v37_v4 }
  0x92   :  { %1465 = vmatmul.mubr.f32.gmra.mrb[54].mxu1 %v100_v5  ;;  %1446 = vmatprep.mubr.msk.f32.mxu0 %vm1653_vm0, %v1654_v1 }
  0x93   :  { %1467 = vmatprep.mubr.msk.f32.mxu1 %vm1653_vm0, %v1654_v1 }
  0x95   :  { %1447 = vmatmul.mubr.f32.gmra.mrb[56].mxu0 %v46_v6 }
  0x96   :  { %1468 = vmatmul.mubr.f32.gmra.mrb[56].mxu1 %v109_v7  ;;  %1449 = vmatprep.mubr.msk.f32.mxu0 %vm1653_vm0, %v1654_v1 }
  0x97   :  { %1470 = vmatprep.mubr.msk.f32.mxu1 %vm1653_vm0, %v1654_v1 }
  0x99   :  { %1450 = vmatmul.mubr.f32.gmra.mrb[58].mxu0 %v55_v8 }
  0x9a   :  { %1471 = vmatmul.mubr.f32.gmra.mrb[58].mxu1 %v118_v9  ;;  %1452 = vmatprep.mubr.msk.f32.mxu0 %vm1653_vm0, %v1654_v1 }
  0x9b   :  { %1473 = vmatprep.mubr.msk.f32.mxu1 %vm1653_vm0, %v1654_v1 }
  0x9d   :  { %1453 = vmatmul.mubr.f32.gmra.mrb[60].mxu0 %v64_v10 }
  0x9e   :  { %1474 = vmatmul.mubr.f32.gmra.mrb[60].mxu1 %v127_v11  ;;  %1455 = vmatprep.mubr.msk.f32.mxu0 %vm1653_vm0, %v1654_v1 }
  0x9f   :  { %1476 = vmatprep.mubr.msk.f32.mxu1 %vm1653_vm0, %v1654_v1 }
  0xa1   :  { %1456 = vmatmul.mubr.f32.gmra.mrb[62].mxu0 %v73_v12 }
  0xa2   :  { %1477 = vmatmul.mubr.f32.gmra.mrb[62].mxu1 %v136_v13  ;;  %1458 = vmatprep.mubr.msk.f32.mxu0 %vm1653_vm0, %v1654_v1 }
  0xa5   :  { %1459 = vmatmul.mubr.f32.gmra.mrb[64].mxu0 %v82_v14 }
  0xf8   :  { %v1127_v15 = vpop.f32.mrb[0].mxu0 }
  0xf9   :  { %v1128_v17 = vpop.f32.mrb[1].mxu0  ;;  %v1198_v18 = vpop.f32.mrb[0].mxu1 }
  0xfa   :  { %v1129_v19 = vadd.f32 %v1128_v17, %v1127_v15  ;;  %v1199_v20 = vpop.f32.mrb[1].mxu1 }
  0xfb   :  { %v1200_v21 = vadd.f32 %v1199_v20, %v1198_v18 }
  0xfc   :  { %v355_v22 = vadd.f32 %v1129_v19, %v2500_v16  ;;  %v1130_v23 = vpop.f32.mrb[2].mxu0 }
  0xfd   :  { %v1131_v24 = vpop.f32.mrb[3].mxu0  ;;  %v1201_v25 = vpop.f32.mrb[2].mxu1 }
  0xfe   :  { %v2503_v26 = vadd.f32 %v1200_v21, %v355_v22  ;;  %v1132_v27 = vadd.f32 %v1131_v24, %v1130_v23  ;;  %v1202_v28 = vpop.f32.mrb[3].mxu1 }
  0xff   :  { %v1203_v29 = vadd.f32 %v1202_v28, %v1201_v25 }
 0x100   :  { %v360_v30 = vadd.f32 %v1132_v27, %v2500_v16  ;;  %v1133_v31 = vpop.f32.mrb[4].mxu0 }
 0x101   :  { %v1134_v32 = vpop.f32.mrb[5].mxu0  ;;  %v1204_v33 = vpop.f32.mrb[4].mxu1 }
 0x102   :  { %v2506_v34 = vadd.f32 %v1203_v29, %v360_v30  ;;  %v1135_v35 = vadd.f32 %v1134_v32, %v1133_v31  ;;  %v1205_v36 = vpop.f32.mrb[5].mxu1 }
 0x103   :  { %v1206_v37 = vadd.f32 %v1205_v36, %v1204_v33 }
 0x104   :  { %v365_v39 = vadd.f32 %v1135_v35, %v2500_v16  ;;  %v1136_v40 = vpop.f32.mrb[6].mxu0 }
 0x105   :  { %v1137_v41 = vpop.f32.mrb[7].mxu0  ;;  %v1207_v42 = vpop.f32.mrb[6].mxu1 }
 0x106   :  { %v2509_v43 = vadd.f32 %v1206_v37, %v365_v39  ;;  %v1138_v44 = vadd.f32 %v1137_v41, %v1136_v40  ;;  %v1208_v45 = vpop.f32.mrb[7].mxu1 }
 0x107   :  { %v1209_v46 = vadd.f32 %v1208_v45, %v1207_v42 }
 0x108   :  { %v370_v47 = vadd.f32 %v1138_v44, %v2500_v16  ;;  %v1139_v48 = vpop.f32.mrb[8].mxu0 }
 0x109   :  { %v1140_v49 = vpop.f32.mrb[9].mxu0  ;;  %v1210_v50 = vpop.f32.mrb[8].mxu1 }
 0x10a   :  { %v2512_v38 = vadd.f32 %v1209_v46, %v370_v47  ;;  %v1141_v51 = vadd.f32 %v1140_v49, %v1139_v48  ;;  %v1211_v52 = vpop.f32.mrb[9].mxu1 }
 0x10b   :  { %v1212_v53 = vadd.f32 %v1211_v52, %v1210_v50 }
 0x10c   :  { %v375_v54 = vadd.f32 %v1141_v51, %v2500_v16  ;;  %v1142_v55 = vpop.f32.mrb[10].mxu0 }
 0x10d   :  { %v1143_v56 = vpop.f32.mrb[11].mxu0  ;;  %v1213_v57 = vpop.f32.mrb[10].mxu1 }
 0x10e   :  { %v2515_v58 = vadd.f32 %v1212_v53, %v375_v54  ;;  %v1144_v59 = vadd.f32 %v1143_v56, %v1142_v55  ;;  %v1214_v60 = vpop.f32.mrb[11].mxu1 }
 0x10f   :  { %v1215_v61 = vadd.f32 %v1214_v60, %v1213_v57 }
 0x110   :  { %v380_v62 = vadd.f32 %v1144_v59, %v2500_v16  ;;  %v1145_v63 = vpop.f32.mrb[12].mxu0 }
 0x111   :  { %v1146_v0 = vpop.f32.mrb[13].mxu0  ;;  %v1216_v1 = vpop.f32.mrb[12].mxu1 }
 0x112   :  { %v2518_v2 = vadd.f32 %v1215_v61, %v380_v62  ;;  %v1147_v3 = vadd.f32 %v1146_v0, %v1145_v63  ;;  %v1217_v4 = vpop.f32.mrb[13].mxu1 }
 0x113   :  { %v1218_v5 = vadd.f32 %v1217_v4, %v1216_v1 }
 0x114   :  { %v385_v6 = vadd.f32 %v1147_v3, %v2500_v16  ;;  %v1148_v7 = vpop.f32.mrb[14].mxu0 }
 0x115   :  { %v1149_v8 = vpop.f32.mrb[15].mxu0  ;;  %v1219_v9 = vpop.f32.mrb[14].mxu1 }
 0x116   :  { %v2521_v10 = vadd.f32 %v1218_v5, %v385_v6  ;;  %v1150_v11 = vadd.f32 %v1149_v8, %v1148_v7  ;;  %v1220_v12 = vpop.f32.mrb[15].mxu1 }
 0x117   :  { %v1221_v13 = vadd.f32 %v1220_v12, %v1219_v9 }
 0x118   :  { %v390_v14 = vadd.f32 %v1150_v11, %v2500_v16  ;;  %v1151_v15 = vpop.f32.mrb[16].mxu0 }
 0x119   :  { %v1152_v17 = vpop.f32.mrb[17].mxu0  ;;  %v1222_v18 = vpop.f32.mrb[16].mxu1 }
 0x11a   :  { %v2524_v19 = vadd.f32 %v1221_v13, %v390_v14  ;;  %v1153_v20 = vadd.f32 %v1152_v17, %v1151_v15  ;;  %v1223_v21 = vpop.f32.mrb[17].mxu1 }
 0x11b   :  { %v1224_v22 = vadd.f32 %v1223_v21, %v1222_v18 }
 0x11c   :  { %v395_v23 = vadd.f32 %v1153_v20, %v2500_v16  ;;  %v1154_v24 = vpop.f32.mrb[18].mxu0 }
 0x11d   :  { %v1155_v25 = vpop.f32.mrb[19].mxu0  ;;  %v1225_v27 = vpop.f32.mrb[18].mxu1 }
 0x11e   :  { %v2527_v28 = vadd.f32 %v1224_v22, %v395_v23  ;;  %v1156_v29 = vadd.f32 %v1155_v25, %v1154_v24  ;;  %v1226_v30 = vpop.f32.mrb[19].mxu1 }
 0x11f   :  { %v1227_v31 = vadd.f32 %v1226_v30, %v1225_v27 }
 0x120   :  { %v400_v32 = vadd.f32 %v1156_v29, %v2500_v16  ;;  %v1157_v33 = vpop.f32.mrb[20].mxu0 }
 0x121   :  { %v1158_v35 = vpop.f32.mrb[21].mxu0  ;;  %v1228_v36 = vpop.f32.mrb[20].mxu1 }
 0x122   :  { %v2530_v37 = vadd.f32 %v1227_v31, %v400_v32  ;;  %v1159_v39 = vadd.f32 %v1158_v35, %v1157_v33  ;;  %v1229_v40 = vpop.f32.mrb[21].mxu1 }
 0x123   :  { %v1230_v41 = vadd.f32 %v1229_v40, %v1228_v36 }
 0x124   :  { %v405_v42 = vadd.f32 %v1159_v39, %v2500_v16  ;;  %v1160_v44 = vpop.f32.mrb[22].mxu0 }
 0x125   :  { %v1161_v45 = vpop.f32.mrb[23].mxu0  ;;  %v1231_v46 = vpop.f32.mrb[22].mxu1 }
 0x126   :  { %v2533_v47 = vadd.f32 %v1230_v41, %v405_v42  ;;  %v1162_v48 = vadd.f32 %v1161_v45, %v1160_v44  ;;  %v1232_v49 = vpop.f32.mrb[23].mxu1 }
 0x127   :  { %v1233_v50 = vadd.f32 %v1232_v49, %v1231_v46 }
 0x128   :  { %v410_v51 = vadd.f32 %v1162_v48, %v2500_v16  ;;  %v1163_v52 = vpop.f32.mrb[24].mxu0 }
 0x129   :  { %v1164_v53 = vpop.f32.mrb[25].mxu0  ;;  %v1234_v54 = vpop.f32.mrb[24].mxu1 }
 0x12a   :  { %v2536_v55 = vadd.f32 %v1233_v50, %v410_v51  ;;  %v1165_v56 = vadd.f32 %v1164_v53, %v1163_v52  ;;  %v1235_v57 = vpop.f32.mrb[25].mxu1 }
 0x12b   :  { %v1236_v59 = vadd.f32 %v1235_v57, %v1234_v54 }
 0x12c   :  { %v415_v60 = vadd.f32 %v1165_v56, %v2500_v16  ;;  %v1269_v61 = vpop.f32.mrb[26].mxu0 }
 0x12d   :  { %v1270_v62 = vpop.f32.mrb[27].mxu0  ;;  %v1340_v63 = vpop.f32.mrb[26].mxu1 }
 0x12e   :  { %v2539_v0 = vadd.f32 %v1236_v59, %v415_v60  ;;  %v1271_v1 = vadd.f32 %v1270_v62, %v1269_v61  ;;  %v1341_v3 = vpop.f32.mrb[27].mxu1 }
 0x12f   :  { %v1342_v4 = vadd.f32 %v1341_v3, %v1340_v63 }
 0x130   :  { %v615_v5 = vadd.f32 %v1271_v1, %v2503_v26  ;;  %v1272_v6 = vpop.f32.mrb[28].mxu0 }
 0x131   :  { %v1273_v7 = vpop.f32.mrb[29].mxu0  ;;  %v1343_v8 = vpop.f32.mrb[28].mxu1 }
 0x132   :  { %v1274_v9 = vadd.f32 %v1273_v7, %v1272_v6  ;;  %v1344_v11 = vpop.f32.mrb[29].mxu1  ;;  %v2542_v12 = vadd.f32 %v1342_v4, %v615_v5 }
 0x133   :  { %v1345_v13 = vadd.f32 %v1344_v11, %v1343_v8 }
 0x134   :  { %v620_v16 = vadd.f32 %v1274_v9, %v2506_v34  ;;  %v1275_v14 = vpop.f32.mrb[30].mxu0 }
 0x135   :  { %v1276_v15 = vpop.f32.mrb[31].mxu0  ;;  %v1346_v17 = vpop.f32.mrb[30].mxu1 }
 0x136   :  { %v1277_v18 = vadd.f32 %v1276_v15, %v1275_v14  ;;  %v1347_v20 = vpop.f32.mrb[31].mxu1  ;;  %v2545_v21 = vadd.f32 %v1345_v13, %v620_v16 }
 0x137   :  { %v1348_v22 = vadd.f32 %v1347_v20, %v1346_v17 }
 0x138   :  { %v625_v26 = vadd.f32 %v1277_v18, %v2509_v43  ;;  %v1278_v23 = vpop.f32.mrb[32].mxu0 }
 0x139   :  { %v1279_v24 = vpop.f32.mrb[33].mxu0  ;;  %v1349_v25 = vpop.f32.mrb[32].mxu1 }
 0x13a   :  { %v1280_v27 = vadd.f32 %v1279_v24, %v1278_v23  ;;  %v1350_v29 = vpop.f32.mrb[33].mxu1  ;;  %v2548_v30 = vadd.f32 %v1348_v22, %v625_v26 }
 0x13b   :  { %v1351_v31 = vadd.f32 %v1350_v29, %v1349_v25 }
 0x13c   :  { %v630_v34 = vadd.f32 %v1280_v27, %v2512_v38  ;;  %v1281_v32 = vpop.f32.mrb[34].mxu0 }
 0x13d   :  { %v1282_v33 = vpop.f32.mrb[35].mxu0  ;;  %v1352_v35 = vpop.f32.mrb[34].mxu1 }
 0x13e   :  { %v1283_v36 = vadd.f32 %v1282_v33, %v1281_v32  ;;  %v1353_v39 = vpop.f32.mrb[35].mxu1  ;;  %v2551_v40 = vadd.f32 %v1351_v31, %v630_v34 }
 0x13f   :  { %v1354_v41 = vadd.f32 %v1353_v39, %v1352_v35 }
 0x140   :  { %v635_v43 = vadd.f32 %v1283_v36, %v2515_v58  ;;  %v1284_v42 = vpop.f32.mrb[36].mxu0 }
 0x141   :  { %v1285_v44 = vpop.f32.mrb[37].mxu0  ;;  %v1355_v45 = vpop.f32.mrb[36].mxu1 }
 0x142   :  { %v1286_v46 = vadd.f32 %v1285_v44, %v1284_v42  ;;  %v1356_v48 = vpop.f32.mrb[37].mxu1  ;;  %v2554_v49 = vadd.f32 %v1354_v41, %v635_v43 }
 0x143   :  { %v1357_v50 = vadd.f32 %v1356_v48, %v1355_v45 }
 0x144   :  { %v640_v38 = vadd.f32 %v1286_v46, %v2518_v2  ;;  %v1287_v51 = vpop.f32.mrb[38].mxu0 }
 0x145   :  { %v1288_v52 = vpop.f32.mrb[39].mxu0  ;;  %v1358_v53 = vpop.f32.mrb[38].mxu1 }
 0x146   :  { %v1289_v54 = vadd.f32 %v1288_v52, %v1287_v51  ;;  %v1359_v56 = vpop.f32.mrb[39].mxu1  ;;  %v2557_v57 = vadd.f32 %v1357_v50, %v640_v38 }
 0x147   :  { %v1360_v59 = vadd.f32 %v1359_v56, %v1358_v53 }
 0x148   :  { %v645_v58 = vadd.f32 %v1289_v54, %v2521_v10  ;;  %v1290_v60 = vpop.f32.mrb[40].mxu0 }
 0x149   :  { %v1291_v61 = vpop.f32.mrb[41].mxu0  ;;  %v1361_v62 = vpop.f32.mrb[40].mxu1 }
 0x14a   :  { %v1292_v63 = vadd.f32 %v1291_v61, %v1290_v60  ;;  %v1362_v1 = vpop.f32.mrb[41].mxu1  ;;  %v2560_v3 = vadd.f32 %v1360_v59, %v645_v58 }
 0x14b   :  { %v1363_v4 = vadd.f32 %v1362_v1, %v1361_v62 }
 0x14c   :  { %v650_v2 = vadd.f32 %v1292_v63, %v2524_v19  ;;  %v1293_v5 = vpop.f32.mrb[42].mxu0 }
 0x14d   :  { %v1294_v6 = vpop.f32.mrb[43].mxu0  ;;  %v1364_v7 = vpop.f32.mrb[42].mxu1 }
 0x14e   :  { %v1295_v8 = vadd.f32 %v1294_v6, %v1293_v5  ;;  %v1365_v9 = vpop.f32.mrb[43].mxu1  ;;  %v780_v11 = vadd.f32 %v1363_v4, %v650_v2 }
 0x14f   :  { %v1366_v13 = vadd.f32 %v1365_v9, %v1364_v7 }
 0x150   :  { %v655_v16 = vadd.f32 %v1295_v8, %v2527_v28  ;;  %v1296_v10 = vpop.f32.mrb[44].mxu0 }
 0x151   :  { %v1297_v14 = vpop.f32.mrb[45].mxu0  ;;  %v1367_v15 = vpop.f32.mrb[44].mxu1 }
 0x152   :  { %v1298_v17 = vadd.f32 %v1297_v14, %v1296_v10  ;;  %v1368_v18 = vpop.f32.mrb[45].mxu1  ;;  %v785_v20 = vadd.f32 %v1366_v13, %v655_v16 }
 0x153   :  { %v1369_v22 = vadd.f32 %v1368_v18, %v1367_v15 }
 0x154   :  { %v660_v26 = vadd.f32 %v1298_v17, %v2530_v37  ;;  %v1299_v23 = vpop.f32.mrb[46].mxu0 }
 0x155   :  { %v1300_v19 = vpop.f32.mrb[47].mxu0  ;;  %v1370_v24 = vpop.f32.mrb[46].mxu1 }
 0x156   :  { %v1301_v25 = vadd.f32 %v1300_v19, %v1299_v23  ;;  %v1371_v27 = vpop.f32.mrb[47].mxu1  ;;  %v790_v29 = vadd.f32 %v1369_v22, %v660_v26 }
 0x157   :  { %v1372_v31 = vadd.f32 %v1371_v27, %v1370_v24 }
 0x158   :  { %v665_v34 = vadd.f32 %v1301_v25, %v2533_v47  ;;  %v1302_v32 = vpop.f32.mrb[48].mxu0 }
 0x159   :  { %v1303_v28 = vpop.f32.mrb[49].mxu0  ;;  %v1373_v33 = vpop.f32.mrb[48].mxu1 }
 0x15a   :  { %v1304_v35 = vadd.f32 %v1303_v28, %v1302_v32  ;;  %v1374_v36 = vpop.f32.mrb[49].mxu1  ;;  %v795_v39 = vadd.f32 %v1372_v31, %v665_v34 }
 0x15b   :  { %v1375_v41 = vadd.f32 %v1374_v36, %v1373_v33 }
 0x15c   :  { %v670_v43 = vadd.f32 %v1304_v35, %v2536_v55  ;;  %v1305_v42 = vpop.f32.mrb[50].mxu0 }
 0x15d   :  { %v1306_v37 = vpop.f32.mrb[51].mxu0  ;;  %v1376_v44 = vpop.f32.mrb[50].mxu1 }
 0x15e   :  { %v1307_v45 = vadd.f32 %v1306_v37, %v1305_v42  ;;  %v1377_v46 = vpop.f32.mrb[51].mxu1  ;;  %v800_v48 = vadd.f32 %v1375_v41, %v670_v43 }
 0x15f   :  { %v1378_v50 = vadd.f32 %v1377_v46, %v1376_v44 }
 0x160   :  { %v675_v38 = vadd.f32 %v1307_v45, %v2539_v0  ;;  %v874_v51 = vpop.f32.mrb[52].mxu0 }
 0x161   :  { %v875_v47 = vadd.f32 %v874_v51, %v2542_v12  ;;  %v909_v52 = vpop.f32.mrb[52].mxu1  ;;  %v1442_v53 = vpop.f32.mrb[53].mxu0 }
 0x162   :  { %v2569_v54 = vadd.f32 %v909_v52, %v780_v11  ;;  %v1463_v56 = vpop.f32.mrb[53].mxu1  ;;  %v805_v59 = vadd.f32 %v1378_v50, %v675_v38 }
 0x163   :  { %v2571_v58 = vmax.f32 %v875_v47, 0.0 }
 0x164   :  { %v879_v55 = vpop.f32.mrb[54].mxu0 }
 0x165   :  { %v880_v60 = vadd.f32 %v879_v55, %v2545_v21  ;;  %v914_v61 = vpop.f32.mrb[54].mxu1  ;;  %v1445_v62 = vpop.f32.mrb[55].mxu0  ;;  %v985_v0 = vmul.f32 %v2571_v58, %v2571_v58  ;;  %v952_v2 = vsel %vm951_vm1, %v2571_v58, 0.0  ;;  %v2614_v55 = vmax.f32 %v2569_v54, 0.0 }
 0x166   :  { %v915_v63 = vadd.f32 %v914_v61, %v785_v20  ;;  %v1466_v1 = vpop.f32.mrb[55].mxu1 }
 0x167   :  { %v2576_v12 = vmax.f32 %v880_v60, 0.0  ;;  %v998_v16 = vsel %vm951_vm1, %v985_v0, 0.0  ;;  %v992_v54 = vmul.f32 %v2614_v55, %v2614_v55 }
 0x168   :  { %v884_v4 = vpop.f32.mrb[56].mxu0  ;;  %v2621_v1 = vmax.f32 %v915_v63, 0.0  ;;  %v965_v63 = vsel %vm951_vm1, %v2614_v55, 0.0 }
 0x169   :  { %v953_v5 = vsel %vm951_vm1, %v2576_v12, 0.0  ;;  %v986_v21 = vmul.f32 %v2576_v12, %v2576_v12  ;;  %v885_v6 = vadd.f32 %v884_v4, %v2548_v30  ;;  %v919_v7 = vpop.f32.mrb[56].mxu1  ;;  %v1448_v8 = vpop.f32.mrb[57].mxu0 }
 0x16a   :  { %v954_v9 = vadd.f32 %v953_v5, %v952_v2  ;;  %v920_v11 = vadd.f32 %v919_v7, %v790_v29  ;;  %v1469_v13 = vpop.f32.mrb[57].mxu1  ;;  %v993_v7 = vmul.f32 %v2621_v1, %v2621_v1 }
 0x16b   :  { %v999_v10 = vsel %vm951_vm1, %v986_v21, 0.0  ;;  %v2587_v14 = vmax.f32 %v885_v6, 0.0 }
 0x16c   :  { %v1000_v15 = vadd.f32 %v999_v10, %v998_v16  ;;  %v889_v17 = vpop.f32.mrb[58].mxu0  ;;  %v2628_v5 = vmax.f32 %v920_v11, 0.0  ;;  %v1011_v16 = vsel %vm951_vm1, %v992_v54, 0.0  ;;  %v967_v10 = vsel %vm951_vm1, %v2621_v1, 0.0 }
 0x16d   :  { %v955_v18 = vsel %vm951_vm1, %v2587_v14, 0.0  ;;  %v987_v20 = vmul.f32 %v2587_v14, %v2587_v14  ;;  %v890_v30 = vadd.f32 %v889_v17, %v2551_v40  ;;  %v924_v22 = vpop.f32.mrb[58].mxu1  ;;  %v1451_v26 = vpop.f32.mrb[59].mxu0 }
 0x16e   :  { %v956_v23 = vadd.f32 %v955_v18, %v954_v9  ;;  %v925_v19 = vadd.f32 %v924_v22, %v795_v39  ;;  %v1472_v24 = vpop.f32.mrb[59].mxu1  ;;  %v969_v22 = vsel %vm951_vm1, %v2628_v5, 0.0 }
 0x16f   :  { %v1001_v25 = vsel %vm951_vm1, %v987_v20, 0.0  ;;  %v2595_v27 = vmax.f32 %v890_v30, 0.0  ;;  %v1013_v30 = vsel %vm951_vm1, %v993_v7, 0.0 }
 0x170   :  { %v1002_v29 = vadd.f32 %v1001_v25, %v1000_v15  ;;  %v894_v31 = vpop.f32.mrb[60].mxu0  ;;  %v2638_v8 = vmax.f32 %v925_v19, 0.0  ;;  %v994_v15 = vmul.f32 %v2628_v5, %v2628_v5 }
 0x171   :  { %v957_v34 = vsel %vm951_vm1, %v2595_v27, 0.0  ;;  %v988_v32 = vmul.f32 %v2595_v27, %v2595_v27  ;;  %v895_v28 = vadd.f32 %v894_v31, %v2554_v49  ;;  %v929_v40 = vpop.f32.mrb[60].mxu1  ;;  %v1454_v33 = vpop.f32.mrb[61].mxu0 }
 0x172   :  { %v958_v35 = vadd.f32 %v957_v34, %v956_v23  ;;  %v930_v36 = vadd.f32 %v929_v40, %v800_v48  ;;  %v1475_v39 = vpop.f32.mrb[61].mxu1  ;;  %v995_v26 = vmul.f32 %v2638_v8, %v2638_v8  ;;  %v1015_v25 = vsel %vm951_vm1, %v994_v15, 0.0 }
 0x173   :  { %v1003_v41 = vsel %vm951_vm1, %v988_v32, 0.0  ;;  %v2603_v43 = vmax.f32 %v895_v28, 0.0 }
 0x174   :  { %v1004_v42 = vadd.f32 %v1003_v41, %v1002_v29  ;;  %v899_v37 = vpop.f32.mrb[62].mxu0  ;;  %v2646_v17 = vmax.f32 %v930_v36, 0.0  ;;  %v971_v29 = vsel %vm951_vm1, %v2638_v8, 0.0  ;;  %v1017_v28 = vsel %vm951_vm1, %v995_v26, 0.0 }
 0x175   :  { %v959_v44 = vsel %vm951_vm1, %v2603_v43, 0.0  ;;  %v989_v45 = vmul.f32 %v2603_v43, %v2603_v43  ;;  %v900_v46 = vadd.f32 %v899_v37, %v2557_v57  ;;  %v934_v49 = vpop.f32.mrb[62].mxu1  ;;  %v1457_v50 = vpop.f32.mrb[63].mxu0 }
 0x176   :  { %v960_v38 = vadd.f32 %v959_v44, %v958_v35  ;;  %v935_v51 = vadd.f32 %v934_v49, %v805_v59  ;;  %v1478_v48 = vpop.f32.mrb[63].mxu1  ;;  %v996_v31 = vmul.f32 %v2646_v17, %v2646_v17  ;;  %v973_v40 = vsel %vm951_vm1, %v2646_v17, 0.0 }
 0x177   :  { %v1005_v47 = vsel %vm951_vm1, %v989_v45, 0.0  ;;  %v2611_v52 = vmax.f32 %v900_v46, 0.0 }
 0x178   :  { %v1006_v53 = vadd.f32 %v1005_v47, %v1004_v42  ;;  %v904_v56 = vpop.f32.mrb[64].mxu0  ;;  %v950_v23 = vmax.f32 %v935_v51, 0.0  ;;  %v1019_v39 = vsel %vm951_vm1, %v996_v31, 0.0 }
 0x179   :  { %v961_v60 = vsel %vm951_vm1, %v2611_v52, 0.0  ;;  %v990_v57 = vmul.f32 %v2611_v52, %v2611_v52  ;;  %v905_v61 = vadd.f32 %v904_v56, %v2560_v3  ;;  %v1460_v62 = vpop.f32.mrb[65].mxu0 }
 0x17a   :  { %v962_v59 = vadd.f32 %v961_v60, %v960_v38  ;;  %v997_v33 = vmul.f32 %v950_v23, %v950_v23  ;;  %v976_v41 = vsel %vm975_vm2, %v950_v23, 0.0 }
 0x17b   :  { %v1007_v0 = vsel %vm951_vm1, %v990_v57, 0.0  ;;  %v2624_v4 = vmax.f32 %v905_v61, 0.0 }
 0x17c   :  { %v1008_v2 = vadd.f32 %v1007_v0, %v1006_v53  ;;  %v1021_v44 = vsel %vm975_vm2, %v997_v33, 0.0 }
 0x17d   :  { %v963_v21 = vsel %vm951_vm1, %v2624_v4, 0.0  ;;  %v991_v3 = vmul.f32 %v2624_v4, %v2624_v4 }
 0x17e   :  { %v964_v6 = vadd.f32 %v963_v21, %v962_v59  ;;  %v1040_v21 = vlaneseq }
 0x17f   :  { %v1009_v9 = vsel %vm951_vm1, %v991_v3, 0.0 }
 0x180   :  { %v966_v13 = vadd.f32 %v965_v63, %v964_v6  ;;  %v1010_v11 = vadd.f32 %v1009_v9, %v1008_v2  ;;  %v1041_v3 = vshrl.u32 %v1040_v21, 7  ;;  %v1032_v6 = vld [vmem:[%s2737_s3] sm:$0x1] }
 0x182   :  { %v968_v18 = vadd.f32 %v967_v10, %v966_v13  ;;  %v1012_v20 = vadd.f32 %v1011_v16, %v1010_v11  ;;  %v1042_v63 = vsub.s32 0, %v1041_v3  ;;  %v1036_v13 = vld [vmem:[%s2738_s4] sm:$0x1] }
 0x184   :  { %v970_v19 = vadd.f32 %v969_v22, %v968_v18  ;;  %v1014_v24 = vadd.f32 %v1013_v30, %v1012_v20 }
 0x186   :  { %v972_v34 = vadd.f32 %v971_v29, %v970_v19  ;;  %v1016_v32 = vadd.f32 %v1015_v25, %v1014_v24 }
 0x188   :  { %v974_v35 = vadd.f32 %v973_v40, %v972_v34  ;;  %v1018_v36 = vadd.f32 %v1017_v28, %v1016_v32 }
 0x18a   :  { %v977_v42 = vadd.f32 %v976_v41, %v974_v35  ;;  %v1020_v37 = vadd.f32 %v1019_v39, %v1018_v36 }
 0x18c   :  { %v978_v45 = vrot.slane %v977_v42, 4  ;;  %v1022_v46 = vadd.f32 %v1021_v44, %v1020_v37 }
 0x18e   :  { %v979_v49 = vadd.f32 %v978_v45, %v977_v42  ;;  %v1023_v50 = vrot.slane %v1022_v46, 4 }
 0x190   :  { %v980_v38 = vrot.slane %v979_v49, 2  ;;  %v1024_v51 = vadd.f32 %v1023_v50, %v1022_v46 }
 0x192   :  { %v981_v48 = vadd.f32 %v980_v38, %v979_v49  ;;  %v1025_v47 = vrot.slane %v1024_v51, 2 }
 0x194   :  { %v982_v53 = vrot.slane %v981_v48, 1  ;;  %v1026_v56 = vadd.f32 %v1025_v47, %v1024_v51 }
 0x196   :  { %v983_v60 = vadd.f32 %v982_v53, %v981_v48  ;;  %v1027_v57 = vrot.slane %v1026_v56, 1 }
 0x198   :  { %v984_v61 = vmul.f32 0.010204081, %v983_v60  ;;  %v1028_v62 = vadd.f32 %v1027_v57, %v1026_v56 }
 0x19a   :  { %v1029_v59 = vmul.f32 0.010204081, %v1028_v62  ;;  %v1030_v0 = vmul.f32 %v984_v61, %v984_v61 }
 0x19c   :  { %v1031_v2 = vsub.f32 %v1029_v59, %v1030_v0 }
 0x19e   :  { %v1033_v54 = vadd.f32 1e-05, %v1031_v2 }
 0x1a0   :  { %1650 = vrsqrt.f32 %v1033_v54 }
 0x1aa   :  { %v1651_v7 = vpop.eup %1650 }
 0x1ab   :  { %v1035_v9 = vmul.f32 %v1651_v7, %v1032_v6 }
 0x1ad   :  { %v1037_v11 = vmul.f32 %v1035_v9, %v984_v61  ;;  %v1043_v16 = vrot.slane %v1035_v9, %v1042_v63 }
 0x1af   :  { %v1038_v10 = vsub.f32 %v1036_v13, %v1037_v11  ;;  %v1045_v15 = vmul.f32 %v1043_v16, %v2571_v58  ;;  %v1046_v18 = vmul.f32 %v1043_v16, %v2576_v12  ;;  %v1047_v20 = vmul.f32 %v1043_v16, %v2587_v14 }
 0x1b0   :  { %v1048_v30 = vmul.f32 %v1043_v16, %v2595_v27  ;;  %v1049_v22 = vmul.f32 %v1043_v16, %v2603_v43  ;;  %v1050_v26 = vmul.f32 %v1043_v16, %v2611_v52  ;;  %v1051_v19 = vmul.f32 %v1043_v16, %v2624_v4 }
 0x1b1   :  { %v1052_v24 = vmul.f32 %v1043_v16, %v2614_v55  ;;  %v1053_v25 = vmul.f32 %v1043_v16, %v2621_v1  ;;  %v1054_v29 = vmul.f32 %v1043_v16, %v2628_v5  ;;  %v1055_v58 = vmul.f32 %v1043_v16, %v2638_v8 }
 0x1b2   :  { %v1056_v12 = vmul.f32 %v1043_v16, %v2646_v17  ;;  %v1057_v31 = vmul.f32 %v1043_v16, %v950_v23  ;;  %v1062_v14 = vrot.slane %v1038_v10, %v1042_v63 }
 0x1b4   :  { %v1064_v34 = vadd.f32 %v1062_v14, %v1045_v15  ;;  %v1065_v27 = vadd.f32 %v1062_v14, %v1046_v18  ;;  %v1066_v32 = vadd.f32 %v1062_v14, %v1047_v20  ;;  %v1067_v43 = vadd.f32 %v1062_v14, %v1048_v30 }
 0x1b5   :  { %v1068_v28 = vadd.f32 %v1062_v14, %v1049_v22  ;;  %v1069_v52 = vadd.f32 %v1062_v14, %v1050_v26  ;;  %v1070_v40 = vadd.f32 %v1062_v14, %v1051_v19  ;;  %v1071_v4 = vadd.f32 %v1062_v14, %v1052_v24 }
 0x1b6   :  { %v1072_v33 = vadd.f32 %v1062_v14, %v1053_v25  ;;  %v1073_v55 = vadd.f32 %v1062_v14, %v1054_v29  ;;  %v1074_v35 = vadd.f32 %v1062_v14, %v1055_v58  ;;  %v1075_v1 = vadd.f32 %v1062_v14, %v1056_v12  ;;  %1077 = vst.msk [vmem:[%s2739_s5] sm:$0xff] %vm951_vm1, %v1064_v34 }
 0x1b7   :  { %1078 = vst.msk [vmem:[%s2739_s5 + $0x8] sm:$0xff] %vm951_vm1, %v1065_v27  ;;  %1079 = vst.msk [vmem:[%s2739_s5 + $0x10] sm:$0xff] %vm951_vm1, %v1066_v32  ;;  %v1076_v5 = vadd.f32 %v1062_v14, %v1057_v31 }
 0x1b8   :  { %1080 = vst.msk [vmem:[%s2739_s5 + $0x18] sm:$0xff] %vm951_vm1, %v1067_v43  ;;  %1081 = vst.msk [vmem:[%s2739_s5 + $0x20] sm:$0xff] %vm951_vm1, %v1068_v28 }
 0x1b9   :  { %1082 = vst.msk [vmem:[%s2739_s5 + $0x28] sm:$0xff] %vm951_vm1, %v1069_v52  ;;  %1083 = vst.msk [vmem:[%s2739_s5 + $0x30] sm:$0xff] %vm951_vm1, %v1070_v40 }
 0x1ba   :  { %1084 = vst.msk [vmem:[%s2739_s5 + $0x38] sm:$0xff] %vm951_vm1, %v1071_v4  ;;  %1085 = vst.msk [vmem:[%s2739_s5 + $0x40] sm:$0xff] %vm951_vm1, %v1072_v33 }
 0x1bb   :  { %1086 = vst.msk [vmem:[%s2739_s5 + $0x48] sm:$0xff] %vm951_vm1, %v1073_v55  ;;  %1087 = vst.msk [vmem:[%s2739_s5 + $0x50] sm:$0xff] %vm951_vm1, %v1074_v35 }
 0x1bc   :  { %1088 = vst.msk [vmem:[%s2739_s5 + $0x58] sm:$0xff] %vm951_vm1, %v1075_v1 }
 0x1bd   :  { %1089 = vst.msk [vmem:[%s2739_s5 + $0x60] sm:$0x3] %vm975_vm2, %v1076_v5 }

// kernel: gen_sagan_forward.9
= control target key start
LH: loop header
LB: loop body
LE: loop exit
PB: predicated region body
PF: predicated region fallthrough
CT: control target
= control target key end

     0   :  { %v92_v0 = vlaneseq  ;;  %s1279_s0 = inlined_call_operand.vmem [shape: f32[2,144,256], index: 0, kind: input, shape index: {}]   ;;  %s1280_s1 = inlined_call_operand.vmem [shape: f32[1,1,256], index: 1, kind: input, shape index: {}]   ;;  %s1281_s2 = inlined_call_operand.vmem [shape: f32[144,128], index: 2, kind: input, shape index: {}]   ;;  %s1282_s3 = inlined_call_operand.vmem [shape: f32[1,128], index: 3, kind: input, shape index: {}]   ;;  %s1283_s4 = inlined_call_operand.hbm [shape: f32[2,128], index: 4, kind: output, shape index: {}]  }
   0x1   :  { %v90_v2 = vld [vmem:[%s1280_s1] sm:$0x3]  ;;  %v55_v4 = vld [vmem:[%s1279_s0 + $0x128] sm:$0xff]  ;;  %v56_v9 = vld [vmem:[%s1279_s0 + $0x130] sm:$0xff] }
   0x2   :  { %v726_v1 = vshrl.u32 %v92_v0, 7  ;;  %v54_v3 = vld [vmem:[%s1279_s0 + $0x120] sm:$0xff]  ;;  %v19_v8 = vld [vmem:[%s1279_s0 + $0x8] sm:$0xff]  ;;  %v57_v12 = vld [vmem:[%s1279_s0 + $0x138] sm:$0xff] }
   0x3   :  { %v18_v7 = vld [vmem:[%s1279_s0] sm:$0xff]  ;;  %v20_v13 = vld [vmem:[%s1279_s0 + $0x10] sm:$0xff]  ;;  %v21_v14 = vld [vmem:[%s1279_s0 + $0x18] sm:$0xff] }
   0x4   :  { %v94_v5 = vsub.s32 0, %v726_v1  ;;  %v98_v6 = vsub.s32 1, %v726_v1  ;;  %v58_v19 = vld [vmem:[%s1279_s0 + $0x140] sm:$0xff]  ;;  %v59_v20 = vld [vmem:[%s1279_s0 + $0x148] sm:$0xff]  ;;  %v60_v35 = vld [vmem:[%s1279_s0 + $0x150] sm:$0xff] }
   0x5   :  { %v22_v25 = vld [vmem:[%s1279_s0 + $0x20] sm:$0xff]  ;;  %v23_v26 = vld [vmem:[%s1279_s0 + $0x28] sm:$0xff]  ;;  %v61_v36 = vld [vmem:[%s1279_s0 + $0x158] sm:$0xff] }
   0x6   :  { %v748_v10 = vrot.slane %v90_v2, %v94_v5  ;;  %v750_v11 = vrot.slane %v90_v2, %v98_v6  ;;  %v24_v37 = vld [vmem:[%s1279_s0 + $0x30] sm:$0xff]  ;;  %v25_v38 = vld [vmem:[%s1279_s0 + $0x38] sm:$0xff]  ;;  %v62_v45 = vld [vmem:[%s1279_s0 + $0x160] sm:$0xff] }
   0x7   :  { %v63_v46 = vld [vmem:[%s1279_s0 + $0x168] sm:$0xff]  ;;  %v26_v47 = vld [vmem:[%s1279_s0 + $0x40] sm:$0xff]  ;;  %v64_v52 = vld [vmem:[%s1279_s0 + $0x170] sm:$0xff] }
   0x8   :  { %v138_v15 = vmul.f32 %v748_v10, %v54_v3  ;;  %v139_v16 = vmul.f32 %v750_v11, %v55_v4  ;;  %v102_v17 = vmul.f32 %v748_v10, %v18_v7  ;;  %v103_v18 = vmul.f32 %v750_v11, %v19_v8  ;;  %v27_v48 = vld [vmem:[%s1279_s0 + $0x48] sm:$0xff]  ;;  %v65_v53 = vld [vmem:[%s1279_s0 + $0x178] sm:$0xff]  ;;  %v28_v57 = vld [vmem:[%s1279_s0 + $0x50] sm:$0xff] }
   0x9   :  { %v140_v21 = vmul.f32 %v748_v10, %v56_v9  ;;  %v141_v22 = vmul.f32 %v750_v11, %v57_v12  ;;  %v104_v23 = vmul.f32 %v748_v10, %v20_v13  ;;  %v105_v24 = vmul.f32 %v750_v11, %v21_v14  ;;  %v29_v58 = vld [vmem:[%s1279_s0 + $0x58] sm:$0xff]  ;;  %v66_v63 = vld [vmem:[%s1279_s0 + $0x180] sm:$0xff]  ;;  %v67_v4 = vld [vmem:[%s1279_s0 + $0x188] sm:$0xff] }
   0xa   :  { %v228_v27 = vadd.f32 %v139_v16, %v138_v15  ;;  %v174_v28 = vadd.f32 %v103_v18, %v102_v17  ;;  %v142_v30 = vmul.f32 %v748_v10, %v58_v19  ;;  %v143_v31 = vmul.f32 %v750_v11, %v59_v20  ;;  %v30_v5 = vld [vmem:[%s1279_s0 + $0x60] sm:$0xff] }
   0xb   :  { %v231_v29 = vadd.f32 %v141_v22, %v140_v21  ;;  %v177_v32 = vadd.f32 %v105_v24, %v104_v23  ;;  %v106_v33 = vmul.f32 %v748_v10, %v22_v25  ;;  %v107_v34 = vmul.f32 %v750_v11, %v23_v26 }
   0xc   :  { %229 = vadd.xlane.f32.xlu1 %v228_v27  ;;  %175 = vadd.xlane.f32.xlu0 %v174_v28  ;;  %v234_v39 = vadd.f32 %v143_v31, %v142_v30  ;;  %v144_v40 = vmul.f32 %v748_v10, %v60_v35  ;;  %v145_v41 = vmul.f32 %v750_v11, %v61_v36 }
   0xd   :  { %v180_v42 = vadd.f32 %v107_v34, %v106_v33  ;;  %v108_v43 = vmul.f32 %v748_v10, %v24_v37  ;;  %v109_v44 = vmul.f32 %v750_v11, %v25_v38  ;;  %v146_v50 = vmul.f32 %v748_v10, %v62_v45 }
   0xe   :  { %v237_v49 = vadd.f32 %v145_v41, %v144_v40  ;;  %v147_v51 = vmul.f32 %v750_v11, %v63_v46  ;;  %v110_v55 = vmul.f32 %v748_v10, %v26_v47  ;;  %v111_v56 = vmul.f32 %v750_v11, %v27_v48 }
   0xf   :  { %v183_v54 = vadd.f32 %v109_v44, %v108_v43  ;;  %v148_v59 = vmul.f32 %v748_v10, %v64_v52  ;;  %v149_v60 = vmul.f32 %v750_v11, %v65_v53  ;;  %v112_v61 = vmul.f32 %v748_v10, %v28_v57 }
  0x10   :  { %232 = vadd.xlane.f32.xlu1 %v231_v29  ;;  %178 = vadd.xlane.f32.xlu0 %v177_v32  ;;  %v113_v62 = vmul.f32 %v750_v11, %v29_v58  ;;  %v240_v2 = vadd.f32 %v147_v51, %v146_v50  ;;  %v186_v3 = vadd.f32 %v111_v56, %v110_v55 }
  0x14   :  { %235 = vadd.xlane.f32.xlu1 %v234_v39  ;;  %181 = vadd.xlane.f32.xlu0 %v180_v42 }
  0x18   :  { %238 = vadd.xlane.f32.xlu1 %v237_v49  ;;  %184 = vadd.xlane.f32.xlu0 %v183_v54 }
  0x19   :  { %9 = vsyncpa [#allocation3], 0  ;;  %v31_v6 = vld [vmem:[%s1279_s0 + $0x68] sm:$0xff]  ;;  %v68_v7 = vld [vmem:[%s1279_s0 + $0x190] sm:$0xff]  ;;  %v243_v9 = vadd.f32 %v149_v60, %v148_v59  ;;  %v189_v12 = vadd.f32 %v113_v62, %v112_v61  ;;  %v150_v13 = vmul.f32 %v748_v10, %v66_v63  ;;  %v151_v14 = vmul.f32 %v750_v11, %v67_v4  ;;  %s699_s7 = smov [#allocation2]  }
  0x1a   :  { %v69_v8 = vld [vmem:[%s1279_s0 + $0x198] sm:$0xff]  ;;  %v114_v15 = vmul.f32 %v748_v10, %v30_v5  ;;  %v32_v16 = vld [vmem:[%s1279_s0 + $0x70] sm:$0xff]  ;;  %v115_v18 = vmul.f32 %v750_v11, %v31_v6  ;;  %v152_v19 = vmul.f32 %v748_v10, %v68_v7  ;;  %v70_v21 = vld [vmem:[%s1279_s0 + $0x1a0] sm:$0xff]  ;;  %vm354_vm0 = vcmask 130112   ;;  %s635_s8 = sshll.u32 %s699_s7, 4  ;;  %s636_s8 = int_to_ptr.vmem [resolvable:$true] %s635_s8 }
  0x1b   :  { %v33_v17 = vld [vmem:[%s1279_s0 + $0x78] sm:$0xff]  ;;  %v153_v20 = vmul.f32 %v750_v11, %v69_v8  ;;  %v71_v22 = vld [vmem:[%s1279_s0 + $0x1a8] sm:$0xff]  ;;  %v116_v23 = vmul.f32 %v748_v10, %v32_v16  ;;  %v88_v25 = vld [vmem:[%s1279_s0 + $0x230] sm:$0xff]  ;;  %v246_v28 = vadd.f32 %v151_v14, %v150_v13  ;;  %v154_v34 = vmul.f32 %v748_v10, %v70_v21  ;;  %s674_s9 = scalar_lea.vmem %s636_s8, 32  ;;  %p679_p1 = scmp.lt.s32.totalorder %s636_s8, %s636_s8 }
  0x1c   :  { %241 = vadd.xlane.f32.xlu1 %v240_v2  ;;  %187 = vadd.xlane.f32.xlu0 %v186_v3  ;;  %v117_v24 = vmul.f32 %v750_v11, %v33_v17  ;;  %v89_v26 = vld [vmem:[%s1279_s0 + $0x238] sm:$0xff]  ;;  %v86_v27 = vld [vmem:[%s1279_s0 + $0x220] sm:$0xff]  ;;  %v87_v29 = vld [vmem:[%s1279_s0 + $0x228] sm:$0xff]  ;;  %v192_v32 = vadd.f32 %v115_v18, %v114_v15  ;;  %v155_v38 = vmul.f32 %v750_v11, %v71_v22  ;;  %vm361_vm1 = vcmask 195712   ;;  %p675_p0 = scmp.ne.s32.totalorder %s636_s8, %s674_s9  ;;  %p680_p2 = scmp.lt.s32.totalorder %s674_s9, %s674_s9 }
  0x1d   :  { %v84_v30 = vld [vmem:[%s1279_s0 + $0x210] sm:$0xff]  ;;  %v85_v31 = vld [vmem:[%s1279_s0 + $0x218] sm:$0xff]  ;;  %v249_v33 = vadd.f32 %v153_v20, %v152_v19  ;;  %v34_v35 = vld [vmem:[%s1279_s0 + $0x80] sm:$0xff]  ;;  %v172_v40 = vmul.f32 %v748_v10, %v88_v25  ;;  %v173_v41 = vmul.f32 %v750_v11, %v89_v26  ;;  %v170_v42 = vmul.f32 %v748_v10, %v86_v27 }
  0x1e   :  { %v48_v36 = vld [vmem:[%s1279_s0 + $0xf0] sm:$0xff]  ;;  %v49_v37 = vld [vmem:[%s1279_s0 + $0xf8] sm:$0xff]  ;;  %v35_v39 = vld [vmem:[%s1279_s0 + $0x88] sm:$0xff]  ;;  %v195_v43 = vadd.f32 %v117_v24, %v116_v23  ;;  %v171_v44 = vmul.f32 %v750_v11, %v87_v29  ;;  %v168_v45 = vmul.f32 %v748_v10, %v84_v30  ;;  %v169_v46 = vmul.f32 %v750_v11, %v85_v31  ;;  %p681_p3 = por %p680_p2, %p679_p1 }
  0x1f   :  { %v118_v47 = vmul.f32 %v748_v10, %v34_v35  ;;  %v910_v48 = vadd.f32 %v173_v41, %v172_v40  ;;  %v132_v49 = vmul.f32 %v748_v10, %v48_v36  ;;  %v133_v50 = vmul.f32 %v750_v11, %v49_v37  ;;  %v72_v52 = vld [vmem:[%s1279_s0 + $0x1b0] sm:$0xff]  ;;  %v73_v53 = vld [vmem:[%s1279_s0 + $0x1b8] sm:$0xff]  ;;  %v74_v3 = vld [vmem:[%s1279_s0 + $0x1c0] sm:$0xff] }
  0x20   :  { %244 = vadd.xlane.f32.xlu1 %v243_v9  ;;  %190 = vadd.xlane.f32.xlu0 %v189_v12  ;;  %v119_v51 = vmul.f32 %v750_v11, %v35_v39  ;;  %v921_v54 = vadd.f32 %v171_v44, %v170_v42  ;;  %v923_v55 = vadd.f32 %v169_v46, %v168_v45  ;;  %v36_v56 = vld [vmem:[%s1279_s0 + $0x90] sm:$0xff]  ;;  %v37_v57 = vld [vmem:[%s1279_s0 + $0x98] sm:$0xff]  ;;  %v75_v4 = vld [vmem:[%s1279_s0 + $0x1c8] sm:$0xff]  ;;  %vm368_vm2 = vcmask 261312   ;;  %p682_p4 = pnand %p681_p3, %p675_p0 }
  0x21   :  { %v931_v58 = vadd.f32 %v133_v50, %v132_v49  ;;  %v252_v59 = vadd.f32 %v155_v38, %v154_v34  ;;  %v156_v60 = vmul.f32 %v748_v10, %v72_v52  ;;  %v157_v61 = vmul.f32 %v750_v11, %v73_v53  ;;  %v38_v5 = vld [vmem:[%s1279_s0 + $0xa0] sm:$0xff]  ;;  %v39_v6 = vld [vmem:[%s1279_s0 + $0xa8] sm:$0xff]  ;;  %v76_v15 = vld [vmem:[%s1279_s0 + $0x1d0] sm:$0xff] }
  0x22   :  { %v198_v62 = vadd.f32 %v119_v51, %v118_v47  ;;  %v120_v63 = vmul.f32 %v748_v10, %v36_v56  ;;  %v121_v2 = vmul.f32 %v750_v11, %v37_v57  ;;  %v158_v7 = vmul.f32 %v748_v10, %v74_v3  ;;  %v77_v16 = vld [vmem:[%s1279_s0 + $0x1d8] sm:$0xff]  ;;  %v40_v17 = vld [vmem:[%s1279_s0 + $0xb0] sm:$0xff]  ;;  %v78_v25 = vld [vmem:[%s1279_s0 + $0x1e0] sm:$0xff] }
  0x23   :  { %v159_v8 = vmul.f32 %v750_v11, %v75_v4  ;;  %v122_v9 = vmul.f32 %v748_v10, %v38_v5  ;;  %v255_v12 = vadd.f32 %v157_v61, %v156_v60  ;;  %v123_v14 = vmul.f32 %v750_v11, %v39_v6  ;;  %v41_v18 = vld [vmem:[%s1279_s0 + $0xb8] sm:$0xff]  ;;  %v79_v26 = vld [vmem:[%s1279_s0 + $0x1e8] sm:$0xff]  ;;  %v42_v27 = vld [vmem:[%s1279_s0 + $0xc0] sm:$0xff] }
  0x24   :  { %247 = vadd.xlane.f32.xlu1 %v246_v28  ;;  %193 = vadd.xlane.f32.xlu0 %v192_v32  ;;  %v201_v13 = vadd.f32 %v121_v2, %v120_v63  ;;  %v160_v20 = vmul.f32 %v748_v10, %v76_v15  ;;  %v161_v21 = vmul.f32 %v750_v11, %v77_v16  ;;  %v43_v28 = vld [vmem:[%s1279_s0 + $0xc8] sm:$0xff]  ;;  %v80_v35 = vld [vmem:[%s1279_s0 + $0x1f0] sm:$0xff]  ;;  %v81_v36 = vld [vmem:[%s1279_s0 + $0x1f8] sm:$0xff]  ;;  %v698_v4 = vmov 0.0|0.0  }
  0x25   :  { %v258_v19 = vadd.f32 %v159_v8, %v158_v7  ;;  %v204_v22 = vadd.f32 %v123_v14, %v122_v9  ;;  %v124_v23 = vmul.f32 %v748_v10, %v40_v17  ;;  %v125_v24 = vmul.f32 %v750_v11, %v41_v18  ;;  %v44_v37 = vld [vmem:[%s1279_s0 + $0xd0] sm:$0xff]  ;;  %v45_v38 = vld [vmem:[%s1279_s0 + $0xd8] sm:$0xff]  ;;  %v50_v45 = vld [vmem:[%s1279_s0 + $0x100] sm:$0xff]  ;;  %645 = vmatprep.subr.bf16.mxu0 %v698_v4 }
  0x26   :  { %v261_v29 = vadd.f32 %v161_v21, %v160_v20  ;;  %v162_v30 = vmul.f32 %v748_v10, %v78_v25  ;;  %v163_v31 = vmul.f32 %v750_v11, %v79_v26  ;;  %v127_v34 = vmul.f32 %v750_v11, %v43_v28  ;;  %v51_v46 = vld [vmem:[%s1279_s0 + $0x108] sm:$0xff]  ;;  %v46_v47 = vld [vmem:[%s1279_s0 + $0xe0] sm:$0xff]  ;;  %v52_v61 = vld [vmem:[%s1279_s0 + $0x110] sm:$0xff] }
  0x27   :  { %v207_v32 = vadd.f32 %v125_v24, %v124_v23  ;;  %v164_v40 = vmul.f32 %v748_v10, %v80_v35  ;;  %v165_v41 = vmul.f32 %v750_v11, %v81_v36  ;;  %v129_v44 = vmul.f32 %v750_v11, %v45_v38  ;;  %v47_v49 = vld [vmem:[%s1279_s0 + $0xe8] sm:$0xff]  ;;  %v82_v53 = vld [vmem:[%s1279_s0 + $0x200] sm:$0xff]  ;;  %v53_v2 = vld [vmem:[%s1279_s0 + $0x118] sm:$0xff] }
  0x28   :  { %250 = vadd.xlane.f32.xlu1 %v249_v33  ;;  %196 = vadd.xlane.f32.xlu0 %v195_v43  ;;  %v126_v33 = vmul.f32 %v748_v10, %v42_v27  ;;  %v264_v39 = vadd.f32 %v163_v31, %v162_v30  ;;  %v128_v43 = vmul.f32 %v748_v10, %v44_v37  ;;  %v83_v56 = vld [vmem:[%s1279_s0 + $0x208] sm:$0xff]  ;;  %v285_v14 = vld [vmem:[%s1281_s2 + $0x18] sm:$0xff]  ;;  %v286_v17 = vld [vmem:[%s1281_s2 + $0x20] sm:$0xff]  ;;  %vm375_vm3 = vcmask 326912  }
  0x29   :  { %v267_v50 = vadd.f32 %v165_v41, %v164_v40  ;;  %v134_v51 = vmul.f32 %v748_v10, %v50_v45  ;;  %v135_v52 = vmul.f32 %v750_v11, %v51_v46  ;;  %v131_v60 = vmul.f32 %v750_v11, %v47_v49  ;;  %v283_v63 = vld [vmem:[%s1281_s2 + $0x8] sm:$0xff]  ;;  %v289_v20 = vld [vmem:[%s1281_s2 + $0x38] sm:$0xff]  ;;  %v294_v26 = vld [vmem:[%s1281_s2 + $0x60] sm:$0xff] }
  0x2a   :  { %v210_v42 = vadd.f32 %v127_v34, %v126_v33  ;;  %v213_v57 = vadd.f32 %v129_v44, %v128_v43  ;;  %v166_v5 = vmul.f32 %v748_v10, %v82_v53  ;;  %v167_v6 = vmul.f32 %v750_v11, %v83_v56  ;;  %v291_v23 = vld [vmem:[%s1281_s2 + $0x48] sm:$0xff]  ;;  %v296_v27 = vld [vmem:[%s1281_s2 + $0x70] sm:$0xff]  ;;  %v297_v28 = vld [vmem:[%s1281_s2 + $0x78] sm:$0xff] }
  0x2b   :  { %v136_v7 = vmul.f32 %v748_v10, %v52_v61  ;;  %v222_v8 = vadd.f32 %v135_v52, %v134_v51  ;;  %v298_v30 = vld [vmem:[%s1281_s2 + $0x80] sm:$0xff]  ;;  %v299_v31 = vld [vmem:[%s1281_s2 + $0x88] sm:$0xff]  ;;  %v344_v56 = vand.u32 127, %v92_v0  ;;  %vm382_vm4 = vcmask 392512  }
  0x2c   :  { %253 = vadd.xlane.f32.xlu1 %v252_v59  ;;  %199 = vadd.xlane.f32.xlu0 %v198_v62  ;;  %v130_v59 = vmul.f32 %v748_v10, %v46_v47  ;;  %v282_v62 = vld [vmem:[%s1281_s2] sm:$0xff]  ;;  %v270_v10 = vadd.f32 %v167_v6, %v166_v5  ;;  %vm389_vm5 = vcmask 458112   ;;  %vm396_vm6 = vcmask 523712  }
  0x2d   :  { %v646_v3 = vpack.c.bf16 %v283_v63, %v282_v62  ;;  %v356_v61 = vadd.s32 4294967280, %v344_v56  ;;  %v363_v62 = vadd.s32 4294967272, %v344_v56  ;;  %v370_v63 = vadd.s32 4294967264, %v344_v56 }
  0x2e   :  { %v216_v9 = vadd.f32 %v131_v60, %v130_v59  ;;  %v349_v60 = vadd.s32 4294967288, %v344_v56  ;;  %v384_v0 = vadd.s32 4294967248, %v344_v56  ;;  %vm403_vm7 = vcmask 589312  }
  0x2f   :  { %647 = vmatpush1.bf16.msra.mxu0 %v646_v3  ;;  %v377_v3 = vadd.s32 4294967256, %v344_v56  ;;  %vm410_vm8 = vcmask 654912   ;;  %vm417_vm9 = vcmask 720512   ;;  %vm424_vm10 = vcmask 786112  }
  0x30   :  { %256 = vadd.xlane.f32.xlu1 %v255_v12  ;;  %202 = vadd.xlane.f32.xlu0 %v201_v13  ;;  %v137_v12 = vmul.f32 %v750_v11, %v53_v2  ;;  %v284_v13 = vld [vmem:[%s1281_s2 + $0x10] sm:$0xff]  ;;  %v287_v11 = vld [vmem:[%s1281_s2 + $0x28] sm:$0xff]  ;;  %v1137_v2 = vsub.s32 %v344_v56, %v726_v1  ;;  %v1144_v6 = vsub.s32 %v349_v60, %v726_v1  ;;  %vm431_vm11 = vcmask 851712  }
  0x31   :  { %648 = vmatprep.subr.bf16.mxu0 %v698_v4  ;;  %v649_v15 = vpack.c.bf16 %v285_v14, %v284_v13  ;;  %v652_v18 = vpack.c.bf16 %v287_v11, %v286_v17  ;;  %v366_v13 = vsub.s32 %v363_v62, %v726_v1  ;;  %v373_v14 = vsub.s32 %v370_v63, %v726_v1 }
  0x32   :  { %v225_v16 = vadd.f32 %v137_v12, %v136_v7  ;;  %v391_v7 = vadd.s32 4294967240, %v344_v56  ;;  %v405_v12 = vadd.s32 4294967224, %v344_v56  ;;  %v426_v17 = vadd.s32 4294967200, %v344_v56 }
  0x33   :  { %650 = vmatpush1.bf16.msra.mxu0 %v649_v15  ;;  %v412_v15 = vadd.s32 4294967216, %v344_v56  ;;  %vm438_vm12 = vcmask 917312   ;;  %vm445_vm13 = vcmask 982912   ;;  %vm551_vm14 = vcmask 1041409  }
  0x34   :  { %259 = vadd.xlane.f32.xlu1 %v258_v19  ;;  %205 = vadd.xlane.f32.xlu0 %v204_v22  ;;  %v288_v19 = vld [vmem:[%s1281_s2 + $0x30] sm:$0xff]  ;;  %v290_v22 = vld [vmem:[%s1281_s2 + $0x40] sm:$0xff]  ;;  %vm555_vm15 = vcmask 130048  }
  0x35   :  { %651 = vmatprep.subr.bf16.mxu0 %v698_v4  ;;  %v655_v21 = vpack.c.bf16 %v289_v20, %v288_v19  ;;  %v658_v24 = vpack.c.bf16 %v291_v23, %v290_v22  ;;  %v433_v19 = vadd.s32 4294967192, %v344_v56  ;;  %v387_v20 = vsub.s32 %v384_v0, %v726_v1 }
  0x36   :  { %v1158_v23 = vsub.s32 %v405_v12, %v726_v1 }
  0x37   :  { %653 = vmatpush1.bf16.msra.mxu0 %v652_v18 }
  0x38   :  { %262 = vadd.xlane.f32.xlu1 %v261_v29  ;;  %208 = vadd.xlane.f32.xlu0 %v207_v32  ;;  %v667_v29 = vpack.c.bf16 %v297_v28, %v296_v27  ;;  %v670_v32 = vpack.c.bf16 %v299_v31, %v298_v30  ;;  %v1173_v27 = vsub.s32 %v426_v17, %v726_v1 }
  0x39   :  { %654 = vmatprep.subr.bf16.mxu0 %v698_v4  ;;  %v1176_v28 = vsub.s32 %v433_v19, %v726_v1 }
  0x3b   :  { %656 = vmatpush1.bf16.msra.mxu0 %v655_v21  ;;  %v394_v21 = vsub.s32 %v391_v7, %v726_v1 }
  0x3c   :  { %265 = vadd.xlane.f32.xlu1 %v264_v39  ;;  %211 = vadd.xlane.f32.xlu0 %v210_v42 }
  0x3d   :  { %657 = vmatprep.subr.bf16.mxu0 %v698_v4 }
  0x3f   :  { %659 = vmatpush1.bf16.msra.mxu0 %v658_v24  ;;  %v440_v24 = vadd.s32 4294967184, %v344_v56 }
  0x40   :  { %268 = vadd.xlane.f32.xlu1 %v267_v50  ;;  %214 = vadd.xlane.f32.xlu0 %v213_v57 }
  0x41   :  { %660 = vmatprep.subr.bf16.mxu0 %v698_v4  ;;  %v1191_v60 = vsub.s32 %v440_v24, %v726_v1 }
  0x44   :  { %223 = vadd.xlane.f32.xlu1 %v222_v8  ;;  %217 = vadd.xlane.f32.xlu0 %v216_v9  ;;  %v359_v8 = vsub.s32 %v356_v61, %v726_v1  ;;  %v398_v9 = vadd.s32 4294967232, %v344_v56  ;;  %v447_v61 = vadd.s32 4294967176, %v344_v56 }
  0x46   :  { %v401_v22 = vsub.s32 %v398_v9, %v726_v1 }
  0x48   :  { %271 = vadd.xlane.f32.xlu1 %v270_v10  ;;  %226 = vadd.xlane.f32.xlu0 %v225_v16  ;;  %v419_v10 = vadd.s32 4294967208, %v344_v56  ;;  %v380_v16 = vsub.s32 %v377_v3, %v726_v1 }
  0x4c   :  { %280 = vadd.xlane.f32.xlu1 %v910_v48  ;;  %277 = vadd.xlane.f32.xlu0 %v921_v54  ;;  %v292_v48 = vld [vmem:[%s1281_s2 + $0x50] sm:$0xff]  ;;  %v293_v54 = vld [vmem:[%s1281_s2 + $0x58] sm:$0xff] }
  0x4d   :  { %v661_v25 = vpack.c.bf16 %v293_v54, %v292_v48 }
  0x4f   :  { %662 = vmatpush1.bf16.msra.mxu0 %v661_v25  ;;  %v1165_v25 = vsub.s32 %v412_v15, %v726_v1 }
  0x50   :  { %274 = vadd.xlane.f32.xlu1 %v923_v55  ;;  %220 = vadd.xlane.f32.xlu0 %v931_v58  ;;  %v295_v55 = vld [vmem:[%s1281_s2 + $0x68] sm:$0xff] }
  0x51   :  { %663 = vmatprep.subr.bf16.mxu0 %v698_v4  ;;  %v664_v58 = vpack.c.bf16 %v295_v55, %v294_v26  ;;  %v1168_v26 = vsub.s32 %v419_v10, %v726_v1 }
  0x53   :  { %665 = vmatpush1.bf16.msra.mxu0 %v664_v58 }
  0x54   :  { %666 = vmatprep.subr.bf16.mxu0 %v698_v4 }
  0x57   :  { %668 = vmatpush1.bf16.msra.mxu0 %v667_v29 }
  0x58   :  { %669 = vmatprep.subr.bf16.mxu0 %v698_v4 }
  0x5b   :  { %671 = vmatpush1.bf16.msra.mxu0 %v670_v32 }
  0x99   :  { %v1091_v33 = vpop.xlane.xlu1 %229  ;;  %v1093_v34 = vpop.xlane.xlu0 %175 }
  0x9a   :  { %v466_v31 = vrot.slane %v1091_v33, %v1137_v2  ;;  %v348_v32 = vrot.slane %v1093_v34, %v1137_v2 }
  0x9d   :  { %v1095_v35 = vpop.xlane.xlu1 %232  ;;  %v1097_v36 = vpop.xlane.xlu0 %178 }
  0x9e   :  { %v470_v48 = vrot.slane %v1095_v35, %v1144_v6  ;;  %v353_v54 = vrot.slane %v1097_v36, %v1144_v6 }
  0xa0   :  { %v471_v62 = vsel %vm354_vm0, %v470_v48, %v466_v31  ;;  %v355_v63 = vsel %vm354_vm0, %v353_v54, %v348_v32 }
  0xa1   :  { %v1099_v37 = vpop.xlane.xlu1 %235  ;;  %v1101_v38 = vpop.xlane.xlu0 %181 }
  0xa2   :  { %v475_v55 = vrot.slane %v1099_v37, %v359_v8  ;;  %v360_v58 = vrot.slane %v1101_v38, %v359_v8 }
  0xa5   :  { %v1103_v39 = vpop.xlane.xlu1 %238  ;;  %v1105_v40 = vpop.xlane.xlu0 %184 }
  0xa6   :  { %v480_v35 = vrot.slane %v1103_v39, %v366_v13  ;;  %v367_v36 = vrot.slane %v1105_v40, %v366_v13  ;;  %v476_v39 = vsel %vm361_vm1, %v475_v55, %v471_v62  ;;  %v362_v40 = vsel %vm361_vm1, %v360_v58, %v355_v63 }
  0xa7   :  { %vm452_vm1 = vcmask 1048512  }
  0xa8   :  { %v481_v0 = vsel %vm368_vm2, %v480_v35, %v476_v39  ;;  %v369_v7 = vsel %vm368_vm2, %v367_v36, %v362_v40  ;;  %v643_v40 = vld [vmem:[%s1282_s3] ss:$0 sm:$0xff] }
  0xa9   :  { %v1107_v41 = vpop.xlane.xlu1 %241  ;;  %v1109_v42 = vpop.xlane.xlu0 %187 }
  0xaa   :  { %v485_v37 = vrot.slane %v1107_v41, %v373_v14  ;;  %v374_v38 = vrot.slane %v1109_v42, %v373_v14 }
  0xac   :  { %v486_v8 = vsel %vm375_vm3, %v485_v37, %v481_v0  ;;  %v376_v9 = vsel %vm375_vm3, %v374_v38, %v369_v7 }
  0xad   :  { %v1111_v43 = vpop.xlane.xlu1 %244  ;;  %v1113_v44 = vpop.xlane.xlu0 %190 }
  0xae   :  { %v490_v33 = vrot.slane %v1111_v43, %v380_v16  ;;  %v381_v34 = vrot.slane %v1113_v44, %v380_v16 }
  0xb0   :  { %v491_v12 = vsel %vm382_vm4, %v490_v33, %v486_v8  ;;  %v383_v13 = vsel %vm382_vm4, %v381_v34, %v376_v9 }
  0xb1   :  { %v1115_v45 = vpop.xlane.xlu1 %247  ;;  %v1117_v46 = vpop.xlane.xlu0 %193 }
  0xb2   :  { %v495_v41 = vrot.slane %v1115_v45, %v387_v20  ;;  %v388_v42 = vrot.slane %v1117_v46, %v387_v20 }
  0xb5   :  { %v1119_v47 = vpop.xlane.xlu1 %250  ;;  %v1121_v49 = vpop.xlane.xlu0 %196 }
  0xb6   :  { %v500_v43 = vrot.slane %v1119_v47, %v394_v21  ;;  %v395_v44 = vrot.slane %v1121_v49, %v394_v21  ;;  %v496_v47 = vsel %vm389_vm5, %v495_v41, %v491_v12  ;;  %v390_v49 = vsel %vm389_vm5, %v388_v42, %v383_v13 }
  0xb8   :  { %v501_v16 = vsel %vm396_vm6, %v500_v43, %v496_v47  ;;  %v397_v17 = vsel %vm396_vm6, %v395_v44, %v390_v49 }
  0xb9   :  { %v1123_v50 = vpop.xlane.xlu1 %253  ;;  %v1125_v51 = vpop.xlane.xlu0 %199 }
  0xba   :  { %v505_v45 = vrot.slane %v1123_v50, %v401_v22  ;;  %v402_v46 = vrot.slane %v1125_v51, %v401_v22  ;;  %v450_v51 = vsub.s32 %v447_v61, %v726_v1 }
  0xbc   :  { %v404_v19 = vsel %vm403_vm7, %v402_v46, %v397_v17 }
  0xbd   :  { %v1127_v52 = vpop.xlane.xlu1 %256  ;;  %v1129_v53 = vpop.xlane.xlu0 %202 }
  0xbe   :  { %v510_v14 = vrot.slane %v1127_v52, %v1158_v23  ;;  %v409_v15 = vrot.slane %v1129_v53, %v1158_v23  ;;  %v506_v52 = vsel %vm403_vm7, %v505_v45, %v501_v16 }
  0xc0   :  { %v511_v21 = vsel %vm410_vm8, %v510_v14, %v506_v52  ;;  %v411_v24 = vsel %vm410_vm8, %v409_v15, %v404_v19 }
  0xc1   :  { %v1132_v57 = vpop.xlane.xlu1 %259  ;;  %v1134_v59 = vpop.xlane.xlu0 %205 }
  0xc2   :  { %v515_v20 = vrot.slane %v1132_v57, %v1165_v25  ;;  %v416_v53 = vrot.slane %v1134_v59, %v1165_v25 }
  0xc4   :  { %v516_v58 = vsel %vm417_vm9, %v515_v20, %v511_v21 }
  0xc5   :  { %v1139_v4 = vpop.xlane.xlu1 %262  ;;  %v1141_v5 = vpop.xlane.xlu0 %208 }
  0xc6   :  { %v520_v1 = vrot.slane %v1139_v4, %v1168_v26  ;;  %v423_v22 = vrot.slane %v1141_v5, %v1168_v26 }
  0xc9   :  { %v1150_v11 = vpop.xlane.xlu1 %265  ;;  %v1152_v18 = vpop.xlane.xlu0 %211 }
  0xca   :  { %v525_v48 = vrot.slane %v1150_v11, %v1173_v27  ;;  %v430_v57 = vrot.slane %v1152_v18, %v1173_v27  ;;  %v418_v11 = vsel %vm417_vm9, %v416_v53, %v411_v24 }
  0xcb   :  { %v425_v31 = vsel %vm424_vm10, %v423_v22, %v418_v11 }
  0xcd   :  { %v1178_v29 = vpop.xlane.xlu1 %268  ;;  %v1180_v30 = vpop.xlane.xlu0 %214 }
  0xce   :  { %v530_v59 = vrot.slane %v1178_v29, %v1176_v28  ;;  %v437_v4 = vrot.slane %v1180_v30, %v1176_v28  ;;  %v521_v29 = vsel %vm424_vm10, %v520_v1, %v516_v58 }
  0xd1   :  { %v224_v3 = vpop.xlane.xlu1 %223  ;;  %v1201_v56 = vpop.xlane.xlu0 %217 }
  0xd2   :  { %v457_v5 = vrot.slane %v224_v3, %v1137_v2  ;;  %v444_v18 = vrot.slane %v1201_v56, %v1191_v60 }
  0xd5   :  { %v272_v10 = vpop.xlane.xlu1 %271  ;;  %v227_v50 = vpop.xlane.xlu0 %226 }
  0xd6   :  { %v461_v23 = vrot.slane %v227_v50, %v1144_v6  ;;  %v535_v27 = vrot.slane %v272_v10, %v1191_v60 }
  0xd8   :  { %v462_v28 = vsel %vm354_vm0, %v461_v23, %v457_v5 }
  0xd9   :  { %v281_v54 = vpop.xlane.xlu1 %280  ;;  %v278_v25 = vpop.xlane.xlu0 %277 }
  0xda   :  { %v549_v26 = vrot.slane %v281_v54, %v1144_v6  ;;  %v545_v55 = vrot.slane %v278_v25, %v1137_v2  ;;  %v526_v6 = vsel %vm431_vm11, %v525_v48, %v521_v29  ;;  %v432_v2 = vsel %vm431_vm11, %v430_v57, %v425_v31 }
  0xdb   :  { %v531_v37 = vsel %vm438_vm12, %v530_v59, %v526_v6  ;;  %v439_v38 = vsel %vm438_vm12, %v437_v4, %v432_v2 }
  0xdc   :  { %v550_v30 = vsel %vm354_vm0, %v549_v26, %v545_v55  ;;  %v446_v62 = vsel %vm445_vm13, %v444_v18, %v439_v38  ;;  %v536_v63 = vsel %vm445_vm13, %v535_v27, %v531_v37 }
  0xdd   :  { %v275_v32 = vpop.xlane.xlu1 %274  ;;  %v221_v35 = vpop.xlane.xlu0 %220  ;;  %v553_v36 = vsel %vm551_vm14, %v550_v30, %v462_v28 }
  0xde   :  { %v540_v60 = vrot.slane %v275_v32, %v450_v51  ;;  %v451_v61 = vrot.slane %v221_v35, %v450_v51  ;;  %644 = vmatprep.mubr.msk.f32.mxu0 %vm555_vm15, %v553_v36 }
  0xe0   :  { %v453_v33 = vsel %vm452_vm1, %v451_v61, %v446_v62  ;;  %v541_v34 = vsel %vm452_vm1, %v540_v60, %v536_v63 }
  0xe1   :  { %v552_v39 = vsel %vm551_vm14, %v541_v34, %v453_v33 }
  0xe2   :  { %623 = vmatmul.mubr.f32.vlgmr.msra.gmra.mrb[0].mxu0 %v552_v39 }
 0x1b5   :  { %v624_v41 = vpop.f32.mrb[0].mxu0 }
 0x1b6   :  { %v625_v42 = vadd.f32 %v643_v40, %v624_v41  ;;  %v626_v3 = vpop.f32.mrb[1].mxu0 }
 0x1b8   :  { %628 = vst [vmem:[#allocation2] sm:$0x3] %v625_v42 }
 0x1b9   :  { %685 = shalt.err (!%p682_p4)
}
 0x1ba   :  { %s686_s12 = scalar_lea.hbm %s1283_s4, 32 }
 0x1bb   :  { %p687_p5 = scmp.ne.s32.totalorder %s1283_s4, %s686_s12  ;;  %p690_p6 = scmp.lt.u32.totalorder %s686_s12, %s1283_s4 }
 0x1bd   :  { %p692_p7 = pnand %p690_p6, %p687_p5 }
 0x1bf   :  { %695 = shalt.err (!%p692_p7)
}
 0x1c0   :  { %638 = dma.vmem_to_hbm [thread:$0]  %s636_s8, 32, %s1283_s4, [#allocation3]  }
 0x1c1   :  { %696 = dma.done.wait [#allocation3], 32  }
 0x1c2   :  { %697 = vsyncadd [#allocation3], 4294967264 }
 0x1c3   :  { %642 = vsyncpa [#allocation3], 1 }

</bundles_post_ra>
